<compile_context>
chip_gen: v5e
topology: v5e:2x2
jax: 0.10.0
libtpu: 0.0.40
codegen_flags: <defaults>
</compile_context>

<pallas_src>
import numpy as np
import jax
import jax.numpy as jnp
from jax.experimental import pallas as pl
from jax.experimental.pallas import tpu as pltpu

C = 128  # channel width fixed by the module


# ----------------------------------------------------------------------------
# Fused Pallas kernel: conv1+ReLU+pool1 -> conv2+ReLU+pool2 -> Linear+LeakyReLU -> Linear
# ----------------------------------------------------------------------------
def _disc_kernel(p1_ref, w1_ref, b1_ref, w2_ref, b2_ref,
                 w3_ref, b3_ref, w4_ref, b4_ref, o_ref):
    Bp = o_ref.shape[0]

    # conv1: one long-contraction matmul (64*Bp, 8*C) x (8*C, C), bf16 in / f32 acc.
    # Rows of p1 are ordered (window_offset d, pooled_cell p, batch b).
    y1 = jnp.dot(p1_ref[...], w1_ref[...], preferred_element_type=jnp.float32)
    y1 = jnp.maximum(y1 + b1_ref[...], 0.0)                       # bias + ReLU (f32)

    # pool1: max over the 8 pool-window offsets = leading row groups of size 8*Bp.
    g = 8 * Bp
    parts = [y1[d * g:(d + 1) * g, :] for d in range(8)]
    while len(parts) > 1:
        parts = [jnp.maximum(parts[i], parts[i + 1]) for i in range(0, len(parts), 2)]
    h = parts[0]                                                   # (8*Bp, C), rows (cell, batch)

    # Put the 8 pooled cells on lanes: (Bp, 8*C).  Slices are 8-aligned (Bp % 8 == 0).
    h_flat = jnp.concatenate([h[p * Bp:(p + 1) * Bp, :] for p in range(8)], axis=1)

    # conv2 (k=3, pad=1, all 8 output positions) folded into one matmul (Bp,8C)x(8C,8C).
    y2 = jnp.dot(h_flat.astype(jnp.bfloat16), w2_ref[...],
                 preferred_element_type=jnp.float32)
    y2 = jnp.maximum(y2 + b2_ref[...], 0.0)                        # bias + ReLU (f32)

    # pool2: max over the 8 conv2 output positions = 128-wide lane groups.
    parts = [y2[:, o * C:(o + 1) * C] for o in range(8)]
    while len(parts) > 1:
        parts = [jnp.maximum(parts[i], parts[i + 1]) for i in range(0, len(parts), 2)]
    z = parts[0]                                                   # (Bp, C)

    # MLP head, lane-padded to 128-wide output (zero-padded weights/biases).
    h3 = jnp.dot(z, w3_ref[...], preferred_element_type=jnp.float32) + b3_ref[...]
    h3 = jnp.where(h3 > 0.0, h3, 0.01 * h3)                        # LeakyReLU(0.01)
    o_ref[...] = jnp.dot(h3, w4_ref[...], preferred_element_type=jnp.float32) + b4_ref[...]


def _vmem_spec():
    return pl.BlockSpec(memory_space=pltpu.MemorySpace.VMEM)


def _fused_call(p1, params, Bp):
    return pl.pallas_call(
        _disc_kernel,
        out_shape=jax.ShapeDtypeStruct((Bp, C), jnp.float32),
        in_specs=[_vmem_spec()] * 9,
        out_specs=_vmem_spec(),
    )(p1, *params)


# ----------------------------------------------------------------------------
# One-time parameter preparation (outside the jitted forward)
# ----------------------------------------------------------------------------
def prepare_params(w1, b1, w2, b2, w3, b3, w4, b4):
    w1 = np.asarray(w1, np.float32); b1 = np.asarray(b1, np.float32)
    w2 = np.asarray(w2, np.float32); b2 = np.asarray(b2, np.float32)
    w3 = np.asarray(w3, np.float32); b3 = np.asarray(b3, np.float32)
    w4 = np.asarray(w4, np.float32); b4 = np.asarray(b4, np.float32)

    # conv1 weights: (Co, Ci, 2,2,2) -> (8*Ci, Co), row = tap_idx*Ci + ci (tap = kz*4+ky*2+kx)
    w1cat = np.transpose(w1, (2, 3, 4, 1, 0)).reshape(8 * C, C)

    # conv2 folded over the padded 2x2x2 grid: every (input cell p, output cell o) pair
    # uses exactly tap k = p - o + 1.   W2big[p*C+ci, o*C+co] = w2[co, ci, kz, ky, kx].
    w2big = np.zeros((8 * C, 8 * C), np.float32)
    for pz in range(2):
        for py in range(2):
            for px in range(2):
                p_idx = pz * 4 + py * 2 + px
                for oz in range(2):
                    for oy in range(2):
                        for ox in range(2):
                            o_idx = oz * 4 + oy * 2 + ox
                            tap = w2[:, :, pz - oz + 1, py - oy + 1, px - ox + 1]  # (Co, Ci)
                            w2big[p_idx * C:(p_idx + 1) * C,
                                  o_idx * C:(o_idx + 1) * C] = tap.T
    b2big = np.tile(b2, 8).reshape(1, 8 * C)

    # MLP weights, zero-padded to 128-wide lane-dense shapes.
    w3p = np.zeros((C, C), np.float32); w3p[:, :64] = w3.T
    b3p = np.zeros((1, C), np.float32); b3p[0, :64] = b3
    w4p = np.zeros((C, C), np.float32); w4p[:64, :2] = w4.T
    b4p = np.zeros((1, C), np.float32); b4p[0, :2] = b4

    return (jnp.asarray(w1cat, jnp.bfloat16), jnp.asarray(b1.reshape(1, C)),
            jnp.asarray(w2big, jnp.bfloat16), jnp.asarray(b2big),
            jnp.asarray(w3p), jnp.asarray(b3p),
            jnp.asarray(w4p), jnp.asarray(b4p))


# ----------------------------------------------------------------------------
# Forward: minimal XLA glue (layout transpose + conv1 im2col) + one pallas_call
# ----------------------------------------------------------------------------
def _conv1_im2col(x):
    """x: (Bp, 5, 5, 5, C) NDHWC -> (64*Bp, 8*C) bf16.

    Row ordering (pool_window_offset d, pooled_cell p, batch b); column ordering
    (conv tap k, channel) to match w1cat."""
    Bp = x.shape[0]
    cols = []
    for kz in range(2):
        for ky in range(2):
            for kx in range(2):
                sub = x[:, kz:kz + 4, ky:ky + 4, kx:kx + 4, :]     # (Bp,4,4,4,C) indexed by o=2p+d
                sub = sub.reshape(Bp, 2, 2, 2, 2, 2, 2, C)         # (b,pz,dz,py,dy,px,dx,c)
                sub = sub.transpose(2, 4, 6, 1, 3, 5, 0, 7)        # (dz,dy,dx,pz,py,px,b,c)
                cols.append(sub.reshape(64 * Bp, C))
    return jnp.concatenate(cols, axis=1).astype(jnp.bfloat16)      # (64*Bp, 8*C)


@jax.jit
def discriminator_forward(x_ncdhw, params):
    B = x_ncdhw.shape[0]
    Bp = ((B + 7) // 8) * 8                                        # pad batch to multiple of 8
    x = jnp.transpose(x_ncdhw, (0, 2, 3, 4, 1))                    # NCDHW -> NDHWC
    if Bp != B:
        x = jnp.pad(x, ((0, Bp - B), (0, 0), (0, 0), (0, 0), (0, 0)))
    p1 = _conv1_im2col(x)                                          # (64*Bp, 1024) bf16
    out = _fused_call(p1, params, Bp)                              # (Bp, 128) lane-dense
    return out[:B, :2]


# ----------------------------------------------------------------------------
# NumPy reference (mirrors the PyTorch module exactly, f32)
# ----------------------------------------------------------------------------
def reference_forward(x, w1, b1, w2, b2, w3, b3, w4, b4):
    def conv3d(x, w, b, pad):
        if pad:
            x = np.pad(x, ((0, 0), (0, 0), (pad, pad), (pad, pad), (pad, pad)))
        B, Ci, D, H, W = x.shape
        Co, _, k, _, _ = w.shape
        oD, oH, oW = D - k + 1, H - k + 1, W - k + 1
        out = np.broadcast_to(b[None, :, None, None, None],
                              (B, Co, oD, oH, oW)).astype(np.float32).copy()
        for kz in range(k):
            for ky in range(k):
                for kx in range(k):
                    xs = x[:, :, kz:kz + oD, ky:ky + oH, kx:kx + oW]
                    out += np.einsum('bczyx,oc->bozyx', xs, w[:, :, kz, ky, kx])
        return out

    def maxpool2(x):
        B, C_, D, H, W = x.shape
        return x.reshape(B, C_, D // 2, 2, H // 2, 2, W // 2, 2).max(axis=(3, 5, 7))

    h = maxpool2(np.maximum(conv3d(x, w1, b1, 0), 0.0))
    h = maxpool2(np.maximum(conv3d(h, w2, b2, 1), 0.0))
    h = h.reshape(h.shape[0], h.shape[1])
    h = h @ w3.T + b3
    h = np.where(h > 0.0, h, 0.01 * h)
    return h @ w4.T + b4


# ----------------------------------------------------------------------------
if __name__ == "__main__":
    key = jax.random.PRNGKey(0)
    ks = jax.random.split(key, 9)
    B = 2  # small batch; channels (128) and spatial (5^3) are fixed by the module

    x = jax.random.normal(ks[0], (B, 128, 5, 5, 5), jnp.float32)
    w1 = 0.05 * jax.random.normal(ks[1], (128, 128, 2, 2, 2), jnp.float32)
    b1 = 0.05 * jax.random.normal(ks[2], (128,), jnp.float32)
    w2 = 0.05 * jax.random.normal(ks[3], (128, 128, 3, 3, 3), jnp.float32)
    b2 = 0.05 * jax.random.normal(ks[4], (128,), jnp.float32)
    w3 = 0.05 * jax.random.normal(ks[5], (64, 128), jnp.float32)
    b3 = 0.05 * jax.random.normal(ks[6], (64,), jnp.float32)
    w4 = 0.05 * jax.random.normal(ks[7], (2, 64), jnp.float32)
    b4 = 0.05 * jax.random.normal(ks[8], (2,), jnp.float32)

    params = prepare_params(w1, b1, w2, b2, w3, b3, w4, b4)  # one-time weight re-layout

    out = discriminator_forward(x, params)
    out = jax.block_until_ready(out)

    ref = reference_forward(np.asarray(x), np.asarray(w1), np.asarray(b1),
                            np.asarray(w2), np.asarray(b2), np.asarray(w3),
                            np.asarray(b3), np.asarray(w4), np.asarray(b4))
    # bf16 matmul operands with f32 accumulation over K=1024 contractions -> ~1% error.
    np.testing.assert_allclose(np.asarray(out), ref, rtol=3e-2, atol=3e-2)
    print("KERNEL_OK")
</pallas_src>

<mosaic_0001>
module attributes {stable_mosaic.version = 11 : i64} {
  func.func @_disc_kernel(%arg0: memref<512x1024xbf16, #tpu.memory_space<vmem>>, %arg1: memref<1024x128xbf16, #tpu.memory_space<vmem>>, %arg2: memref<1x128xf32, #tpu.memory_space<vmem>>, %arg3: memref<1024x1024xbf16, #tpu.memory_space<vmem>>, %arg4: memref<1x1024xf32, #tpu.memory_space<vmem>>, %arg5: memref<128x128xf32, #tpu.memory_space<vmem>>, %arg6: memref<1x128xf32, #tpu.memory_space<vmem>>, %arg7: memref<128x128xf32, #tpu.memory_space<vmem>>, %arg8: memref<1x128xf32, #tpu.memory_space<vmem>>, %arg9: memref<8x128xf32, #tpu.memory_space<vmem>>) attributes {dimension_semantics = [], scalar_prefetch = 0 : i64, scratch_operands = 0 : i64, tpu.core_type = #tpu.core_type<tc>} {
    %c0 = arith.constant 0 : index
    %c0_0 = arith.constant 0 : index
    %0 = vector.load %arg0[%c0, %c0_0] : memref<512x1024xbf16, #tpu.memory_space<vmem>>, vector<512x1024xbf16>
    %c0_1 = arith.constant 0 : index
    %c0_2 = arith.constant 0 : index
    %1 = vector.load %arg1[%c0_1, %c0_2] : memref<1024x128xbf16, #tpu.memory_space<vmem>>, vector<1024x128xbf16>
    %cst = arith.constant dense<0.000000e+00> : vector<512x128xf32>
    %2 = tpu.matmul %0, %1, %cst {dimension_numbers = #tpu.dot_dimension_numbers<[1], [0], [0], [1], [0, 0, 1, 1], [], []>} : vector<512x1024xbf16>, vector<1024x128xbf16>, vector<512x128xf32> -> vector<512x128xf32>
    %c0_3 = arith.constant 0 : index
    %c0_4 = arith.constant 0 : index
    %3 = vector.load %arg2[%c0_3, %c0_4] : memref<1x128xf32, #tpu.memory_space<vmem>>, vector<1x128xf32>
    %4 = vector.broadcast %3 : vector<1x128xf32> to vector<512x128xf32>
    %5 = arith.addf %2, %4 : vector<512x128xf32>
    %cst_5 = arith.constant 0.000000e+00 : f32
    %6 = vector.broadcast %cst_5 : f32 to vector<512x128xf32>
    %7 = arith.maximumf %5, %6 : vector<512x128xf32>
    %8 = vector.extract_strided_slice %7 {offsets = [0, 0], sizes = [64, 128], strides = [1, 1]} : vector<512x128xf32> to vector<64x128xf32>
    %9 = vector.extract_strided_slice %7 {offsets = [64, 0], sizes = [64, 128], strides = [1, 1]} : vector<512x128xf32> to vector<64x128xf32>
    %10 = vector.extract_strided_slice %7 {offsets = [128, 0], sizes = [64, 128], strides = [1, 1]} : vector<512x128xf32> to vector<64x128xf32>
    %11 = vector.extract_strided_slice %7 {offsets = [192, 0], sizes = [64, 128], strides = [1, 1]} : vector<512x128xf32> to vector<64x128xf32>
    %12 = vector.extract_strided_slice %7 {offsets = [256, 0], sizes = [64, 128], strides = [1, 1]} : vector<512x128xf32> to vector<64x128xf32>
    %13 = vector.extract_strided_slice %7 {offsets = [320, 0], sizes = [64, 128], strides = [1, 1]} : vector<512x128xf32> to vector<64x128xf32>
    %14 = vector.extract_strided_slice %7 {offsets = [384, 0], sizes = [64, 128], strides = [1, 1]} : vector<512x128xf32> to vector<64x128xf32>
    %15 = vector.extract_strided_slice %7 {offsets = [448, 0], sizes = [64, 128], strides = [1, 1]} : vector<512x128xf32> to vector<64x128xf32>
    %16 = arith.maximumf %8, %9 : vector<64x128xf32>
    %17 = arith.maximumf %10, %11 : vector<64x128xf32>
    %18 = arith.maximumf %12, %13 : vector<64x128xf32>
    %19 = arith.maximumf %14, %15 : vector<64x128xf32>
    %20 = arith.maximumf %16, %17 : vector<64x128xf32>
    %21 = arith.maximumf %18, %19 : vector<64x128xf32>
    %22 = arith.maximumf %20, %21 : vector<64x128xf32>
    %23 = vector.extract_strided_slice %22 {offsets = [0, 0], sizes = [8, 128], strides = [1, 1]} : vector<64x128xf32> to vector<8x128xf32>
    %24 = vector.extract_strided_slice %22 {offsets = [8, 0], sizes = [8, 128], strides = [1, 1]} : vector<64x128xf32> to vector<8x128xf32>
    %25 = vector.extract_strided_slice %22 {offsets = [16, 0], sizes = [8, 128], strides = [1, 1]} : vector<64x128xf32> to vector<8x128xf32>
    %26 = vector.extract_strided_slice %22 {offsets = [24, 0], sizes = [8, 128], strides = [1, 1]} : vector<64x128xf32> to vector<8x128xf32>
    %27 = vector.extract_strided_slice %22 {offsets = [32, 0], sizes = [8, 128], strides = [1, 1]} : vector<64x128xf32> to vector<8x128xf32>
    %28 = vector.extract_strided_slice %22 {offsets = [40, 0], sizes = [8, 128], strides = [1, 1]} : vector<64x128xf32> to vector<8x128xf32>
    %29 = vector.extract_strided_slice %22 {offsets = [48, 0], sizes = [8, 128], strides = [1, 1]} : vector<64x128xf32> to vector<8x128xf32>
    %30 = vector.extract_strided_slice %22 {offsets = [56, 0], sizes = [8, 128], strides = [1, 1]} : vector<64x128xf32> to vector<8x128xf32>
    %31 = tpu.concatenate %23, %24, %25, %26, %27, %28, %29, %30 in 1 : vector<8x128xf32>, vector<8x128xf32>, vector<8x128xf32>, vector<8x128xf32>, vector<8x128xf32>, vector<8x128xf32>, vector<8x128xf32>, vector<8x128xf32> -> vector<8x1024xf32>
    %32 = arith.truncf %31 : vector<8x1024xf32> to vector<8x1024xbf16>
    %c0_6 = arith.constant 0 : index
    %c0_7 = arith.constant 0 : index
    %33 = vector.load %arg3[%c0_6, %c0_7] : memref<1024x1024xbf16, #tpu.memory_space<vmem>>, vector<1024x1024xbf16>
    %cst_8 = arith.constant dense<0.000000e+00> : vector<8x1024xf32>
    %34 = tpu.matmul %32, %33, %cst_8 {dimension_numbers = #tpu.dot_dimension_numbers<[1], [0], [0], [1], [0, 0, 1, 1], [], []>} : vector<8x1024xbf16>, vector<1024x1024xbf16>, vector<8x1024xf32> -> vector<8x1024xf32>
    %c0_9 = arith.constant 0 : index
    %c0_10 = arith.constant 0 : index
    %35 = vector.load %arg4[%c0_9, %c0_10] : memref<1x1024xf32, #tpu.memory_space<vmem>>, vector<1x1024xf32>
    %36 = vector.broadcast %35 : vector<1x1024xf32> to vector<8x1024xf32>
    %37 = arith.addf %34, %36 : vector<8x1024xf32>
    %cst_11 = arith.constant 0.000000e+00 : f32
    %38 = vector.broadcast %cst_11 : f32 to vector<8x1024xf32>
    %39 = arith.maximumf %37, %38 : vector<8x1024xf32>
    %40 = vector.extract_strided_slice %39 {offsets = [0, 0], sizes = [8, 128], strides = [1, 1]} : vector<8x1024xf32> to vector<8x128xf32>
    %41 = vector.extract_strided_slice %39 {offsets = [0, 128], sizes = [8, 128], strides = [1, 1]} : vector<8x1024xf32> to vector<8x128xf32>
    %42 = vector.extract_strided_slice %39 {offsets = [0, 256], sizes = [8, 128], strides = [1, 1]} : vector<8x1024xf32> to vector<8x128xf32>
    %43 = vector.extract_strided_slice %39 {offsets = [0, 384], sizes = [8, 128], strides = [1, 1]} : vector<8x1024xf32> to vector<8x128xf32>
    %44 = vector.extract_strided_slice %39 {offsets = [0, 512], sizes = [8, 128], strides = [1, 1]} : vector<8x1024xf32> to vector<8x128xf32>
    %45 = vector.extract_strided_slice %39 {offsets = [0, 640], sizes = [8, 128], strides = [1, 1]} : vector<8x1024xf32> to vector<8x128xf32>
    %46 = vector.extract_strided_slice %39 {offsets = [0, 768], sizes = [8, 128], strides = [1, 1]} : vector<8x1024xf32> to vector<8x128xf32>
    %47 = vector.extract_strided_slice %39 {offsets = [0, 896], sizes = [8, 128], strides = [1, 1]} : vector<8x1024xf32> to vector<8x128xf32>
    %48 = arith.maximumf %40, %41 : vector<8x128xf32>
    %49 = arith.maximumf %42, %43 : vector<8x128xf32>
    %50 = arith.maximumf %44, %45 : vector<8x128xf32>
    %51 = arith.maximumf %46, %47 : vector<8x128xf32>
    %52 = arith.maximumf %48, %49 : vector<8x128xf32>
    %53 = arith.maximumf %50, %51 : vector<8x128xf32>
    %54 = arith.maximumf %52, %53 : vector<8x128xf32>
    %c0_12 = arith.constant 0 : index
    %c0_13 = arith.constant 0 : index
    %55 = vector.load %arg5[%c0_12, %c0_13] : memref<128x128xf32, #tpu.memory_space<vmem>>, vector<128x128xf32>
    %cst_14 = arith.constant dense<0.000000e+00> : vector<8x128xf32>
    %56 = tpu.matmul %54, %55, %cst_14 {dimension_numbers = #tpu.dot_dimension_numbers<[1], [0], [0], [1], [0, 0, 1, 1], [], []>} : vector<8x128xf32>, vector<128x128xf32>, vector<8x128xf32> -> vector<8x128xf32>
    %c0_15 = arith.constant 0 : index
    %c0_16 = arith.constant 0 : index
    %57 = vector.load %arg6[%c0_15, %c0_16] : memref<1x128xf32, #tpu.memory_space<vmem>>, vector<1x128xf32>
    %58 = vector.broadcast %57 : vector<1x128xf32> to vector<8x128xf32>
    %59 = arith.addf %56, %58 : vector<8x128xf32>
    %cst_17 = arith.constant 0.000000e+00 : f32
    %60 = vector.broadcast %cst_17 : f32 to vector<8x128xf32>
    %61 = arith.cmpf ogt, %59, %60 : vector<8x128xf32>
    %cst_18 = arith.constant 0.00999999977 : f32
    %62 = vector.broadcast %cst_18 : f32 to vector<8x128xf32>
    %63 = arith.mulf %62, %59 : vector<8x128xf32>
    %64 = arith.select %61, %59, %63 : vector<8x128xi1>, vector<8x128xf32>
    %c0_19 = arith.constant 0 : index
    %c0_20 = arith.constant 0 : index
    %65 = vector.load %arg7[%c0_19, %c0_20] : memref<128x128xf32, #tpu.memory_space<vmem>>, vector<128x128xf32>
    %cst_21 = arith.constant dense<0.000000e+00> : vector<8x128xf32>
    %66 = tpu.matmul %64, %65, %cst_21 {dimension_numbers = #tpu.dot_dimension_numbers<[1], [0], [0], [1], [0, 0, 1, 1], [], []>} : vector<8x128xf32>, vector<128x128xf32>, vector<8x128xf32> -> vector<8x128xf32>
    %c0_22 = arith.constant 0 : index
    %c0_23 = arith.constant 0 : index
    %67 = vector.load %arg8[%c0_22, %c0_23] : memref<1x128xf32, #tpu.memory_space<vmem>>, vector<1x128xf32>
    %68 = vector.broadcast %67 : vector<1x128xf32> to vector<8x128xf32>
    %69 = arith.addf %66, %68 : vector<8x128xf32>
    %c0_24 = arith.constant 0 : index
    %c0_25 = arith.constant 0 : index
    %70 = vector.load %arg9[%c0_24, %c0_25] : memref<8x128xf32, #tpu.memory_space<vmem>>, vector<8x128xf32>
    tpu.vector_store %arg9[%c0_24, %c0_25], %69 {strides = array<i32>} : memref<8x128xf32, #tpu.memory_space<vmem>>, vector<8x128xf32>,
    return
  }
}

</mosaic_0001>

<bundles_post_ra>
// kernel: discriminator_forward.1
= control target key start
LH: loop header
LB: loop body
LE: loop exit
PB: predicated region body
PF: predicated region fallthrough
CT: control target
= control target key end

     0   :  { %s17373_s1 = inlined_call_operand.vmem [shape: bf16[1024,128], index: 1, kind: input, shape index: {}]   ;;  %s17374_s2 = inlined_call_operand.vmem [shape: f32[1,128], index: 2, kind: input, shape index: {}]   ;;  %s17375_s0 = inlined_call_operand.vmem [shape: bf16[512,1024], index: 0, kind: input, shape index: {}]   ;;  %s17376_s3 = inlined_call_operand.vmem [shape: bf16[1024,1024], index: 3, kind: input, shape index: {}]   ;;  %s17377_s4 = inlined_call_operand.vmem [shape: f32[1,1024], index: 4, kind: input, shape index: {}]   ;;  %s17378_s6 = inlined_call_operand.vmem [shape: f32[1,128], index: 6, kind: input, shape index: {}]   ;;  %s17379_s5 = inlined_call_operand.vmem [shape: f32[128,128], index: 5, kind: input, shape index: {}]   ;;  %s17380_s7 = inlined_call_operand.vmem [shape: f32[128,128], index: 7, kind: input, shape index: {}]   ;;  %s17381_s8 = inlined_call_operand.vmem [shape: f32[1,128], index: 8, kind: input, shape index: {}]   ;;  %s17382_s9 = inlined_call_operand.vmem [shape: f32[8,128], index: 9, kind: output, shape index: {}]  }
   0x1   :  { %v11180_v0 = vld [vmem:[%s17373_s1 + $0x38] sm:$0xff]  ;;  %v11179_v4 = vld [vmem:[%s17373_s1 + $0x30] sm:$0xff]  ;;  %v11178_v8 = vld [vmem:[%s17373_s1 + $0x28] sm:$0xff] }
   0x2   :  { %v11188_v1 = vld [vmem:[%s17373_s1 + $0x78] sm:$0xff]  ;;  %2084 = vmatpush.bf16.msra.mxu0 %v11180_v0  ;;  %v11187_v5 = vld [vmem:[%s17373_s1 + $0x70] sm:$0xff]  ;;  %v11186_v9 = vld [vmem:[%s17373_s1 + $0x68] sm:$0xff] }
   0x3   :  { %v11196_v2 = vld [vmem:[%s17373_s1 + $0xb8] sm:$0xff]  ;;  %2253 = vmatpush.bf16.msra.mxu1 %v11188_v1  ;;  %v11195_v6 = vld [vmem:[%s17373_s1 + $0xb0] sm:$0xff]  ;;  %v11194_v10 = vld [vmem:[%s17373_s1 + $0xa8] sm:$0xff] }
   0x4   :  { %v11204_v3 = vld [vmem:[%s17373_s1 + $0xf8] sm:$0xff]  ;;  %2422 = vmatpush.bf16.msra.mxu2 %v11196_v2  ;;  %v11203_v7 = vld [vmem:[%s17373_s1 + $0xf0] sm:$0xff]  ;;  %v11202_v11 = vld [vmem:[%s17373_s1 + $0xe8] sm:$0xff] }
   0x5   :  { %2591 = vmatpush.bf16.msra.mxu3 %v11204_v3  ;;  %v11177_v12 = vld [vmem:[%s17373_s1 + $0x20] sm:$0xff]  ;;  %v11176_v16 = vld [vmem:[%s17373_s1 + $0x18] sm:$0xff]  ;;  %v11175_v20 = vld [vmem:[%s17373_s1 + $0x10] sm:$0xff] }
   0x6   :  { %2085 = vmatpush.bf16.msra.mxu0 %v11179_v4  ;;  %v11185_v13 = vld [vmem:[%s17373_s1 + $0x60] sm:$0xff]  ;;  %v11184_v17 = vld [vmem:[%s17373_s1 + $0x58] sm:$0xff]  ;;  %v11183_v21 = vld [vmem:[%s17373_s1 + $0x50] sm:$0xff] }
   0x7   :  { %2254 = vmatpush.bf16.msra.mxu1 %v11187_v5  ;;  %v11193_v14 = vld [vmem:[%s17373_s1 + $0xa0] sm:$0xff]  ;;  %v11192_v18 = vld [vmem:[%s17373_s1 + $0x98] sm:$0xff]  ;;  %v11191_v22 = vld [vmem:[%s17373_s1 + $0x90] sm:$0xff] }
   0x8   :  { %2423 = vmatpush.bf16.msra.mxu2 %v11195_v6  ;;  %v11201_v15 = vld [vmem:[%s17373_s1 + $0xe0] sm:$0xff]  ;;  %v11200_v19 = vld [vmem:[%s17373_s1 + $0xd8] sm:$0xff]  ;;  %v11199_v23 = vld [vmem:[%s17373_s1 + $0xd0] sm:$0xff] }
   0x9   :  { %2592 = vmatpush.bf16.msra.mxu3 %v11203_v7  ;;  %v11174_v24 = vld [vmem:[%s17373_s1 + $0x8] sm:$0xff]  ;;  %v11173_v28 = vld [vmem:[%s17373_s1] sm:$0xff] }
   0xa   :  { %2086 = vmatpush.bf16.msra.mxu0 %v11178_v8  ;;  %v11182_v25 = vld [vmem:[%s17373_s1 + $0x48] sm:$0xff]  ;;  %v11181_v29 = vld [vmem:[%s17373_s1 + $0x40] sm:$0xff] }
   0xb   :  { %2255 = vmatpush.bf16.msra.mxu1 %v11186_v9  ;;  %v11190_v26 = vld [vmem:[%s17373_s1 + $0x88] sm:$0xff]  ;;  %v11189_v30 = vld [vmem:[%s17373_s1 + $0x80] sm:$0xff] }
   0xc   :  { %2424 = vmatpush.bf16.msra.mxu2 %v11194_v10  ;;  %v11198_v27 = vld [vmem:[%s17373_s1 + $0xc8] sm:$0xff]  ;;  %v11197_v31 = vld [vmem:[%s17373_s1 + $0xc0] sm:$0xff] }
   0xd   :  { %2593 = vmatpush.bf16.msra.mxu3 %v11202_v11  ;;  %v7591_v32 = vld [vmem:[%s17375_s0] sm:$0xf]  ;;  %v10917_v34 = vld [vmem:[%s17375_s0 + $0x4] sm:$0xf]  ;;  %v7599_v36 = vld [vmem:[%s17375_s0 + $0x8] sm:$0xf] }
   0xe   :  { %2087 = vmatpush.bf16.msra.mxu0 %v11177_v12  ;;  %v10921_v33 = vld [vmem:[%s17375_s0 + $0x1c] sm:$0xf0]  ;;  %v7593_v35 = vld [vmem:[%s17375_s0 + $0x20] sm:$0xf0]  ;;  %v10922_v37 = vld [vmem:[%s17375_s0 + $0x24] sm:$0xf0] }
   0xf   :  { %2256 = vmatpush.bf16.msra.mxu1 %v11185_v13  ;;  %v10918_v38 = vld [vmem:[%s17375_s0 + $0xc] sm:$0xf]  ;;  %v7592_v40 = vor.u32 %v10921_v33, %v7591_v32  ;;  %v7596_v41 = vor.u32 %v10917_v34, %v7593_v35  ;;  %v7600_v42 = vor.u32 %v10922_v37, %v7599_v36  ;;  %v7623_v44 = vld [vmem:[%s17375_s0 + $0x40] sm:$0xf]  ;;  %v10925_v46 = vld [vmem:[%s17375_s0 + $0x44] sm:$0xf] }
  0x10   :  { %2425 = vmatpush.bf16.msra.mxu2 %v11193_v14  ;;  %v7601_v39 = vld [vmem:[%s17375_s0 + $0x28] sm:$0xf0]  ;;  %v10929_v45 = vld [vmem:[%s17375_s0 + $0x5c] sm:$0xf0]  ;;  %v7625_v47 = vld [vmem:[%s17375_s0 + $0x60] sm:$0xf0] }
  0x11   :  { %2594 = vmatpush.bf16.msra.mxu3 %v11201_v15  ;;  %v7604_v43 = vor.u32 %v10918_v38, %v7601_v39  ;;  %v7631_v48 = vld [vmem:[%s17375_s0 + $0x48] sm:$0xf]  ;;  %v10926_v50 = vld [vmem:[%s17375_s0 + $0x4c] sm:$0xf]  ;;  %v7624_v52 = vor.u32 %v10929_v45, %v7623_v44  ;;  %v7628_v53 = vor.u32 %v10925_v46, %v7625_v47  ;;  %v7655_v56 = vld [vmem:[%s17375_s0 + $0x80] sm:$0xf] }
  0x12   :  { %2088 = vmatpush.bf16.msra.mxu0 %v11176_v16  ;;  %v10930_v49 = vld [vmem:[%s17375_s0 + $0x64] sm:$0xf0]  ;;  %v7633_v51 = vld [vmem:[%s17375_s0 + $0x68] sm:$0xf0]  ;;  %v10937_v57 = vld [vmem:[%s17375_s0 + $0x9c] sm:$0xf0] }
  0x13   :  { %2257 = vmatpush.bf16.msra.mxu1 %v11184_v17  ;;  %v7632_v54 = vor.u32 %v10930_v49, %v7631_v48  ;;  %v7636_v55 = vor.u32 %v10926_v50, %v7633_v51  ;;  %v10933_v58 = vld [vmem:[%s17375_s0 + $0x84] sm:$0xf]  ;;  %v7663_v60 = vld [vmem:[%s17375_s0 + $0x88] sm:$0xf]  ;;  %v10934_v62 = vld [vmem:[%s17375_s0 + $0x8c] sm:$0xf]  ;;  %v7656_v0 = vor.u32 %v10937_v57, %v7655_v56 }
  0x14   :  { %2426 = vmatpush.bf16.msra.mxu2 %v11192_v18  ;;  %v7657_v59 = vld [vmem:[%s17375_s0 + $0xa0] sm:$0xf0]  ;;  %v10938_v61 = vld [vmem:[%s17375_s0 + $0xa4] sm:$0xf0]  ;;  %v7665_v63 = vld [vmem:[%s17375_s0 + $0xa8] sm:$0xf0] }
  0x15   :  { %2595 = vmatpush.bf16.msra.mxu3 %v11200_v19  ;;  %v7660_v1 = vor.u32 %v10933_v58, %v7657_v59  ;;  %v7664_v2 = vor.u32 %v10938_v61, %v7663_v60  ;;  %v7668_v3 = vor.u32 %v10934_v62, %v7665_v63  ;;  %v7687_v4 = vld [vmem:[%s17375_s0 + $0xc0] sm:$0xf]  ;;  %v10941_v6 = vld [vmem:[%s17375_s0 + $0xc4] sm:$0xf]  ;;  %v7695_v8 = vld [vmem:[%s17375_s0 + $0xc8] sm:$0xf] }
  0x16   :  { %2089 = vmatpush.bf16.msra.mxu0 %v11175_v20  ;;  %v10945_v5 = vld [vmem:[%s17375_s0 + $0xdc] sm:$0xf0]  ;;  %v7689_v7 = vld [vmem:[%s17375_s0 + $0xe0] sm:$0xf0]  ;;  %v10946_v9 = vld [vmem:[%s17375_s0 + $0xe4] sm:$0xf0] }
  0x17   :  { %2258 = vmatpush.bf16.msra.mxu1 %v11183_v21  ;;  %v10942_v10 = vld [vmem:[%s17375_s0 + $0xcc] sm:$0xf]  ;;  %v7688_v12 = vor.u32 %v10945_v5, %v7687_v4  ;;  %v7692_v13 = vor.u32 %v10941_v6, %v7689_v7  ;;  %v7696_v14 = vor.u32 %v10946_v9, %v7695_v8  ;;  %v7719_v16 = vld [vmem:[%s17375_s0 + $0x100] sm:$0xf]  ;;  %v10949_v18 = vld [vmem:[%s17375_s0 + $0x104] sm:$0xf] }
  0x18   :  { %2427 = vmatpush.bf16.msra.mxu2 %v11191_v22  ;;  %v7697_v11 = vld [vmem:[%s17375_s0 + $0xe8] sm:$0xf0]  ;;  %v10953_v17 = vld [vmem:[%s17375_s0 + $0x11c] sm:$0xf0]  ;;  %v7721_v19 = vld [vmem:[%s17375_s0 + $0x120] sm:$0xf0] }
  0x19   :  { %2596 = vmatpush.bf16.msra.mxu3 %v11199_v23  ;;  %v7700_v15 = vor.u32 %v10942_v10, %v7697_v11  ;;  %v7727_v20 = vld [vmem:[%s17375_s0 + $0x108] sm:$0xf]  ;;  %v10950_v22 = vld [vmem:[%s17375_s0 + $0x10c] sm:$0xf]  ;;  %v7849_v4 = vld [vmem:[%s17375_s0 + $0x220] sm:$0xf0] }
  0x1a   :  { %2090 = vmatpush.bf16.msra.mxu0 %v11174_v24  ;;  %v10954_v21 = vld [vmem:[%s17375_s0 + $0x124] sm:$0xf0]  ;;  %v7729_v23 = vld [vmem:[%s17375_s0 + $0x128] sm:$0xf0]  ;;  %v7720_v24 = vor.u32 %v10953_v17, %v7719_v16  ;;  %v11228_v16 = vld [vmem:[%s17373_s1 + $0x1b8] sm:$0xff] }
  0x1b   :  { %2259 = vmatpush.bf16.msra.mxu1 %v11182_v25  ;;  %v7724_v25 = vor.u32 %v10949_v18, %v7721_v19  ;;  %v7759_v32 = vld [vmem:[%s17375_s0 + $0x148] sm:$0xf]  ;;  %v10958_v34 = vld [vmem:[%s17375_s0 + $0x14c] sm:$0xf]  ;;  %v11212_v18 = vld [vmem:[%s17373_s1 + $0x138] sm:$0xff] }
  0x1c   :  { %2428 = vmatpush.bf16.msra.mxu2 %v11190_v26  ;;  %v7728_v26 = vor.u32 %v10954_v21, %v7727_v20  ;;  %v10962_v33 = vld [vmem:[%s17375_s0 + $0x164] sm:$0xf0]  ;;  %v7761_v35 = vld [vmem:[%s17375_s0 + $0x168] sm:$0xf0]  ;;  %v11236_v19 = vld [vmem:[%s17373_s1 + $0x1f8] sm:$0xff] }
  0x1d   :  { %2597 = vmatpush.bf16.msra.mxu3 %v11198_v27  ;;  %v7732_v27 = vor.u32 %v10950_v22, %v7729_v23  ;;  %v7760_v38 = vor.u32 %v10962_v33, %v7759_v32  ;;  %v7764_v39 = vor.u32 %v10958_v34, %v7761_v35  ;;  %v7791_v44 = vld [vmem:[%s17375_s0 + $0x188] sm:$0xf]  ;;  %v10966_v46 = vld [vmem:[%s17375_s0 + $0x18c] sm:$0xf]  ;;  %v11220_v20 = vld [vmem:[%s17373_s1 + $0x178] sm:$0xff] }
  0x1e   :  { %2091 = vmatpush.bf16.msra.mxu0 %v11173_v28  ;;  %v7751_v28 = vld [vmem:[%s17375_s0 + $0x140] sm:$0xf]  ;;  %v10970_v45 = vld [vmem:[%s17375_s0 + $0x1a4] sm:$0xf0]  ;;  %v7793_v47 = vld [vmem:[%s17375_s0 + $0x1a8] sm:$0xf0] }
  0x1f   :  { %2260 = vmatpush.bf16.msra.mxu1 %v11181_v29  ;;  %v10961_v29 = vld [vmem:[%s17375_s0 + $0x15c] sm:$0xf0]  ;;  %v7792_v50 = vor.u32 %v10970_v45, %v7791_v44  ;;  %v7796_v51 = vor.u32 %v10966_v46, %v7793_v47  ;;  %v7823_v56 = vld [vmem:[%s17375_s0 + $0x1c8] sm:$0xf]  ;;  %v10974_v58 = vld [vmem:[%s17375_s0 + $0x1cc] sm:$0xf] }
  0x20   :  { %2429 = vmatpush.bf16.msra.mxu2 %v11189_v30  ;;  %v10957_v30 = vld [vmem:[%s17375_s0 + $0x144] sm:$0xf]  ;;  %v7752_v36 = vor.u32 %v10961_v29, %v7751_v28  ;;  %v10978_v57 = vld [vmem:[%s17375_s0 + $0x1e4] sm:$0xf0]  ;;  %v7825_v59 = vld [vmem:[%s17375_s0 + $0x1e8] sm:$0xf0] }
  0x21   :  { %2598 = vmatpush.bf16.msra.mxu3 %v11197_v31  ;;  %2092 = vmatmul.bf16.vlgmr.msra.gmra.mxu0 %v7592_v40  ;;  %v7753_v31 = vld [vmem:[%s17375_s0 + $0x160] sm:$0xf0]  ;;  %v7783_v40 = vld [vmem:[%s17375_s0 + $0x180] sm:$0xf]  ;;  %v7824_v62 = vor.u32 %v10978_v57, %v7823_v56  ;;  %v7828_v63 = vor.u32 %v10974_v58, %v7825_v59  ;;  %v7855_v5 = vld [vmem:[%s17375_s0 + $0x208] sm:$0xf] }
  0x22   :  { %2261 = vmatmul.bf16.vlgmr.msra.gmra.mxu1 %v7596_v41  ;;  %v7756_v37 = vor.u32 %v10957_v30, %v7753_v31  ;;  %v10969_v41 = vld [vmem:[%s17375_s0 + $0x19c] sm:$0xf0]  ;;  %v10986_v6 = vld [vmem:[%s17375_s0 + $0x224] sm:$0xf0]  ;;  %v10982_v7 = vld [vmem:[%s17375_s0 + $0x20c] sm:$0xf]  ;;  %2760 = vmatpush.bf16.msrb.mxu0 %v11212_v18 }
  0x23   :  { %2430 = vmatmul.bf16.vlgmr.msra.gmra.mxu2 %v7600_v42  ;;  %v10965_v42 = vld [vmem:[%s17375_s0 + $0x184] sm:$0xf]  ;;  %v7784_v48 = vor.u32 %v10969_v41, %v7783_v40  ;;  %v7857_v8 = vld [vmem:[%s17375_s0 + $0x228] sm:$0xf0]  ;;  %2929 = vmatpush.bf16.msrb.mxu1 %v11220_v20  ;;  %v7879_v29 = vld [vmem:[%s17375_s0 + $0x240] sm:$0xf] }
  0x24   :  { %2599 = vmatmul.bf16.vlgmr.msra.gmra.mxu3 %v7604_v43  ;;  %v7785_v43 = vld [vmem:[%s17375_s0 + $0x1a0] sm:$0xf0]  ;;  %3098 = vmatpush.bf16.msrb.mxu2 %v11228_v16  ;;  %v10993_v30 = vld [vmem:[%s17375_s0 + $0x25c] sm:$0xf0]  ;;  %v7887_v33 = vld [vmem:[%s17375_s0 + $0x248] sm:$0xf] }
  0x25   :  { %v7788_v49 = vor.u32 %v10965_v42, %v7785_v43  ;;  %3267 = vmatpush.bf16.msrb.mxu3 %v11236_v19  ;;  %v10989_v31 = vld [vmem:[%s17375_s0 + $0x244] sm:$0xf]  ;;  %v10994_v34 = vld [vmem:[%s17375_s0 + $0x264] sm:$0xf0]  ;;  %v10990_v35 = vld [vmem:[%s17375_s0 + $0x24c] sm:$0xf] }
  0x26   :  { %v7881_v32 = vld [vmem:[%s17375_s0 + $0x260] sm:$0xf0]  ;;  %v7888_v44 = vor.u32 %v10994_v34, %v7887_v33  ;;  %v7911_v57 = vld [vmem:[%s17375_s0 + $0x280] sm:$0xf] }
  0x27   :  { %v7884_v40 = vor.u32 %v10989_v31, %v7881_v32  ;;  %v11001_v58 = vld [vmem:[%s17375_s0 + $0x29c] sm:$0xf0]  ;;  %v10997_v59 = vld [vmem:[%s17375_s0 + $0x284] sm:$0xf] }
  0x31   :  { %2097 = vmatmul.bf16.gmra.mxu0 %v7624_v52  ;;  %v7815_v52 = vld [vmem:[%s17375_s0 + $0x1c0] sm:$0xf] }
  0x32   :  { %2266 = vmatmul.bf16.gmra.mxu1 %v7628_v53  ;;  %v10977_v53 = vld [vmem:[%s17375_s0 + $0x1dc] sm:$0xf0] }
  0x33   :  { %2435 = vmatmul.bf16.gmra.mxu2 %v7632_v54  ;;  %v10973_v54 = vld [vmem:[%s17375_s0 + $0x1c4] sm:$0xf]  ;;  %v7816_v60 = vor.u32 %v10977_v53, %v7815_v52 }
  0x34   :  { %2604 = vmatmul.bf16.gmra.mxu3 %v7636_v55  ;;  %v7817_v55 = vld [vmem:[%s17375_s0 + $0x1e0] sm:$0xf0] }
  0x35   :  { %v7820_v61 = vor.u32 %v10973_v54, %v7817_v55 }
  0x41   :  { %2102 = vmatmul.bf16.gmra.mxu0 %v7656_v0  ;;  %v12097_v0 = vld [vmem:[%s17374_s2] ss:$0 sm:$0xff] }
  0x42   :  { %2271 = vmatmul.bf16.gmra.mxu1 %v7660_v1  ;;  %v7847_v1 = vld [vmem:[%s17375_s0 + $0x200] sm:$0xf] }
  0x43   :  { %2440 = vmatmul.bf16.gmra.mxu2 %v7664_v2  ;;  %v10985_v2 = vld [vmem:[%s17375_s0 + $0x21c] sm:$0xf0] }
  0x44   :  { %2609 = vmatmul.bf16.gmra.mxu3 %v7668_v3  ;;  %v10981_v3 = vld [vmem:[%s17375_s0 + $0x204] sm:$0xf]  ;;  %v7848_v9 = vor.u32 %v10985_v2, %v7847_v1  ;;  %v7921_v1 = vld [vmem:[%s17375_s0 + $0x2a8] sm:$0xf0] }
  0x45   :  { %v7852_v10 = vor.u32 %v10981_v3, %v7849_v4  ;;  %v7912_v4 = vor.u32 %v11001_v58, %v7911_v57  ;;  %v7983_v57 = vld [vmem:[%s17375_s0 + $0x308] sm:$0xf] }
  0x46   :  { %v11018_v58 = vld [vmem:[%s17375_s0 + $0x324] sm:$0xf0] }
  0x51   :  { %2107 = vmatmul.bf16.gmra.mxu0 %v7688_v12 }
  0x52   :  { %2276 = vmatmul.bf16.gmra.mxu1 %v7692_v13  ;;  %v7856_v13 = vor.u32 %v10986_v6, %v7855_v5 }
  0x53   :  { %2445 = vmatmul.bf16.gmra.mxu2 %v7696_v14  ;;  %v7860_v14 = vor.u32 %v10982_v7, %v7857_v8 }
  0x54   :  { %2614 = vmatmul.bf16.gmra.mxu3 %v7700_v15 }
  0x61   :  { %2112 = vmatmul.bf16.gmra.mxu0 %v7720_v24 }
  0x62   :  { %2281 = vmatmul.bf16.gmra.mxu1 %v7724_v25 }
  0x63   :  { %2450 = vmatmul.bf16.gmra.mxu2 %v7728_v26 }
  0x64   :  { %2619 = vmatmul.bf16.gmra.mxu3 %v7732_v27 }
  0x71   :  { %2117 = vmatmul.bf16.gmra.mxu0 %v7752_v36  ;;  %v7889_v36 = vld [vmem:[%s17375_s0 + $0x268] sm:$0xf0] }
  0x72   :  { %2286 = vmatmul.bf16.gmra.mxu1 %v7756_v37  ;;  %v7892_v45 = vor.u32 %v10990_v35, %v7889_v36 }
  0x73   :  { %2455 = vmatmul.bf16.gmra.mxu2 %v7760_v38 }
  0x74   :  { %2624 = vmatmul.bf16.gmra.mxu3 %v7764_v39  ;;  %v7880_v39 = vor.u32 %v10993_v30, %v7879_v29  ;;  %v11006_v29 = vld [vmem:[%s17375_s0 + $0x2cc] sm:$0xf] }
  0x75   :  { %v7953_v30 = vld [vmem:[%s17375_s0 + $0x2e8] sm:$0xf0] }
  0x81   :  { %2122 = vmatmul.bf16.gmra.mxu0 %v7784_v48 }
  0x82   :  { %2291 = vmatmul.bf16.gmra.mxu1 %v7788_v49 }
  0x83   :  { %2460 = vmatmul.bf16.gmra.mxu2 %v7792_v50 }
  0x84   :  { %2629 = vmatmul.bf16.gmra.mxu3 %v7796_v51 }
  0x91   :  { %2127 = vmatmul.bf16.gmra.mxu0 %v7816_v60  ;;  %v7913_v60 = vld [vmem:[%s17375_s0 + $0x2a0] sm:$0xf0] }
  0x92   :  { %2296 = vmatmul.bf16.gmra.mxu1 %v7820_v61  ;;  %v7919_v61 = vld [vmem:[%s17375_s0 + $0x288] sm:$0xf]  ;;  %v7916_v5 = vor.u32 %v10997_v59, %v7913_v60  ;;  %v11014_v59 = vld [vmem:[%s17375_s0 + $0x30c] sm:$0xf] }
  0x93   :  { %2465 = vmatmul.bf16.gmra.mxu2 %v7824_v62  ;;  %v11002_v62 = vld [vmem:[%s17375_s0 + $0x2a4] sm:$0xf0]  ;;  %v7985_v60 = vld [vmem:[%s17375_s0 + $0x328] sm:$0xf0] }
  0x94   :  { %2634 = vmatmul.bf16.gmra.mxu3 %v7828_v63  ;;  %v10998_v63 = vld [vmem:[%s17375_s0 + $0x28c] sm:$0xf] }
  0x9e   :  { %v2093_v11 = vpop.f32.mrf.mxu0 }
  0x9f   :  { %v2262_v12 = vpop.f32.mrf.mxu1  ;;  %v2094_v15 = vadd.f32 %v12097_v0, %v2093_v11 }
  0xa1   :  { %v2263_v17 = vadd.f32 %v2262_v12, %v2094_v15  ;;  %2132 = vmatmul.bf16.gmra.mxu0 %v7848_v9  ;;  %v7920_v9 = vor.u32 %v11002_v62, %v7919_v61 }
  0xa2   :  { %2301 = vmatmul.bf16.gmra.mxu1 %v7852_v10  ;;  %v7924_v10 = vor.u32 %v10998_v63, %v7921_v1 }
  0xa3   :  { %2470 = vmatmul.bf16.gmra.mxu2 %v7856_v13 }
  0xa4   :  { %2639 = vmatmul.bf16.gmra.mxu3 %v7860_v14 }
  0xa6   :  { %v2431_v21 = vpop.f32.mrf.mxu2  ;;  %v2095_v24 = vpop.f32.mrf.mxu0 }
  0xa7   :  { %v2600_v22 = vpop.f32.mrf.mxu3  ;;  %v2432_v23 = vadd.f32 %v2431_v21, %v2263_v17  ;;  %v2264_v25 = vpop.f32.mrf.mxu1  ;;  %v2096_v26 = vadd.f32 %v12097_v0, %v2095_v24  ;;  %v11005_v24 = vld [vmem:[%s17375_s0 + $0x2c4] sm:$0xf] }
  0xa9   :  { %v12137_v27 = vadd.f32 %v2600_v22, %v2432_v23  ;;  %v2265_v28 = vadd.f32 %v2264_v25, %v2096_v26  ;;  %v7943_v22 = vld [vmem:[%s17375_s0 + $0x2c0] sm:$0xf]  ;;  %v7945_v25 = vld [vmem:[%s17375_s0 + $0x2e0] sm:$0xf0]  ;;  %v7951_v26 = vld [vmem:[%s17375_s0 + $0x2c8] sm:$0xf] }
  0xaa   :  { %v11009_v23 = vld [vmem:[%s17375_s0 + $0x2dc] sm:$0xf0]  ;;  %v7948_v34 = vor.u32 %v11005_v24, %v7945_v25 }
  0xab   :  { %v7944_v33 = vor.u32 %v11009_v23, %v7943_v22  ;;  %v8007_v24 = vld [vmem:[%s17375_s0 + $0x340] sm:$0xf] }
  0xac   :  { %v11025_v25 = vld [vmem:[%s17375_s0 + $0x35c] sm:$0xf0] }
  0xae   :  { %v2433_v37 = vpop.f32.mrf.mxu2  ;;  %v2098_v42 = vpop.f32.mrf.mxu0 }
  0xaf   :  { %v2602_v38 = vpop.f32.mrf.mxu3  ;;  %v2434_v41 = vadd.f32 %v2433_v37, %v2265_v28  ;;  %v2267_v43 = vpop.f32.mrf.mxu1  ;;  %v2099_v46 = vadd.f32 %v12097_v0, %v2098_v42  ;;  %v11010_v28 = vld [vmem:[%s17375_s0 + $0x2e4] sm:$0xf0] }
  0xb1   :  { %v12164_v47 = vadd.f32 %v2602_v38, %v2434_v41  ;;  %v2268_v48 = vadd.f32 %v2267_v43, %v2099_v46  ;;  %2137 = vmatmul.bf16.gmra.mxu0 %v7880_v39  ;;  %v7952_v38 = vor.u32 %v11010_v28, %v7951_v26  ;;  %v7956_v39 = vor.u32 %v11006_v29, %v7953_v30  ;;  %v11021_v26 = vld [vmem:[%s17375_s0 + $0x344] sm:$0xf]  ;;  %v8015_v29 = vld [vmem:[%s17375_s0 + $0x348] sm:$0xf] }
  0xb2   :  { %2306 = vmatmul.bf16.gmra.mxu1 %v7884_v40  ;;  %v8009_v28 = vld [vmem:[%s17375_s0 + $0x360] sm:$0xf0]  ;;  %v11026_v30 = vld [vmem:[%s17375_s0 + $0x364] sm:$0xf0] }
  0xb3   :  { %2475 = vmatmul.bf16.gmra.mxu2 %v7888_v44 }
  0xb4   :  { %2644 = vmatmul.bf16.gmra.mxu3 %v7892_v45 }
  0xb6   :  { %v2436_v49 = vpop.f32.mrf.mxu2  ;;  %v2100_v52 = vpop.f32.mrf.mxu0 }
  0xb7   :  { %v2605_v50 = vpop.f32.mrf.mxu3  ;;  %v2437_v51 = vadd.f32 %v2436_v49, %v2268_v48  ;;  %v2269_v53 = vpop.f32.mrf.mxu1  ;;  %v2101_v54 = vadd.f32 %v12097_v0, %v2100_v52  ;;  %v7975_v52 = vld [vmem:[%s17375_s0 + $0x300] sm:$0xf] }
  0xb9   :  { %v12167_v55 = vadd.f32 %v2605_v50, %v2437_v51  ;;  %v2270_v56 = vadd.f32 %v2269_v53, %v2101_v54  ;;  %v11017_v53 = vld [vmem:[%s17375_s0 + $0x31c] sm:$0xf0]  ;;  %v11013_v54 = vld [vmem:[%s17375_s0 + $0x304] sm:$0xf] }
  0xba   :  { %v7976_v63 = vor.u32 %v11017_v53, %v7975_v52 }
  0xbe   :  { %v2438_v2 = vpop.f32.mrf.mxu2  ;;  %v2103_v7 = vpop.f32.mrf.mxu0 }
  0xbf   :  { %v2607_v3 = vpop.f32.mrf.mxu3  ;;  %v2439_v6 = vadd.f32 %v2438_v2, %v2270_v56  ;;  %v2272_v8 = vpop.f32.mrf.mxu1  ;;  %v2104_v11 = vadd.f32 %v12097_v0, %v2103_v7  ;;  %v7977_v56 = vld [vmem:[%s17375_s0 + $0x320] sm:$0xf0] }
  0xc0   :  { %v7980_v1 = vor.u32 %v11013_v54, %v7977_v56 }
  0xc1   :  { %v12194_v12 = vadd.f32 %v2607_v3, %v2439_v6  ;;  %v2273_v13 = vadd.f32 %v2272_v8, %v2104_v11  ;;  %2142 = vmatmul.bf16.gmra.mxu0 %v7912_v4  ;;  %v7988_v6 = vor.u32 %v11014_v59, %v7985_v60  ;;  %v11211_v11 = vld [vmem:[%s17373_s1 + $0x130] sm:$0xff]  ;;  %v11029_v59 = vld [vmem:[%s17375_s0 + $0x384] sm:$0xf] }
  0xc2   :  { %2311 = vmatmul.bf16.gmra.mxu1 %v7916_v5  ;;  %v7984_v5 = vor.u32 %v11018_v58, %v7983_v57  ;;  %2761 = vmatpush.bf16.msrb.mxu0 %v11211_v11  ;;  %v8039_v57 = vld [vmem:[%s17375_s0 + $0x380] sm:$0xf]  ;;  %v8041_v60 = vld [vmem:[%s17375_s0 + $0x3a0] sm:$0xf0] }
  0xc3   :  { %2480 = vmatmul.bf16.gmra.mxu2 %v7920_v9  ;;  %v11227_v9 = vld [vmem:[%s17373_s1 + $0x1b0] sm:$0xff]  ;;  %v11033_v58 = vld [vmem:[%s17375_s0 + $0x39c] sm:$0xf0] }
  0xc4   :  { %2649 = vmatmul.bf16.gmra.mxu3 %v7924_v10  ;;  %3099 = vmatpush.bf16.msrb.mxu2 %v11227_v9 }
  0xc6   :  { %v2441_v14 = vpop.f32.mrf.mxu2  ;;  %v2105_v17 = vpop.f32.mrf.mxu0 }
  0xc7   :  { %v2610_v15 = vpop.f32.mrf.mxu3  ;;  %v2442_v16 = vadd.f32 %v2441_v14, %v2273_v13  ;;  %v2274_v18 = vpop.f32.mrf.mxu1  ;;  %v2106_v19 = vadd.f32 %v12097_v0, %v2105_v17  ;;  %v11235_v13 = vld [vmem:[%s17373_s1 + $0x1f0] sm:$0xff] }
  0xc8   :  { %v11219_v14 = vld [vmem:[%s17373_s1 + $0x170] sm:$0xff]  ;;  %3268 = vmatpush.bf16.msrb.mxu3 %v11235_v13 }
  0xc9   :  { %v12197_v20 = vadd.f32 %v2610_v15, %v2442_v16  ;;  %v2275_v21 = vadd.f32 %v2274_v18, %v2106_v19  ;;  %2930 = vmatpush.bf16.msrb.mxu1 %v11219_v14 }
  0xce   :  { %v2443_v31 = vpop.f32.mrf.mxu2  ;;  %v2108_v36 = vpop.f32.mrf.mxu0 }
  0xcf   :  { %v2612_v32 = vpop.f32.mrf.mxu3  ;;  %v2444_v35 = vadd.f32 %v2443_v31, %v2275_v21  ;;  %v2277_v37 = vpop.f32.mrf.mxu1  ;;  %v2109_v40 = vadd.f32 %v12097_v0, %v2108_v36  ;;  %v11022_v31 = vld [vmem:[%s17375_s0 + $0x34c] sm:$0xf]  ;;  %v8012_v36 = vor.u32 %v11021_v26, %v8009_v28  ;;  %v8071_v26 = vld [vmem:[%s17375_s0 + $0x3c0] sm:$0xf] }
  0xd0   :  { %v11041_v28 = vld [vmem:[%s17375_s0 + $0x3dc] sm:$0xf0] }
  0xd1   :  { %v12224_v41 = vadd.f32 %v2612_v32, %v2444_v35  ;;  %v2278_v42 = vadd.f32 %v2277_v37, %v2109_v40  ;;  %2147 = vmatmul.bf16.gmra.mxu0 %v7944_v33  ;;  %v8017_v32 = vld [vmem:[%s17375_s0 + $0x368] sm:$0xf0]  ;;  %v8008_v35 = vor.u32 %v11025_v25, %v8007_v24  ;;  %v8016_v40 = vor.u32 %v11026_v30, %v8015_v29  ;;  %v11037_v29 = vld [vmem:[%s17375_s0 + $0x3c4] sm:$0xf] }
  0xd2   :  { %2316 = vmatmul.bf16.gmra.mxu1 %v7948_v34  ;;  %v8073_v30 = vld [vmem:[%s17375_s0 + $0x3e0] sm:$0xf0] }
  0xd3   :  { %2485 = vmatmul.bf16.gmra.mxu2 %v7952_v38 }
  0xd4   :  { %2654 = vmatmul.bf16.gmra.mxu3 %v7956_v39 }
  0xd6   :  { %v2446_v43 = vpop.f32.mrf.mxu2  ;;  %v2110_v46 = vpop.f32.mrf.mxu0 }
  0xd7   :  { %v2615_v44 = vpop.f32.mrf.mxu3  ;;  %v2447_v45 = vadd.f32 %v2446_v43, %v2278_v42  ;;  %v2279_v48 = vpop.f32.mrf.mxu1  ;;  %v2111_v49 = vadd.f32 %v12097_v0, %v2110_v46  ;;  %v8020_v42 = vor.u32 %v11022_v31, %v8017_v32  ;;  %v8079_v31 = vld [vmem:[%s17375_s0 + $0x3c8] sm:$0xf] }
  0xd8   :  { %v11042_v32 = vld [vmem:[%s17375_s0 + $0x3e4] sm:$0xf0] }
  0xd9   :  { %v12227_v50 = vadd.f32 %v2615_v44, %v2447_v45  ;;  %v2280_v51 = vadd.f32 %v2279_v48, %v2111_v49 }
  0xde   :  { %v2448_v61 = vpop.f32.mrf.mxu2  ;;  %v2113_v3 = vpop.f32.mrf.mxu0 }
  0xdf   :  { %v2617_v62 = vpop.f32.mrf.mxu3  ;;  %v2449_v2 = vadd.f32 %v2448_v61, %v2280_v51  ;;  %v2282_v4 = vpop.f32.mrf.mxu1  ;;  %v2114_v7 = vadd.f32 %v12097_v0, %v2113_v3  ;;  %v8047_v61 = vld [vmem:[%s17375_s0 + $0x388] sm:$0xf] }
  0xe1   :  { %v12254_v8 = vadd.f32 %v2617_v62, %v2449_v2  ;;  %v2283_v10 = vadd.f32 %v2282_v4, %v2114_v7  ;;  %2152 = vmatmul.bf16.gmra.mxu0 %v7976_v63  ;;  %v11034_v62 = vld [vmem:[%s17375_s0 + $0x3a4] sm:$0xf0]  ;;  %v11030_v63 = vld [vmem:[%s17375_s0 + $0x38c] sm:$0xf]  ;;  %v8040_v4 = vor.u32 %v11033_v58, %v8039_v57 }
  0xe2   :  { %2321 = vmatmul.bf16.gmra.mxu1 %v7980_v1  ;;  %v8049_v1 = vld [vmem:[%s17375_s0 + $0x3a8] sm:$0xf0] }
  0xe3   :  { %2490 = vmatmul.bf16.gmra.mxu2 %v7984_v5  ;;  %v8044_v5 = vor.u32 %v11029_v59, %v8041_v60  ;;  %v8052_v11 = vor.u32 %v11030_v63, %v8049_v1  ;;  %v11045_v63 = vld [vmem:[%s17375_s0 + $0x404] sm:$0xf] }
  0xe4   :  { %2659 = vmatmul.bf16.gmra.mxu3 %v7988_v6  ;;  %v8105_v1 = vld [vmem:[%s17375_s0 + $0x420] sm:$0xf0] }
  0xe6   :  { %v2451_v15 = vpop.f32.mrf.mxu2  ;;  %v2115_v18 = vpop.f32.mrf.mxu0 }
  0xe7   :  { %v2620_v16 = vpop.f32.mrf.mxu3  ;;  %v2452_v17 = vadd.f32 %v2451_v15, %v2283_v10  ;;  %v2284_v19 = vpop.f32.mrf.mxu1  ;;  %v2116_v21 = vadd.f32 %v12097_v0, %v2115_v18  ;;  %v8048_v10 = vor.u32 %v11034_v62, %v8047_v61  ;;  %v8103_v61 = vld [vmem:[%s17375_s0 + $0x400] sm:$0xf] }
  0xe8   :  { %v11049_v62 = vld [vmem:[%s17375_s0 + $0x41c] sm:$0xf0] }
  0xe9   :  { %v12269_v22 = vadd.f32 %v2620_v16, %v2452_v17  ;;  %v2285_v23 = vadd.f32 %v2284_v19, %v2116_v21 }
  0xee   :  { %v2453_v33 = vpop.f32.mrf.mxu2  ;;  %v2118_v38 = vpop.f32.mrf.mxu0 }
  0xef   :  { %v2622_v34 = vpop.f32.mrf.mxu3  ;;  %v2454_v37 = vadd.f32 %v2453_v33, %v2285_v23  ;;  %v2287_v39 = vpop.f32.mrf.mxu1  ;;  %v2119_v43 = vadd.f32 %v12097_v0, %v2118_v38  ;;  %v11038_v33 = vld [vmem:[%s17375_s0 + $0x3cc] sm:$0xf]  ;;  %v8076_v38 = vor.u32 %v11037_v29, %v8073_v30 }
  0xf1   :  { %v12296_v44 = vadd.f32 %v2622_v34, %v2454_v37  ;;  %v2288_v45 = vadd.f32 %v2287_v39, %v2119_v43  ;;  %2157 = vmatmul.bf16.gmra.mxu0 %v8008_v35  ;;  %v8081_v34 = vld [vmem:[%s17375_s0 + $0x3e8] sm:$0xf0]  ;;  %v8072_v37 = vor.u32 %v11041_v28, %v8071_v26  ;;  %v8080_v43 = vor.u32 %v11042_v32, %v8079_v31 }
  0xf2   :  { %2326 = vmatmul.bf16.gmra.mxu1 %v8012_v36  ;;  %v11234_v26 = vld [vmem:[%s17373_s1 + $0x1e8] sm:$0xff] }
  0xf3   :  { %2495 = vmatmul.bf16.gmra.mxu2 %v8016_v40  ;;  %v11218_v28 = vld [vmem:[%s17373_s1 + $0x168] sm:$0xff]  ;;  %3269 = vmatpush.bf16.msrb.mxu3 %v11234_v26 }
  0xf4   :  { %2664 = vmatmul.bf16.gmra.mxu3 %v8020_v42  ;;  %2931 = vmatpush.bf16.msrb.mxu1 %v11218_v28 }
  0xf6   :  { %v2456_v46 = vpop.f32.mrf.mxu2  ;;  %v2120_v51 = vpop.f32.mrf.mxu0 }
  0xf7   :  { %v2625_v48 = vpop.f32.mrf.mxu3  ;;  %v2457_v49 = vadd.f32 %v2456_v46, %v2288_v45  ;;  %v2289_v52 = vpop.f32.mrf.mxu1  ;;  %v2121_v53 = vadd.f32 %v12097_v0, %v2120_v51  ;;  %v8084_v45 = vor.u32 %v11038_v33, %v8081_v34 }
  0xf9   :  { %v12299_v54 = vadd.f32 %v2625_v48, %v2457_v49  ;;  %v2290_v56 = vadd.f32 %v2289_v52, %v2121_v53 }
  0xfe   :  { %v2458_v2 = vpop.f32.mrf.mxu2  ;;  %v2123_v7 = vpop.f32.mrf.mxu0 }
  0xff   :  { %v2627_v3 = vpop.f32.mrf.mxu3  ;;  %v2459_v6 = vadd.f32 %v2458_v2, %v2290_v56  ;;  %v2292_v9 = vpop.f32.mrf.mxu1  ;;  %v2124_v13 = vadd.f32 %v12097_v0, %v2123_v7  ;;  %v8111_v2 = vld [vmem:[%s17375_s0 + $0x408] sm:$0xf] }
 0x101   :  { %v12326_v14 = vadd.f32 %v2627_v3, %v2459_v6  ;;  %v2293_v15 = vadd.f32 %v2292_v9, %v2124_v13  ;;  %2162 = vmatmul.bf16.gmra.mxu0 %v8040_v4  ;;  %v11050_v3 = vld [vmem:[%s17375_s0 + $0x424] sm:$0xf0]  ;;  %v11046_v4 = vld [vmem:[%s17375_s0 + $0x40c] sm:$0xf]  ;;  %v8104_v9 = vor.u32 %v11049_v62, %v8103_v61 }
 0x102   :  { %2331 = vmatmul.bf16.gmra.mxu1 %v8044_v5  ;;  %v8113_v5 = vld [vmem:[%s17375_s0 + $0x428] sm:$0xf0] }
 0x103   :  { %2500 = vmatmul.bf16.gmra.mxu2 %v8048_v10  ;;  %v8108_v10 = vor.u32 %v11045_v63, %v8105_v1 }
 0x104   :  { %2669 = vmatmul.bf16.gmra.mxu3 %v8052_v11 }
 0x106   :  { %v2461_v16 = vpop.f32.mrf.mxu2  ;;  %v2125_v19 = vpop.f32.mrf.mxu0 }
 0x107   :  { %v2630_v17 = vpop.f32.mrf.mxu3  ;;  %v2462_v18 = vadd.f32 %v2461_v16, %v2293_v15  ;;  %v2294_v21 = vpop.f32.mrf.mxu1  ;;  %v2126_v23 = vadd.f32 %v12097_v0, %v2125_v19  ;;  %v8112_v16 = vor.u32 %v11050_v3, %v8111_v2 }
 0x109   :  { %v12329_v24 = vadd.f32 %v2630_v17, %v2462_v18  ;;  %v2295_v25 = vadd.f32 %v2294_v21, %v2126_v23  ;;  %v8116_v17 = vor.u32 %v11046_v4, %v8113_v5  ;;  %v11226_v21 = vld [vmem:[%s17373_s1 + $0x1a8] sm:$0xff] }
 0x10a   :  { %3100 = vmatpush.bf16.msrb.mxu2 %v11226_v21  ;;  %v11062_v21 = vld [vmem:[%s17375_s0 + $0x48c] sm:$0xf] }
 0x10e   :  { %v2463_v35 = vpop.f32.mrf.mxu2  ;;  %v2128_v40 = vpop.f32.mrf.mxu0 }
 0x10f   :  { %v2632_v36 = vpop.f32.mrf.mxu3  ;;  %v2464_v39 = vadd.f32 %v2463_v35, %v2295_v25  ;;  %v2297_v42 = vpop.f32.mrf.mxu1  ;;  %v2129_v46 = vadd.f32 %v12097_v0, %v2128_v40  ;;  %v11210_v25 = vld [vmem:[%s17373_s1 + $0x128] sm:$0xff]  ;;  %v8137_v40 = vld [vmem:[%s17375_s0 + $0x460] sm:$0xf0] }
 0x110   :  { %2762 = vmatpush.bf16.msrb.mxu0 %v11210_v25 }
 0x111   :  { %v12356_v48 = vadd.f32 %v2632_v36, %v2464_v39  ;;  %v2298_v49 = vadd.f32 %v2297_v42, %v2129_v46  ;;  %2167 = vmatmul.bf16.gmra.mxu0 %v8072_v37  ;;  %v8135_v37 = vld [vmem:[%s17375_s0 + $0x440] sm:$0xf]  ;;  %v11053_v39 = vld [vmem:[%s17375_s0 + $0x444] sm:$0xf]  ;;  %v8143_v42 = vld [vmem:[%s17375_s0 + $0x448] sm:$0xf] }
 0x112   :  { %2336 = vmatmul.bf16.gmra.mxu1 %v8076_v38  ;;  %v11057_v38 = vld [vmem:[%s17375_s0 + $0x45c] sm:$0xf0]  ;;  %v8145_v46 = vld [vmem:[%s17375_s0 + $0x468] sm:$0xf0] }
 0x113   :  { %2505 = vmatmul.bf16.gmra.mxu2 %v8080_v43  ;;  %v11058_v43 = vld [vmem:[%s17375_s0 + $0x464] sm:$0xf0] }
 0x114   :  { %2674 = vmatmul.bf16.gmra.mxu3 %v8084_v45  ;;  %v11054_v45 = vld [vmem:[%s17375_s0 + $0x44c] sm:$0xf] }
 0x115   :  { %v8148_v61 = vor.u32 %v11054_v45, %v8145_v46 }
 0x116   :  { %v2466_v51 = vpop.f32.mrf.mxu2  ;;  %v2130_v56 = vpop.f32.mrf.mxu0 }
 0x117   :  { %v2635_v52 = vpop.f32.mrf.mxu3  ;;  %v2467_v53 = vadd.f32 %v2466_v51, %v2298_v49  ;;  %v2299_v57 = vpop.f32.mrf.mxu1  ;;  %v2131_v58 = vadd.f32 %v12097_v0, %v2130_v56 }
 0x119   :  { %v12359_v59 = vadd.f32 %v2635_v52, %v2467_v53  ;;  %v2300_v60 = vadd.f32 %v2299_v57, %v2131_v58  ;;  %v8136_v52 = vor.u32 %v11057_v38, %v8135_v37  ;;  %v8140_v53 = vor.u32 %v11053_v39, %v8137_v40 }
 0x11e   :  { %v2468_v6 = vpop.f32.mrf.mxu2  ;;  %v2133_v13 = vpop.f32.mrf.mxu0 }
 0x11f   :  { %v2637_v7 = vpop.f32.mrf.mxu3  ;;  %v2469_v11 = vadd.f32 %v2468_v6, %v2300_v60  ;;  %v2302_v15 = vpop.f32.mrf.mxu1  ;;  %v2134_v18 = vadd.f32 %v12097_v0, %v2133_v13  ;;  %v8144_v60 = vor.u32 %v11058_v43, %v8143_v42  ;;  %v11065_v13 = vld [vmem:[%s17375_s0 + $0x49c] sm:$0xf0] }
 0x121   :  { %v12386_v19 = vadd.f32 %v2637_v7, %v2469_v11  ;;  %v2303_v23 = vadd.f32 %v2302_v15, %v2134_v18  ;;  %2172 = vmatmul.bf16.gmra.mxu0 %v8104_v9  ;;  %v8167_v11 = vld [vmem:[%s17375_s0 + $0x480] sm:$0xf]  ;;  %v11061_v15 = vld [vmem:[%s17375_s0 + $0x484] sm:$0xf]  ;;  %v11066_v18 = vld [vmem:[%s17375_s0 + $0x4a4] sm:$0xf0] }
 0x122   :  { %2341 = vmatmul.bf16.gmra.mxu1 %v8108_v10  ;;  %v8168_v28 = vor.u32 %v11065_v13, %v8167_v11 }
 0x123   :  { %2510 = vmatmul.bf16.gmra.mxu2 %v8112_v16  ;;  %v8169_v16 = vld [vmem:[%s17375_s0 + $0x4a0] sm:$0xf0] }
 0x124   :  { %2679 = vmatmul.bf16.gmra.mxu3 %v8116_v17  ;;  %v8175_v17 = vld [vmem:[%s17375_s0 + $0x488] sm:$0xf] }
 0x126   :  { %v2471_v29 = vpop.f32.mrf.mxu2  ;;  %v2135_v32 = vpop.f32.mrf.mxu0 }
 0x127   :  { %v2640_v30 = vpop.f32.mrf.mxu3  ;;  %v2472_v31 = vadd.f32 %v2471_v29, %v2303_v23  ;;  %v2304_v33 = vpop.f32.mrf.mxu1  ;;  %v2136_v34 = vadd.f32 %v12097_v0, %v2135_v32  ;;  %v8177_v23 = vld [vmem:[%s17375_s0 + $0x4a8] sm:$0xf0]  ;;  %v8172_v29 = vor.u32 %v11061_v15, %v8169_v16 }
 0x129   :  { %v12401_v35 = vadd.f32 %v2640_v30, %v2472_v31  ;;  %v2305_v36 = vadd.f32 %v2304_v33, %v2136_v34  ;;  %v8176_v33 = vor.u32 %v11066_v18, %v8175_v17  ;;  %v8180_v34 = vor.u32 %v11062_v21, %v8177_v23 }
 0x12e   :  { %v2473_v49 = vpop.f32.mrf.mxu2  ;;  %v2138_v57 = vpop.f32.mrf.mxu0 }
 0x12f   :  { %v2642_v51 = vpop.f32.mrf.mxu3  ;;  %v2474_v56 = vadd.f32 %v2473_v49, %v2305_v36  ;;  %v2307_v58 = vpop.f32.mrf.mxu1  ;;  %v2139_v62 = vadd.f32 %v12097_v0, %v2138_v57  ;;  %v8201_v57 = vld [vmem:[%s17375_s0 + $0x4e0] sm:$0xf0] }
 0x131   :  { %v12428_v63 = vadd.f32 %v2642_v51, %v2474_v56  ;;  %v2308_v1 = vadd.f32 %v2307_v58, %v2139_v62  ;;  %2177 = vmatmul.bf16.gmra.mxu0 %v8136_v52  ;;  %v8199_v52 = vld [vmem:[%s17375_s0 + $0x4c0] sm:$0xf]  ;;  %v11069_v56 = vld [vmem:[%s17375_s0 + $0x4c4] sm:$0xf]  ;;  %v8207_v58 = vld [vmem:[%s17375_s0 + $0x4c8] sm:$0xf] }
 0x132   :  { %2346 = vmatmul.bf16.gmra.mxu1 %v8140_v53  ;;  %v11073_v53 = vld [vmem:[%s17375_s0 + $0x4dc] sm:$0xf0]  ;;  %v8209_v62 = vld [vmem:[%s17375_s0 + $0x4e8] sm:$0xf0] }
 0x133   :  { %2515 = vmatmul.bf16.gmra.mxu2 %v8144_v60  ;;  %v11074_v60 = vld [vmem:[%s17375_s0 + $0x4e4] sm:$0xf0] }
 0x134   :  { %2684 = vmatmul.bf16.gmra.mxu3 %v8148_v61  ;;  %v11070_v61 = vld [vmem:[%s17375_s0 + $0x4cc] sm:$0xf] }
 0x135   :  { %v8212_v11 = vor.u32 %v11070_v61, %v8209_v62  ;;  %v11209_v62 = vld [vmem:[%s17373_s1 + $0x120] sm:$0xff] }
 0x136   :  { %v2476_v2 = vpop.f32.mrf.mxu2  ;;  %v2140_v5 = vpop.f32.mrf.mxu0  ;;  %2763 = vmatpush.bf16.msrb.mxu0 %v11209_v62  ;;  %v8295_v62 = vld [vmem:[%s17375_s0 + $0x580] sm:$0xf] }
 0x137   :  { %v2645_v3 = vpop.f32.mrf.mxu3  ;;  %v2477_v4 = vadd.f32 %v2476_v2, %v2308_v1  ;;  %v2309_v6 = vpop.f32.mrf.mxu1  ;;  %v2141_v7 = vadd.f32 %v12097_v0, %v2140_v5 }
 0x139   :  { %v12431_v9 = vadd.f32 %v2645_v3, %v2477_v4  ;;  %v2310_v10 = vadd.f32 %v2309_v6, %v2141_v7  ;;  %v8200_v3 = vor.u32 %v11073_v53, %v8199_v52  ;;  %v8204_v4 = vor.u32 %v11069_v56, %v8201_v57 }
 0x13e   :  { %v2478_v25 = vpop.f32.mrf.mxu2  ;;  %v2143_v31 = vpop.f32.mrf.mxu0 }
 0x13f   :  { %v2647_v26 = vpop.f32.mrf.mxu3  ;;  %v2479_v30 = vadd.f32 %v2478_v25, %v2310_v10  ;;  %v2312_v32 = vpop.f32.mrf.mxu1  ;;  %v2144_v36 = vadd.f32 %v12097_v0, %v2143_v31  ;;  %v8208_v10 = vor.u32 %v11074_v60, %v8207_v58  ;;  %v11081_v31 = vld [vmem:[%s17375_s0 + $0x51c] sm:$0xf0] }
 0x140   :  { %v11225_v60 = vld [vmem:[%s17373_s1 + $0x1a0] sm:$0xff] }
 0x141   :  { %v12458_v37 = vadd.f32 %v2647_v26, %v2479_v30  ;;  %v2313_v38 = vadd.f32 %v2312_v32, %v2144_v36  ;;  %2182 = vmatmul.bf16.gmra.mxu0 %v8168_v28  ;;  %v8231_v30 = vld [vmem:[%s17375_s0 + $0x500] sm:$0xf]  ;;  %v11077_v32 = vld [vmem:[%s17375_s0 + $0x504] sm:$0xf]  ;;  %v11082_v36 = vld [vmem:[%s17375_s0 + $0x524] sm:$0xf0]  ;;  %3101 = vmatpush.bf16.msrb.mxu2 %v11225_v60 }
 0x142   :  { %2351 = vmatmul.bf16.gmra.mxu1 %v8172_v29 }
 0x143   :  { %2520 = vmatmul.bf16.gmra.mxu2 %v8176_v33  ;;  %v8233_v33 = vld [vmem:[%s17375_s0 + $0x520] sm:$0xf0] }
 0x144   :  { %2689 = vmatmul.bf16.gmra.mxu3 %v8180_v34  ;;  %v8239_v34 = vld [vmem:[%s17375_s0 + $0x508] sm:$0xf] }
 0x145   :  { %v8240_v53 = vor.u32 %v11082_v36, %v8239_v34 }
 0x146   :  { %v2481_v39 = vpop.f32.mrf.mxu2  ;;  %v2145_v43 = vpop.f32.mrf.mxu0 }
 0x147   :  { %v2650_v40 = vpop.f32.mrf.mxu3  ;;  %v2482_v42 = vadd.f32 %v2481_v39, %v2313_v38  ;;  %v2314_v45 = vpop.f32.mrf.mxu1  ;;  %v2146_v46 = vadd.f32 %v12097_v0, %v2145_v43  ;;  %v11078_v38 = vld [vmem:[%s17375_s0 + $0x50c] sm:$0xf]  ;;  %v8232_v43 = vor.u32 %v11081_v31, %v8231_v30 }
 0x148   :  { %v8241_v39 = vld [vmem:[%s17375_s0 + $0x528] sm:$0xf0] }
 0x149   :  { %v12461_v49 = vadd.f32 %v2650_v40, %v2482_v42  ;;  %v2315_v51 = vadd.f32 %v2314_v45, %v2146_v46  ;;  %v8236_v45 = vor.u32 %v11077_v32, %v8233_v33  ;;  %v8244_v56 = vor.u32 %v11078_v38, %v8241_v39 }
 0x14e   :  { %v2483_v1 = vpop.f32.mrf.mxu2  ;;  %v2148_v6 = vpop.f32.mrf.mxu0 }
 0x14f   :  { %v2652_v2 = vpop.f32.mrf.mxu3  ;;  %v2484_v5 = vadd.f32 %v2483_v1, %v2315_v51  ;;  %v2317_v7 = vpop.f32.mrf.mxu1  ;;  %v2149_v13 = vadd.f32 %v12097_v0, %v2148_v6  ;;  %v11233_v1 = vld [vmem:[%s17373_s1 + $0x1e0] sm:$0xff] }
 0x150   :  { %3270 = vmatpush.bf16.msrb.mxu3 %v11233_v1  ;;  %v11097_v1 = vld [vmem:[%s17375_s0 + $0x59c] sm:$0xf0] }
 0x151   :  { %v12488_v15 = vadd.f32 %v2652_v2, %v2484_v5  ;;  %v2318_v16 = vadd.f32 %v2317_v7, %v2149_v13  ;;  %2187 = vmatmul.bf16.gmra.mxu0 %v8200_v3  ;;  %v11217_v2 = vld [vmem:[%s17373_s1 + $0x160] sm:$0xff] }
 0x152   :  { %2356 = vmatmul.bf16.gmra.mxu1 %v8204_v4 }
 0x153   :  { %2525 = vmatmul.bf16.gmra.mxu2 %v8208_v10  ;;  %2932 = vmatpush.bf16.msrb.mxu1 %v11217_v2  ;;  %v11093_v2 = vld [vmem:[%s17375_s0 + $0x584] sm:$0xf] }
 0x154   :  { %2694 = vmatmul.bf16.gmra.mxu3 %v8212_v11 }
 0x156   :  { %v2486_v17 = vpop.f32.mrf.mxu2  ;;  %v2150_v23 = vpop.f32.mrf.mxu0 }
 0x157   :  { %v2655_v18 = vpop.f32.mrf.mxu3  ;;  %v2487_v21 = vadd.f32 %v2486_v17, %v2318_v16  ;;  %v2319_v25 = vpop.f32.mrf.mxu1  ;;  %v2151_v26 = vadd.f32 %v12097_v0, %v2150_v23  ;;  %v8263_v16 = vld [vmem:[%s17375_s0 + $0x540] sm:$0xf]  ;;  %v8271_v23 = vld [vmem:[%s17375_s0 + $0x548] sm:$0xf] }
 0x158   :  { %v11089_v17 = vld [vmem:[%s17375_s0 + $0x55c] sm:$0xf0] }
 0x159   :  { %v12491_v28 = vadd.f32 %v2655_v18, %v2487_v21  ;;  %v2320_v29 = vadd.f32 %v2319_v25, %v2151_v26  ;;  %v11085_v18 = vld [vmem:[%s17375_s0 + $0x544] sm:$0xf]  ;;  %v11090_v25 = vld [vmem:[%s17375_s0 + $0x564] sm:$0xf0]  ;;  %v11086_v26 = vld [vmem:[%s17375_s0 + $0x54c] sm:$0xf]  ;;  %v8264_v32 = vor.u32 %v11089_v17, %v8263_v16  ;;  %v8296_v16 = vor.u32 %v11097_v1, %v8295_v62 }
 0x15a   :  { %v8265_v21 = vld [vmem:[%s17375_s0 + $0x560] sm:$0xf0]  ;;  %v8272_v39 = vor.u32 %v11090_v25, %v8271_v23 }
 0x15b   :  { %v8268_v33 = vor.u32 %v11085_v18, %v8265_v21 }
 0x15e   :  { %v2488_v40 = vpop.f32.mrf.mxu2  ;;  %v2153_v51 = vpop.f32.mrf.mxu0 }
 0x15f   :  { %v2657_v42 = vpop.f32.mrf.mxu3  ;;  %v2489_v46 = vadd.f32 %v2488_v40, %v2320_v29  ;;  %v2322_v52 = vpop.f32.mrf.mxu1  ;;  %v2154_v57 = vadd.f32 %v12097_v0, %v2153_v51  ;;  %v8273_v29 = vld [vmem:[%s17375_s0 + $0x568] sm:$0xf0] }
 0x160   :  { %v8276_v40 = vor.u32 %v11086_v26, %v8273_v29 }
 0x161   :  { %v12518_v58 = vadd.f32 %v2657_v42, %v2489_v46  ;;  %v2323_v61 = vadd.f32 %v2322_v52, %v2154_v57  ;;  %2192 = vmatmul.bf16.gmra.mxu0 %v8232_v43 }
 0x162   :  { %2361 = vmatmul.bf16.gmra.mxu1 %v8236_v45 }
 0x163   :  { %2530 = vmatmul.bf16.gmra.mxu2 %v8240_v53 }
 0x164   :  { %2699 = vmatmul.bf16.gmra.mxu3 %v8244_v56 }
 0x166   :  { %v2491_v3 = vpop.f32.mrf.mxu2  ;;  %v2155_v6 = vpop.f32.mrf.mxu0 }
 0x167   :  { %v2660_v4 = vpop.f32.mrf.mxu3  ;;  %v2492_v5 = vadd.f32 %v2491_v3, %v2323_v61  ;;  %v2324_v7 = vpop.f32.mrf.mxu1  ;;  %v2156_v10 = vadd.f32 %v12097_v0, %v2155_v6  ;;  %v8297_v3 = vld [vmem:[%s17375_s0 + $0x5a0] sm:$0xf0]  ;;  %v11094_v6 = vld [vmem:[%s17375_s0 + $0x58c] sm:$0xf] }
 0x168   :  { %v8300_v17 = vor.u32 %v11093_v2, %v8297_v3 }
 0x169   :  { %v12533_v11 = vadd.f32 %v2660_v4, %v2492_v5  ;;  %v2325_v13 = vadd.f32 %v2324_v7, %v2156_v10  ;;  %v8303_v4 = vld [vmem:[%s17375_s0 + $0x588] sm:$0xf]  ;;  %v8305_v7 = vld [vmem:[%s17375_s0 + $0x5a8] sm:$0xf0] }
 0x16a   :  { %v11098_v5 = vld [vmem:[%s17375_s0 + $0x5a4] sm:$0xf0]  ;;  %v8308_v26 = vor.u32 %v11094_v6, %v8305_v7 }
 0x16b   :  { %v8304_v25 = vor.u32 %v11098_v5, %v8303_v4 }
 0x16e   :  { %v2493_v30 = vpop.f32.mrf.mxu2  ;;  %v2158_v36 = vpop.f32.mrf.mxu0 }
 0x16f   :  { %v2662_v31 = vpop.f32.mrf.mxu3  ;;  %v2494_v34 = vadd.f32 %v2493_v30, %v2325_v13  ;;  %v2327_v38 = vpop.f32.mrf.mxu1  ;;  %v2159_v42 = vadd.f32 %v12097_v0, %v2158_v36 }
 0x171   :  { %v12560_v43 = vadd.f32 %v2662_v31, %v2494_v34  ;;  %v2328_v45 = vadd.f32 %v2327_v38, %v2159_v42  ;;  %2197 = vmatmul.bf16.gmra.mxu0 %v8264_v32 }
 0x172   :  { %2366 = vmatmul.bf16.gmra.mxu1 %v8268_v33 }
 0x173   :  { %2535 = vmatmul.bf16.gmra.mxu2 %v8272_v39 }
 0x174   :  { %2704 = vmatmul.bf16.gmra.mxu3 %v8276_v40 }
 0x176   :  { %v2496_v46 = vpop.f32.mrf.mxu2  ;;  %v2160_v53 = vpop.f32.mrf.mxu0 }
 0x177   :  { %v2665_v51 = vpop.f32.mrf.mxu3  ;;  %v2497_v52 = vadd.f32 %v2496_v46, %v2328_v45  ;;  %v2329_v56 = vpop.f32.mrf.mxu1  ;;  %v2161_v57 = vadd.f32 %v12097_v0, %v2160_v53  ;;  %v8327_v45 = vld [vmem:[%s17375_s0 + $0x5c0] sm:$0xf]  ;;  %v11106_v53 = vld [vmem:[%s17375_s0 + $0x5e4] sm:$0xf0] }
 0x178   :  { %v11105_v46 = vld [vmem:[%s17375_s0 + $0x5dc] sm:$0xf0] }
 0x179   :  { %v12563_v60 = vadd.f32 %v2665_v51, %v2497_v52  ;;  %v2330_v61 = vadd.f32 %v2329_v56, %v2161_v57  ;;  %v11101_v51 = vld [vmem:[%s17375_s0 + $0x5c4] sm:$0xf]  ;;  %v11102_v56 = vld [vmem:[%s17375_s0 + $0x5cc] sm:$0xf]  ;;  %v8328_v1 = vor.u32 %v11105_v46, %v8327_v45 }
 0x17a   :  { %v8329_v52 = vld [vmem:[%s17375_s0 + $0x5e0] sm:$0xf0]  ;;  %v8337_v57 = vld [vmem:[%s17375_s0 + $0x5e8] sm:$0xf0] }
 0x17b   :  { %v8332_v2 = vor.u32 %v11101_v51, %v8329_v52  ;;  %v8340_v7 = vor.u32 %v11102_v56, %v8337_v57  ;;  %v11110_v45 = vld [vmem:[%s17375_s0 + $0x60c] sm:$0xf] }
 0x17c   :  { %v8369_v46 = vld [vmem:[%s17375_s0 + $0x628] sm:$0xf0] }
 0x17e   :  { %v2498_v10 = vpop.f32.mrf.mxu2  ;;  %v2163_v21 = vpop.f32.mrf.mxu0 }
 0x17f   :  { %v2667_v13 = vpop.f32.mrf.mxu3  ;;  %v2499_v18 = vadd.f32 %v2498_v10, %v2330_v61  ;;  %v2332_v23 = vpop.f32.mrf.mxu1  ;;  %v2164_v29 = vadd.f32 %v12097_v0, %v2163_v21  ;;  %v12622_v10 = vld [vmem:[%s17374_s2] ss:$0 sm:$0xff] }
 0x181   :  { %v12590_v30 = vadd.f32 %v2667_v13, %v2499_v18  ;;  %v2333_v31 = vadd.f32 %v2332_v23, %v2164_v29  ;;  %2202 = vmatmul.bf16.gmra.mxu0 %v8296_v16 }
 0x182   :  { %2371 = vmatmul.bf16.gmra.mxu1 %v8300_v17 }
 0x183   :  { %2540 = vmatmul.bf16.gmra.mxu2 %v8304_v25 }
 0x184   :  { %2709 = vmatmul.bf16.gmra.mxu3 %v8308_v26 }
 0x186   :  { %v2501_v32 = vpop.f32.mrf.mxu2  ;;  %v2165_v36 = vpop.f32.mrf.mxu0 }
 0x187   :  { %v2670_v33 = vpop.f32.mrf.mxu3  ;;  %v2502_v34 = vadd.f32 %v2501_v32, %v2333_v31  ;;  %v2334_v38 = vpop.f32.mrf.mxu1  ;;  %v2166_v39 = vadd.f32 %v12097_v0, %v2165_v36  ;;  %v8335_v0 = vld [vmem:[%s17375_s0 + $0x5c8] sm:$0xf]  ;;  %v11109_v36 = vld [vmem:[%s17375_s0 + $0x604] sm:$0xf] }
 0x188   :  { %v8336_v6 = vor.u32 %v11106_v53, %v8335_v0 }
 0x189   :  { %v12593_v40 = vadd.f32 %v2670_v33, %v2502_v34  ;;  %v2335_v42 = vadd.f32 %v2334_v38, %v2166_v39  ;;  %v8359_v33 = vld [vmem:[%s17375_s0 + $0x600] sm:$0xf]  ;;  %v8361_v38 = vld [vmem:[%s17375_s0 + $0x620] sm:$0xf0]  ;;  %v8367_v39 = vld [vmem:[%s17375_s0 + $0x608] sm:$0xf] }
 0x18a   :  { %v11113_v34 = vld [vmem:[%s17375_s0 + $0x61c] sm:$0xf0]  ;;  %v8364_v53 = vor.u32 %v11109_v36, %v8361_v38  ;;  %v11117_v36 = vld [vmem:[%s17375_s0 + $0x644] sm:$0xf] }
 0x18b   :  { %v8360_v0 = vor.u32 %v11113_v34, %v8359_v33  ;;  %v8391_v33 = vld [vmem:[%s17375_s0 + $0x640] sm:$0xf]  ;;  %v8393_v38 = vld [vmem:[%s17375_s0 + $0x660] sm:$0xf0] }
 0x18c   :  { %v11121_v34 = vld [vmem:[%s17375_s0 + $0x65c] sm:$0xf0] }
 0x18e   :  { %v2503_v61 = vpop.f32.mrf.mxu2  ;;  %v2168_v4 = vpop.f32.mrf.mxu0 }
 0x18f   :  { %v2672_v62 = vpop.f32.mrf.mxu3  ;;  %v2504_v3 = vadd.f32 %v2503_v61, %v2335_v42  ;;  %v2337_v5 = vpop.f32.mrf.mxu1  ;;  %v2169_v13 = vadd.f32 %v12622_v10, %v2168_v4  ;;  %v11114_v42 = vld [vmem:[%s17375_s0 + $0x624] sm:$0xf0]  ;;  %v11224_v4 = vld [vmem:[%s17373_s1 + $0x198] sm:$0xff] }
 0x190   :  { %3102 = vmatpush.bf16.msrb.mxu2 %v11224_v4 }
 0x191   :  { %v12625_v16 = vadd.f32 %v2672_v62, %v2504_v3  ;;  %v2338_v17 = vadd.f32 %v2337_v5, %v2169_v13  ;;  %2207 = vmatmul.bf16.gmra.mxu0 %v8328_v1  ;;  %v8368_v62 = vor.u32 %v11114_v42, %v8367_v39  ;;  %v8372_v1 = vor.u32 %v11110_v45, %v8369_v46  ;;  %v11216_v13 = vld [vmem:[%s17373_s1 + $0x158] sm:$0xff]  ;;  %v8399_v39 = vld [vmem:[%s17375_s0 + $0x648] sm:$0xf]  ;;  %v11118_v45 = vld [vmem:[%s17375_s0 + $0x64c] sm:$0xf] }
 0x192   :  { %2376 = vmatmul.bf16.gmra.mxu1 %v8332_v2  ;;  %v11122_v42 = vld [vmem:[%s17375_s0 + $0x664] sm:$0xf0]  ;;  %v8401_v46 = vld [vmem:[%s17375_s0 + $0x668] sm:$0xf0] }
 0x193   :  { %2545 = vmatmul.bf16.gmra.mxu2 %v8336_v6  ;;  %v11208_v6 = vld [vmem:[%s17373_s1 + $0x118] sm:$0xff]  ;;  %2933 = vmatpush.bf16.msrb.mxu1 %v11216_v13 }
 0x194   :  { %2714 = vmatmul.bf16.gmra.mxu3 %v8340_v7  ;;  %v11232_v7 = vld [vmem:[%s17373_s1 + $0x1d8] sm:$0xff]  ;;  %2764 = vmatpush.bf16.msrb.mxu0 %v11208_v6 }
 0x195   :  { %3271 = vmatpush.bf16.msrb.mxu3 %v11232_v7 }
 0x196   :  { %v2506_v18 = vpop.f32.mrf.mxu2  ;;  %v2170_v25 = vpop.f32.mrf.mxu0 }
 0x197   :  { %v2675_v21 = vpop.f32.mrf.mxu3  ;;  %v2507_v23 = vadd.f32 %v2506_v18, %v2338_v17  ;;  %v2339_v26 = vpop.f32.mrf.mxu1  ;;  %v2171_v29 = vadd.f32 %v12622_v10, %v2170_v25 }
 0x199   :  { %v12628_v31 = vadd.f32 %v2675_v21, %v2507_v23  ;;  %v2340_v32 = vadd.f32 %v2339_v26, %v2171_v29 }
 0x19e   :  { %v2508_v51 = vpop.f32.mrf.mxu2  ;;  %v2173_v57 = vpop.f32.mrf.mxu0 }
 0x19f   :  { %v2677_v52 = vpop.f32.mrf.mxu3  ;;  %v2509_v56 = vadd.f32 %v2508_v51, %v2340_v32  ;;  %v2342_v61 = vpop.f32.mrf.mxu1  ;;  %v2174_v2 = vadd.f32 %v12622_v10, %v2173_v57 }
 0x1a1   :  { %v12655_v3 = vadd.f32 %v2677_v52, %v2509_v56  ;;  %v2343_v5 = vadd.f32 %v2342_v61, %v2174_v2  ;;  %2212 = vmatmul.bf16.gmra.mxu0 %v8360_v0  ;;  %v8392_v0 = vor.u32 %v11121_v34, %v8391_v33  ;;  %v11125_v33 = vld [vmem:[%s17375_s0 + $0x684] sm:$0xf] }
 0x1a2   :  { %2381 = vmatmul.bf16.gmra.mxu1 %v8364_v53  ;;  %v8396_v53 = vor.u32 %v11117_v36, %v8393_v38  ;;  %v8425_v34 = vld [vmem:[%s17375_s0 + $0x6a0] sm:$0xf0]  ;;  %v8431_v36 = vld [vmem:[%s17375_s0 + $0x688] sm:$0xf] }
 0x1a3   :  { %2550 = vmatmul.bf16.gmra.mxu2 %v8368_v62  ;;  %v8400_v62 = vor.u32 %v11122_v42, %v8399_v39  ;;  %v11130_v38 = vld [vmem:[%s17375_s0 + $0x6a4] sm:$0xf0]  ;;  %v11126_v39 = vld [vmem:[%s17375_s0 + $0x68c] sm:$0xf] }
 0x1a4   :  { %2719 = vmatmul.bf16.gmra.mxu3 %v8372_v1  ;;  %v8404_v1 = vor.u32 %v11118_v45, %v8401_v46  ;;  %v8433_v42 = vld [vmem:[%s17375_s0 + $0x6a8] sm:$0xf0] }
 0x1a6   :  { %v2511_v17 = vpop.f32.mrf.mxu2  ;;  %v2175_v23 = vpop.f32.mrf.mxu0 }
 0x1a7   :  { %v2680_v18 = vpop.f32.mrf.mxu3  ;;  %v2512_v21 = vadd.f32 %v2511_v17, %v2343_v5  ;;  %v2344_v25 = vpop.f32.mrf.mxu1  ;;  %v2176_v26 = vadd.f32 %v12622_v10, %v2175_v23 }
 0x1a9   :  { %v12670_v29 = vadd.f32 %v2680_v18, %v2512_v21  ;;  %v2345_v32 = vadd.f32 %v2344_v25, %v2176_v26  ;;  %v8423_v26 = vld [vmem:[%s17375_s0 + $0x680] sm:$0xf] }
 0x1ae   :  { %v2513_v51 = vpop.f32.mrf.mxu2  ;;  %v2178_v57 = vpop.f32.mrf.mxu0 }
 0x1af   :  { %v2682_v52 = vpop.f32.mrf.mxu3  ;;  %v2514_v56 = vadd.f32 %v2513_v51, %v2345_v32  ;;  %v2347_v61 = vpop.f32.mrf.mxu1  ;;  %v2179_v2 = vadd.f32 %v12622_v10, %v2178_v57  ;;  %v11129_v32 = vld [vmem:[%s17375_s0 + $0x69c] sm:$0xf0]  ;;  %v8432_v57 = vor.u32 %v11130_v38, %v8431_v36  ;;  %v8463_v36 = vld [vmem:[%s17375_s0 + $0x6c8] sm:$0xf] }
 0x1b0   :  { %v8424_v51 = vor.u32 %v11129_v32, %v8423_v26  ;;  %v8455_v26 = vld [vmem:[%s17375_s0 + $0x6c0] sm:$0xf]  ;;  %v11138_v38 = vld [vmem:[%s17375_s0 + $0x6e4] sm:$0xf0] }
 0x1b1   :  { %v12697_v4 = vadd.f32 %v2682_v52, %v2514_v56  ;;  %v2348_v5 = vadd.f32 %v2347_v61, %v2179_v2  ;;  %2217 = vmatmul.bf16.gmra.mxu0 %v8392_v0  ;;  %v8428_v52 = vor.u32 %v11125_v33, %v8425_v34  ;;  %v8436_v61 = vor.u32 %v11126_v39, %v8433_v42  ;;  %v11137_v32 = vld [vmem:[%s17375_s0 + $0x6dc] sm:$0xf0]  ;;  %v11133_v33 = vld [vmem:[%s17375_s0 + $0x6c4] sm:$0xf]  ;;  %v11134_v39 = vld [vmem:[%s17375_s0 + $0x6cc] sm:$0xf] }
 0x1b2   :  { %2386 = vmatmul.bf16.gmra.mxu1 %v8396_v53  ;;  %v8457_v34 = vld [vmem:[%s17375_s0 + $0x6e0] sm:$0xf0]  ;;  %v8465_v42 = vld [vmem:[%s17375_s0 + $0x6e8] sm:$0xf0] }
 0x1b3   :  { %2555 = vmatmul.bf16.gmra.mxu2 %v8400_v62 }
 0x1b4   :  { %2724 = vmatmul.bf16.gmra.mxu3 %v8404_v1 }
 0x1b6   :  { %v2516_v6 = vpop.f32.mrf.mxu2  ;;  %v2180_v17 = vpop.f32.mrf.mxu0 }
 0x1b7   :  { %v2685_v7 = vpop.f32.mrf.mxu3  ;;  %v2517_v13 = vadd.f32 %v2516_v6, %v2348_v5  ;;  %v2349_v18 = vpop.f32.mrf.mxu1  ;;  %v2181_v21 = vadd.f32 %v12622_v10, %v2180_v17 }
 0x1b9   :  { %v12700_v23 = vadd.f32 %v2685_v7, %v2517_v13  ;;  %v2350_v25 = vadd.f32 %v2349_v18, %v2181_v21 }
 0x1be   :  { %v2518_v45 = vpop.f32.mrf.mxu2  ;;  %v2183_v53 = vpop.f32.mrf.mxu0 }
 0x1bf   :  { %v2687_v46 = vpop.f32.mrf.mxu3  ;;  %v2519_v0 = vadd.f32 %v2518_v45, %v2350_v25  ;;  %v2352_v56 = vpop.f32.mrf.mxu1  ;;  %v2184_v62 = vadd.f32 %v12622_v10, %v2183_v53 }
 0x1c1   :  { %v12727_v1 = vadd.f32 %v2687_v46, %v2519_v0  ;;  %v2353_v2 = vadd.f32 %v2352_v56, %v2184_v62  ;;  %2222 = vmatmul.bf16.gmra.mxu0 %v8424_v51  ;;  %v8456_v51 = vor.u32 %v11137_v32, %v8455_v26 }
 0x1c2   :  { %2391 = vmatmul.bf16.gmra.mxu1 %v8428_v52  ;;  %v8460_v52 = vor.u32 %v11133_v33, %v8457_v34  ;;  %v8487_v33 = vld [vmem:[%s17375_s0 + $0x700] sm:$0xf] }
 0x1c3   :  { %2560 = vmatmul.bf16.gmra.mxu2 %v8432_v57  ;;  %v8464_v57 = vor.u32 %v11138_v38, %v8463_v36  ;;  %v11145_v34 = vld [vmem:[%s17375_s0 + $0x71c] sm:$0xf0]  ;;  %v11141_v36 = vld [vmem:[%s17375_s0 + $0x704] sm:$0xf] }
 0x1c4   :  { %2729 = vmatmul.bf16.gmra.mxu3 %v8436_v61  ;;  %v8468_v61 = vor.u32 %v11134_v39, %v8465_v42  ;;  %v8489_v38 = vld [vmem:[%s17375_s0 + $0x720] sm:$0xf0]  ;;  %v8495_v39 = vld [vmem:[%s17375_s0 + $0x708] sm:$0xf] }
 0x1c5   :  { %v11146_v42 = vld [vmem:[%s17375_s0 + $0x724] sm:$0xf0] }
 0x1c6   :  { %v2521_v5 = vpop.f32.mrf.mxu2  ;;  %v2185_v13 = vpop.f32.mrf.mxu0 }
 0x1c7   :  { %v2690_v6 = vpop.f32.mrf.mxu3  ;;  %v2522_v7 = vadd.f32 %v2521_v5, %v2353_v2  ;;  %v2354_v17 = vpop.f32.mrf.mxu1  ;;  %v2186_v18 = vadd.f32 %v12622_v10, %v2185_v13 }
 0x1c9   :  { %v12730_v21 = vadd.f32 %v2690_v6, %v2522_v7  ;;  %v2355_v25 = vadd.f32 %v2354_v17, %v2186_v18 }
 0x1ce   :  { %v2523_v45 = vpop.f32.mrf.mxu2  ;;  %v2188_v53 = vpop.f32.mrf.mxu0 }
 0x1cf   :  { %v2692_v46 = vpop.f32.mrf.mxu3  ;;  %v2524_v0 = vadd.f32 %v2523_v45, %v2355_v25  ;;  %v2357_v56 = vpop.f32.mrf.mxu1  ;;  %v2189_v62 = vadd.f32 %v12622_v10, %v2188_v53  ;;  %v11142_v45 = vld [vmem:[%s17375_s0 + $0x70c] sm:$0xf]  ;;  %v8492_v53 = vor.u32 %v11141_v36, %v8489_v38 }
 0x1d1   :  { %v12757_v2 = vadd.f32 %v2692_v46, %v2524_v0  ;;  %v2358_v5 = vadd.f32 %v2357_v56, %v2189_v62  ;;  %2227 = vmatmul.bf16.gmra.mxu0 %v8456_v51  ;;  %v8497_v46 = vld [vmem:[%s17375_s0 + $0x728] sm:$0xf0]  ;;  %v8488_v0 = vor.u32 %v11145_v34, %v8487_v33  ;;  %v8496_v62 = vor.u32 %v11146_v42, %v8495_v39 }
 0x1d2   :  { %2396 = vmatmul.bf16.gmra.mxu1 %v8460_v52 }
 0x1d3   :  { %17384 = vst [vmem:[#allocation2_spill] sm:$0xff] %v12757_v2  ;;  %2565 = vmatmul.bf16.gmra.mxu2 %v8464_v57 }
 0x1d4   :  { %2734 = vmatmul.bf16.gmra.mxu3 %v8468_v61 }
 0x1d6   :  { %v2526_v6 = vpop.f32.mrf.mxu2  ;;  %v2190_v17 = vpop.f32.mrf.mxu0 }
 0x1d7   :  { %v2695_v7 = vpop.f32.mrf.mxu3  ;;  %v2527_v13 = vadd.f32 %v2526_v6, %v2358_v5  ;;  %v2359_v18 = vpop.f32.mrf.mxu1  ;;  %v2191_v25 = vadd.f32 %v12622_v10, %v2190_v17  ;;  %v8500_v5 = vor.u32 %v11142_v45, %v8497_v46 }
 0x1d9   :  { %v12760_v26 = vadd.f32 %v2695_v7, %v2527_v13  ;;  %v2360_v32 = vadd.f32 %v2359_v18, %v2191_v25  ;;  %v11223_v13 = vld [vmem:[%s17373_s1 + $0x190] sm:$0xff] }
 0x1da   :  { %v11207_v18 = vld [vmem:[%s17373_s1 + $0x110] sm:$0xff]  ;;  %3103 = vmatpush.bf16.msrb.mxu2 %v11223_v13 }
 0x1db   :  { %17385 = vst [vmem:[#allocation3_spill] sm:$0xff] %v12760_v26  ;;  %v11231_v25 = vld [vmem:[%s17373_s1 + $0x1d0] sm:$0xff]  ;;  %2765 = vmatpush.bf16.msrb.mxu0 %v11207_v18 }
 0x1dc   :  { %3272 = vmatpush.bf16.msrb.mxu3 %v11231_v25 }
 0x1de   :  { %v2528_v51 = vpop.f32.mrf.mxu2  ;;  %v2193_v57 = vpop.f32.mrf.mxu0 }
 0x1df   :  { %v2697_v52 = vpop.f32.mrf.mxu3  ;;  %v2529_v56 = vadd.f32 %v2528_v51, %v2360_v32  ;;  %v2362_v61 = vpop.f32.mrf.mxu1  ;;  %v2194_v6 = vadd.f32 %v12622_v10, %v2193_v57  ;;  %v11215_v32 = vld [vmem:[%s17373_s1 + $0x150] sm:$0xff]  ;;  %v8519_v51 = vld [vmem:[%s17375_s0 + $0x740] sm:$0xf]  ;;  %v11154_v57 = vld [vmem:[%s17375_s0 + $0x764] sm:$0xf0] }
 0x1e0   :  { %2934 = vmatpush.bf16.msrb.mxu1 %v11215_v32 }
 0x1e1   :  { %v12787_v7 = vadd.f32 %v2697_v52, %v2529_v56  ;;  %v2363_v17 = vadd.f32 %v2362_v61, %v2194_v6  ;;  %2232 = vmatmul.bf16.gmra.mxu0 %v8488_v0  ;;  %v11153_v52 = vld [vmem:[%s17375_s0 + $0x75c] sm:$0xf0]  ;;  %v11149_v0 = vld [vmem:[%s17375_s0 + $0x744] sm:$0xf]  ;;  %v8527_v56 = vld [vmem:[%s17375_s0 + $0x748] sm:$0xf] }
 0x1e2   :  { %2401 = vmatmul.bf16.gmra.mxu1 %v8492_v53  ;;  %v8521_v53 = vld [vmem:[%s17375_s0 + $0x760] sm:$0xf0]  ;;  %v11150_v61 = vld [vmem:[%s17375_s0 + $0x74c] sm:$0xf]  ;;  %v8520_v13 = vor.u32 %v11153_v52, %v8519_v51 }
 0x1e3   :  { %17386 = vst [vmem:[#allocation4_spill] sm:$0xff] %v12787_v7  ;;  %2570 = vmatmul.bf16.gmra.mxu2 %v8496_v62  ;;  %v8529_v62 = vld [vmem:[%s17375_s0 + $0x768] sm:$0xf0] }
 0x1e4   :  { %2739 = vmatmul.bf16.gmra.mxu3 %v8500_v5 }
 0x1e6   :  { %v2531_v33 = vpop.f32.mrf.mxu2  ;;  %v2195_v38 = vpop.f32.mrf.mxu0 }
 0x1e7   :  { %v2700_v34 = vpop.f32.mrf.mxu3  ;;  %v2532_v36 = vadd.f32 %v2531_v33, %v2363_v17  ;;  %v2364_v39 = vpop.f32.mrf.mxu1  ;;  %v2196_v42 = vadd.f32 %v12622_v10, %v2195_v38  ;;  %v8524_v17 = vor.u32 %v11149_v0, %v8521_v53  ;;  %v8528_v33 = vor.u32 %v11154_v57, %v8527_v56  ;;  %v8551_v0 = vld [vmem:[%s17375_s0 + $0x780] sm:$0xf]  ;;  %v11157_v56 = vld [vmem:[%s17375_s0 + $0x784] sm:$0xf] }
 0x1e8   :  { %v11161_v53 = vld [vmem:[%s17375_s0 + $0x79c] sm:$0xf0] }
 0x1e9   :  { %v12802_v45 = vadd.f32 %v2700_v34, %v2532_v36  ;;  %v2365_v46 = vadd.f32 %v2364_v39, %v2196_v42  ;;  %v8532_v34 = vor.u32 %v11150_v61, %v8529_v62  ;;  %v11206_v61 = vld [vmem:[%s17373_s1 + $0x108] sm:$0xff] }
 0x1ea   :  { %v8559_v62 = vld [vmem:[%s17375_s0 + $0x788] sm:$0xf]  ;;  %2766 = vmatpush.bf16.msrb.mxu0 %v11206_v61 }
 0x1eb   :  { %17387 = vst [vmem:[#allocation5_spill] sm:$0xff] %v12802_v45 }
 0x1ee   :  { %v2533_v5 = vpop.f32.mrf.mxu2  ;;  %v2198_v25 = vpop.f32.mrf.mxu0 }
 0x1ef   :  { %v2702_v6 = vpop.f32.mrf.mxu3  ;;  %v2534_v18 = vadd.f32 %v2533_v5, %v2365_v46  ;;  %v2367_v32 = vpop.f32.mrf.mxu1  ;;  %v2199_v36 = vadd.f32 %v12622_v10, %v2198_v25  ;;  %v11230_v5 = vld [vmem:[%s17373_s1 + $0x1c8] sm:$0xff] }
 0x1f0   :  { %3273 = vmatpush.bf16.msrb.mxu3 %v11230_v5 }
 0x1f1   :  { %v12829_v38 = vadd.f32 %v2702_v6, %v2534_v18  ;;  %v2368_v39 = vadd.f32 %v2367_v32, %v2199_v36  ;;  %2237 = vmatmul.bf16.gmra.mxu0 %v8520_v13  ;;  %v11162_v6 = vld [vmem:[%s17375_s0 + $0x7a4] sm:$0xf0]  ;;  %v11158_v13 = vld [vmem:[%s17375_s0 + $0x78c] sm:$0xf]  ;;  %v8552_v32 = vor.u32 %v11161_v53, %v8551_v0  ;;  %v11213_v36 = vld [vmem:[%s17373_s1 + $0x140] sm:$0xff] }
 0x1f2   :  { %2406 = vmatmul.bf16.gmra.mxu1 %v8524_v17  ;;  %v8561_v17 = vld [vmem:[%s17375_s0 + $0x7a8] sm:$0xf0]  ;;  %v8560_v61 = vor.u32 %v11162_v6, %v8559_v62  ;;  %v11229_v0 = vld [vmem:[%s17373_s1 + $0x1c0] sm:$0xff] }
 0x1f3   :  { %17388 = vst [vmem:[#allocation6_spill] sm:$0xff] %v12829_v38  ;;  %2575 = vmatmul.bf16.gmra.mxu2 %v8528_v33 }
 0x1f4   :  { %2744 = vmatmul.bf16.gmra.mxu3 %v8532_v34  ;;  %v11205_v34 = vld [vmem:[%s17373_s1 + $0x100] sm:$0xff] }
 0x1f5   :  { %2767 = vmatpush.bf16.msrb.mxu0 %v11205_v34  ;;  %3274 = vmatpush.bf16.msrb.mxu3 %v11229_v0  ;;  %v8585_v34 = vld [vmem:[%s17375_s0 + $0x7e0] sm:$0xf0] }
 0x1f6   :  { %v2536_v42 = vpop.f32.mrf.mxu2  ;;  %v2200_v26 = vpop.f32.mrf.mxu0 }
 0x1f7   :  { %v2705_v45 = vpop.f32.mrf.mxu3  ;;  %v2537_v7 = vadd.f32 %v2536_v42, %v2368_v39  ;;  %v2369_v51 = vpop.f32.mrf.mxu1  ;;  %v2201_v46 = vadd.f32 %v12622_v10, %v2200_v26  ;;  %v11214_v26 = vld [vmem:[%s17373_s1 + $0x148] sm:$0xff]  ;;  %v11221_v39 = vld [vmem:[%s17373_s1 + $0x180] sm:$0xff] }
 0x1f8   :  { %2935 = vmatpush.bf16.msrb.mxu1 %v11214_v26  ;;  %v8564_v26 = vor.u32 %v11158_v13, %v8561_v17 }
 0x1f9   :  { %v12832_v52 = vadd.f32 %v2705_v45, %v2537_v7  ;;  %v2370_v57 = vadd.f32 %v2369_v51, %v2201_v46  ;;  %v11222_v7 = vld [vmem:[%s17373_s1 + $0x188] sm:$0xff]  ;;  %v8553_v45 = vld [vmem:[%s17375_s0 + $0x7a0] sm:$0xf0] }
 0x1fa   :  { %3104 = vmatpush.bf16.msrb.mxu2 %v11222_v7  ;;  %v8556_v33 = vor.u32 %v11157_v56, %v8553_v45 }
 0x1fb   :  { %17389 = vst [vmem:[#allocation7_spill] sm:$0xff] %v12832_v52 }
 0x1fc   :  { %2936 = vmatpush.bf16.msrb.mxu1 %v11213_v36  ;;  %v8591_v36 = vld [vmem:[%s17375_s0 + $0x7c8] sm:$0xf] }
 0x1fe   :  { %v2538_v18 = vpop.f32.mrf.mxu2  ;;  %v2203_v51 = vpop.f32.mrf.mxu0  ;;  %3105 = vmatpush.bf16.msrb.mxu2 %v11221_v39  ;;  %v11170_v39 = vld [vmem:[%s17375_s0 + $0x7e4] sm:$0xf0] }
 0x1ff   :  { %v2707_v25 = vpop.f32.mrf.mxu3  ;;  %v2539_v42 = vadd.f32 %v2538_v18, %v2370_v57  ;;  %v2372_v46 = vpop.f32.mrf.mxu1  ;;  %v2204_v53 = vadd.f32 %v12622_v10, %v2203_v51  ;;  %v8593_v51 = vld [vmem:[%s17375_s0 + $0x7e8] sm:$0xf0] }
 0x201   :  { %v12883_v56 = vadd.f32 %v2707_v25, %v2539_v42  ;;  %v2373_v7 = vadd.f32 %v2372_v46, %v2204_v53  ;;  %2242 = vmatmul.bf16.gmra.mxu0 %v8552_v32  ;;  %v8583_v25 = vld [vmem:[%s17375_s0 + $0x7c0] sm:$0xf]  ;;  %v11166_v42 = vld [vmem:[%s17375_s0 + $0x7cc] sm:$0xf] }
 0x202   :  { %2411 = vmatmul.bf16.gmra.mxu1 %v8556_v33  ;;  %v11169_v32 = vld [vmem:[%s17375_s0 + $0x7dc] sm:$0xf0]  ;;  %v11165_v33 = vld [vmem:[%s17375_s0 + $0x7c4] sm:$0xf] }
 0x203   :  { %17390 = vst [vmem:[#allocation8_spill] sm:$0xff] %v12883_v56  ;;  %2580 = vmatmul.bf16.gmra.mxu2 %v8560_v61  ;;  %v8588_v0 = vor.u32 %v11165_v33, %v8585_v34  ;;  %v7607_v34 = vld [vmem:[%s17375_s0 + $0x10] sm:$0xf] }
 0x204   :  { %2749 = vmatmul.bf16.gmra.mxu3 %v8564_v26  ;;  %v8584_v26 = vor.u32 %v11169_v32, %v8583_v25 }
 0x206   :  { %v2541_v57 = vpop.f32.mrf.mxu2  ;;  %v2205_v5 = vpop.f32.mrf.mxu0 }
 0x207   :  { %v2710_v45 = vpop.f32.mrf.mxu3  ;;  %v2542_v62 = vadd.f32 %v2541_v57, %v2373_v7  ;;  %v2374_v6 = vpop.f32.mrf.mxu1  ;;  %v2206_v13 = vadd.f32 %v12622_v10, %v2205_v5 }
 0x209   :  { %v12886_v17 = vadd.f32 %v2710_v45, %v2542_v62  ;;  %v2375_v18 = vadd.f32 %v2374_v6, %v2206_v13  ;;  %v8592_v45 = vor.u32 %v11170_v39, %v8591_v36  ;;  %v8596_v62 = vor.u32 %v11166_v42, %v8593_v51  ;;  %v10923_v36 = vld [vmem:[%s17375_s0 + $0x2c] sm:$0xf0]  ;;  %v10919_v39 = vld [vmem:[%s17375_s0 + $0x14] sm:$0xf]  ;;  %v7617_v42 = vld [vmem:[%s17375_s0 + $0x38] sm:$0xf0] }
 0x20b   :  { %17391 = vst [vmem:[#allocation9_spill] sm:$0xff] %v12886_v17 }
 0x20e   :  { %v2543_v46 = vpop.f32.mrf.mxu2  ;;  %v2208_v7 = vpop.f32.mrf.mxu0 }
 0x20f   :  { %v2712_v61 = vpop.f32.mrf.mxu3  ;;  %v2544_v53 = vadd.f32 %v2543_v46, %v2375_v18  ;;  %v2377_v57 = vpop.f32.mrf.mxu1  ;;  %v2209_v5 = vadd.f32 %v12622_v10, %v2208_v7 }
 0x211   :  { %v12913_v6 = vadd.f32 %v2712_v61, %v2544_v53  ;;  %v2378_v13 = vadd.f32 %v2377_v57, %v2209_v5  ;;  %2247 = vmatmul.bf16.gmra.mxu0 %v8584_v26  ;;  %v7608_v61 = vor.u32 %v10923_v36, %v7607_v34 }
 0x212   :  { %2416 = vmatmul.bf16.gmra.mxu1 %v8588_v0 }
 0x213   :  { %17392 = vst [vmem:[#allocation10_spill] sm:$0xff] %v12913_v6  ;;  %2585 = vmatmul.bf16.gmra.mxu2 %v8592_v45 }
 0x214   :  { %2754 = vmatmul.bf16.gmra.mxu3 %v8596_v62 }
 0x216   :  { %v2546_v17 = vpop.f32.mrf.mxu2  ;;  %v2210_v38 = vpop.f32.mrf.mxu0 }
 0x217   :  { %v2715_v56 = vpop.f32.mrf.mxu3  ;;  %v2547_v52 = vadd.f32 %v2546_v17, %v2378_v13  ;;  %v2379_v25 = vpop.f32.mrf.mxu1  ;;  %v2211_v18 = vadd.f32 %v12622_v10, %v2210_v38  ;;  %v7609_v17 = vld [vmem:[%s17375_s0 + $0x30] sm:$0xf0]  ;;  %v7615_v38 = vld [vmem:[%s17375_s0 + $0x18] sm:$0xf] }
 0x218   :  { %v7612_v26 = vor.u32 %v10919_v39, %v7609_v17  ;;  %v7639_v17 = vld [vmem:[%s17375_s0 + $0x50] sm:$0xf] }
 0x219   :  { %v12916_v32 = vadd.f32 %v2715_v56, %v2547_v52  ;;  %v2380_v33 = vadd.f32 %v2379_v25, %v2211_v18  ;;  %v10924_v52 = vld [vmem:[%s17375_s0 + $0x34] sm:$0xf0]  ;;  %v10920_v56 = vld [vmem:[%s17375_s0 + $0x1c] sm:$0xf] }
 0x21a   :  { %v7616_v57 = vor.u32 %v10924_v52, %v7615_v38  ;;  %v7620_v45 = vor.u32 %v10920_v56, %v7617_v42  ;;  %v10931_v38 = vld [vmem:[%s17375_s0 + $0x6c] sm:$0xf0]  ;;  %v10927_v52 = vld [vmem:[%s17375_s0 + $0x54] sm:$0xf]  ;;  %v10928_v42 = vld [vmem:[%s17375_s0 + $0x5c] sm:$0xf] }
 0x21b   :  { %17393 = vst [vmem:[#allocation11_spill] sm:$0xff] %v12916_v32  ;;  %v7641_v56 = vld [vmem:[%s17375_s0 + $0x70] sm:$0xf0] }
 0x21e   :  { %v2548_v51 = vpop.f32.mrf.mxu2  ;;  %v2213_v53 = vpop.f32.mrf.mxu0 }
 0x21f   :  { %v2717_v46 = vpop.f32.mrf.mxu3  ;;  %v2549_v0 = vadd.f32 %v2548_v51, %v2380_v33  ;;  %v2382_v7 = vpop.f32.mrf.mxu1  ;;  %v2214_v62 = vadd.f32 %v12622_v10, %v2213_v53  ;;  %v7649_v51 = vld [vmem:[%s17375_s0 + $0x78] sm:$0xf0] }
 0x221   :  { %v12943_v5 = vadd.f32 %v2717_v46, %v2549_v0  ;;  %v2383_v13 = vadd.f32 %v2382_v7, %v2214_v62  ;;  %2768 = vmatmul.bf16.vlgmr.msrb.gmra.mxu0 %v7608_v61  ;;  %v7644_v0 = vor.u32 %v10927_v52, %v7641_v56  ;;  %v7652_v62 = vor.u32 %v10928_v42, %v7649_v51  ;;  %v7671_v56 = vld [vmem:[%s17375_s0 + $0x90] sm:$0xf]  ;;  %v7673_v42 = vld [vmem:[%s17375_s0 + $0xb0] sm:$0xf0]  ;;  %v10936_v51 = vld [vmem:[%s17375_s0 + $0x9c] sm:$0xf] }
 0x222   :  { %2937 = vmatmul.bf16.vlgmr.msrb.gmra.mxu1 %v7612_v26  ;;  %v7640_v26 = vor.u32 %v10931_v38, %v7639_v17 }
 0x223   :  { %17394 = vst [vmem:[#allocation12_spill] sm:$0xff] %v12943_v5  ;;  %3106 = vmatmul.bf16.vlgmr.msrb.gmra.mxu2 %v7616_v57 }
 0x224   :  { %3275 = vmatmul.bf16.vlgmr.msrb.gmra.mxu3 %v7620_v45 }
 0x226   :  { %v2551_v25 = vpop.f32.mrf.mxu2  ;;  %v2215_v6 = vpop.f32.mrf.mxu0 }
 0x227   :  { %v2720_v18 = vpop.f32.mrf.mxu3  ;;  %v2552_v32 = vadd.f32 %v2551_v25, %v2383_v13  ;;  %v2384_v34 = vpop.f32.mrf.mxu1  ;;  %v2216_v33 = vadd.f32 %v12622_v10, %v2215_v6  ;;  %v7647_v6 = vld [vmem:[%s17375_s0 + $0x58] sm:$0xf] }
 0x229   :  { %v12946_v36 = vadd.f32 %v2720_v18, %v2552_v32  ;;  %v2385_v39 = vadd.f32 %v2384_v34, %v2216_v33  ;;  %v10932_v32 = vld [vmem:[%s17375_s0 + $0x74] sm:$0xf0] }
 0x22a   :  { %v7648_v45 = vor.u32 %v10932_v32, %v7647_v6  ;;  %v10939_v6 = vld [vmem:[%s17375_s0 + $0xac] sm:$0xf0]  ;;  %v10935_v32 = vld [vmem:[%s17375_s0 + $0x94] sm:$0xf] }
 0x22b   :  { %17395 = vst [vmem:[#allocation13_spill] sm:$0xff] %v12946_v36 }
 0x22e   :  { %v2553_v46 = vpop.f32.mrf.mxu2  ;;  %v2218_v7 = vpop.f32.mrf.mxu0 }
 0x22f   :  { %v2722_v61 = vpop.f32.mrf.mxu3  ;;  %v2554_v53 = vadd.f32 %v2553_v46, %v2385_v39  ;;  %v2387_v57 = vpop.f32.mrf.mxu1  ;;  %v2219_v13 = vadd.f32 %v12622_v10, %v2218_v7  ;;  %v7681_v46 = vld [vmem:[%s17375_s0 + $0xb8] sm:$0xf0] }
 0x231   :  { %v12973_v25 = vadd.f32 %v2722_v61, %v2554_v53  ;;  %v2388_v18 = vadd.f32 %v2387_v57, %v2219_v13  ;;  %2773 = vmatmul.bf16.gmra.mxu0 %v7640_v26  ;;  %v7676_v53 = vor.u32 %v10935_v32, %v7673_v42  ;;  %v7684_v13 = vor.u32 %v10936_v51, %v7681_v46  ;;  %v7703_v42 = vld [vmem:[%s17375_s0 + $0xd0] sm:$0xf]  ;;  %v7705_v51 = vld [vmem:[%s17375_s0 + $0xf0] sm:$0xf0]  ;;  %v10944_v46 = vld [vmem:[%s17375_s0 + $0xdc] sm:$0xf] }
 0x232   :  { %2942 = vmatmul.bf16.gmra.mxu1 %v7644_v0  ;;  %v7672_v0 = vor.u32 %v10939_v6, %v7671_v56 }
 0x233   :  { %17396 = vst [vmem:[#allocation14_spill] sm:$0xff] %v12973_v25  ;;  %3111 = vmatmul.bf16.gmra.mxu2 %v7648_v45 }
 0x234   :  { %3280 = vmatmul.bf16.gmra.mxu3 %v7652_v62 }
 0x236   :  { %v2556_v34 = vpop.f32.mrf.mxu2  ;;  %v2220_v5 = vpop.f32.mrf.mxu0 }
 0x237   :  { %v2725_v33 = vpop.f32.mrf.mxu3  ;;  %v2557_v36 = vadd.f32 %v2556_v34, %v2388_v18  ;;  %v2389_v17 = vpop.f32.mrf.mxu1  ;;  %v2221_v39 = vadd.f32 %v12622_v10, %v2220_v5  ;;  %v7679_v5 = vld [vmem:[%s17375_s0 + $0x98] sm:$0xf] }
 0x239   :  { %v12976_v38 = vadd.f32 %v2725_v33, %v2557_v36  ;;  %v2390_v52 = vadd.f32 %v2389_v17, %v2221_v39  ;;  %v10940_v36 = vld [vmem:[%s17375_s0 + $0xb4] sm:$0xf0] }
 0x23a   :  { %v7680_v62 = vor.u32 %v10940_v36, %v7679_v5  ;;  %v10947_v5 = vld [vmem:[%s17375_s0 + $0xec] sm:$0xf0]  ;;  %v10943_v36 = vld [vmem:[%s17375_s0 + $0xd4] sm:$0xf] }
 0x23b   :  { %17397 = vst [vmem:[#allocation15_spill] sm:$0xff] %v12976_v38 }
 0x23e   :  { %v2558_v61 = vpop.f32.mrf.mxu2  ;;  %v2223_v57 = vpop.f32.mrf.mxu0 }
 0x23f   :  { %v2727_v26 = vpop.f32.mrf.mxu3  ;;  %v2559_v7 = vadd.f32 %v2558_v61, %v2390_v52  ;;  %v2392_v45 = vpop.f32.mrf.mxu1  ;;  %v2224_v18 = vadd.f32 %v12622_v10, %v2223_v57  ;;  %v7713_v61 = vld [vmem:[%s17375_s0 + $0xf8] sm:$0xf0] }
 0x241   :  { %v13003_v34 = vadd.f32 %v2727_v26, %v2559_v7  ;;  %v2393_v33 = vadd.f32 %v2392_v45, %v2224_v18  ;;  %2778 = vmatmul.bf16.gmra.mxu0 %v7672_v0  ;;  %v7708_v7 = vor.u32 %v10943_v36, %v7705_v51  ;;  %v7716_v18 = vor.u32 %v10944_v46, %v7713_v61  ;;  %v7735_v51 = vld [vmem:[%s17375_s0 + $0x110] sm:$0xf]  ;;  %v7737_v46 = vld [vmem:[%s17375_s0 + $0x130] sm:$0xf0]  ;;  %v10952_v61 = vld [vmem:[%s17375_s0 + $0x11c] sm:$0xf] }
 0x242   :  { %2947 = vmatmul.bf16.gmra.mxu1 %v7676_v53  ;;  %v7704_v53 = vor.u32 %v10947_v5, %v7703_v42 }
 0x243   :  { %17398 = vst [vmem:[#allocation16_spill] sm:$0xff] %v13003_v34  ;;  %3116 = vmatmul.bf16.gmra.mxu2 %v7680_v62 }
 0x244   :  { %3285 = vmatmul.bf16.gmra.mxu3 %v7684_v13 }
 0x246   :  { %v2561_v17 = vpop.f32.mrf.mxu2  ;;  %v2225_v38 = vpop.f32.mrf.mxu0 }
 0x247   :  { %v2730_v39 = vpop.f32.mrf.mxu3  ;;  %v2562_v25 = vadd.f32 %v2561_v17, %v2393_v33  ;;  %v2394_v56 = vpop.f32.mrf.mxu1  ;;  %v2226_v52 = vadd.f32 %v12622_v10, %v2225_v38  ;;  %v10948_v38 = vld [vmem:[%s17375_s0 + $0xf4] sm:$0xf0] }
 0x249   :  { %v13006_v6 = vadd.f32 %v2730_v39, %v2562_v25  ;;  %v2395_v32 = vadd.f32 %v2394_v56, %v2226_v52  ;;  %v7711_v25 = vld [vmem:[%s17375_s0 + $0xd8] sm:$0xf] }
 0x24a   :  { %v7712_v13 = vor.u32 %v10948_v38, %v7711_v25  ;;  %v10955_v25 = vld [vmem:[%s17375_s0 + $0x12c] sm:$0xf0]  ;;  %v10951_v38 = vld [vmem:[%s17375_s0 + $0x114] sm:$0xf] }
 0x24b   :  { %17399 = vst [vmem:[#allocation17_spill] sm:$0xff] %v13006_v6 }
 0x24e   :  { %v2563_v26 = vpop.f32.mrf.mxu2  ;;  %v2228_v45 = vpop.f32.mrf.mxu0 }
 0x24f   :  { %v2732_v0 = vpop.f32.mrf.mxu3  ;;  %v2564_v57 = vadd.f32 %v2563_v26, %v2395_v32  ;;  %v2397_v62 = vpop.f32.mrf.mxu1  ;;  %v2229_v33 = vadd.f32 %v12622_v10, %v2228_v45  ;;  %v7745_v26 = vld [vmem:[%s17375_s0 + $0x138] sm:$0xf0] }
 0x251   :  { %v13033_v17 = vadd.f32 %v2732_v0, %v2564_v57  ;;  %v2398_v39 = vadd.f32 %v2397_v62, %v2229_v33  ;;  %2783 = vmatmul.bf16.gmra.mxu0 %v7704_v53  ;;  %v7740_v57 = vor.u32 %v10951_v38, %v7737_v46  ;;  %v7748_v33 = vor.u32 %v10952_v61, %v7745_v26  ;;  %v7767_v46 = vld [vmem:[%s17375_s0 + $0x150] sm:$0xf]  ;;  %v7769_v61 = vld [vmem:[%s17375_s0 + $0x170] sm:$0xf0]  ;;  %v10960_v26 = vld [vmem:[%s17375_s0 + $0x15c] sm:$0xf] }
 0x252   :  { %2952 = vmatmul.bf16.gmra.mxu1 %v7708_v7  ;;  %v7736_v7 = vor.u32 %v10955_v25, %v7735_v51 }
 0x253   :  { %17400 = vst [vmem:[#allocation18_spill] sm:$0xff] %v13033_v17  ;;  %3121 = vmatmul.bf16.gmra.mxu2 %v7712_v13 }
 0x254   :  { %3290 = vmatmul.bf16.gmra.mxu3 %v7716_v18 }
 0x256   :  { %v2566_v56 = vpop.f32.mrf.mxu2  ;;  %v2230_v6 = vpop.f32.mrf.mxu0 }
 0x257   :  { %v2735_v52 = vpop.f32.mrf.mxu3  ;;  %v2567_v34 = vadd.f32 %v2566_v56, %v2398_v39  ;;  %v2399_v42 = vpop.f32.mrf.mxu1  ;;  %v2231_v32 = vadd.f32 %v12622_v10, %v2230_v6  ;;  %v10956_v6 = vld [vmem:[%s17375_s0 + $0x134] sm:$0xf0] }
 0x259   :  { %v13036_v5 = vadd.f32 %v2735_v52, %v2567_v34  ;;  %v2400_v36 = vadd.f32 %v2399_v42, %v2231_v32  ;;  %v7743_v34 = vld [vmem:[%s17375_s0 + $0x118] sm:$0xf] }
 0x25a   :  { %v7744_v18 = vor.u32 %v10956_v6, %v7743_v34  ;;  %v10963_v34 = vld [vmem:[%s17375_s0 + $0x16c] sm:$0xf0]  ;;  %v10959_v6 = vld [vmem:[%s17375_s0 + $0x154] sm:$0xf] }
 0x25b   :  { %17401 = vst [vmem:[#allocation19_spill] sm:$0xff] %v13036_v5 }
 0x25e   :  { %v2568_v0 = vpop.f32.mrf.mxu2  ;;  %v2233_v62 = vpop.f32.mrf.mxu0 }
 0x25f   :  { %v2737_v53 = vpop.f32.mrf.mxu3  ;;  %v2569_v45 = vadd.f32 %v2568_v0, %v2400_v36  ;;  %v2402_v13 = vpop.f32.mrf.mxu1  ;;  %v2234_v39 = vadd.f32 %v12622_v10, %v2233_v62  ;;  %v7777_v0 = vld [vmem:[%s17375_s0 + $0x178] sm:$0xf0] }
 0x261   :  { %v13063_v56 = vadd.f32 %v2737_v53, %v2569_v45  ;;  %v2403_v52 = vadd.f32 %v2402_v13, %v2234_v39  ;;  %2788 = vmatmul.bf16.gmra.mxu0 %v7736_v7  ;;  %v7772_v45 = vor.u32 %v10959_v6, %v7769_v61  ;;  %v7780_v39 = vor.u32 %v10960_v26, %v7777_v0  ;;  %v7799_v61 = vld [vmem:[%s17375_s0 + $0x190] sm:$0xf]  ;;  %v7801_v26 = vld [vmem:[%s17375_s0 + $0x1b0] sm:$0xf0]  ;;  %v7809_v0 = vld [vmem:[%s17375_s0 + $0x1b8] sm:$0xf0] }
 0x262   :  { %2957 = vmatmul.bf16.gmra.mxu1 %v7740_v57  ;;  %v7768_v57 = vor.u32 %v10963_v34, %v7767_v46 }
 0x263   :  { %17402 = vst [vmem:[#allocation20_spill] sm:$0xff] %v13063_v56  ;;  %3126 = vmatmul.bf16.gmra.mxu2 %v7744_v18 }
 0x264   :  { %3295 = vmatmul.bf16.gmra.mxu3 %v7748_v33 }
 0x266   :  { %v2571_v42 = vpop.f32.mrf.mxu2  ;;  %v2235_v5 = vpop.f32.mrf.mxu0 }
 0x267   :  { %v2740_v32 = vpop.f32.mrf.mxu3  ;;  %v2572_v17 = vadd.f32 %v2571_v42, %v2403_v52  ;;  %v2404_v51 = vpop.f32.mrf.mxu1  ;;  %v2236_v36 = vadd.f32 %v12622_v10, %v2235_v5  ;;  %v10964_v5 = vld [vmem:[%s17375_s0 + $0x174] sm:$0xf0] }
 0x269   :  { %v13066_v25 = vadd.f32 %v2740_v32, %v2572_v17  ;;  %v2405_v38 = vadd.f32 %v2404_v51, %v2236_v36  ;;  %v7775_v17 = vld [vmem:[%s17375_s0 + $0x158] sm:$0xf] }
 0x26a   :  { %v7776_v33 = vor.u32 %v10964_v5, %v7775_v17  ;;  %v10971_v17 = vld [vmem:[%s17375_s0 + $0x1ac] sm:$0xf0]  ;;  %v10967_v5 = vld [vmem:[%s17375_s0 + $0x194] sm:$0xf] }
 0x26b   :  { %17403 = vst [vmem:[#allocation21_spill] sm:$0xff] %v13066_v25 }
 0x26e   :  { %v2573_v53 = vpop.f32.mrf.mxu2  ;;  %v2238_v13 = vpop.f32.mrf.mxu0 }
 0x26f   :  { %v2742_v7 = vpop.f32.mrf.mxu3  ;;  %v2574_v62 = vadd.f32 %v2573_v53, %v2405_v38  ;;  %v2407_v18 = vpop.f32.mrf.mxu1  ;;  %v2239_v52 = vadd.f32 %v12622_v10, %v2238_v13 }
 0x271   :  { %v13093_v42 = vadd.f32 %v2742_v7, %v2574_v62  ;;  %v2408_v32 = vadd.f32 %v2407_v18, %v2239_v52  ;;  %2793 = vmatmul.bf16.gmra.mxu0 %v7768_v57  ;;  %v7800_v57 = vor.u32 %v10971_v17, %v7799_v61  ;;  %v11753_v52 = vld [vmem:[%s17374_s2] ss:$0 sm:$0xff] }
 0x272   :  { %2962 = vmatmul.bf16.gmra.mxu1 %v7772_v45  ;;  %v7804_v45 = vor.u32 %v10967_v5, %v7801_v26 }
 0x273   :  { %17404 = vst [vmem:[#allocation22_spill] sm:$0xff] %v13093_v42  ;;  %3131 = vmatmul.bf16.gmra.mxu2 %v7776_v33 }
 0x274   :  { %3300 = vmatmul.bf16.gmra.mxu3 %v7780_v39 }
 0x276   :  { %v2576_v51 = vpop.f32.mrf.mxu2  ;;  %v2240_v25 = vpop.f32.mrf.mxu0 }
 0x277   :  { %v2745_v36 = vpop.f32.mrf.mxu3  ;;  %v2577_v56 = vadd.f32 %v2576_v51, %v2408_v32  ;;  %v2409_v46 = vpop.f32.mrf.mxu1  ;;  %v2241_v38 = vadd.f32 %v12622_v10, %v2240_v25  ;;  %v7807_v10 = vld [vmem:[%s17375_s0 + $0x198] sm:$0xf]  ;;  %v10968_v25 = vld [vmem:[%s17375_s0 + $0x19c] sm:$0xf] }
 0x278   :  { %v7812_v39 = vor.u32 %v10968_v25, %v7809_v0  ;;  %v10979_v25 = vld [vmem:[%s17375_s0 + $0x1ec] sm:$0xf0]  ;;  %v10975_v0 = vld [vmem:[%s17375_s0 + $0x1d4] sm:$0xf] }
 0x279   :  { %v13096_v34 = vadd.f32 %v2745_v36, %v2577_v56  ;;  %v2410_v6 = vadd.f32 %v2409_v46, %v2241_v38  ;;  %v10972_v56 = vld [vmem:[%s17375_s0 + $0x1b4] sm:$0xf0] }
 0x27a   :  { %v7808_v33 = vor.u32 %v10972_v56, %v7807_v10  ;;  %v7831_v56 = vld [vmem:[%s17375_s0 + $0x1d0] sm:$0xf] }
 0x27b   :  { %17405 = vst [vmem:[#allocation23_spill] sm:$0xff] %v13096_v34 }
 0x27e   :  { %v2578_v53 = vpop.f32.mrf.mxu2  ;;  %v2243_v13 = vpop.f32.mrf.mxu0 }
 0x27f   :  { %v2747_v7 = vpop.f32.mrf.mxu3  ;;  %v2579_v62 = vadd.f32 %v2578_v53, %v2410_v6  ;;  %v2412_v18 = vpop.f32.mrf.mxu1  ;;  %v2244_v32 = vadd.f32 %v11753_v52, %v2243_v13  ;;  %v7833_v53 = vld [vmem:[%s17375_s0 + $0x1f0] sm:$0xf0] }
 0x281   :  { %v13125_v51 = vadd.f32 %v2747_v7, %v2579_v62  ;;  %v2413_v36 = vadd.f32 %v2412_v18, %v2244_v32  ;;  %2798 = vmatmul.bf16.gmra.mxu0 %v7800_v57  ;;  %v7839_v7 = vld [vmem:[%s17375_s0 + $0x1d8] sm:$0xf]  ;;  %v7841_v62 = vld [vmem:[%s17375_s0 + $0x1f8] sm:$0xf0] }
 0x282   :  { %2967 = vmatmul.bf16.gmra.mxu1 %v7804_v45  ;;  %v10980_v57 = vld [vmem:[%s17375_s0 + $0x1f4] sm:$0xf0]  ;;  %v10976_v45 = vld [vmem:[%s17375_s0 + $0x1dc] sm:$0xf] }
 0x283   :  { %17406 = vst [vmem:[#allocation24_spill] sm:$0xff] %v13125_v51  ;;  %3136 = vmatmul.bf16.gmra.mxu2 %v7808_v33  ;;  %v7832_v33 = vor.u32 %v10979_v25, %v7831_v56 }
 0x284   :  { %3305 = vmatmul.bf16.gmra.mxu3 %v7812_v39  ;;  %v7836_v39 = vor.u32 %v10975_v0, %v7833_v53  ;;  %v7863_v0 = vld [vmem:[%s17375_s0 + $0x210] sm:$0xf] }
 0x285   :  { %v10987_v53 = vld [vmem:[%s17375_s0 + $0x22c] sm:$0xf0] }
 0x286   :  { %v2581_v46 = vpop.f32.mrf.mxu2  ;;  %v2245_v6 = vpop.f32.mrf.mxu0 }
 0x287   :  { %v2750_v38 = vpop.f32.mrf.mxu3  ;;  %v2582_v61 = vadd.f32 %v2581_v46, %v2413_v36  ;;  %v2414_v17 = vpop.f32.mrf.mxu1  ;;  %v2246_v5 = vadd.f32 %v11753_v52, %v2245_v6 }
 0x289   :  { %v13127_v26 = vadd.f32 %v2750_v38, %v2582_v61  ;;  %v2415_v10 = vadd.f32 %v2414_v17, %v2246_v5  ;;  %v7840_v38 = vor.u32 %v10980_v57, %v7839_v7  ;;  %v7844_v61 = vor.u32 %v10976_v45, %v7841_v62  ;;  %v10983_v7 = vld [vmem:[%s17375_s0 + $0x214] sm:$0xf] }
 0x28a   :  { %v7864_v45 = vor.u32 %v10987_v53, %v7863_v0 }
 0x28b   :  { %17407 = vst [vmem:[#allocation25_spill] sm:$0xff] %v13127_v26 }
 0x28e   :  { %v2583_v13 = vpop.f32.mrf.mxu2  ;;  %v2248_v36 = vpop.f32.mrf.mxu0 }
 0x28f   :  { %v2752_v18 = vpop.f32.mrf.mxu3  ;;  %v2584_v32 = vadd.f32 %v2583_v13, %v2415_v10  ;;  %v2417_v46 = vpop.f32.mrf.mxu1  ;;  %v2249_v6 = vadd.f32 %v11753_v52, %v2248_v36 }
 0x291   :  { %v13153_v17 = vadd.f32 %v2752_v18, %v2584_v32  ;;  %v2418_v5 = vadd.f32 %v2417_v46, %v2249_v6  ;;  %2803 = vmatmul.bf16.gmra.mxu0 %v7832_v33 }
 0x292   :  { %2972 = vmatmul.bf16.gmra.mxu1 %v7836_v39 }
 0x293   :  { %3141 = vmatmul.bf16.gmra.mxu2 %v7840_v38 }
 0x294   :  { %3310 = vmatmul.bf16.gmra.mxu3 %v7844_v61 }
 0x296   :  { %v2586_v26 = vpop.f32.mrf.mxu2  ;;  %v2250_v42 = vpop.f32.mrf.mxu0 }
 0x297   :  { %v2755_v51 = vpop.f32.mrf.mxu3  ;;  %v2587_v34 = vadd.f32 %v2586_v26, %v2418_v5  ;;  %v2419_v2 = vpop.f32.mrf.mxu1  ;;  %v2251_v56 = vadd.f32 %v11753_v52, %v2250_v42  ;;  %v7865_v26 = vld [vmem:[%s17375_s0 + $0x230] sm:$0xf0]  ;;  %v10988_v42 = vld [vmem:[%s17375_s0 + $0x234] sm:$0xf0]  ;;  %v7873_v52 = vld [vmem:[%s17375_s0 + $0x238] sm:$0xf0] }
 0x298   :  { %v7868_v62 = vor.u32 %v10983_v7, %v7865_v26  ;;  %v10995_v26 = vld [vmem:[%s17375_s0 + $0x26c] sm:$0xf0] }
 0x299   :  { %v13155_v25 = vadd.f32 %v2755_v51, %v2587_v34  ;;  %v2420_v10 = vadd.f32 %v2419_v2, %v2251_v56  ;;  %v7871_v2 = vld [vmem:[%s17375_s0 + $0x218] sm:$0xf]  ;;  %v10984_v34 = vld [vmem:[%s17375_s0 + $0x21c] sm:$0xf] }
 0x29a   :  { %v7872_v39 = vor.u32 %v10988_v42, %v7871_v2  ;;  %v7876_v32 = vor.u32 %v10984_v34, %v7873_v52  ;;  %v10991_v2 = vld [vmem:[%s17375_s0 + $0x254] sm:$0xf]  ;;  %v10996_v34 = vld [vmem:[%s17375_s0 + $0x274] sm:$0xf0]  ;;  %v10992_v52 = vld [vmem:[%s17375_s0 + $0x25c] sm:$0xf] }
 0x29b   :  { %v7897_v42 = vld [vmem:[%s17375_s0 + $0x270] sm:$0xf0] }
 0x29e   :  { %v2588_v51 = vpop.f32.mrf.mxu2  ;;  %v2769_v18 = vpop.f32.mrf.mxu0 }
 0x29f   :  { %v2757_v57 = vpop.f32.mrf.mxu3  ;;  %v2589_v13 = vadd.f32 %v2588_v51, %v2420_v10  ;;  %v2938_v33 = vpop.f32.mrf.mxu1  ;;  %v2770_v36 = vadd.f32 %v2769_v18, %v12137_v27  ;;  %v7895_v27 = vld [vmem:[%s17375_s0 + $0x250] sm:$0xf]  ;;  %v7905_v51 = vld [vmem:[%s17375_s0 + $0x278] sm:$0xf0] }
 0x2a1   :  { %v13182_v46 = vadd.f32 %v2757_v57, %v2589_v13  ;;  %v2939_v38 = vadd.f32 %v2938_v33, %v2770_v36  ;;  %2808 = vmatmul.bf16.gmra.mxu0 %v7864_v45  ;;  %v7900_v13 = vor.u32 %v10991_v2, %v7897_v42  ;;  %v7908_v36 = vor.u32 %v10992_v52, %v7905_v51  ;;  %v11003_v42 = vld [vmem:[%s17375_s0 + $0x2ac] sm:$0xf0]  ;;  %v11004_v52 = vld [vmem:[%s17375_s0 + $0x2b4] sm:$0xf0]  ;;  %v11000_v51 = vld [vmem:[%s17375_s0 + $0x29c] sm:$0xf] }
 0x2a2   :  { %2977 = vmatmul.bf16.gmra.mxu1 %v7868_v62  ;;  %v7896_v62 = vor.u32 %v10995_v26, %v7895_v27 }
 0x2a3   :  { %3146 = vmatmul.bf16.gmra.mxu2 %v7872_v39 }
 0x2a4   :  { %3315 = vmatmul.bf16.gmra.mxu3 %v7876_v32 }
 0x2a6   :  { %v3107_v61 = vpop.f32.mrf.mxu2  ;;  %v2771_v56 = vpop.f32.mrf.mxu0 }
 0x2a7   :  { %v3276_v6 = vpop.f32.mrf.mxu3  ;;  %v3108_v5 = vadd.f32 %v3107_v61, %v2939_v38  ;;  %v2940_v0 = vpop.f32.mrf.mxu1  ;;  %v2772_v10 = vadd.f32 %v2771_v56, %v12164_v47  ;;  %v7903_v47 = vld [vmem:[%s17375_s0 + $0x258] sm:$0xf] }
 0x2a8   :  { %v7904_v32 = vor.u32 %v10996_v34, %v7903_v47  ;;  %v10999_v47 = vld [vmem:[%s17375_s0 + $0x294] sm:$0xf] }
 0x2a9   :  { %v13185_v53 = vadd.f32 %v3276_v6, %v3108_v5  ;;  %v2941_v7 = vadd.f32 %v2940_v0, %v2772_v10  ;;  %v7929_v34 = vld [vmem:[%s17375_s0 + $0x2b0] sm:$0xf0] }
 0x2ae   :  { %v3109_v57 = vpop.f32.mrf.mxu2  ;;  %v2774_v33 = vpop.f32.mrf.mxu0 }
 0x2af   :  { %v3278_v45 = vpop.f32.mrf.mxu3  ;;  %v3110_v18 = vadd.f32 %v3109_v57, %v2941_v7  ;;  %v2943_v39 = vpop.f32.mrf.mxu1  ;;  %v2775_v38 = vadd.f32 %v2774_v33, %v12167_v55  ;;  %v7927_v55 = vld [vmem:[%s17375_s0 + $0x290] sm:$0xf]  ;;  %v7937_v57 = vld [vmem:[%s17375_s0 + $0x2b8] sm:$0xf0] }
 0x2b1   :  { %v13212_v61 = vadd.f32 %v3278_v45, %v3110_v18  ;;  %v2944_v6 = vadd.f32 %v2943_v39, %v2775_v38  ;;  %2813 = vmatmul.bf16.gmra.mxu0 %v7896_v62  ;;  %v7932_v18 = vor.u32 %v10999_v47, %v7929_v34  ;;  %v7940_v38 = vor.u32 %v11000_v51, %v7937_v57  ;;  %v11011_v34 = vld [vmem:[%s17375_s0 + $0x2ec] sm:$0xf0]  ;;  %v11012_v51 = vld [vmem:[%s17375_s0 + $0x2f4] sm:$0xf0]  ;;  %v11008_v57 = vld [vmem:[%s17375_s0 + $0x2dc] sm:$0xf] }
 0x2b2   :  { %2982 = vmatmul.bf16.gmra.mxu1 %v7900_v13  ;;  %v7928_v13 = vor.u32 %v11003_v42, %v7927_v55 }
 0x2b3   :  { %3151 = vmatmul.bf16.gmra.mxu2 %v7904_v32 }
 0x2b4   :  { %3320 = vmatmul.bf16.gmra.mxu3 %v7908_v36 }
 0x2b6   :  { %v3112_v5 = vpop.f32.mrf.mxu2  ;;  %v2776_v10 = vpop.f32.mrf.mxu0 }
 0x2b7   :  { %v3281_v56 = vpop.f32.mrf.mxu3  ;;  %v3113_v0 = vadd.f32 %v3112_v5, %v2944_v6  ;;  %v2945_v27 = vpop.f32.mrf.mxu1  ;;  %v2777_v7 = vadd.f32 %v2776_v10, %v12194_v12  ;;  %v7935_v12 = vld [vmem:[%s17375_s0 + $0x298] sm:$0xf] }
 0x2b8   :  { %v7936_v36 = vor.u32 %v11004_v52, %v7935_v12  ;;  %v11007_v12 = vld [vmem:[%s17375_s0 + $0x2d4] sm:$0xf] }
 0x2b9   :  { %v13215_v26 = vadd.f32 %v3281_v56, %v3113_v0  ;;  %v2946_v2 = vadd.f32 %v2945_v27, %v2777_v7  ;;  %v7961_v52 = vld [vmem:[%s17375_s0 + $0x2f0] sm:$0xf0] }
 0x2be   :  { %v3114_v45 = vpop.f32.mrf.mxu2  ;;  %v2779_v39 = vpop.f32.mrf.mxu0 }
 0x2bf   :  { %v3283_v62 = vpop.f32.mrf.mxu3  ;;  %v3115_v33 = vadd.f32 %v3114_v45, %v2946_v2  ;;  %v2948_v32 = vpop.f32.mrf.mxu1  ;;  %v2780_v6 = vadd.f32 %v2779_v39, %v12197_v20  ;;  %v7959_v20 = vld [vmem:[%s17375_s0 + $0x2d0] sm:$0xf]  ;;  %v7969_v45 = vld [vmem:[%s17375_s0 + $0x2f8] sm:$0xf0] }
 0x2c1   :  { %v13242_v5 = vadd.f32 %v3283_v62, %v3115_v33  ;;  %v2949_v56 = vadd.f32 %v2948_v32, %v2780_v6  ;;  %2818 = vmatmul.bf16.gmra.mxu0 %v7928_v13  ;;  %v7964_v33 = vor.u32 %v11007_v12, %v7961_v52  ;;  %v7972_v6 = vor.u32 %v11008_v57, %v7969_v45  ;;  %v11019_v52 = vld [vmem:[%s17375_s0 + $0x32c] sm:$0xf0]  ;;  %v11020_v57 = vld [vmem:[%s17375_s0 + $0x334] sm:$0xf0]  ;;  %v11016_v45 = vld [vmem:[%s17375_s0 + $0x31c] sm:$0xf] }
 0x2c2   :  { %2987 = vmatmul.bf16.gmra.mxu1 %v7932_v18  ;;  %v7960_v18 = vor.u32 %v11011_v34, %v7959_v20 }
 0x2c3   :  { %3156 = vmatmul.bf16.gmra.mxu2 %v7936_v36 }
 0x2c4   :  { %3325 = vmatmul.bf16.gmra.mxu3 %v7940_v38 }
 0x2c6   :  { %v3117_v0 = vpop.f32.mrf.mxu2  ;;  %v2781_v7 = vpop.f32.mrf.mxu0 }
 0x2c7   :  { %v3286_v10 = vpop.f32.mrf.mxu3  ;;  %v3118_v27 = vadd.f32 %v3117_v0, %v2949_v56  ;;  %v2950_v55 = vpop.f32.mrf.mxu1  ;;  %v2782_v2 = vadd.f32 %v2781_v7, %v12224_v41  ;;  %v7967_v41 = vld [vmem:[%s17375_s0 + $0x2d8] sm:$0xf] }
 0x2c8   :  { %v7968_v38 = vor.u32 %v11012_v51, %v7967_v41  ;;  %v11015_v41 = vld [vmem:[%s17375_s0 + $0x314] sm:$0xf] }
 0x2c9   :  { %v13245_v42 = vadd.f32 %v3286_v10, %v3118_v27  ;;  %v2951_v47 = vadd.f32 %v2950_v55, %v2782_v2  ;;  %v7993_v51 = vld [vmem:[%s17375_s0 + $0x330] sm:$0xf0] }
 0x2ce   :  { %v3119_v62 = vpop.f32.mrf.mxu2  ;;  %v2784_v32 = vpop.f32.mrf.mxu0 }
 0x2cf   :  { %v3288_v13 = vpop.f32.mrf.mxu3  ;;  %v3120_v39 = vadd.f32 %v3119_v62, %v2951_v47  ;;  %v2953_v36 = vpop.f32.mrf.mxu1  ;;  %v2785_v56 = vadd.f32 %v2784_v32, %v12227_v50  ;;  %v7991_v50 = vld [vmem:[%s17375_s0 + $0x310] sm:$0xf]  ;;  %v8001_v62 = vld [vmem:[%s17375_s0 + $0x338] sm:$0xf0] }
 0x2d1   :  { %v13272_v0 = vadd.f32 %v3288_v13, %v3120_v39  ;;  %v2954_v10 = vadd.f32 %v2953_v36, %v2785_v56  ;;  %2823 = vmatmul.bf16.gmra.mxu0 %v7960_v18  ;;  %v7996_v39 = vor.u32 %v11015_v41, %v7993_v51  ;;  %v8004_v56 = vor.u32 %v11016_v45, %v8001_v62  ;;  %v11027_v51 = vld [vmem:[%s17375_s0 + $0x36c] sm:$0xf0]  ;;  %v8031_v62 = vld [vmem:[%s17375_s0 + $0x358] sm:$0xf] }
 0x2d2   :  { %2992 = vmatmul.bf16.gmra.mxu1 %v7964_v33  ;;  %v7992_v33 = vor.u32 %v11019_v52, %v7991_v50 }
 0x2d3   :  { %3161 = vmatmul.bf16.gmra.mxu2 %v7968_v38 }
 0x2d4   :  { %3330 = vmatmul.bf16.gmra.mxu3 %v7972_v6 }
 0x2d6   :  { %v3122_v27 = vpop.f32.mrf.mxu2  ;;  %v2786_v2 = vpop.f32.mrf.mxu0 }
 0x2d7   :  { %v3291_v7 = vpop.f32.mrf.mxu3  ;;  %v3123_v55 = vadd.f32 %v3122_v27, %v2954_v10  ;;  %v2955_v20 = vpop.f32.mrf.mxu1  ;;  %v2787_v47 = vadd.f32 %v2786_v2, %v12254_v8  ;;  %v7999_v8 = vld [vmem:[%s17375_s0 + $0x318] sm:$0xf] }
 0x2d8   :  { %v8000_v6 = vor.u32 %v11020_v57, %v7999_v8  ;;  %v11023_v8 = vld [vmem:[%s17375_s0 + $0x354] sm:$0xf]  ;;  %v3436_v57 = vmax.f32 %v13185_v53, 0.0  ;;  %v8033_v53 = vld [vmem:[%s17375_s0 + $0x378] sm:$0xf0] }
 0x2d9   :  { %v13275_v34 = vadd.f32 %v3291_v7, %v3123_v55  ;;  %v2956_v12 = vadd.f32 %v2955_v20, %v2787_v47 }
 0x2de   :  { %v3124_v13 = vpop.f32.mrf.mxu2  ;;  %v2789_v36 = vpop.f32.mrf.mxu0 }
 0x2df   :  { %v3293_v18 = vpop.f32.mrf.mxu3  ;;  %v3125_v32 = vadd.f32 %v3124_v13, %v2956_v12  ;;  %v2958_v38 = vpop.f32.mrf.mxu1  ;;  %v2790_v10 = vadd.f32 %v2789_v36, %v12269_v22  ;;  %v8023_v22 = vld [vmem:[%s17375_s0 + $0x350] sm:$0xf]  ;;  %v11028_v13 = vld [vmem:[%s17375_s0 + $0x374] sm:$0xf0] }
 0x2e0   :  { %v8024_v36 = vor.u32 %v11027_v51, %v8023_v22 }
 0x2e1   :  { %v13302_v27 = vadd.f32 %v3293_v18, %v3125_v32  ;;  %v2959_v7 = vadd.f32 %v2958_v38, %v2790_v10  ;;  %2828 = vmatmul.bf16.gmra.mxu0 %v7992_v33  ;;  %v11024_v18 = vld [vmem:[%s17375_s0 + $0x35c] sm:$0xf] }
 0x2e2   :  { %2997 = vmatmul.bf16.gmra.mxu1 %v7996_v39 }
 0x2e3   :  { %3166 = vmatmul.bf16.gmra.mxu2 %v8000_v6 }
 0x2e4   :  { %3335 = vmatmul.bf16.gmra.mxu3 %v8004_v56 }
 0x2e6   :  { %v3127_v55 = vpop.f32.mrf.mxu2  ;;  %v2791_v47 = vpop.f32.mrf.mxu0 }
 0x2e7   :  { %v3296_v2 = vpop.f32.mrf.mxu3  ;;  %v3128_v20 = vadd.f32 %v3127_v55, %v2959_v7  ;;  %v2960_v50 = vpop.f32.mrf.mxu1  ;;  %v2792_v12 = vadd.f32 %v2791_v47, %v12296_v44  ;;  %v8025_v44 = vld [vmem:[%s17375_s0 + $0x370] sm:$0xf0]  ;;  %v8032_v7 = vor.u32 %v11028_v13, %v8031_v62  ;;  %v8036_v55 = vor.u32 %v11024_v18, %v8033_v53  ;;  %v8055_v62 = vld [vmem:[%s17375_s0 + $0x390] sm:$0xf] }
 0x2e8   :  { %v8028_v38 = vor.u32 %v11023_v8, %v8025_v44  ;;  %v11031_v13 = vld [vmem:[%s17375_s0 + $0x394] sm:$0xf]  ;;  %v3438_v18 = vmax.f32 %v13215_v26, 0.0  ;;  %v8065_v26 = vld [vmem:[%s17375_s0 + $0x3b8] sm:$0xf0] }
 0x2e9   :  { %v3297_v52 = vadd.f32 %v3296_v2, %v3128_v20  ;;  %v2961_v41 = vadd.f32 %v2960_v50, %v2792_v12  ;;  %v3437_v50 = vmax.f32 %v13212_v61, 0.0  ;;  %v11035_v61 = vld [vmem:[%s17375_s0 + $0x3ac] sm:$0xf0] }
 0x2eb   :  { %v3444_v45 = vmax.f32 %v3297_v52, 0.0 }
 0x2ed   :  { %v13330_v33 = vmax.f32 %v3436_v57, %v3444_v45 }
 0x2ee   :  { %v3129_v39 = vpop.f32.mrf.mxu2  ;;  %v2794_v56 = vpop.f32.mrf.mxu0 }
 0x2ef   :  { %v3298_v32 = vpop.f32.mrf.mxu3  ;;  %v3130_v6 = vadd.f32 %v3129_v39, %v2961_v41  ;;  %v2963_v10 = vpop.f32.mrf.mxu1  ;;  %v2795_v2 = vadd.f32 %v2794_v56, %v12299_v54  ;;  %v8063_v39 = vld [vmem:[%s17375_s0 + $0x398] sm:$0xf] }
 0x2f1   :  { %v3299_v20 = vadd.f32 %v3298_v32, %v3130_v6  ;;  %v2964_v47 = vadd.f32 %v2963_v10, %v2795_v2  ;;  %2833 = vmatmul.bf16.gmra.mxu0 %v8024_v36  ;;  %v11036_v32 = vld [vmem:[%s17375_s0 + $0x3b4] sm:$0xf0]  ;;  %v11032_v36 = vld [vmem:[%s17375_s0 + $0x39c] sm:$0xf]  ;;  %v8056_v10 = vor.u32 %v11035_v61, %v8055_v62 }
 0x2f2   :  { %3002 = vmatmul.bf16.gmra.mxu1 %v8028_v38 }
 0x2f3   :  { %v3445_v12 = vmax.f32 %v3299_v20, 0.0  ;;  %3171 = vmatmul.bf16.gmra.mxu2 %v8032_v7 }
 0x2f4   :  { %3340 = vmatmul.bf16.gmra.mxu3 %v8036_v55 }
 0x2f5   :  { %v13334_v52 = vmax.f32 %v3437_v50, %v3445_v12  ;;  %v8068_v50 = vor.u32 %v11032_v36, %v8065_v26  ;;  %v8095_v36 = vld [vmem:[%s17375_s0 + $0x3d8] sm:$0xf] }
 0x2f6   :  { %v3132_v22 = vpop.f32.mrf.mxu2  ;;  %v2796_v8 = vpop.f32.mrf.mxu0  ;;  %v11044_v26 = vld [vmem:[%s17375_s0 + $0x3f4] sm:$0xf0] }
 0x2f7   :  { %v3301_v51 = vpop.f32.mrf.mxu3  ;;  %v3133_v41 = vadd.f32 %v3132_v22, %v2964_v47  ;;  %v2965_v57 = vpop.f32.mrf.mxu1  ;;  %v2797_v45 = vadd.f32 %v2796_v8, %v12326_v14  ;;  %v8057_v14 = vld [vmem:[%s17375_s0 + $0x3b0] sm:$0xf0]  ;;  %v8064_v47 = vor.u32 %v11036_v32, %v8063_v39  ;;  %v3440_v39 = vmax.f32 %v13245_v42, 0.0  ;;  %v8097_v42 = vld [vmem:[%s17375_s0 + $0x3f8] sm:$0xf0] }
 0x2f8   :  { %v8060_v7 = vor.u32 %v11031_v13, %v8057_v14  ;;  %v11039_v14 = vld [vmem:[%s17375_s0 + $0x3d4] sm:$0xf] }
 0x2f9   :  { %v3302_v44 = vadd.f32 %v3301_v51, %v3133_v41  ;;  %v2966_v54 = vadd.f32 %v2965_v57, %v2797_v45  ;;  %v3439_v41 = vmax.f32 %v13242_v5, 0.0  ;;  %v11043_v5 = vld [vmem:[%s17375_s0 + $0x3ec] sm:$0xf0] }
 0x2fb   :  { %v3446_v53 = vmax.f32 %v3302_v44, 0.0 }
 0x2fd   :  { %v13362_v38 = vmax.f32 %v3438_v18, %v3446_v53  ;;  %v8087_v53 = vld [vmem:[%s17375_s0 + $0x3d0] sm:$0xf] }
 0x2fe   :  { %v3134_v6 = vpop.f32.mrf.mxu2  ;;  %v2799_v2 = vpop.f32.mrf.mxu0 }
 0x2ff   :  { %v3303_v56 = vpop.f32.mrf.mxu3  ;;  %v3135_v55 = vadd.f32 %v3134_v6, %v2966_v54  ;;  %v2968_v20 = vpop.f32.mrf.mxu1  ;;  %v2800_v12 = vadd.f32 %v2799_v2, %v12329_v24  ;;  %v11040_v6 = vld [vmem:[%s17375_s0 + $0x3dc] sm:$0xf] }
 0x301   :  { %v3304_v22 = vadd.f32 %v3303_v56, %v3135_v55  ;;  %v2969_v51 = vadd.f32 %v2968_v20, %v2800_v12  ;;  %2838 = vmatmul.bf16.gmra.mxu0 %v8056_v10  ;;  %v8088_v55 = vor.u32 %v11043_v5, %v8087_v53  ;;  %v8096_v12 = vor.u32 %v11044_v26, %v8095_v36  ;;  %v11048_v36 = vld [vmem:[%s17375_s0 + $0x41c] sm:$0xf] }
 0x302   :  { %3007 = vmatmul.bf16.gmra.mxu1 %v8060_v7  ;;  %v8129_v26 = vld [vmem:[%s17375_s0 + $0x438] sm:$0xf0] }
 0x303   :  { %v3447_v8 = vmax.f32 %v3304_v22, 0.0  ;;  %3176 = vmatmul.bf16.gmra.mxu2 %v8064_v47  ;;  %v8100_v22 = vor.u32 %v11040_v6, %v8097_v42  ;;  %v3442_v6 = vmax.f32 %v13275_v34, 0.0  ;;  %v9863_v34 = vld [vmem:[%s17376_s3 + $0x7c0] sm:$0xf] }
 0x304   :  { %3345 = vmatmul.bf16.gmra.mxu3 %v8068_v50 }
 0x305   :  { %v13366_v57 = vmax.f32 %v3439_v41, %v3447_v8 }
 0x306   :  { %v3137_v45 = vpop.f32.mrf.mxu2  ;;  %v2801_v62 = vpop.f32.mrf.mxu0 }
 0x307   :  { %v3306_v44 = vpop.f32.mrf.mxu3  ;;  %v3138_v54 = vadd.f32 %v3137_v45, %v2969_v51  ;;  %v2970_v61 = vpop.f32.mrf.mxu1  ;;  %v2802_v13 = vadd.f32 %v2801_v62, %v12356_v48  ;;  %v8089_v48 = vld [vmem:[%s17375_s0 + $0x3f0] sm:$0xf0]  ;;  %v3441_v45 = vmax.f32 %v13272_v0, 0.0  ;;  %v11051_v0 = vld [vmem:[%s17375_s0 + $0x42c] sm:$0xf0] }
 0x308   :  { %v8092_v2 = vor.u32 %v11039_v14, %v8089_v48  ;;  %v11047_v14 = vld [vmem:[%s17375_s0 + $0x414] sm:$0xf]  ;;  %v11052_v48 = vld [vmem:[%s17375_s0 + $0x434] sm:$0xf0] }
 0x309   :  { %v3307_v18 = vadd.f32 %v3306_v44, %v3138_v54  ;;  %v2971_v24 = vadd.f32 %v2970_v61, %v2802_v13 }
 0x30b   :  { %v3448_v32 = vmax.f32 %v3307_v18, 0.0 }
 0x30d   :  { %v13394_v56 = vmax.f32 %v3440_v39, %v3448_v32  ;;  %v8121_v39 = vld [vmem:[%s17375_s0 + $0x430] sm:$0xf0] }
 0x30e   :  { %v3139_v10 = vpop.f32.mrf.mxu2  ;;  %v2804_v47 = vpop.f32.mrf.mxu0 }
 0x30f   :  { %v3308_v7 = vpop.f32.mrf.mxu3  ;;  %v3140_v20 = vadd.f32 %v3139_v10, %v2971_v24  ;;  %v2973_v50 = vpop.f32.mrf.mxu1  ;;  %v2805_v51 = vadd.f32 %v2804_v47, %v12359_v59  ;;  %v8119_v59 = vld [vmem:[%s17375_s0 + $0x410] sm:$0xf]  ;;  %v9607_v10 = vld [vmem:[%s17376_s3 + $0x5c0] sm:$0xf] }
 0x311   :  { %v3309_v41 = vadd.f32 %v3308_v7, %v3140_v20  ;;  %v2974_v8 = vadd.f32 %v2973_v50, %v2805_v51  ;;  %2843 = vmatmul.bf16.gmra.mxu0 %v8088_v55  ;;  %v11425_v7 = vld [vmem:[%s17376_s3 + $0x5dc] sm:$0xf0] }
 0x312   :  { %3012 = vmatmul.bf16.gmra.mxu1 %v8092_v2  ;;  %v9608_v55 = vor.u32 %v11425_v7, %v9607_v10  ;;  %v9095_v2 = vld [vmem:[%s17376_s3 + $0x1c0] sm:$0xf] }
 0x313   :  { %v3449_v44 = vmax.f32 %v3309_v41, 0.0  ;;  %3181 = vmatmul.bf16.gmra.mxu2 %v8096_v12  ;;  %v11297_v20 = vld [vmem:[%s17376_s3 + $0x1dc] sm:$0xf0] }
 0x314   :  { %3350 = vmatmul.bf16.gmra.mxu3 %v8100_v22  ;;  %v9096_v50 = vor.u32 %v11297_v20, %v9095_v2  ;;  %v11489_v12 = vld [vmem:[%s17376_s3 + $0x7dc] sm:$0xf0]  ;;  %6680 = vmatpush.bf16.msra.mxu2 %v9608_v55  ;;  %v8151_v55 = vld [vmem:[%s17375_s0 + $0x450] sm:$0xf]  ;;  %v11055_v2 = vld [vmem:[%s17375_s0 + $0x454] sm:$0xf] }
 0x315   :  { %v13398_v54 = vmax.f32 %v3441_v45, %v3449_v44  ;;  %v9351_v22 = vld [vmem:[%s17376_s3 + $0x3c0] sm:$0xf]  ;;  %v8120_v45 = vor.u32 %v11051_v0, %v8119_v59  ;;  %v8124_v44 = vor.u32 %v11047_v14, %v8121_v39  ;;  %v3443_v59 = vmax.f32 %v13302_v27, 0.0  ;;  %v11059_v27 = vld [vmem:[%s17375_s0 + $0x46c] sm:$0xf0] }
 0x316   :  { %v3142_v62 = vpop.f32.mrf.mxu2  ;;  %v2806_v18 = vpop.f32.mrf.mxu0  ;;  %v11361_v51 = vld [vmem:[%s17376_s3 + $0x3dc] sm:$0xf0]  ;;  %6654 = vmatpush.bf16.msra.mxu0 %v9096_v50  ;;  %v8153_v20 = vld [vmem:[%s17375_s0 + $0x470] sm:$0xf0]  ;;  %v11056_v50 = vld [vmem:[%s17375_s0 + $0x45c] sm:$0xf] }
 0x317   :  { %v3311_v61 = vpop.f32.mrf.mxu3  ;;  %v3143_v13 = vadd.f32 %v3142_v62, %v2974_v8  ;;  %v2975_v24 = vpop.f32.mrf.mxu1  ;;  %v2807_v53 = vadd.f32 %v2806_v18, %v12386_v19  ;;  %v8127_v19 = vld [vmem:[%s17375_s0 + $0x418] sm:$0xf]  ;;  %v9864_v62 = vor.u32 %v11489_v12, %v9863_v34  ;;  %v8161_v12 = vld [vmem:[%s17375_s0 + $0x478] sm:$0xf0] }
 0x318   :  { %v11060_v34 = vld [vmem:[%s17375_s0 + $0x474] sm:$0xf0] }
 0x319   :  { %v3312_v5 = vadd.f32 %v3311_v61, %v3143_v13  ;;  %v2976_v32 = vadd.f32 %v2975_v24, %v2807_v53  ;;  %v9352_v61 = vor.u32 %v11361_v51, %v9351_v22  ;;  %v8128_v53 = vor.u32 %v11052_v48, %v8127_v19  ;;  %6693 = vmatpush.bf16.msra.mxu3 %v9864_v62 }
 0x31b   :  { %v3450_v42 = vmax.f32 %v3312_v5, 0.0  ;;  %v8132_v5 = vor.u32 %v11048_v36, %v8129_v26  ;;  %6667 = vmatpush.bf16.msra.mxu1 %v9352_v61 }
 0x31d   :  { %v13441_v47 = vmax.f32 %v3442_v6, %v3450_v42 }
 0x31e   :  { %v3144_v41 = vpop.f32.mrf.mxu2  ;;  %v2809_v18 = vpop.f32.mrf.mxu0 }
 0x31f   :  { %v3313_v8 = vpop.f32.mrf.mxu3  ;;  %v3145_v13 = vadd.f32 %v3144_v41, %v2976_v32  ;;  %v2978_v24 = vpop.f32.mrf.mxu1  ;;  %v2810_v6 = vadd.f32 %v2809_v18, %v12401_v35  ;;  %v8152_v41 = vor.u32 %v11059_v27, %v8151_v55  ;;  %v8193_v55 = vld [vmem:[%s17375_s0 + $0x4b8] sm:$0xf0] }
 0x321   :  { %v3314_v42 = vadd.f32 %v3313_v8, %v3145_v13  ;;  %v2979_v10 = vadd.f32 %v2978_v24, %v2810_v6  ;;  %2848 = vmatmul.bf16.gmra.mxu0 %v8120_v45  ;;  %v8156_v8 = vor.u32 %v11055_v2, %v8153_v20  ;;  %v8164_v13 = vor.u32 %v11056_v50, %v8161_v12 }
 0x322   :  { %3017 = vmatmul.bf16.gmra.mxu1 %v8124_v44 }
 0x323   :  { %v3451_v0 = vmax.f32 %v3314_v42, 0.0  ;;  %3186 = vmatmul.bf16.gmra.mxu2 %v8128_v53 }
 0x324   :  { %3355 = vmatmul.bf16.gmra.mxu3 %v8132_v5 }
 0x325   :  { %v13454_v14 = vmax.f32 %v3443_v59, %v3451_v0 }
 0x326   :  { %v3147_v39 = vpop.f32.mrf.mxu2  ;;  %v2811_v48 = vpop.f32.mrf.mxu0 }
 0x327   :  { %v3316_v32 = vpop.f32.mrf.mxu3  ;;  %v3148_v19 = vadd.f32 %v3147_v39, %v2979_v10  ;;  %v2980_v36 = vpop.f32.mrf.mxu1  ;;  %v2812_v35 = vadd.f32 %v2811_v48, %v12428_v63  ;;  %v8159_v63 = vld [vmem:[%s17375_s0 + $0x458] sm:$0xf]  ;;  %v11063_v48 = vld [vmem:[%s17375_s0 + $0x494] sm:$0xf] }
 0x328   :  { %v8160_v61 = vor.u32 %v11060_v34, %v8159_v63 }
 0x329   :  { %v13457_v26 = vadd.f32 %v3316_v32, %v3148_v19  ;;  %v2981_v7 = vadd.f32 %v2980_v36, %v2812_v35  ;;  %v11067_v19 = vld [vmem:[%s17375_s0 + $0x4ac] sm:$0xf0]  ;;  %v8185_v36 = vld [vmem:[%s17375_s0 + $0x4b0] sm:$0xf0]  ;;  %v11068_v35 = vld [vmem:[%s17375_s0 + $0x4b4] sm:$0xf0] }
 0x32a   :  { %v8188_v63 = vor.u32 %v11063_v48, %v8185_v36 }
 0x32e   :  { %v3149_v22 = vpop.f32.mrf.mxu2  ;;  %v2814_v44 = vpop.f32.mrf.mxu0 }
 0x32f   :  { %v3318_v51 = vpop.f32.mrf.mxu3  ;;  %v3150_v45 = vadd.f32 %v3149_v22, %v2981_v7  ;;  %v2983_v62 = vpop.f32.mrf.mxu1  ;;  %v2815_v18 = vadd.f32 %v2814_v44, %v12431_v9  ;;  %v8183_v9 = vld [vmem:[%s17375_s0 + $0x490] sm:$0xf]  ;;  %v11064_v7 = vld [vmem:[%s17375_s0 + $0x49c] sm:$0xf] }
 0x330   :  { %v8184_v20 = vor.u32 %v11067_v19, %v8183_v9  ;;  %v8225_v9 = vld [vmem:[%s17375_s0 + $0x4f8] sm:$0xf0] }
 0x331   :  { %v13484_v24 = vadd.f32 %v3318_v51, %v3150_v45  ;;  %v2984_v53 = vadd.f32 %v2983_v62, %v2815_v18  ;;  %2853 = vmatmul.bf16.gmra.mxu0 %v8152_v41  ;;  %v8196_v51 = vor.u32 %v11064_v7, %v8193_v55 }
 0x332   :  { %3022 = vmatmul.bf16.gmra.mxu1 %v8156_v8 }
 0x333   :  { %3191 = vmatmul.bf16.gmra.mxu2 %v8160_v61 }
 0x334   :  { %3360 = vmatmul.bf16.gmra.mxu3 %v8164_v13 }
 0x336   :  { %v3152_v5 = vpop.f32.mrf.mxu2  ;;  %v2816_v10 = vpop.f32.mrf.mxu0 }
 0x337   :  { %v3321_v6 = vpop.f32.mrf.mxu3  ;;  %v3153_v42 = vadd.f32 %v3152_v5, %v2984_v53  ;;  %v2985_v59 = vpop.f32.mrf.mxu1  ;;  %v2817_v0 = vadd.f32 %v2816_v10, %v12458_v37  ;;  %v8191_v37 = vld [vmem:[%s17375_s0 + $0x498] sm:$0xf]  ;;  %v11071_v10 = vld [vmem:[%s17375_s0 + $0x4d4] sm:$0xf] }
 0x338   :  { %v8192_v22 = vor.u32 %v11068_v35, %v8191_v37 }
 0x339   :  { %v13487_v39 = vadd.f32 %v3321_v6, %v3153_v42  ;;  %v2986_v32 = vadd.f32 %v2985_v59, %v2817_v0  ;;  %v11075_v42 = vld [vmem:[%s17375_s0 + $0x4ec] sm:$0xf0]  ;;  %v8217_v59 = vld [vmem:[%s17375_s0 + $0x4f0] sm:$0xf0]  ;;  %v11076_v0 = vld [vmem:[%s17375_s0 + $0x4f4] sm:$0xf0] }
 0x33a   :  { %v8220_v37 = vor.u32 %v11071_v10, %v8217_v59 }
 0x33e   :  { %v3154_v27 = vpop.f32.mrf.mxu2  ;;  %v2819_v50 = vpop.f32.mrf.mxu0 }
 0x33f   :  { %v3323_v2 = vpop.f32.mrf.mxu3  ;;  %v3155_v34 = vadd.f32 %v3154_v27, %v2986_v32  ;;  %v2988_v12 = vpop.f32.mrf.mxu1  ;;  %v2820_v41 = vadd.f32 %v2819_v50, %v12461_v49  ;;  %v8215_v49 = vld [vmem:[%s17375_s0 + $0x4d0] sm:$0xf]  ;;  %v11072_v32 = vld [vmem:[%s17375_s0 + $0x4dc] sm:$0xf] }
 0x340   :  { %v8216_v36 = vor.u32 %v11075_v42, %v8215_v49  ;;  %v8257_v49 = vld [vmem:[%s17375_s0 + $0x538] sm:$0xf0] }
 0x341   :  { %v13514_v8 = vadd.f32 %v3323_v2, %v3155_v34  ;;  %v2989_v45 = vadd.f32 %v2988_v12, %v2820_v41  ;;  %2858 = vmatmul.bf16.gmra.mxu0 %v8184_v20  ;;  %v8228_v2 = vor.u32 %v11072_v32, %v8225_v9 }
 0x342   :  { %3027 = vmatmul.bf16.gmra.mxu1 %v8188_v63 }
 0x343   :  { %3196 = vmatmul.bf16.gmra.mxu2 %v8192_v22 }
 0x344   :  { %3365 = vmatmul.bf16.gmra.mxu3 %v8196_v51 }
 0x346   :  { %v3157_v44 = vpop.f32.mrf.mxu2  ;;  %v2821_v13 = vpop.f32.mrf.mxu0 }
 0x347   :  { %v3326_v62 = vpop.f32.mrf.mxu3  ;;  %v3158_v61 = vadd.f32 %v3157_v44, %v2989_v45  ;;  %v2990_v18 = vpop.f32.mrf.mxu1  ;;  %v2822_v53 = vadd.f32 %v2821_v13, %v12488_v15  ;;  %v8223_v15 = vld [vmem:[%s17375_s0 + $0x4d8] sm:$0xf]  ;;  %v11079_v13 = vld [vmem:[%s17375_s0 + $0x514] sm:$0xf] }
 0x348   :  { %v8224_v27 = vor.u32 %v11076_v0, %v8223_v15 }
 0x349   :  { %v13517_v5 = vadd.f32 %v3326_v62, %v3158_v61  ;;  %v2991_v6 = vadd.f32 %v2990_v18, %v2822_v53  ;;  %v11083_v61 = vld [vmem:[%s17375_s0 + $0x52c] sm:$0xf0]  ;;  %v8249_v18 = vld [vmem:[%s17375_s0 + $0x530] sm:$0xf0]  ;;  %v11084_v53 = vld [vmem:[%s17375_s0 + $0x534] sm:$0xf0] }
 0x34a   :  { %v8252_v15 = vor.u32 %v11079_v13, %v8249_v18 }
 0x34e   :  { %v3159_v19 = vpop.f32.mrf.mxu2  ;;  %v2824_v7 = vpop.f32.mrf.mxu0 }
 0x34f   :  { %v3328_v48 = vpop.f32.mrf.mxu3  ;;  %v3160_v35 = vadd.f32 %v3159_v19, %v2991_v6  ;;  %v2993_v55 = vpop.f32.mrf.mxu1  ;;  %v2825_v20 = vadd.f32 %v2824_v7, %v12491_v28  ;;  %v8247_v28 = vld [vmem:[%s17375_s0 + $0x510] sm:$0xf]  ;;  %v11080_v6 = vld [vmem:[%s17375_s0 + $0x51c] sm:$0xf] }
 0x350   :  { %v8248_v59 = vor.u32 %v11083_v61, %v8247_v28 }
 0x351   :  { %v13544_v63 = vadd.f32 %v3328_v48, %v3160_v35  ;;  %v2994_v34 = vadd.f32 %v2993_v55, %v2825_v20  ;;  %2863 = vmatmul.bf16.gmra.mxu0 %v8216_v36  ;;  %v8260_v48 = vor.u32 %v11080_v6, %v8257_v49  ;;  %v9575_v36 = vld [vmem:[%s17376_s3 + $0x580] sm:$0xf]  ;;  %v8279_v6 = vld [vmem:[%s17375_s0 + $0x550] sm:$0xf] }
 0x352   :  { %3032 = vmatmul.bf16.gmra.mxu1 %v8220_v37  ;;  %v11417_v37 = vld [vmem:[%s17376_s3 + $0x59c] sm:$0xf0]  ;;  %v11091_v49 = vld [vmem:[%s17375_s0 + $0x56c] sm:$0xf0] }
 0x353   :  { %3201 = vmatmul.bf16.gmra.mxu2 %v8224_v27  ;;  %v9063_v35 = vld [vmem:[%s17376_s3 + $0x180] sm:$0xf]  ;;  %v9576_v55 = vor.u32 %v11417_v37, %v9575_v36  ;;  %v8280_v36 = vor.u32 %v11091_v49, %v8279_v6  ;;  %v11099_v6 = vld [vmem:[%s17375_s0 + $0x5ac] sm:$0xf0]  ;;  %v11095_v49 = vld [vmem:[%s17375_s0 + $0x594] sm:$0xf] }
 0x354   :  { %3370 = vmatmul.bf16.gmra.mxu3 %v8228_v2  ;;  %v11289_v27 = vld [vmem:[%s17376_s3 + $0x19c] sm:$0xf0] }
 0x355   :  { %v9831_v2 = vld [vmem:[%s17376_s3 + $0x780] sm:$0xf]  ;;  %6681 = vmatpush.bf16.msra.mxu2 %v9576_v55 }
 0x356   :  { %v3162_v50 = vpop.f32.mrf.mxu2  ;;  %v2826_v51 = vpop.f32.mrf.mxu0  ;;  %v11481_v20 = vld [vmem:[%s17376_s3 + $0x79c] sm:$0xf0] }
 0x357   :  { %v3331_v12 = vpop.f32.mrf.mxu3  ;;  %v3163_v22 = vadd.f32 %v3162_v50, %v2994_v34  ;;  %v2995_v41 = vpop.f32.mrf.mxu1  ;;  %v2827_v45 = vadd.f32 %v2826_v51, %v12518_v58  ;;  %v8255_v58 = vld [vmem:[%s17375_s0 + $0x518] sm:$0xf]  ;;  %v9064_v50 = vor.u32 %v11289_v27, %v9063_v35 }
 0x358   :  { %v8256_v19 = vor.u32 %v11084_v53, %v8255_v58 }
 0x359   :  { %v13547_v44 = vadd.f32 %v3331_v12, %v3163_v22  ;;  %v2996_v62 = vadd.f32 %v2995_v41, %v2827_v45  ;;  %v9832_v12 = vor.u32 %v11481_v20, %v9831_v2  ;;  %v11353_v22 = vld [vmem:[%s17376_s3 + $0x39c] sm:$0xf0]  ;;  %6655 = vmatpush.bf16.msra.mxu0 %v9064_v50 }
 0x35b   :  { %6694 = vmatpush.bf16.msra.mxu3 %v9832_v12 }
 0x35e   :  { %v3164_v42 = vpop.f32.mrf.mxu2  ;;  %v2829_v32 = vpop.f32.mrf.mxu0 }
 0x35f   :  { %v3333_v10 = vpop.f32.mrf.mxu3  ;;  %v3165_v0 = vadd.f32 %v3164_v42, %v2996_v62  ;;  %v2998_v9 = vpop.f32.mrf.mxu1  ;;  %v2830_v7 = vadd.f32 %v2829_v32, %v12533_v11  ;;  %v9319_v11 = vld [vmem:[%s17376_s3 + $0x380] sm:$0xf]  ;;  %v11087_v42 = vld [vmem:[%s17375_s0 + $0x554] sm:$0xf]  ;;  %v11088_v32 = vld [vmem:[%s17375_s0 + $0x55c] sm:$0xf] }
 0x360   :  { %v9320_v41 = vor.u32 %v11353_v22, %v9319_v11  ;;  %v3453_v22 = vmax.f32 %v13484_v24, 0.0  ;;  %v8311_v24 = vld [vmem:[%s17375_s0 + $0x590] sm:$0xf] }
 0x361   :  { %v13592_v34 = vadd.f32 %v3333_v10, %v3165_v0  ;;  %v2999_v51 = vadd.f32 %v2998_v9, %v2830_v7  ;;  %2868 = vmatmul.bf16.gmra.mxu0 %v8248_v59  ;;  %v3452_v10 = vmax.f32 %v13457_v26, 0.0  ;;  %v11092_v0 = vld [vmem:[%s17375_s0 + $0x574] sm:$0xf0]  ;;  %v8289_v26 = vld [vmem:[%s17375_s0 + $0x578] sm:$0xf0] }
 0x362   :  { %3037 = vmatmul.bf16.gmra.mxu1 %v8252_v15  ;;  %v8287_v15 = vld [vmem:[%s17375_s0 + $0x558] sm:$0xf]  ;;  %v8292_v20 = vor.u32 %v11088_v32, %v8289_v26 }
 0x363   :  { %3206 = vmatmul.bf16.gmra.mxu2 %v8256_v19  ;;  %6668 = vmatpush.bf16.msra.mxu1 %v9320_v41  ;;  %v8288_v2 = vor.u32 %v11092_v0, %v8287_v15  ;;  %v11096_v15 = vld [vmem:[%s17375_s0 + $0x59c] sm:$0xf] }
 0x364   :  { %3375 = vmatmul.bf16.gmra.mxu3 %v8260_v48 }
 0x366   :  { %v3167_v45 = vpop.f32.mrf.mxu2  ;;  %v2831_v61 = vpop.f32.mrf.mxu0 }
 0x367   :  { %v3336_v62 = vpop.f32.mrf.mxu3  ;;  %v3168_v28 = vadd.f32 %v3167_v45, %v2999_v51  ;;  %v3000_v13 = vpop.f32.mrf.mxu1  ;;  %v2832_v18 = vadd.f32 %v2831_v61, %v12560_v43  ;;  %v8281_v43 = vld [vmem:[%s17375_s0 + $0x570] sm:$0xf0] }
 0x368   :  { %v8284_v37 = vor.u32 %v11087_v42, %v8281_v43  ;;  %v3454_v42 = vmax.f32 %v13487_v39, 0.0  ;;  %v11100_v43 = vld [vmem:[%s17375_s0 + $0x5b4] sm:$0xf0]  ;;  %v8321_v39 = vld [vmem:[%s17375_s0 + $0x5b8] sm:$0xf0] }
 0x369   :  { %v3337_v58 = vadd.f32 %v3336_v62, %v3168_v28  ;;  %v3001_v53 = vadd.f32 %v3000_v13, %v2832_v18  ;;  %v11625_v28 = vld [vmem:[%s17376_s3 + $0xc1c] sm:$0xf0] }
 0x36b   :  { %v3460_v59 = vmax.f32 %v3337_v58, 0.0 }
 0x36d   :  { %v13626_v9 = vmax.f32 %v3452_v10, %v3460_v59  ;;  %v8319_v59 = vld [vmem:[%s17375_s0 + $0x598] sm:$0xf] }
 0x36e   :  { %v3169_v19 = vpop.f32.mrf.mxu2  ;;  %v2834_v55 = vpop.f32.mrf.mxu0 }
 0x36f   :  { %v3338_v48 = vpop.f32.mrf.mxu3  ;;  %v3170_v7 = vadd.f32 %v3169_v19, %v3001_v53  ;;  %v3003_v27 = vpop.f32.mrf.mxu1  ;;  %v2835_v50 = vadd.f32 %v2834_v55, %v12563_v60  ;;  %v8312_v19 = vor.u32 %v11099_v6, %v8311_v24  ;;  %v11107_v24 = vld [vmem:[%s17375_s0 + $0x5ec] sm:$0xf0]  ;;  %v11103_v6 = vld [vmem:[%s17375_s0 + $0x5d4] sm:$0xf] }
 0x371   :  { %v3339_v12 = vadd.f32 %v3338_v48, %v3170_v7  ;;  %v3004_v11 = vadd.f32 %v3003_v27, %v2835_v50  ;;  %2873 = vmatmul.bf16.gmra.mxu0 %v8280_v36  ;;  %v8320_v27 = vor.u32 %v11100_v43, %v8319_v59  ;;  %v11104_v59 = vld [vmem:[%s17375_s0 + $0x5dc] sm:$0xf]  ;;  %v10407_v36 = vld [vmem:[%s17376_s3 + $0xc00] sm:$0xf] }
 0x372   :  { %3042 = vmatmul.bf16.gmra.mxu1 %v8284_v37 }
 0x373   :  { %v3461_v51 = vmax.f32 %v3339_v12, 0.0  ;;  %3211 = vmatmul.bf16.gmra.mxu2 %v8288_v2  ;;  %v8324_v2 = vor.u32 %v11096_v15, %v8321_v39 }
 0x374   :  { %3380 = vmatmul.bf16.gmra.mxu3 %v8292_v20 }
 0x375   :  { %v13632_v41 = vmax.f32 %v3453_v22, %v3461_v51 }
 0x376   :  { %v3172_v45 = vpop.f32.mrf.mxu2  ;;  %v2836_v13 = vpop.f32.mrf.mxu0 }
 0x377   :  { %v3341_v62 = vpop.f32.mrf.mxu3  ;;  %v3173_v61 = vadd.f32 %v3172_v45, %v3004_v11  ;;  %v3005_v18 = vpop.f32.mrf.mxu1  ;;  %v2837_v60 = vadd.f32 %v2836_v13, %v12590_v30  ;;  %v8313_v30 = vld [vmem:[%s17375_s0 + $0x5b0] sm:$0xf0]  ;;  %v3455_v11 = vmax.f32 %v13514_v8, 0.0  ;;  %v8343_v8 = vld [vmem:[%s17375_s0 + $0x5d0] sm:$0xf] }
 0x378   :  { %v8316_v48 = vor.u32 %v11095_v49, %v8313_v30  ;;  %v3456_v49 = vmax.f32 %v13517_v5, 0.0  ;;  %v11108_v30 = vld [vmem:[%s17375_s0 + $0x5f4] sm:$0xf0]  ;;  %v8353_v5 = vld [vmem:[%s17375_s0 + $0x5f8] sm:$0xf0] }
 0x379   :  { %v3342_v58 = vadd.f32 %v3341_v62, %v3173_v61  ;;  %v3006_v53 = vadd.f32 %v3005_v18, %v2837_v60 }
 0x37b   :  { %v3462_v10 = vmax.f32 %v3342_v58, 0.0 }
 0x37d   :  { %v13662_v0 = vmax.f32 %v3454_v42, %v3462_v10  ;;  %v8351_v10 = vld [vmem:[%s17375_s0 + $0x5d8] sm:$0xf] }
 0x37e   :  { %v3174_v32 = vpop.f32.mrf.mxu2  ;;  %v2839_v7 = vpop.f32.mrf.mxu0 }
 0x37f   :  { %v3343_v26 = vpop.f32.mrf.mxu3  ;;  %v3175_v37 = vadd.f32 %v3174_v32, %v3006_v53  ;;  %v3008_v55 = vpop.f32.mrf.mxu1  ;;  %v2840_v20 = vadd.f32 %v2839_v7, %v12593_v40  ;;  %v8344_v32 = vor.u32 %v11107_v24, %v8343_v8  ;;  %v11111_v8 = vld [vmem:[%s17375_s0 + $0x614] sm:$0xf] }
 0x380   :  { %v8377_v24 = vld [vmem:[%s17375_s0 + $0x630] sm:$0xf0] }
 0x381   :  { %v3344_v50 = vadd.f32 %v3343_v26, %v3175_v37  ;;  %v3009_v12 = vadd.f32 %v3008_v55, %v2840_v20  ;;  %2878 = vmatmul.bf16.gmra.mxu0 %v8312_v19  ;;  %v8352_v55 = vor.u32 %v11108_v30, %v8351_v10  ;;  %v3458_v10 = vmax.f32 %v13547_v44, 0.0  ;;  %v9799_v44 = vld [vmem:[%s17376_s3 + $0x740] sm:$0xf]  ;;  %v17424_v19 = vld [vmem:[#allocation21_spill] sm:$0xff] }
 0x382   :  { %3047 = vmatmul.bf16.gmra.mxu1 %v8316_v48 }
 0x383   :  { %v3463_v22 = vmax.f32 %v3344_v50, 0.0  ;;  %3216 = vmatmul.bf16.gmra.mxu2 %v8320_v27  ;;  %v8356_v27 = vor.u32 %v11104_v59, %v8353_v5  ;;  %v9543_v59 = vld [vmem:[%s17376_s3 + $0x540] sm:$0xf] }
 0x384   :  { %3385 = vmatmul.bf16.gmra.mxu3 %v8324_v2  ;;  %v11409_v5 = vld [vmem:[%s17376_s3 + $0x55c] sm:$0xf0] }
 0x385   :  { %v13668_v51 = vmax.f32 %v3455_v11, %v3463_v22 }
 0x386   :  { %v3177_v45 = vpop.f32.mrf.mxu2  ;;  %v2841_v18 = vpop.f32.mrf.mxu0 }
 0x387   :  { %v3346_v62 = vpop.f32.mrf.mxu3  ;;  %v3178_v13 = vadd.f32 %v3177_v45, %v3009_v12  ;;  %v3010_v60 = vpop.f32.mrf.mxu1  ;;  %v2842_v40 = vadd.f32 %v2841_v18, %v12625_v16  ;;  %v8345_v16 = vld [vmem:[%s17375_s0 + $0x5f0] sm:$0xf0]  ;;  %v3457_v12 = vmax.f32 %v13544_v63, 0.0  ;;  %v8375_v63 = vld [vmem:[%s17375_s0 + $0x610] sm:$0xf] }
 0x388   :  { %v8348_v26 = vor.u32 %v11103_v6, %v8345_v16  ;;  %v8385_v16 = vld [vmem:[%s17375_s0 + $0x638] sm:$0xf0] }
 0x389   :  { %v3347_v58 = vadd.f32 %v3346_v62, %v3178_v13  ;;  %v3011_v53 = vadd.f32 %v3010_v60, %v2842_v40  ;;  %v10759_v13 = vld [vmem:[%s17376_s3 + $0xec0] sm:$0xf] }
 0x38b   :  { %v3464_v42 = vmax.f32 %v3347_v58, 0.0 }
 0x38d   :  { %v13698_v43 = vmax.f32 %v3456_v49, %v3464_v42  ;;  %v11116_v49 = vld [vmem:[%s17375_s0 + $0x634] sm:$0xf0]  ;;  %v11112_v42 = vld [vmem:[%s17375_s0 + $0x61c] sm:$0xf] }
 0x38e   :  { %v3179_v15 = vpop.f32.mrf.mxu2  ;;  %v2844_v37 = vpop.f32.mrf.mxu0 }
 0x38f   :  { %v3348_v39 = vpop.f32.mrf.mxu3  ;;  %v3180_v48 = vadd.f32 %v3179_v15, %v3011_v53  ;;  %v3013_v7 = vpop.f32.mrf.mxu1  ;;  %v2845_v2 = vadd.f32 %v2844_v37, %v12628_v31  ;;  %v11115_v53 = vld [vmem:[%s17375_s0 + $0x62c] sm:$0xf0]  ;;  %v9544_v15 = vor.u32 %v11409_v5, %v9543_v59  ;;  %v11473_v37 = vld [vmem:[%s17376_s3 + $0x75c] sm:$0xf0] }
 0x391   :  { %v3349_v20 = vadd.f32 %v3348_v39, %v3180_v48  ;;  %v3014_v50 = vadd.f32 %v3013_v7, %v2845_v2  ;;  %2883 = vmatmul.bf16.gmra.mxu0 %v8344_v32  ;;  %v9031_v39 = vld [vmem:[%s17376_s3 + $0x140] sm:$0xf]  ;;  %6682 = vmatpush.bf16.msra.mxu2 %v9544_v15  ;;  %v11123_v15 = vld [vmem:[%s17375_s0 + $0x66c] sm:$0xf0] }
 0x392   :  { %3052 = vmatmul.bf16.gmra.mxu1 %v8348_v26  ;;  %v11281_v32 = vld [vmem:[%s17376_s3 + $0x15c] sm:$0xf0] }
 0x393   :  { %v3465_v11 = vmax.f32 %v3349_v20, 0.0  ;;  %3221 = vmatmul.bf16.gmra.mxu2 %v8352_v55  ;;  %v9032_v48 = vor.u32 %v11281_v32, %v9031_v39  ;;  %v9287_v7 = vld [vmem:[%s17376_s3 + $0x340] sm:$0xf]  ;;  %v8376_v20 = vor.u32 %v11115_v53, %v8375_v63  ;;  %v3459_v63 = vmax.f32 %v13592_v34, 0.0  ;;  %v8407_v34 = vld [vmem:[%s17375_s0 + $0x650] sm:$0xf] }
 0x394   :  { %3390 = vmatmul.bf16.gmra.mxu3 %v8356_v27  ;;  %v11345_v55 = vld [vmem:[%s17376_s3 + $0x35c] sm:$0xf0]  ;;  %v11119_v39 = vld [vmem:[%s17375_s0 + $0x654] sm:$0xf] }
 0x395   :  { %v13704_v22 = vmax.f32 %v3457_v12, %v3465_v11  ;;  %v9800_v12 = vor.u32 %v11473_v37, %v9799_v44  ;;  %v9288_v11 = vor.u32 %v11345_v55, %v9287_v7  ;;  %6656 = vmatpush.bf16.msra.mxu0 %v9032_v48  ;;  %v8409_v32 = vld [vmem:[%s17375_s0 + $0x670] sm:$0xf0]  ;;  %v11124_v44 = vld [vmem:[%s17375_s0 + $0x674] sm:$0xf0]  ;;  %v11120_v48 = vld [vmem:[%s17375_s0 + $0x65c] sm:$0xf] }
 0x396   :  { %v3182_v45 = vpop.f32.mrf.mxu2  ;;  %v2846_v60 = vpop.f32.mrf.mxu0  ;;  %v8417_v37 = vld [vmem:[%s17375_s0 + $0x678] sm:$0xf0] }
 0x397   :  { %v3351_v62 = vpop.f32.mrf.mxu3  ;;  %v3183_v18 = vadd.f32 %v3182_v45, %v3014_v50  ;;  %v3015_v40 = vpop.f32.mrf.mxu1  ;;  %v2847_v31 = vadd.f32 %v2846_v60, %v12655_v3  ;;  %v8383_v3 = vld [vmem:[%s17375_s0 + $0x618] sm:$0xf]  ;;  %v8380_v50 = vor.u32 %v11111_v8, %v8377_v24  ;;  %6695 = vmatpush.bf16.msra.mxu3 %v9800_v12  ;;  %6669 = vmatpush.bf16.msra.mxu1 %v9288_v11 }
 0x399   :  { %v3352_v58 = vadd.f32 %v3351_v62, %v3183_v18  ;;  %v3016_v6 = vadd.f32 %v3015_v40, %v2847_v31  ;;  %v8384_v40 = vor.u32 %v11116_v49, %v8383_v3  ;;  %v8388_v31 = vor.u32 %v11112_v42, %v8385_v16 }
 0x39b   :  { %v3466_v30 = vmax.f32 %v3352_v58, 0.0 }
 0x39d   :  { %v13749_v26 = vmax.f32 %v3458_v10, %v3466_v30 }
 0x39e   :  { %v3184_v27 = vpop.f32.mrf.mxu2  ;;  %v2849_v18 = vpop.f32.mrf.mxu0 }
 0x39f   :  { %v3353_v2 = vpop.f32.mrf.mxu3  ;;  %v3185_v62 = vadd.f32 %v3184_v27, %v3016_v6  ;;  %v3018_v60 = vpop.f32.mrf.mxu1  ;;  %v2850_v58 = vadd.f32 %v2849_v18, %v12670_v29  ;;  %v8408_v27 = vor.u32 %v11123_v15, %v8407_v34  ;;  %v8449_v34 = vld [vmem:[%s17375_s0 + $0x6b8] sm:$0xf0] }
 0x3a1   :  { %v3354_v10 = vadd.f32 %v3353_v2, %v3185_v62  ;;  %v3019_v30 = vadd.f32 %v3018_v60, %v2850_v58  ;;  %2888 = vmatmul.bf16.gmra.mxu0 %v8376_v20  ;;  %v8412_v2 = vor.u32 %v11119_v39, %v8409_v32  ;;  %v8420_v62 = vor.u32 %v11120_v48, %v8417_v37 }
 0x3a2   :  { %3057 = vmatmul.bf16.gmra.mxu1 %v8380_v50 }
 0x3a3   :  { %v3467_v53 = vmax.f32 %v3354_v10, 0.0  ;;  %3226 = vmatmul.bf16.gmra.mxu2 %v8384_v40 }
 0x3a4   :  { %3395 = vmatmul.bf16.gmra.mxu3 %v8388_v31 }
 0x3a5   :  { %v13764_v8 = vmax.f32 %v3459_v63, %v3467_v53 }
 0x3a6   :  { %v3187_v24 = vpop.f32.mrf.mxu2  ;;  %v2851_v29 = vpop.f32.mrf.mxu0 }
 0x3a7   :  { %17408 = vst [vmem:[#allocation26_spill] sm:$0xff] %v13764_v8  ;;  %v3356_v6 = vpop.f32.mrf.mxu3  ;;  %v3188_v49 = vadd.f32 %v3187_v24, %v3019_v30  ;;  %v3020_v42 = vpop.f32.mrf.mxu1  ;;  %v2852_v16 = vadd.f32 %v2851_v29, %v12697_v4  ;;  %v8415_v4 = vld [vmem:[%s17375_s0 + $0x658] sm:$0xf]  ;;  %v11127_v29 = vld [vmem:[%s17375_s0 + $0x694] sm:$0xf] }
 0x3a8   :  { %v8416_v11 = vor.u32 %v11124_v44, %v8415_v4  ;;  %v10695_v8 = vld [vmem:[%s17376_s3 + $0xe40] sm:$0xf] }
 0x3a9   :  { %v13769_v59 = vadd.f32 %v3356_v6, %v3188_v49  ;;  %v3021_v5 = vadd.f32 %v3020_v42, %v2852_v16  ;;  %v11131_v49 = vld [vmem:[%s17375_s0 + $0x6ac] sm:$0xf0]  ;;  %v8441_v42 = vld [vmem:[%s17375_s0 + $0x6b0] sm:$0xf0]  ;;  %v11132_v16 = vld [vmem:[%s17375_s0 + $0x6b4] sm:$0xf0] }
 0x3aa   :  { %v8444_v4 = vor.u32 %v11127_v29, %v8441_v42  ;;  %v8481_v29 = vld [vmem:[%s17375_s0 + $0x6f8] sm:$0xf0] }
 0x3ae   :  { %v3189_v7 = vpop.f32.mrf.mxu2  ;;  %v2854_v50 = vpop.f32.mrf.mxu0 }
 0x3af   :  { %v3358_v55 = vpop.f32.mrf.mxu3  ;;  %v3190_v20 = vadd.f32 %v3189_v7, %v3021_v5  ;;  %v3023_v12 = vpop.f32.mrf.mxu1  ;;  %v2855_v18 = vadd.f32 %v2854_v50, %v12700_v23  ;;  %v8439_v23 = vld [vmem:[%s17375_s0 + $0x690] sm:$0xf]  ;;  %v11128_v5 = vld [vmem:[%s17375_s0 + $0x69c] sm:$0xf] }
 0x3b0   :  { %v8440_v32 = vor.u32 %v11131_v49, %v8439_v23  ;;  %v11140_v23 = vld [vmem:[%s17375_s0 + $0x6f4] sm:$0xf0]  ;;  %v11136_v49 = vld [vmem:[%s17375_s0 + $0x6dc] sm:$0xf] }
 0x3b1   :  { %v13796_v60 = vadd.f32 %v3358_v55, %v3190_v20  ;;  %v3024_v40 = vadd.f32 %v3023_v12, %v2855_v18  ;;  %2893 = vmatmul.bf16.gmra.mxu0 %v8408_v27  ;;  %v8452_v55 = vor.u32 %v11128_v5, %v8449_v34 }
 0x3b2   :  { %3062 = vmatmul.bf16.gmra.mxu1 %v8412_v2 }
 0x3b3   :  { %3231 = vmatmul.bf16.gmra.mxu2 %v8416_v11 }
 0x3b4   :  { %3400 = vmatmul.bf16.gmra.mxu3 %v8420_v62 }
 0x3b6   :  { %v3192_v31 = vpop.f32.mrf.mxu2  ;;  %v2856_v30 = vpop.f32.mrf.mxu0 }
 0x3b7   :  { %v3361_v58 = vpop.f32.mrf.mxu3  ;;  %v3193_v10 = vadd.f32 %v3192_v31, %v3024_v40  ;;  %v3025_v63 = vpop.f32.mrf.mxu1  ;;  %v2857_v53 = vadd.f32 %v2856_v30, %v12727_v1  ;;  %v8447_v1 = vld [vmem:[%s17375_s0 + $0x698] sm:$0xf]  ;;  %v17409_v40 = vld [vmem:[#allocation2_spill] sm:$0xff]  ;;  %v11139_v30 = vld [vmem:[%s17375_s0 + $0x6ec] sm:$0xf0] }
 0x3b8   :  { %v8448_v7 = vor.u32 %v11132_v16, %v8447_v1 }
 0x3b9   :  { %v13799_v24 = vadd.f32 %v3361_v58, %v3193_v10  ;;  %v3026_v6 = vadd.f32 %v3025_v63, %v2857_v53  ;;  %v11135_v63 = vld [vmem:[%s17375_s0 + $0x6d4] sm:$0xf] }
 0x3ba   :  { %v8473_v53 = vld [vmem:[%s17375_s0 + $0x6f0] sm:$0xf0] }
 0x3bb   :  { %v8476_v5 = vor.u32 %v11135_v63, %v8473_v53  ;;  %v8511_v63 = vld [vmem:[%s17375_s0 + $0x718] sm:$0xf] }
 0x3bc   :  { %v11148_v53 = vld [vmem:[%s17375_s0 + $0x734] sm:$0xf0] }
 0x3be   :  { %v3194_v15 = vpop.f32.mrf.mxu2  ;;  %v2859_v48 = vpop.f32.mrf.mxu0 }
 0x3bf   :  { %v3363_v39 = vpop.f32.mrf.mxu3  ;;  %v3195_v44 = vadd.f32 %v3194_v15, %v3026_v6  ;;  %v3028_v37 = vpop.f32.mrf.mxu1  ;;  %v2860_v27 = vadd.f32 %v2859_v48, %v12730_v21  ;;  %v8471_v21 = vld [vmem:[%s17375_s0 + $0x6d0] sm:$0xf]  ;;  %v8479_v6 = vld [vmem:[%s17375_s0 + $0x6d8] sm:$0xf] }
 0x3c0   :  { %v8472_v16 = vor.u32 %v11139_v30, %v8471_v21  ;;  %v11143_v21 = vld [vmem:[%s17375_s0 + $0x714] sm:$0xf] }
 0x3c1   :  { %v13826_v2 = vadd.f32 %v3363_v39, %v3195_v44  ;;  %v3029_v20 = vadd.f32 %v3028_v37, %v2860_v27  ;;  %2898 = vmatmul.bf16.gmra.mxu0 %v8440_v32  ;;  %v8480_v32 = vor.u32 %v11140_v23, %v8479_v6  ;;  %v17410_v44 = vld [vmem:[#allocation3_spill] sm:$0xff]  ;;  %v8505_v30 = vld [vmem:[%s17375_s0 + $0x730] sm:$0xf0]  ;;  %v11144_v6 = vld [vmem:[%s17375_s0 + $0x71c] sm:$0xf] }
 0x3c2   :  { %3067 = vmatmul.bf16.gmra.mxu1 %v8444_v4  ;;  %v8484_v4 = vor.u32 %v11136_v49, %v8481_v29  ;;  %v8513_v23 = vld [vmem:[%s17375_s0 + $0x738] sm:$0xf0]  ;;  %v9511_v49 = vld [vmem:[%s17376_s3 + $0x500] sm:$0xf] }
 0x3c3   :  { %3236 = vmatmul.bf16.gmra.mxu2 %v8448_v7  ;;  %v11401_v29 = vld [vmem:[%s17376_s3 + $0x51c] sm:$0xf0] }
 0x3c4   :  { %3405 = vmatmul.bf16.gmra.mxu3 %v8452_v55 }
 0x3c6   :  { %v3197_v50 = vpop.f32.mrf.mxu2  ;;  %v2861_v62 = vpop.f32.mrf.mxu0 }
 0x3c7   :  { %v3366_v12 = vpop.f32.mrf.mxu3  ;;  %v3198_v11 = vadd.f32 %v3197_v50, %v3029_v20  ;;  %v3030_v18 = vpop.f32.mrf.mxu1  ;;  %v2862_v31 = vadd.f32 %v2861_v62, %v17409_v40 }
 0x3c9   :  { %v13829_v58 = vadd.f32 %v3366_v12, %v3198_v11  ;;  %v3031_v10 = vadd.f32 %v3030_v18, %v2862_v31  ;;  %v17411_v11 = vld [vmem:[#allocation4_spill] sm:$0xff] }
 0x3ca   :  { %v8503_v31 = vld [vmem:[%s17375_s0 + $0x710] sm:$0xf] }
 0x3ce   :  { %v3199_v42 = vpop.f32.mrf.mxu2  ;;  %v2864_v15 = vpop.f32.mrf.mxu0 }
 0x3cf   :  { %v3368_v1 = vpop.f32.mrf.mxu3  ;;  %v3200_v34 = vadd.f32 %v3199_v42, %v3031_v10  ;;  %v3033_v39 = vpop.f32.mrf.mxu1  ;;  %v2865_v48 = vadd.f32 %v2864_v15, %v17410_v44  ;;  %v11147_v10 = vld [vmem:[%s17375_s0 + $0x72c] sm:$0xf0]  ;;  %v8999_v42 = vld [vmem:[%s17376_s3 + $0x100] sm:$0xf]  ;;  %v8512_v15 = vor.u32 %v11148_v53, %v8511_v63 }
 0x3d0   :  { %v11465_v44 = vld [vmem:[%s17376_s3 + $0x71c] sm:$0xf0] }
 0x3d1   :  { %v13856_v37 = vadd.f32 %v3368_v1, %v3200_v34  ;;  %v3034_v7 = vadd.f32 %v3033_v39, %v2865_v48  ;;  %2903 = vmatmul.bf16.gmra.mxu0 %v8472_v16  ;;  %v8508_v34 = vor.u32 %v11143_v21, %v8505_v30  ;;  %v9512_v39 = vor.u32 %v11401_v29, %v9511_v49  ;;  %v17413_v29 = vld [vmem:[#allocation6_spill] sm:$0xff] }
 0x3d2   :  { %3072 = vmatmul.bf16.gmra.mxu1 %v8476_v5  ;;  %v8504_v5 = vor.u32 %v11147_v10, %v8503_v31 }
 0x3d3   :  { %3241 = vmatmul.bf16.gmra.mxu2 %v8480_v32  ;;  %v11273_v32 = vld [vmem:[%s17376_s3 + $0x11c] sm:$0xf0] }
 0x3d4   :  { %3410 = vmatmul.bf16.gmra.mxu3 %v8484_v4  ;;  %v9767_v4 = vld [vmem:[%s17376_s3 + $0x700] sm:$0xf]  ;;  %6683 = vmatpush.bf16.msra.mxu2 %v9512_v39  ;;  %v8537_v39 = vld [vmem:[%s17375_s0 + $0x770] sm:$0xf0] }
 0x3d6   :  { %v3202_v55 = vpop.f32.mrf.mxu2  ;;  %v2866_v50 = vpop.f32.mrf.mxu0 }
 0x3d7   :  { %v3371_v27 = vpop.f32.mrf.mxu3  ;;  %v3203_v20 = vadd.f32 %v3202_v55, %v3034_v7  ;;  %v3035_v12 = vpop.f32.mrf.mxu1  ;;  %v2867_v62 = vadd.f32 %v2866_v50, %v17411_v11  ;;  %v9768_v50 = vor.u32 %v11465_v44, %v9767_v4  ;;  %v11337_v11 = vld [vmem:[%s17376_s3 + $0x31c] sm:$0xf0]  ;;  %v11156_v4 = vld [vmem:[%s17375_s0 + $0x774] sm:$0xf0]  ;;  %v11152_v44 = vld [vmem:[%s17375_s0 + $0x75c] sm:$0xf] }
 0x3d9   :  { %v13859_v18 = vadd.f32 %v3371_v27, %v3203_v20  ;;  %v3036_v40 = vadd.f32 %v3035_v12, %v2867_v62  ;;  %v8516_v27 = vor.u32 %v11144_v6, %v8513_v23  ;;  %v9000_v20 = vor.u32 %v11273_v32, %v8999_v42  ;;  %v9255_v12 = vld [vmem:[%s17376_s3 + $0x300] sm:$0xf]  ;;  %v17412_v62 = vld [vmem:[#allocation5_spill] sm:$0xff]  ;;  %6696 = vmatpush.bf16.msra.mxu3 %v9768_v50 }
 0x3da   :  { %v9256_v10 = vor.u32 %v11337_v11, %v9255_v12  ;;  %v8543_v32 = vld [vmem:[%s17375_s0 + $0x758] sm:$0xf] }
 0x3db   :  { %6657 = vmatpush.bf16.msra.mxu0 %v9000_v20 }
 0x3dc   :  { %6670 = vmatpush.bf16.msra.mxu1 %v9256_v10 }
 0x3de   :  { %v3204_v1 = vpop.f32.mrf.mxu2  ;;  %v2869_v7 = vpop.f32.mrf.mxu0 }
 0x3df   :  { %v3373_v16 = vpop.f32.mrf.mxu3  ;;  %v3205_v48 = vadd.f32 %v3204_v1, %v3036_v40  ;;  %v3038_v55 = vpop.f32.mrf.mxu1  ;;  %v2870_v31 = vadd.f32 %v2869_v7, %v17412_v62  ;;  %v8535_v1 = vld [vmem:[%s17375_s0 + $0x750] sm:$0xf] }
 0x3e1   :  { %v13910_v21 = vadd.f32 %v3373_v16, %v3205_v48  ;;  %v3039_v40 = vadd.f32 %v3038_v55, %v2870_v31  ;;  %2908 = vmatmul.bf16.gmra.mxu0 %v8504_v5  ;;  %v11155_v16 = vld [vmem:[%s17375_s0 + $0x76c] sm:$0xf0]  ;;  %v11151_v5 = vld [vmem:[%s17375_s0 + $0x754] sm:$0xf]  ;;  %v8544_v31 = vor.u32 %v11156_v4, %v8543_v32 }
 0x3e2   :  { %3077 = vmatmul.bf16.gmra.mxu1 %v8508_v34  ;;  %v3468_v34 = vmax.f32 %v13769_v59, 0.0  ;;  %v8545_v59 = vld [vmem:[%s17375_s0 + $0x778] sm:$0xf0]  ;;  %v8536_v20 = vor.u32 %v11155_v16, %v8535_v1  ;;  %v8540_v50 = vor.u32 %v11151_v5, %v8537_v39  ;;  %v8567_v32 = vld [vmem:[%s17375_s0 + $0x790] sm:$0xf] }
 0x3e3   :  { %3246 = vmatmul.bf16.gmra.mxu2 %v8512_v15  ;;  %v8548_v10 = vor.u32 %v11152_v44, %v8545_v59  ;;  %v11159_v4 = vld [vmem:[%s17375_s0 + $0x794] sm:$0xf]  ;;  %v3470_v44 = vmax.f32 %v13799_v24, 0.0  ;;  %v8577_v24 = vld [vmem:[%s17375_s0 + $0x7b8] sm:$0xf0] }
 0x3e4   :  { %3415 = vmatmul.bf16.gmra.mxu3 %v8516_v27 }
 0x3e6   :  { %v3207_v30 = vpop.f32.mrf.mxu2  ;;  %v2871_v6 = vpop.f32.mrf.mxu0 }
 0x3e7   :  { %v3376_v63 = vpop.f32.mrf.mxu3  ;;  %v3208_v53 = vadd.f32 %v3207_v30, %v3039_v40  ;;  %v3040_v23 = vpop.f32.mrf.mxu1  ;;  %v2872_v42 = vadd.f32 %v2871_v6, %v17413_v29  ;;  %v17414_v40 = vld [vmem:[#allocation7_spill] sm:$0xff]  ;;  %v3469_v6 = vmax.f32 %v13796_v60, 0.0  ;;  %v11163_v60 = vld [vmem:[%s17375_s0 + $0x7ac] sm:$0xf0] }
 0x3e9   :  { %v3377_v49 = vadd.f32 %v3376_v63, %v3208_v53  ;;  %v3041_v7 = vadd.f32 %v3040_v23, %v2872_v42 }
 0x3eb   :  { %v3476_v15 = vmax.f32 %v3377_v49, 0.0 }
 0x3ed   :  { %v13938_v48 = vmax.f32 %v3468_v34, %v3476_v15  ;;  %v17415_v15 = vld [vmem:[#allocation8_spill] sm:$0xff] }
 0x3ee   :  { %v3209_v55 = vpop.f32.mrf.mxu2  ;;  %v2874_v11 = vpop.f32.mrf.mxu0 }
 0x3ef   :  { %v3378_v27 = vpop.f32.mrf.mxu3  ;;  %v3210_v12 = vadd.f32 %v3209_v55, %v3041_v7  ;;  %v3043_v62 = vpop.f32.mrf.mxu1  ;;  %v2875_v30 = vadd.f32 %v2874_v11, %v17414_v40  ;;  %v8569_v7 = vld [vmem:[%s17375_s0 + $0x7b0] sm:$0xf0]  ;;  %v8575_v55 = vld [vmem:[%s17375_s0 + $0x798] sm:$0xf] }
 0x3f1   :  { %v3379_v63 = vadd.f32 %v3378_v27, %v3210_v12  ;;  %v3044_v53 = vadd.f32 %v3043_v62, %v2875_v30  ;;  %2913 = vmatmul.bf16.gmra.mxu0 %v8536_v20  ;;  %v11164_v27 = vld [vmem:[%s17375_s0 + $0x7b4] sm:$0xf0]  ;;  %v11160_v20 = vld [vmem:[%s17375_s0 + $0x79c] sm:$0xf] }
 0x3f2   :  { %3082 = vmatmul.bf16.gmra.mxu1 %v8540_v50 }
 0x3f3   :  { %v3477_v49 = vmax.f32 %v3379_v63, 0.0  ;;  %3251 = vmatmul.bf16.gmra.mxu2 %v8544_v31  ;;  %v8568_v31 = vor.u32 %v11163_v60, %v8567_v32 }
 0x3f4   :  { %3420 = vmatmul.bf16.gmra.mxu3 %v8548_v10  ;;  %v8572_v10 = vor.u32 %v11159_v4, %v8569_v7 }
 0x3f5   :  { %v13942_v23 = vmax.f32 %v3469_v6, %v3477_v49  ;;  %v8580_v6 = vor.u32 %v11160_v20, %v8577_v24  ;;  %v17416_v49 = vld [vmem:[#allocation9_spill] sm:$0xff]  ;;  %v3472_v20 = vmax.f32 %v13829_v58, 0.0 }
 0x3f6   :  { %v3212_v29 = vpop.f32.mrf.mxu2  ;;  %v2876_v16 = vpop.f32.mrf.mxu0  ;;  %v8609_v58 = vld [vmem:[%s17375_s0 + $0x7f8] sm:$0xf0] }
 0x3f7   :  { %v3381_v42 = vpop.f32.mrf.mxu3  ;;  %v3213_v1 = vadd.f32 %v3212_v29, %v3044_v53  ;;  %v3045_v5 = vpop.f32.mrf.mxu1  ;;  %v2877_v39 = vadd.f32 %v2876_v16, %v17415_v15  ;;  %v8576_v53 = vor.u32 %v11164_v27, %v8575_v55  ;;  %v3471_v16 = vmax.f32 %v13826_v2, 0.0  ;;  %v8599_v55 = vld [vmem:[%s17375_s0 + $0x7d0] sm:$0xf]  ;;  %v11167_v27 = vld [vmem:[%s17375_s0 + $0x7d4] sm:$0xf] }
 0x3f8   :  { %v11171_v2 = vld [vmem:[%s17375_s0 + $0x7ec] sm:$0xf0] }
 0x3f9   :  { %v3382_v34 = vadd.f32 %v3381_v42, %v3213_v1  ;;  %v3046_v12 = vadd.f32 %v3045_v5, %v2877_v39 }
 0x3fb   :  { %v3478_v59 = vmax.f32 %v3382_v34, 0.0 }
 0x3fd   :  { %v13970_v50 = vmax.f32 %v3470_v44, %v3478_v59  ;;  %v17417_v59 = vld [vmem:[#allocation10_spill] sm:$0xff] }
 0x3fe   :  { %v3214_v11 = vpop.f32.mrf.mxu2  ;;  %v2879_v30 = vpop.f32.mrf.mxu0 }
 0x3ff   :  { %v3383_v62 = vpop.f32.mrf.mxu3  ;;  %v3215_v40 = vadd.f32 %v3214_v11, %v3046_v12  ;;  %v3048_v63 = vpop.f32.mrf.mxu1  ;;  %v2880_v29 = vadd.f32 %v2879_v30, %v17416_v49  ;;  %v8601_v12 = vld [vmem:[%s17375_s0 + $0x7f0] sm:$0xf0]  ;;  %v8607_v11 = vld [vmem:[%s17375_s0 + $0x7d8] sm:$0xf] }
 0x401   :  { %v3384_v42 = vadd.f32 %v3383_v62, %v3215_v40  ;;  %v3049_v1 = vadd.f32 %v3048_v63, %v2880_v29  ;;  %2918 = vmatmul.bf16.gmra.mxu0 %v8568_v31  ;;  %v11172_v62 = vld [vmem:[%s17375_s0 + $0x7f4] sm:$0xf0]  ;;  %v11168_v31 = vld [vmem:[%s17375_s0 + $0x7dc] sm:$0xf] }
 0x402   :  { %3087 = vmatmul.bf16.gmra.mxu1 %v8572_v10 }
 0x403   :  { %v3479_v34 = vmax.f32 %v3384_v42, 0.0  ;;  %3256 = vmatmul.bf16.gmra.mxu2 %v8576_v53  ;;  %v8600_v53 = vor.u32 %v11171_v2, %v8599_v55 }
 0x404   :  { %3425 = vmatmul.bf16.gmra.mxu3 %v8580_v6  ;;  %v8604_v6 = vor.u32 %v11167_v27, %v8601_v12 }
 0x405   :  { %v13974_v5 = vmax.f32 %v3471_v16, %v3479_v34  ;;  %v8612_v16 = vor.u32 %v11168_v31, %v8609_v58  ;;  %v17418_v34 = vld [vmem:[#allocation11_spill] sm:$0xff]  ;;  %v11393_v31 = vld [vmem:[%s17376_s3 + $0x4dc] sm:$0xf0] }
 0x406   :  { %v3217_v15 = vpop.f32.mrf.mxu2  ;;  %v2881_v60 = vpop.f32.mrf.mxu0 }
 0x407   :  { %v3386_v39 = vpop.f32.mrf.mxu3  ;;  %v3218_v32 = vadd.f32 %v3217_v15, %v3049_v1  ;;  %v3050_v4 = vpop.f32.mrf.mxu1  ;;  %v2882_v7 = vadd.f32 %v2881_v60, %v17417_v59  ;;  %v8608_v1 = vor.u32 %v11172_v62, %v8607_v11  ;;  %v3473_v60 = vmax.f32 %v13856_v37, 0.0  ;;  %v9479_v37 = vld [vmem:[%s17376_s3 + $0x4c0] sm:$0xf] }
 0x408   :  { %v3474_v11 = vmax.f32 %v13859_v18, 0.0  ;;  %v9480_v58 = vor.u32 %v11393_v31, %v9479_v37  ;;  %v9735_v18 = vld [vmem:[%s17376_s3 + $0x6c0] sm:$0xf] }
 0x409   :  { %v3387_v44 = vadd.f32 %v3386_v39, %v3218_v32  ;;  %v3051_v40 = vadd.f32 %v3050_v4, %v2882_v7 }
 0x40a   :  { %6684 = vmatpush.bf16.msra.mxu2 %v9480_v58 }
 0x40b   :  { %v3480_v24 = vmax.f32 %v3387_v44, 0.0 }
 0x40d   :  { %v14002_v10 = vmax.f32 %v3472_v20, %v3480_v24  ;;  %v17419_v24 = vld [vmem:[#allocation12_spill] sm:$0xff] }
 0x40e   :  { %v3219_v30 = vpop.f32.mrf.mxu2  ;;  %v2884_v29 = vpop.f32.mrf.mxu0 }
 0x40f   :  { %v3388_v63 = vpop.f32.mrf.mxu3  ;;  %v3220_v49 = vadd.f32 %v3219_v30, %v3051_v40  ;;  %v3053_v42 = vpop.f32.mrf.mxu1  ;;  %v2885_v15 = vadd.f32 %v2884_v29, %v17418_v34  ;;  %v8967_v40 = vld [vmem:[%s17376_s3 + $0xc0] sm:$0xf] }
 0x410   :  { %v11265_v30 = vld [vmem:[%s17376_s3 + $0xdc] sm:$0xf0] }
 0x411   :  { %v3389_v39 = vadd.f32 %v3388_v63, %v3220_v49  ;;  %v3054_v32 = vadd.f32 %v3053_v42, %v2885_v15  ;;  %2923 = vmatmul.bf16.gmra.mxu0 %v8600_v53  ;;  %v11457_v49 = vld [vmem:[%s17376_s3 + $0x6dc] sm:$0xf0] }
 0x412   :  { %3092 = vmatmul.bf16.gmra.mxu1 %v8604_v6  ;;  %v8968_v6 = vor.u32 %v11265_v30, %v8967_v40  ;;  %v9223_v29 = vld [vmem:[%s17376_s3 + $0x2c0] sm:$0xf]  ;;  %v9736_v34 = vor.u32 %v11457_v49, %v9735_v18 }
 0x413   :  { %v3481_v44 = vmax.f32 %v3389_v39, 0.0  ;;  %3261 = vmatmul.bf16.gmra.mxu2 %v8608_v1  ;;  %v11329_v42 = vld [vmem:[%s17376_s3 + $0x2dc] sm:$0xf0] }
 0x414   :  { %3430 = vmatmul.bf16.gmra.mxu3 %v8612_v16  ;;  %v9224_v15 = vor.u32 %v11329_v42, %v9223_v29  ;;  %6658 = vmatpush.bf16.msra.mxu0 %v8968_v6  ;;  %v17421_v6 = vld [vmem:[#allocation15_spill] sm:$0xff] }
 0x415   :  { %v14006_v4 = vmax.f32 %v3473_v60, %v3481_v44  ;;  %v17420_v44 = vld [vmem:[#allocation13_spill] sm:$0xff]  ;;  %6697 = vmatpush.bf16.msra.mxu3 %v9736_v34 }
 0x416   :  { %v3222_v59 = vpop.f32.mrf.mxu2  ;;  %v2886_v2 = vpop.f32.mrf.mxu0  ;;  %6671 = vmatpush.bf16.msra.mxu1 %v9224_v15 }
 0x417   :  { %v3391_v7 = vpop.f32.mrf.mxu3  ;;  %v3223_v55 = vadd.f32 %v3222_v59, %v3054_v32  ;;  %v3055_v27 = vpop.f32.mrf.mxu1  ;;  %v2887_v12 = vadd.f32 %v2886_v2, %v17419_v24  ;;  %v3475_v2 = vmax.f32 %v13910_v21, 0.0  ;;  %v8935_v21 = vld [vmem:[%s17376_s3 + $0x80] sm:$0xf] }
 0x419   :  { %v3392_v20 = vadd.f32 %v3391_v7, %v3223_v55  ;;  %v3056_v53 = vadd.f32 %v3055_v27, %v2887_v12 }
 0x41b   :  { %v3482_v62 = vmax.f32 %v3392_v20, 0.0 }
 0x41d   :  { %v14025_v63 = vmax.f32 %v3474_v11, %v3482_v62 }
 0x41e   :  { %v3224_v1 = vpop.f32.mrf.mxu2  ;;  %v2889_v32 = vpop.f32.mrf.mxu0 }
 0x41f   :  { %v3393_v16 = vpop.f32.mrf.mxu3  ;;  %v3225_v39 = vadd.f32 %v3224_v1, %v3056_v53  ;;  %v3058_v60 = vpop.f32.mrf.mxu1  ;;  %v2890_v59 = vadd.f32 %v2889_v32, %v17420_v44  ;;  %v11257_v53 = vld [vmem:[%s17376_s3 + $0x9c] sm:$0xf0] }
 0x420   :  { %v8936_v29 = vor.u32 %v11257_v53, %v8935_v21  ;;  %v8903_v1 = vld [vmem:[%s17376_s3 + $0x40] sm:$0xf] }
 0x421   :  { %v3394_v7 = vadd.f32 %v3393_v16, %v3225_v39  ;;  %v3059_v55 = vadd.f32 %v3058_v60, %v2890_v59  ;;  %v11249_v16 = vld [vmem:[%s17376_s3 + $0x5c] sm:$0xf0] }
 0x422   :  { %6659 = vmatpush.bf16.msra.mxu0 %v8936_v29  ;;  %v8904_v34 = vor.u32 %v11249_v16, %v8903_v1  ;;  %v8871_v59 = vld [vmem:[%s17376_s3] sm:$0xf] }
 0x423   :  { %v3483_v27 = vmax.f32 %v3394_v7, 0.0  ;;  %v11241_v7 = vld [vmem:[%s17376_s3 + $0x1c] sm:$0xf0] }
 0x424   :  { %v9159_v21 = vld [vmem:[%s17376_s3 + $0x240] sm:$0xf] }
 0x425   :  { %v14038_v20 = vmax.f32 %v3475_v2, %v3483_v27  ;;  %v8872_v2 = vor.u32 %v11241_v7, %v8871_v59  ;;  %v11321_v27 = vld [vmem:[%s17376_s3 + $0x29c] sm:$0xf0]  ;;  %v17422_v7 = vld [vmem:[#allocation17_spill] sm:$0xff] }
 0x426   :  { %v3227_v24 = vpop.f32.mrf.mxu2  ;;  %v14040_v62 = vpop.f32.mrf.mxu0  ;;  %6660 = vmatpush.bf16.msra.mxu0 %v8904_v34  ;;  %v11313_v53 = vld [vmem:[%s17376_s3 + $0x25c] sm:$0xf0] }
 0x427   :  { %v3396_v12 = vpop.f32.mrf.mxu3  ;;  %v3228_v11 = vadd.f32 %v3227_v24, %v3059_v55  ;;  %v14042_v37 = vpop.f32.mrf.mxu1  ;;  %v9191_v55 = vld [vmem:[%s17376_s3 + $0x280] sm:$0xf] }
 0x428   :  { %v10119_v24 = vld [vmem:[%s17376_s3 + $0x9c0] sm:$0xf] }
 0x429   :  { %v14044_v31 = vadd.f32 %v3396_v12, %v3228_v11  ;;  %v11553_v12 = vld [vmem:[%s17376_s3 + $0x9dc] sm:$0xf0] }
 0x42a   :  { %6661 = vmatpush.bf16.msra.mxu0 %v8872_v2  ;;  %v11545_v29 = vld [vmem:[%s17376_s3 + $0x99c] sm:$0xf0] }
 0x42b   :  { %v9447_v59 = vld [vmem:[%s17376_s3 + $0x480] sm:$0xf] }
 0x42e   :  { %v14046_v58 = vpop.f32.mrf.mxu2  ;;  %v2894_v30 = vpop.f32.mrf.mxu0 }
 0x42f   :  { %v14048_v40 = vpop.f32.mrf.mxu3  ;;  %v3063_v18 = vpop.f32.mrf.mxu1  ;;  %v2895_v49 = vadd.f32 %v2894_v30, %v17421_v6  ;;  %v9192_v30 = vor.u32 %v11321_v27, %v9191_v55  ;;  %v9160_v6 = vor.u32 %v11313_v53, %v9159_v21  ;;  %v11385_v27 = vld [vmem:[%s17376_s3 + $0x49c] sm:$0xf0] }
 0x430   :  { %v10375_v21 = vld [vmem:[%s17376_s3 + $0xbc0] sm:$0xf] }
 0x431   :  { %v3064_v42 = vadd.f32 %v3063_v18, %v2895_v49  ;;  %v10120_v18 = vor.u32 %v11553_v12, %v10119_v24  ;;  %6672 = vmatpush.bf16.msra.mxu1 %v9192_v30  ;;  %v10087_v49 = vld [vmem:[%s17376_s3 + $0x980] sm:$0xf]  ;;  %v9448_v30 = vor.u32 %v11385_v27, %v9447_v59 }
 0x432   :  { %v10055_v24 = vld [vmem:[%s17376_s3 + $0x940] sm:$0xf] }
 0x433   :  { %6706 = vmatpush.bf16.msrb.mxu0 %v10120_v18  ;;  %v11537_v12 = vld [vmem:[%s17376_s3 + $0x95c] sm:$0xf0]  ;;  %6685 = vmatpush.bf16.msra.mxu2 %v9448_v30 }
 0x434   :  { %v10056_v18 = vor.u32 %v11537_v12, %v10055_v24  ;;  %v11617_v53 = vld [vmem:[%s17376_s3 + $0xbdc] sm:$0xf0] }
 0x435   :  { %6673 = vmatpush.bf16.msra.mxu1 %v9160_v6 }
 0x436   :  { %v3232_v15 = vpop.f32.mrf.mxu2  ;;  %v14063_v60 = vpop.f32.mrf.mxu0 }
 0x437   :  { %v3401_v39 = vpop.f32.mrf.mxu3  ;;  %v3233_v32 = vadd.f32 %v3232_v15, %v3064_v42  ;;  %v14065_v44 = vpop.f32.mrf.mxu1  ;;  %v10088_v42 = vor.u32 %v11545_v29, %v10087_v49  ;;  %v10376_v49 = vor.u32 %v11617_v53, %v10375_v21  ;;  %v9415_v29 = vld [vmem:[%s17376_s3 + $0x440] sm:$0xf] }
 0x438   :  { %v11369_v21 = vld [vmem:[%s17376_s3 + $0x41c] sm:$0xf0] }
 0x439   :  { %v14085_v11 = vadd.f32 %v3401_v39, %v3233_v32  ;;  %6707 = vmatpush.bf16.msrb.mxu0 %v10088_v42  ;;  %v9127_v39 = vld [vmem:[%s17376_s3 + $0x200] sm:$0xf] }
 0x43a   :  { %v11305_v32 = vld [vmem:[%s17376_s3 + $0x21c] sm:$0xf0] }
 0x43b   :  { %v9128_v2 = vor.u32 %v11305_v32, %v9127_v39  ;;  %v11377_v42 = vld [vmem:[%s17376_s3 + $0x45c] sm:$0xf0] }
 0x43c   :  { %v10023_v39 = vld [vmem:[%s17376_s3 + $0x900] sm:$0xf] }
 0x43d   :  { %6674 = vmatpush.bf16.msra.mxu1 %v9128_v2  ;;  %6708 = vmatpush.bf16.msrb.mxu0 %v10056_v18  ;;  %v10343_v32 = vld [vmem:[%s17376_s3 + $0xb80] sm:$0xf] }
 0x43e   :  { %v14099_v1 = vpop.f32.mrf.mxu2  ;;  %v2899_v34 = vpop.f32.mrf.mxu0  ;;  %v9383_v18 = vld [vmem:[%s17376_s3 + $0x400] sm:$0xf] }
 0x43f   :  { %v14101_v16 = vpop.f32.mrf.mxu3  ;;  %v3068_v15 = vpop.f32.mrf.mxu1  ;;  %v2900_v55 = vadd.f32 %v2899_v34, %v17422_v7  ;;  %v9416_v34 = vor.u32 %v11377_v42, %v9415_v29  ;;  %v11609_v7 = vld [vmem:[%s17376_s3 + $0xb9c] sm:$0xf0] }
 0x440   :  { %v10344_v27 = vor.u32 %v11609_v7, %v10343_v32  ;;  %v9703_v53 = vld [vmem:[%s17376_s3 + $0x680] sm:$0xf] }
 0x441   :  { %v3069_v6 = vadd.f32 %v3068_v15, %v2900_v55  ;;  %6719 = vmatpush.bf16.msrb.mxu1 %v10376_v49  ;;  %v11529_v15 = vld [vmem:[%s17376_s3 + $0x91c] sm:$0xf0]  ;;  %6686 = vmatpush.bf16.msra.mxu2 %v9416_v34 }
 0x442   :  { %v10024_v59 = vor.u32 %v11529_v15, %v10023_v39  ;;  %v11449_v49 = vld [vmem:[%s17376_s3 + $0x69c] sm:$0xf0] }
 0x443   :  { %v9991_v29 = vld [vmem:[%s17376_s3 + $0x8c0] sm:$0xf]  ;;  %v9704_v39 = vor.u32 %v11449_v49, %v9703_v53 }
 0x444   :  { %6709 = vmatpush.bf16.msrb.mxu0 %v10024_v59  ;;  %v11521_v42 = vld [vmem:[%s17376_s3 + $0x8dc] sm:$0xf0] }
 0x445   :  { %6720 = vmatpush.bf16.msrb.mxu1 %v10344_v27  ;;  %v9992_v15 = vor.u32 %v11521_v42, %v9991_v29  ;;  %v10311_v32 = vld [vmem:[%s17376_s3 + $0xb40] sm:$0xf]  ;;  %6698 = vmatpush.bf16.msra.mxu3 %v9704_v39 }
 0x446   :  { %v3237_v55 = vpop.f32.mrf.mxu2  ;;  %v14146_v12 = vpop.f32.mrf.mxu0  ;;  %v11601_v59 = vld [vmem:[%s17376_s3 + $0xb5c] sm:$0xf0] }
 0x447   :  { %v3406_v2 = vpop.f32.mrf.mxu3  ;;  %v3238_v24 = vadd.f32 %v3237_v55, %v3069_v6  ;;  %v14148_v30 = vpop.f32.mrf.mxu1  ;;  %v9384_v6 = vor.u32 %v11369_v21, %v9383_v18  ;;  %v10631_v7 = vld [vmem:[%s17376_s3 + $0xdc0] sm:$0xf]  ;;  %v10312_v55 = vor.u32 %v11601_v59, %v10311_v32 }
 0x448   :  { %v11441_v18 = vld [vmem:[%s17376_s3 + $0x65c] sm:$0xf0]  ;;  %6710 = vmatpush.bf16.msrb.mxu0 %v9992_v15 }
 0x449   :  { %v14168_v34 = vadd.f32 %v3406_v2, %v3238_v24  ;;  %v11681_v2 = vld [vmem:[%s17376_s3 + $0xddc] sm:$0xf0]  ;;  %6687 = vmatpush.bf16.msra.mxu2 %v9384_v6  ;;  %6721 = vmatpush.bf16.msrb.mxu1 %v10312_v55 }
 0x44a   :  { %v10632_v27 = vor.u32 %v11681_v2, %v10631_v7  ;;  %v9671_v24 = vld [vmem:[%s17376_s3 + $0x640] sm:$0xf] }
 0x44b   :  { %v9672_v21 = vor.u32 %v11441_v18, %v9671_v24  ;;  %v9959_v53 = vld [vmem:[%s17376_s3 + $0x880] sm:$0xf] }
 0x44c   :  { %v11513_v6 = vld [vmem:[%s17376_s3 + $0x89c] sm:$0xf0] }
 0x44d   :  { %v10279_v49 = vld [vmem:[%s17376_s3 + $0xb00] sm:$0xf]  ;;  %6732 = vmatpush.bf16.msrb.mxu2 %v10632_v27  ;;  %v9960_v29 = vor.u32 %v11513_v6, %v9959_v53  ;;  %6699 = vmatpush.bf16.msra.mxu3 %v9672_v21  ;;  %v17423_v53 = vld [vmem:[#allocation19_spill] sm:$0xff] }
 0x44e   :  { %v11593_v42 = vld [vmem:[%s17376_s3 + $0xb1c] sm:$0xf0]  ;;  %v14206_v32 = vpop.f32.mrf.mxu2  ;;  %v2904_v2 = vpop.f32.mrf.mxu0 }
 0x44f   :  { %v10599_v39 = vld [vmem:[%s17376_s3 + $0xd80] sm:$0xf]  ;;  %v14208_v59 = vpop.f32.mrf.mxu3  ;;  %v10280_v7 = vor.u32 %v11593_v42, %v10279_v49  ;;  %v3073_v27 = vpop.f32.mrf.mxu1  ;;  %v2905_v6 = vadd.f32 %v2904_v2, %v17423_v53  ;;  %6711 = vmatpush.bf16.msrb.mxu0 %v9960_v29 }
 0x450   :  { %v11673_v15 = vld [vmem:[%s17376_s3 + $0xd9c] sm:$0xf0] }
 0x451   :  { %v10600_v55 = vor.u32 %v11673_v15, %v10599_v39  ;;  %v9639_v24 = vld [vmem:[%s17376_s3 + $0x600] sm:$0xf]  ;;  %6722 = vmatpush.bf16.msrb.mxu1 %v10280_v7  ;;  %v3074_v2 = vadd.f32 %v3073_v27, %v2905_v6 }
 0x452   :  { %v11433_v18 = vld [vmem:[%s17376_s3 + $0x61c] sm:$0xf0] }
 0x453   :  { %v9640_v3 = vor.u32 %v11433_v18, %v9639_v24  ;;  %v9927_v49 = vld [vmem:[%s17376_s3 + $0x840] sm:$0xf]  ;;  %6733 = vmatpush.bf16.msrb.mxu2 %v10600_v55 }
 0x454   :  { %v11505_v21 = vld [vmem:[%s17376_s3 + $0x85c] sm:$0xf0] }
 0x455   :  { %v10247_v42 = vld [vmem:[%s17376_s3 + $0xac0] sm:$0xf]  ;;  %v9928_v39 = vor.u32 %v11505_v21, %v9927_v49  ;;  %6700 = vmatpush.bf16.msra.mxu3 %v9640_v3 }
 0x456   :  { %v11585_v29 = vld [vmem:[%s17376_s3 + $0xadc] sm:$0xf0] }
 0x457   :  { %v10567_v15 = vld [vmem:[%s17376_s3 + $0xd40] sm:$0xf]  ;;  %v10248_v24 = vor.u32 %v11585_v29, %v10247_v42  ;;  %6712 = vmatpush.bf16.msrb.mxu0 %v9928_v39 }
 0x458   :  { %v11665_v7 = vld [vmem:[%s17376_s3 + $0xd5c] sm:$0xf0] }
 0x459   :  { %v10568_v18 = vor.u32 %v11665_v7, %v10567_v15  ;;  %v10887_v55 = vld [vmem:[%s17376_s3 + $0xfc0] sm:$0xf]  ;;  %6723 = vmatpush.bf16.msrb.mxu1 %v10248_v24  ;;  %v3242_v15 = vpop.f32.mrf.mxu2  ;;  %v3411_v7 = vpop.f32.mrf.mxu3 }
 0x45a   :  { %v11745_v53 = vld [vmem:[%s17376_s3 + $0xfdc] sm:$0xf0] }
 0x45b   :  { %v10888_v49 = vor.u32 %v11745_v53, %v10887_v55  ;;  %v9895_v21 = vld [vmem:[%s17376_s3 + $0x800] sm:$0xf]  ;;  %6734 = vmatpush.bf16.msrb.mxu2 %v10568_v18 }
 0x45c   :  { %v11497_v27 = vld [vmem:[%s17376_s3 + $0x81c] sm:$0xf0] }
 0x45d   :  { %v10215_v6 = vld [vmem:[%s17376_s3 + $0xa80] sm:$0xf]  ;;  %6745 = vmatpush.bf16.msrb.mxu3 %v10888_v49  ;;  %v9896_v42 = vor.u32 %v11497_v27, %v9895_v21  ;;  %v3243_v49 = vadd.f32 %v3242_v15, %v3074_v2  ;;  %v14265_v21 = vpop.f32.mrf.mxu0  ;;  %v14267_v27 = vpop.f32.mrf.mxu1 }
 0x45e   :  { %v11577_v3 = vld [vmem:[%s17376_s3 + $0xa9c] sm:$0xf0] }
 0x45f   :  { %v10535_v39 = vld [vmem:[%s17376_s3 + $0xd00] sm:$0xf]  ;;  %v10216_v24 = vor.u32 %v11577_v3, %v10215_v6  ;;  %6713 = vmatpush.bf16.msrb.mxu0 %v9896_v42  ;;  %v14278_v2 = vadd.f32 %v3411_v7, %v3243_v49 }
 0x460   :  { %v11657_v29 = vld [vmem:[%s17376_s3 + $0xd1c] sm:$0xf0] }
 0x461   :  { %v10536_v55 = vor.u32 %v11657_v29, %v10535_v39  ;;  %v10855_v18 = vld [vmem:[%s17376_s3 + $0xf80] sm:$0xf]  ;;  %6724 = vmatpush.bf16.msrb.mxu1 %v10216_v24 }
 0x462   :  { %v11737_v53 = vld [vmem:[%s17376_s3 + $0xf9c] sm:$0xf0] }
 0x463   :  { %v10856_v45 = vor.u32 %v11737_v53, %v10855_v18  ;;  %v10183_v6 = vld [vmem:[%s17376_s3 + $0xa40] sm:$0xf]  ;;  %6735 = vmatpush.bf16.msrb.mxu2 %v10536_v55 }
 0x464   :  { %v11569_v3 = vld [vmem:[%s17376_s3 + $0xa5c] sm:$0xf0] }
 0x465   :  { %v10503_v39 = vld [vmem:[%s17376_s3 + $0xcc0] sm:$0xf]  ;;  %6746 = vmatpush.bf16.msrb.mxu3 %v10856_v45  ;;  %v10184_v29 = vor.u32 %v11569_v3, %v10183_v6 }
 0x466   :  { %v11649_v42 = vld [vmem:[%s17376_s3 + $0xcdc] sm:$0xf0] }
 0x467   :  { %v10823_v15 = vld [vmem:[%s17376_s3 + $0xf40] sm:$0xf]  ;;  %v10504_v18 = vor.u32 %v11649_v42, %v10503_v39  ;;  %6725 = vmatpush.bf16.msrb.mxu1 %v10184_v29  ;;  %v14307_v29 = vpop.f32.mrf.mxu2  ;;  %v14309_v42 = vpop.f32.mrf.mxu3 }
 0x468   :  { %v11729_v24 = vld [vmem:[%s17376_s3 + $0xf5c] sm:$0xf0] }
 0x469   :  { %v10824_v53 = vor.u32 %v11729_v24, %v10823_v15  ;;  %v10151_v45 = vld [vmem:[%s17376_s3 + $0xa00] sm:$0xf]  ;;  %6736 = vmatpush.bf16.msrb.mxu2 %v10504_v18  ;;  %v2909_v18 = vpop.f32.mrf.mxu0 }
 0x46a   :  { %v11561_v7 = vld [vmem:[%s17376_s3 + $0xa1c] sm:$0xf0]  ;;  %v2910_v61 = vadd.f32 %v2909_v18, %v17424_v19 }
 0x46b   :  { %v10471_v55 = vld [vmem:[%s17376_s3 + $0xc80] sm:$0xf]  ;;  %6747 = vmatpush.bf16.msrb.mxu3 %v10824_v53  ;;  %v10152_v49 = vor.u32 %v11561_v7, %v10151_v45  ;;  %v3078_v53 = vpop.f32.mrf.mxu1 }
 0x46c   :  { %v11641_v6 = vld [vmem:[%s17376_s3 + $0xc9c] sm:$0xf0] }
 0x46d   :  { %v10791_v3 = vld [vmem:[%s17376_s3 + $0xf00] sm:$0xf]  ;;  %v10472_v15 = vor.u32 %v11641_v6, %v10471_v55  ;;  %6726 = vmatpush.bf16.msrb.mxu1 %v10152_v49 }
 0x46e   :  { %v11721_v39 = vld [vmem:[%s17376_s3 + $0xf1c] sm:$0xf0] }
 0x46f   :  { %v10792_v24 = vor.u32 %v11721_v39, %v10791_v3  ;;  %v10439_v45 = vld [vmem:[%s17376_s3 + $0xc40] sm:$0xf]  ;;  %6737 = vmatpush.bf16.msrb.mxu2 %v10472_v15  ;;  %v3079_v15 = vadd.f32 %v3078_v53, %v2910_v61  ;;  %v3416_v18 = vpop.f32.mrf.mxu3 }
 0x470   :  { %v11633_v7 = vld [vmem:[%s17376_s3 + $0xc5c] sm:$0xf0] }
 0x471   :  { %6748 = vmatpush.bf16.msrb.mxu3 %v10792_v24  ;;  %v10440_v55 = vor.u32 %v11633_v7, %v10439_v45  ;;  %v11713_v49 = vld [vmem:[%s17376_s3 + $0xedc] sm:$0xf0]  ;;  %v10408_v24 = vor.u32 %v11625_v28, %v10407_v36 }
 0x472   :  { %v10760_v6 = vor.u32 %v11713_v49, %v10759_v13  ;;  %v17425_v3 = vld [vmem:[#allocation14_spill] sm:$0xff]  ;;  %v2911_v49 = vpop.f32.mrf.mxu0 }
 0x473   :  { %v2892_v39 = vadd.f32 %v14040_v62, %v17425_v3  ;;  %v10727_v19 = vld [vmem:[%s17376_s3 + $0xe80] sm:$0xf]  ;;  %6738 = vmatpush.bf16.msrb.mxu2 %v10440_v55  ;;  %v3247_v62 = vpop.f32.mrf.mxu2  ;;  %v3080_v3 = vpop.f32.mrf.mxu1 }
 0x474   :  { %v11705_v13 = vld [vmem:[%s17376_s3 + $0xe9c] sm:$0xf0]  ;;  %v3248_v7 = vadd.f32 %v3247_v62, %v3079_v15 }
 0x475   :  { %6749 = vmatpush.bf16.msrb.mxu3 %v10760_v6  ;;  %v10728_v45 = vor.u32 %v11705_v13, %v10727_v19  ;;  %v3061_v35 = vadd.f32 %v14042_v37, %v2892_v39  ;;  %v11697_v28 = vld [vmem:[%s17376_s3 + $0xe5c] sm:$0xf0]  ;;  %v3484_v6 = vmax.f32 %v14044_v31, 0.0 }
 0x476   :  { %v3417_v36 = vadd.f32 %v3416_v18, %v3248_v7  ;;  %v17426_v61 = vld [vmem:[#allocation22_spill] sm:$0xff]  ;;  %v10696_v55 = vor.u32 %v11697_v28, %v10695_v8 }
 0x477   :  { %v2912_v53 = vadd.f32 %v2911_v49, %v17426_v61  ;;  %6739 = vmatpush.bf16.msrb.mxu2 %v10408_v24  ;;  %v3230_v19 = vadd.f32 %v14046_v58, %v3061_v35  ;;  %v10663_v37 = vld [vmem:[%s17376_s3 + $0xe00] sm:$0xf]  ;;  %v11293_v49 = vld [vmem:[%s17376_s3 + $0x1c4] sm:$0xf] }
 0x478   :  { %v3492_v15 = vmax.f32 %v3417_v36, 0.0  ;;  %v11689_v39 = vld [vmem:[%s17376_s3 + $0xe1c] sm:$0xf0]  ;;  %v9097_v28 = vld [vmem:[%s17376_s3 + $0x1e0] sm:$0xf0] }
 0x479   :  { %6750 = vmatpush.bf16.msrb.mxu3 %v10728_v45  ;;  %v3081_v62 = vadd.f32 %v3080_v3, %v2912_v53  ;;  %v10664_v18 = vor.u32 %v11689_v39, %v10663_v37  ;;  %v3418_v45 = vpop.f32.mrf.mxu3  ;;  %v3399_v8 = vadd.f32 %v14048_v40, %v3230_v19  ;;  %v17427_v3 = vmax.f32 %v13330_v33, %v13626_v9  ;;  %v17428_v53 = vld [vmem:[#allocation23_spill] sm:$0xff]  ;;  %v9065_v37 = vld [vmem:[%s17376_s3 + $0x1a0] sm:$0xf0]  ;;  %v17429_v39 = vld [vmem:[#allocation16_spill] sm:$0xff] }
 0x47a   :  { %v3524_v13 = vmax.f32 %v3484_v6, %v3492_v15  ;;  %v2914_v58 = vpop.f32.mrf.mxu0  ;;  %v11285_v15 = vld [vmem:[%s17376_s3 + $0x184] sm:$0xf]  ;;  %v2897_v33 = vadd.f32 %v14063_v60, %v17429_v39 }
 0x47b   :  { %v3249_v24 = vpop.f32.mrf.mxu2  ;;  %v3083_v7 = vpop.f32.mrf.mxu1  ;;  %v2915_v40 = vadd.f32 %v2914_v58, %v17428_v53  ;;  %v9033_v60 = vld [vmem:[%s17376_s3 + $0x160] sm:$0xf0] }
 0x47c   :  { %v3540_v31 = vmax.f32 %v13938_v48, %v3524_v13  ;;  %v3250_v35 = vadd.f32 %v3249_v24, %v3081_v62  ;;  %v9100_v48 = vor.u32 %v11293_v49, %v9097_v28  ;;  %v9068_v24 = vor.u32 %v11285_v15, %v9065_v37  ;;  %v9353_v49 = vld [vmem:[%s17376_s3 + $0x3e0] sm:$0xf0] }
 0x47d   :  { %6751 = vmatpush.bf16.msrb.mxu3 %v10696_v55  ;;  %v3485_v55 = vmax.f32 %v3399_v8, 0.0  ;;  %v3084_v13 = vadd.f32 %v3083_v7, %v2915_v40  ;;  %v11357_v7 = vld [vmem:[%s17376_s3 + $0x3c4] sm:$0xf]  ;;  %v3066_v28 = vadd.f32 %v14065_v44, %v2897_v33  ;;  %v3486_v44 = vmax.f32 %v14085_v11, 0.0 }
 0x47e   :  { %v3548_v36 = vmax.f32 %v17427_v3, %v3540_v31  ;;  %v3419_v61 = vadd.f32 %v3418_v45, %v3250_v35  ;;  %v11277_v45 = vld [vmem:[%s17376_s3 + $0x144] sm:$0xf] }
 0x47f   :  { %v9036_v40 = vor.u32 %v11277_v45, %v9033_v60  ;;  %v3235_v15 = vadd.f32 %v14099_v1, %v3066_v28  ;;  %v11349_v37 = vld [vmem:[%s17376_s3 + $0x384] sm:$0xf] }
 0x480   :  { %v14366_v6 = vpack.c.bf16 %v3548_v36, %v3548_v36  ;;  %v3493_v19 = vmax.f32 %v3419_v61, 0.0  ;;  %v17431_v61 = vld [vmem:[#allocation24_spill] sm:$0xff]  ;;  %v9321_v39 = vld [vmem:[%s17376_s3 + $0x3a0] sm:$0xf0] }
 0x481   :  { %6752 = vmatpush.bf16.msrb.mxu3 %v10664_v18  ;;  %v3421_v18 = vpop.f32.mrf.mxu3  ;;  %v9324_v1 = vor.u32 %v11349_v37, %v9321_v39  ;;  %v11341_v60 = vld [vmem:[%s17376_s3 + $0x344] sm:$0xf] }
 0x482   :  { %v3525_v9 = vmax.f32 %v3485_v55, %v3493_v19  ;;  %6662 = vmatmul.bf16.vlgmr.msra.gmra.mxu0 %v14366_v6  ;;  %v2916_v35 = vpop.f32.mrf.mxu0  ;;  %v11269_v55 = vld [vmem:[%s17376_s3 + $0x104] sm:$0xf] }
 0x483   :  { %v3252_v62 = vpop.f32.mrf.mxu2  ;;  %6758 = vmatpush.bf16.msra.mxu0 %v9100_v48  ;;  %v3085_v58 = vpop.f32.mrf.mxu1  ;;  %v2917_v53 = vadd.f32 %v2916_v35, %v17431_v61  ;;  %v9356_v48 = vor.u32 %v11357_v7, %v9353_v49  ;;  %v9001_v19 = vld [vmem:[%s17376_s3 + $0x120] sm:$0xf0]  ;;  %v17434_v61 = vld [vmem:[#allocation25_spill] sm:$0xff] }
 0x484   :  { %v3541_v8 = vmax.f32 %v13942_v23, %v3525_v9  ;;  %v3253_v31 = vadd.f32 %v3252_v62, %v3084_v13  ;;  %v17430_v23 = vmax.f32 %v13334_v52, %v13632_v41  ;;  %v9004_v11 = vor.u32 %v11269_v55, %v9001_v19  ;;  %v9289_v7 = vld [vmem:[%s17376_s3 + $0x360] sm:$0xf0] }
 0x485   :  { %v3086_v9 = vadd.f32 %v3085_v58, %v2917_v53  ;;  %v8969_v58 = vld [vmem:[%s17376_s3 + $0xe0] sm:$0xf0] }
 0x486   :  { %v3549_v3 = vmax.f32 %v17430_v23, %v3541_v8  ;;  %v3422_v36 = vadd.f32 %v3421_v18, %v3253_v31  ;;  %v11261_v18 = vld [vmem:[%s17376_s3 + $0xc4] sm:$0xf]  ;;  %v17433_v23 = vmax.f32 %v13362_v38, %v13662_v0 }
 0x487   :  { %6759 = vmatpush.bf16.msra.mxu0 %v9068_v24  ;;  %v3404_v24 = vadd.f32 %v14101_v16, %v3235_v15  ;;  %v17432_v49 = vld [vmem:[#allocation18_spill] sm:$0xff] }
 0x488   :  { %v14403_v52 = vpack.c.bf16 %v3549_v3, %v3549_v3  ;;  %v3494_v41 = vmax.f32 %v3422_v36, 0.0  ;;  %v2902_v16 = vadd.f32 %v14146_v12, %v17432_v49  ;;  %v9609_v28 = vld [vmem:[%s17376_s3 + $0x5e0] sm:$0xf0] }
 0x489   :  { %v3423_v62 = vpop.f32.mrf.mxu3  ;;  %v11253_v12 = vld [vmem:[%s17376_s3 + $0x84] sm:$0xf]  ;;  %v3487_v19 = vmax.f32 %v3404_v24, 0.0 }
 0x48a   :  { %v3526_v33 = vmax.f32 %v3486_v44, %v3494_v41  ;;  %6675 = vmatmul.bf16.vlgmr.msra.gmra.mxu1 %v14403_v52  ;;  %v2919_v31 = vpop.f32.mrf.mxu0  ;;  %v8937_v55 = vld [vmem:[%s17376_s3 + $0xa0] sm:$0xf0]  ;;  %v3071_v37 = vadd.f32 %v14148_v30, %v2902_v16 }
 0x48b   :  { %v3254_v13 = vpop.f32.mrf.mxu2  ;;  %6760 = vmatpush.bf16.msra.mxu0 %v9036_v40  ;;  %6771 = vmatpush.bf16.msra.mxu1 %v9356_v48  ;;  %v3088_v35 = vpop.f32.mrf.mxu1  ;;  %v2920_v53 = vadd.f32 %v2919_v31, %v17434_v61  ;;  %v8972_v40 = vor.u32 %v11261_v18, %v8969_v58  ;;  %v9292_v48 = vor.u32 %v11341_v60, %v9289_v7  ;;  %v11333_v15 = vld [vmem:[%s17376_s3 + $0x304] sm:$0xf] }
 0x48c   :  { %v3542_v45 = vmax.f32 %v13970_v50, %v3526_v33  ;;  %v3255_v8 = vadd.f32 %v3254_v13, %v3086_v9  ;;  %v11421_v50 = vld [vmem:[%s17376_s3 + $0x5c4] sm:$0xf]  ;;  %v8940_v18 = vor.u32 %v11253_v12, %v8937_v55 }
 0x48d   :  { %v9612_v0 = vor.u32 %v11421_v50, %v9609_v28  ;;  %v9257_v41 = vld [vmem:[%s17376_s3 + $0x320] sm:$0xf0]  ;;  %v3089_v13 = vadd.f32 %v3088_v35, %v2920_v53  ;;  %v3488_v28 = vmax.f32 %v14168_v34, 0.0 }
 0x48e   :  { %v3550_v3 = vmax.f32 %v17433_v23, %v3542_v45  ;;  %v3424_v36 = vadd.f32 %v3423_v62, %v3255_v8  ;;  %v11413_v39 = vld [vmem:[%s17376_s3 + $0x584] sm:$0xf]  ;;  %v3240_v62 = vadd.f32 %v14206_v32, %v3071_v37  ;;  %v9260_v30 = vor.u32 %v11333_v15, %v9257_v41 }
 0x48f   :  { %6761 = vmatpush.bf16.msra.mxu0 %v9004_v11  ;;  %6772 = vmatpush.bf16.msra.mxu1 %v9324_v1  ;;  %v9577_v33 = vld [vmem:[%s17376_s3 + $0x5a0] sm:$0xf0]  ;;  %v17435_v23 = vmax.f32 %v13366_v57, %v13668_v51 }
 0x490   :  { %v14444_v44 = vpack.c.bf16 %v3550_v3, %v3550_v3  ;;  %v3495_v38 = vmax.f32 %v3424_v36, 0.0  ;;  %v11245_v24 = vld [vmem:[%s17376_s3 + $0x44] sm:$0xf]  ;;  %v9580_v32 = vor.u32 %v11413_v39, %v9577_v33 }
 0x491   :  { %v3426_v1 = vpop.f32.mrf.mxu3  ;;  %v8905_v45 = vld [vmem:[%s17376_s3 + $0x60] sm:$0xf0] }
 0x492   :  { %v3527_v9 = vmax.f32 %v3487_v19, %v3495_v38  ;;  %6688 = vmatmul.bf16.vlgmr.msra.gmra.mxu2 %v14444_v44  ;;  %v2921_v35 = vpop.f32.mrf.mxu0  ;;  %v11325_v58 = vld [vmem:[%s17376_s3 + $0x2c4] sm:$0xf] }
 0x493   :  { %v3257_v11 = vpop.f32.mrf.mxu2  ;;  %6762 = vmatpush.bf16.msra.mxu0 %v8972_v40  ;;  %6773 = vmatpush.bf16.msra.mxu1 %v9292_v48  ;;  %v9225_v60 = vld [vmem:[%s17376_s3 + $0x2e0] sm:$0xf0]  ;;  %v3090_v49 = vpop.f32.mrf.mxu1  ;;  %v2922_v61 = vadd.f32 %v2921_v35, %v13153_v17  ;;  %v14495_v40 = vadd.f32 %v14208_v59, %v3240_v62  ;;  %v8908_v48 = vor.u32 %v11245_v24, %v8905_v45 }
 0x494   :  { %v3543_v8 = vmax.f32 %v13974_v5, %v3527_v9  ;;  %v3258_v31 = vadd.f32 %v3257_v11, %v3089_v13  ;;  %6784 = vmatpush.bf16.msra.mxu2 %v9612_v0  ;;  %v11405_v7 = vld [vmem:[%s17376_s3 + $0x544] sm:$0xf]  ;;  %v9228_v12 = vor.u32 %v11325_v58, %v9225_v60 }
 0x495   :  { %v9545_v5 = vld [vmem:[%s17376_s3 + $0x560] sm:$0xf0]  ;;  %v3091_v39 = vadd.f32 %v3090_v49, %v2922_v61  ;;  %v3489_v33 = vmax.f32 %v14495_v40, 0.0  ;;  %v17436_v49 = vld [vmem:[#allocation20_spill] sm:$0xff] }
 0x496   :  { %v11485_v16 = vld [vmem:[%s17376_s3 + $0x7c4] sm:$0xf]  ;;  %v3551_v3 = vmax.f32 %v17435_v23, %v3543_v8  ;;  %v3427_v36 = vadd.f32 %v3426_v1, %v3258_v31  ;;  %v9548_v55 = vor.u32 %v11405_v7, %v9545_v5  ;;  %v2907_v5 = vadd.f32 %v14265_v21, %v17436_v49 }
 0x497   :  { %v9865_v50 = vld [vmem:[%s17376_s3 + $0x7e0] sm:$0xf0]  ;;  %6763 = vmatpush.bf16.msra.mxu0 %v8940_v18  ;;  %6774 = vmatpush.bf16.msra.mxu1 %v9260_v30 }
 0x498   :  { %v11237_v53 = vld [vmem:[%s17376_s3 + $0x4] sm:$0xf]  ;;  %v14506_v51 = vpack.c.bf16 %v3551_v3, %v3551_v3  ;;  %v3496_v59 = vmax.f32 %v3427_v36, 0.0  ;;  %6785 = vmatpush.bf16.msra.mxu2 %v9580_v32  ;;  %v9868_v19 = vor.u32 %v11485_v16, %v9865_v50  ;;  %v17437_v16 = vmax.f32 %v13394_v56, %v13698_v43 }
 0x499   :  { %v8873_v34 = vld [vmem:[%s17376_s3 + $0x20] sm:$0xf0]  ;;  %v3428_v13 = vpop.f32.mrf.mxu3 }
 0x49a   :  { %v11317_v57 = vld [vmem:[%s17376_s3 + $0x284] sm:$0xf]  ;;  %v3528_v37 = vmax.f32 %v3488_v28, %v3496_v59  ;;  %6701 = vmatmul.bf16.vlgmr.msra.gmra.mxu3 %v14506_v51  ;;  %v8876_v62 = vor.u32 %v11237_v53, %v8873_v34  ;;  %v2924_v8 = vpop.f32.mrf.mxu0 }
 0x49b   :  { %v9193_v17 = vld [vmem:[%s17376_s3 + $0x2a0] sm:$0xf0]  ;;  %v3259_v9 = vpop.f32.mrf.mxu2  ;;  %6764 = vmatpush.bf16.msra.mxu0 %v8908_v48  ;;  %6775 = vmatpush.bf16.msra.mxu1 %v9228_v12  ;;  %v2925_v23 = vadd.f32 %v2924_v8, %v13155_v25  ;;  %v3093_v36 = vpop.f32.mrf.mxu1 }
 0x49c   :  { %v11397_v38 = vld [vmem:[%s17376_s3 + $0x504] sm:$0xf]  ;;  %v9196_v11 = vor.u32 %v11317_v57, %v9193_v17  ;;  %v3544_v24 = vmax.f32 %v14002_v10, %v3528_v37  ;;  %v3260_v45 = vadd.f32 %v3259_v9, %v3091_v39  ;;  %6786 = vmatpush.bf16.msra.mxu2 %v9548_v55  ;;  %6797 = vmatpush.bf16.msra.mxu3 %v9868_v19 }
 0x49d   :  { %v9513_v0 = vld [vmem:[%s17376_s3 + $0x520] sm:$0xf0]  ;;  %v3076_v55 = vadd.f32 %v14267_v27, %v2907_v5 }
 0x49e   :  { %v11477_v15 = vld [vmem:[%s17376_s3 + $0x784] sm:$0xf]  ;;  %v9516_v1 = vor.u32 %v11397_v38, %v9513_v0  ;;  %v3552_v50 = vmax.f32 %v17437_v16, %v3544_v24  ;;  %v3429_v28 = vadd.f32 %v3428_v13, %v3260_v45  ;;  %v3094_v38 = vadd.f32 %v3093_v36, %v2925_v23 }
 0x49f   :  { %v9833_v41 = vld [vmem:[%s17376_s3 + $0x7a0] sm:$0xf0]  ;;  %6765 = vmatpush.bf16.msra.mxu0 %v8876_v62  ;;  %6776 = vmatpush.bf16.msra.mxu1 %v9196_v11  ;;  %v3490_v0 = vmax.f32 %v14278_v2, 0.0  ;;  %v3245_v8 = vadd.f32 %v14307_v29, %v3076_v55 }
 0x4a0   :  { %v11549_v18 = vld [vmem:[%s17376_s3 + $0x9c4] sm:$0xf]  ;;  %v9836_v31 = vor.u32 %v11477_v15, %v9833_v41  ;;  %v14565_v43 = vpack.c.bf16 %v3552_v50, %v3552_v50  ;;  %v3497_v40 = vmax.f32 %v3429_v28, 0.0  ;;  %6787 = vmatpush.bf16.msra.mxu2 %v9516_v1 }
 0x4a1   :  { %v10121_v30 = vld [vmem:[%s17376_s3 + $0x9e0] sm:$0xf0]  ;;  %v3431_v41 = vpop.f32.mrf.mxu3 }
 0x4a2   :  { %v11309_v35 = vld [vmem:[%s17376_s3 + $0x244] sm:$0xf]  ;;  %v10124_v61 = vor.u32 %v11549_v18, %v10121_v30  ;;  %6798 = vmatpush.bf16.msra.mxu3 %v9836_v31  ;;  %v3529_v19 = vmax.f32 %v3489_v33, %v3497_v40  ;;  %6714 = vmatmul.bf16.vlgmr.msrb.gmra.mxu0 %v14565_v43  ;;  %v2926_v11 = vpop.f32.mrf.mxu0  ;;  %v17438_v31 = vmax.f32 %v13398_v54, %v13704_v22 }
 0x4a3   :  { %v9161_v32 = vld [vmem:[%s17376_s3 + $0x260] sm:$0xf0]  ;;  %v3262_v15 = vpop.f32.mrf.mxu2  ;;  %v3095_v23 = vpop.f32.mrf.mxu1 }
 0x4a4   :  { %v11389_v58 = vld [vmem:[%s17376_s3 + $0x4c4] sm:$0xf]  ;;  %v9164_v53 = vor.u32 %v11309_v35, %v9161_v32  ;;  %6810 = vmatpush.bf16.msrb.mxu0 %v10124_v61  ;;  %v3545_v33 = vmax.f32 %v14006_v4, %v3529_v19  ;;  %v3263_v62 = vadd.f32 %v3262_v15, %v3094_v38  ;;  %v3414_v61 = vadd.f32 %v14309_v42, %v3245_v8 }
 0x4a5   :  { %v9481_v10 = vld [vmem:[%s17376_s3 + $0x4e0] sm:$0xf0] }
 0x4a6   :  { %v11469_v60 = vld [vmem:[%s17376_s3 + $0x744] sm:$0xf]  ;;  %v9484_v48 = vor.u32 %v11389_v58, %v9481_v10  ;;  %6777 = vmatpush.bf16.msra.mxu1 %v9164_v53  ;;  %v3553_v35 = vmax.f32 %v17438_v31, %v3545_v33  ;;  %v3432_v32 = vadd.f32 %v3431_v41, %v3263_v62  ;;  %v2927_v58 = vadd.f32 %v2926_v11, %v13182_v46 }
 0x4a7   :  { %v9801_v7 = vld [vmem:[%s17376_s3 + $0x760] sm:$0xf0]  ;;  %v3491_v41 = vmax.f32 %v3414_v61, 0.0 }
 0x4a8   :  { %v11541_v3 = vld [vmem:[%s17376_s3 + $0x984] sm:$0xf]  ;;  %v9804_v12 = vor.u32 %v11469_v60, %v9801_v7  ;;  %6788 = vmatpush.bf16.msra.mxu2 %v9484_v48  ;;  %v14624_v22 = vpack.c.bf16 %v3553_v35, %v3553_v35  ;;  %v3498_v29 = vmax.f32 %v3432_v32, 0.0 }
 0x4a9   :  { %v10089_v21 = vld [vmem:[%s17376_s3 + $0x9a0] sm:$0xf0]  ;;  %v3433_v38 = vpop.f32.mrf.mxu3 }
 0x4aa   :  { %v11301_v56 = vld [vmem:[%s17376_s3 + $0x204] sm:$0xf]  ;;  %v10092_v37 = vor.u32 %v11541_v3, %v10089_v21  ;;  %6799 = vmatpush.bf16.msra.mxu3 %v9804_v12  ;;  %v3530_v53 = vmax.f32 %v3490_v0, %v3498_v29  ;;  %v3096_v21 = vadd.f32 %v3095_v23, %v2927_v58  ;;  %6727 = vmatmul.bf16.vlgmr.msrb.gmra.mxu1 %v14624_v22 }
 0x4ab   :  { %v9129_v25 = vld [vmem:[%s17376_s3 + $0x220] sm:$0xf0] }
 0x4ac   :  { %v11381_v34 = vld [vmem:[%s17376_s3 + $0x484] sm:$0xf]  ;;  %v9132_v39 = vor.u32 %v11301_v56, %v9129_v25  ;;  %6811 = vmatpush.bf16.msrb.mxu0 %v10092_v37  ;;  %v3264_v56 = vpop.f32.mrf.mxu2  ;;  %v3546_v42 = vmax.f32 %v14025_v63, %v3530_v53  ;;  %v17439_v37 = vmax.f32 %v13441_v47, %v13749_v26 }
 0x4ad   :  { %v9449_v57 = vld [vmem:[%s17376_s3 + $0x4a0] sm:$0xf0] }
 0x4ae   :  { %v11461_v17 = vld [vmem:[%s17376_s3 + $0x704] sm:$0xf]  ;;  %v9452_v9 = vor.u32 %v11381_v34, %v9449_v57  ;;  %6778 = vmatpush.bf16.msra.mxu1 %v9132_v39  ;;  %v3265_v57 = vadd.f32 %v3264_v56, %v3096_v21  ;;  %v3554_v39 = vmax.f32 %v17439_v37, %v3546_v42  ;;  %v9103_v42 = vld [vmem:[%s17376_s3 + $0x1c8] sm:$0xf] }
 0x4af   :  { %v9769_v59 = vld [vmem:[%s17376_s3 + $0x720] sm:$0xf0] }
 0x4b0   :  { %v11533_v13 = vld [vmem:[%s17376_s3 + $0x944] sm:$0xf]  ;;  %v9772_v2 = vor.u32 %v11461_v17, %v9769_v59  ;;  %6789 = vmatpush.bf16.msra.mxu2 %v9452_v9  ;;  %v3434_v9 = vadd.f32 %v3433_v38, %v3265_v57  ;;  %v11298_v57 = vld [vmem:[%s17376_s3 + $0x1e4] sm:$0xf0] }
 0x4b1   :  { %v10057_v27 = vld [vmem:[%s17376_s3 + $0x960] sm:$0xf0] }
 0x4b2   :  { %v11613_v1 = vld [vmem:[%s17376_s3 + $0xbc4] sm:$0xf]  ;;  %v10060_v60 = vor.u32 %v11533_v13, %v10057_v27  ;;  %6800 = vmatpush.bf16.msra.mxu3 %v9772_v2  ;;  %v14677_v2 = vpack.c.bf16 %v3554_v39, %v3554_v39  ;;  %v3499_v47 = vmax.f32 %v3434_v9, 0.0  ;;  %6766 = vmatmul.bf16.vlgmr.msra.gmra.mxu0 %v14366_v6  ;;  %v9071_v9 = vld [vmem:[%s17376_s3 + $0x188] sm:$0xf] }
 0x4b3   :  { %v10377_v18 = vld [vmem:[%s17376_s3 + $0xbe0] sm:$0xf0] }
 0x4b4   :  { %v11373_v30 = vld [vmem:[%s17376_s3 + $0x444] sm:$0xf]  ;;  %v10380_v7 = vor.u32 %v11613_v1, %v10377_v18  ;;  %6812 = vmatpush.bf16.msrb.mxu0 %v10060_v60  ;;  %v3531_v8 = vmax.f32 %v3491_v41, %v3499_v47  ;;  %6740 = vmatmul.bf16.vlgmr.msrb.gmra.mxu2 %v14677_v2 }
 0x4b5   :  { %v9417_v4 = vld [vmem:[%s17376_s3 + $0x460] sm:$0xf0] }
 0x4b6   :  { %v11453_v24 = vld [vmem:[%s17376_s3 + $0x6c4] sm:$0xf]  ;;  %v9420_v5 = vor.u32 %v11373_v30, %v9417_v4  ;;  %6823 = vmatpush.bf16.msrb.mxu1 %v10380_v7 }
 0x4b7   :  { %v9737_v45 = vld [vmem:[%s17376_s3 + $0x6e0] sm:$0xf0] }
 0x4b8   :  { %v11525_v10 = vld [vmem:[%s17376_s3 + $0x904] sm:$0xf]  ;;  %v9740_v16 = vor.u32 %v11453_v24, %v9737_v45  ;;  %6790 = vmatpush.bf16.msra.mxu2 %v9420_v5 }
 0x4b9   :  { %v10025_v49 = vld [vmem:[%s17376_s3 + $0x920] sm:$0xf0] }
 0x4ba   :  { %v11605_v54 = vld [vmem:[%s17376_s3 + $0xb84] sm:$0xf]  ;;  %v10028_v25 = vor.u32 %v11525_v10, %v10025_v49  ;;  %6801 = vmatpush.bf16.msra.mxu3 %v9740_v16  ;;  %v3547_v10 = vmax.f32 %v14038_v20, %v3531_v8  ;;  %6779 = vmatmul.bf16.vlgmr.msra.gmra.mxu1 %v14403_v52  ;;  %v9359_v8 = vld [vmem:[%s17376_s3 + $0x3c8] sm:$0xf] }
 0x4bb   :  { %v10345_v46 = vld [vmem:[%s17376_s3 + $0xba0] sm:$0xf0] }
 0x4bc   :  { %v11365_v50 = vld [vmem:[%s17376_s3 + $0x404] sm:$0xf]  ;;  %v10348_v40 = vor.u32 %v11605_v54, %v10345_v46  ;;  %6813 = vmatpush.bf16.msrb.mxu0 %v10028_v25 }
 0x4bd   :  { %v9385_v28 = vld [vmem:[%s17376_s3 + $0x420] sm:$0xf0] }
 0x4be   :  { %v11445_v3 = vld [vmem:[%s17376_s3 + $0x684] sm:$0xf]  ;;  %v9388_v48 = vor.u32 %v11365_v50, %v9385_v28  ;;  %6824 = vmatpush.bf16.msrb.mxu1 %v10348_v40 }
 0x4bf   :  { %v9705_v36 = vld [vmem:[%s17376_s3 + $0x6a0] sm:$0xf0] }
 0x4c0   :  { %v11517_v12 = vld [vmem:[%s17376_s3 + $0x8c4] sm:$0xf]  ;;  %v9708_v17 = vor.u32 %v11445_v3, %v9705_v36  ;;  %6791 = vmatpush.bf16.msra.mxu2 %v9388_v48 }
 0x4c1   :  { %v9993_v34 = vld [vmem:[%s17376_s3 + $0x8e0] sm:$0xf0] }
 0x4c2   :  { %v11597_v59 = vld [vmem:[%s17376_s3 + $0xb44] sm:$0xf]  ;;  %v9996_v13 = vor.u32 %v11517_v12, %v9993_v34  ;;  %6802 = vmatpush.bf16.msra.mxu3 %v9708_v17 }
 0x4c3   :  { %v10313_v55 = vld [vmem:[%s17376_s3 + $0xb60] sm:$0xf0] }
 0x4c4   :  { %v11677_v19 = vld [vmem:[%s17376_s3 + $0xdc4] sm:$0xf]  ;;  %v10316_v27 = vor.u32 %v11597_v59, %v10313_v55  ;;  %6814 = vmatpush.bf16.msrb.mxu0 %v9996_v13  ;;  %v11290_v13 = vld [vmem:[%s17376_s3 + $0x1a4] sm:$0xf0]  ;;  %6792 = vmatmul.bf16.vlgmr.msra.gmra.mxu2 %v14444_v44 }
 0x4c5   :  { %v10633_v63 = vld [vmem:[%s17376_s3 + $0xde0] sm:$0xf0] }
 0x4c6   :  { %v11437_v0 = vld [vmem:[%s17376_s3 + $0x644] sm:$0xf]  ;;  %v10636_v26 = vor.u32 %v11677_v19, %v10633_v63  ;;  %6825 = vmatpush.bf16.msrb.mxu1 %v10316_v27 }
 0x4c7   :  { %v9673_v15 = vld [vmem:[%s17376_s3 + $0x660] sm:$0xf0] }
 0x4c8   :  { %v11509_v33 = vld [vmem:[%s17376_s3 + $0x884] sm:$0xf]  ;;  %v9676_v1 = vor.u32 %v11437_v0, %v9673_v15  ;;  %6836 = vmatpush.bf16.msrb.mxu2 %v10636_v26  ;;  %v9104_v15 = vor.u32 %v11298_v57, %v9103_v42 }
 0x4c9   :  { %v9961_v62 = vld [vmem:[%s17376_s3 + $0x8a0] sm:$0xf0] }
 0x4ca   :  { %v11589_v11 = vld [vmem:[%s17376_s3 + $0xb04] sm:$0xf]  ;;  %v9964_v31 = vor.u32 %v11509_v33, %v9961_v62  ;;  %6803 = vmatpush.bf16.msra.mxu3 %v9676_v1 }
 0x4cb   :  { %v10281_v18 = vld [vmem:[%s17376_s3 + $0xb20] sm:$0xf0] }
 0x4cc   :  { %v11669_v30 = vld [vmem:[%s17376_s3 + $0xd84] sm:$0xf]  ;;  %v10284_v35 = vor.u32 %v11589_v11, %v10281_v18  ;;  %6815 = vmatpush.bf16.msrb.mxu0 %v9964_v31  ;;  %v9072_v18 = vor.u32 %v11290_v13, %v9071_v9  ;;  %v11362_v31 = vld [vmem:[%s17376_s3 + $0x3e4] sm:$0xf0] }
 0x4cd   :  { %v10601_v4 = vld [vmem:[%s17376_s3 + $0xda0] sm:$0xf0] }
 0x4ce   :  { %v11429_v24 = vld [vmem:[%s17376_s3 + $0x604] sm:$0xf]  ;;  %v10604_v60 = vor.u32 %v11669_v30, %v10601_v4  ;;  %6826 = vmatpush.bf16.msrb.mxu1 %v10284_v35 }
 0x4cf   :  { %v9641_v45 = vld [vmem:[%s17376_s3 + $0x620] sm:$0xf0] }
 0x4d0   :  { %v11501_v32 = vld [vmem:[%s17376_s3 + $0x844] sm:$0xf]  ;;  %v9644_v7 = vor.u32 %v11429_v24, %v9641_v45  ;;  %6837 = vmatpush.bf16.msrb.mxu2 %v10604_v60  ;;  %v9039_v24 = vld [vmem:[%s17376_s3 + $0x148] sm:$0xf] }
 0x4d1   :  { %v9929_v58 = vld [vmem:[%s17376_s3 + $0x860] sm:$0xf0]  ;;  %v11282_v45 = vld [vmem:[%s17376_s3 + $0x164] sm:$0xf0] }
 0x4d2   :  { %v11581_v49 = vld [vmem:[%s17376_s3 + $0xac4] sm:$0xf]  ;;  %v9932_v23 = vor.u32 %v11501_v32, %v9929_v58  ;;  %6804 = vmatpush.bf16.msra.mxu3 %v9644_v7  ;;  %v9040_v7 = vor.u32 %v11282_v45, %v9039_v24  ;;  %v9871_v24 = vld [vmem:[%s17376_s3 + $0x7c8] sm:$0xf] }
 0x4d3   :  { %v10249_v54 = vld [vmem:[%s17376_s3 + $0xae0] sm:$0xf0]  ;;  %v11490_v45 = vld [vmem:[%s17376_s3 + $0x7e4] sm:$0xf0] }
 0x4d4   :  { %v11661_v46 = vld [vmem:[%s17376_s3 + $0xd44] sm:$0xf]  ;;  %v10252_v3 = vor.u32 %v11581_v49, %v10249_v54  ;;  %6816 = vmatpush.bf16.msrb.mxu0 %v9932_v23  ;;  %v9360_v49 = vor.u32 %v11362_v31, %v9359_v8 }
 0x4d5   :  { %v10569_v20 = vld [vmem:[%s17376_s3 + $0xd60] sm:$0xf0] }
 0x4d6   :  { %v11741_v29 = vld [vmem:[%s17376_s3 + $0xfc4] sm:$0xf]  ;;  %v10572_v21 = vor.u32 %v11661_v46, %v10569_v20  ;;  %6827 = vmatpush.bf16.msrb.mxu1 %v10252_v3  ;;  %v9007_v20 = vld [vmem:[%s17376_s3 + $0x108] sm:$0xf] }
 0x4d7   :  { %v10889_v5 = vld [vmem:[%s17376_s3 + $0xfe0] sm:$0xf0] }
 0x4d8   :  { %v17440_v16 = vld [vmem:[#allocation26_spill] sm:$0xff]  ;;  %v10892_v56 = vor.u32 %v11741_v29, %v10889_v5  ;;  %6838 = vmatpush.bf16.msrb.mxu2 %v10572_v21  ;;  %v11274_v29 = vld [vmem:[%s17376_s3 + $0x124] sm:$0xf0] }
 0x4d9   :  { %v17441_v50 = vmax.f32 %v13454_v14, %v17440_v16  ;;  %v11493_v36 = vld [vmem:[%s17376_s3 + $0x804] sm:$0xf]  ;;  %v9327_v5 = vld [vmem:[%s17376_s3 + $0x388] sm:$0xf] }
 0x4da   :  { %v9897_v61 = vld [vmem:[%s17376_s3 + $0x820] sm:$0xf0]  ;;  %v11354_v16 = vld [vmem:[%s17376_s3 + $0x3a4] sm:$0xf0] }
 0x4db   :  { %v3555_v28 = vmax.f32 %v17441_v50, %v3547_v10  ;;  %v11573_v14 = vld [vmem:[%s17376_s3 + $0xa84] sm:$0xf]  ;;  %v9900_v17 = vor.u32 %v11493_v36, %v9897_v61  ;;  %v9008_v36 = vor.u32 %v11274_v29, %v9007_v20  ;;  %v9328_v61 = vor.u32 %v11354_v16, %v9327_v5  ;;  %v9839_v20 = vld [vmem:[%s17376_s3 + $0x788] sm:$0xf] }
 0x4dc   :  { %v10217_v25 = vld [vmem:[%s17376_s3 + $0xaa0] sm:$0xf0]  ;;  %v11482_v29 = vld [vmem:[%s17376_s3 + $0x7a4] sm:$0xf0] }
 0x4dd   :  { %v14730_v53 = vpack.c.bf16 %v3555_v28, %v3555_v28  ;;  %v11653_v40 = vld [vmem:[%s17376_s3 + $0xd04] sm:$0xf]  ;;  %v10220_v59 = vor.u32 %v11573_v14, %v10217_v25  ;;  %6817 = vmatpush.bf16.msrb.mxu0 %v9900_v17  ;;  %v8975_v14 = vld [vmem:[%s17376_s3 + $0xc8] sm:$0xf] }
 0x4de   :  { %v10537_v48 = vld [vmem:[%s17376_s3 + $0xd20] sm:$0xf0]  ;;  %v11266_v25 = vld [vmem:[%s17376_s3 + $0xe4] sm:$0xf0] }
 0x4df   :  { %v11733_v12 = vld [vmem:[%s17376_s3 + $0xf84] sm:$0xf]  ;;  %6753 = vmatmul.bf16.vlgmr.msrb.gmra.mxu3 %v14730_v53  ;;  %v10540_v55 = vor.u32 %v11653_v40, %v10537_v48  ;;  %6828 = vmatpush.bf16.msrb.mxu1 %v10220_v59  ;;  %v9295_v40 = vld [vmem:[%s17376_s3 + $0x348] sm:$0xf]  ;;  %v8976_v17 = vor.u32 %v11266_v25, %v8975_v14 }
 0x4e0   :  { %v10857_v34 = vld [vmem:[%s17376_s3 + $0xfa0] sm:$0xf0]  ;;  %6849 = vmatpush.bf16.msrb.mxu3 %v10892_v56  ;;  %6818 = vmatmul.bf16.vlgmr.msrb.gmra.mxu0 %v14565_v43  ;;  %v11346_v48 = vld [vmem:[%s17376_s3 + $0x364] sm:$0xf0] }
 0x4e1   :  { %v10860_v19 = vor.u32 %v11733_v12, %v10857_v34  ;;  %v11565_v38 = vld [vmem:[%s17376_s3 + $0xa44] sm:$0xf]  ;;  %6839 = vmatpush.bf16.msrb.mxu2 %v10540_v55  ;;  %6862 = vmatpush.bf16.msra.mxu0 %v9104_v15  ;;  %v9615_v12 = vld [vmem:[%s17376_s3 + $0x5c8] sm:$0xf]  ;;  %v9296_v59 = vor.u32 %v11346_v48, %v9295_v40 }
 0x4e2   :  { %v10185_v63 = vld [vmem:[%s17376_s3 + $0xa60] sm:$0xf0]  ;;  %v11426_v34 = vld [vmem:[%s17376_s3 + $0x5e4] sm:$0xf0] }
 0x4e3   :  { %v11645_v0 = vld [vmem:[%s17376_s3 + $0xcc4] sm:$0xf]  ;;  %v10188_v27 = vor.u32 %v11565_v38, %v10185_v63  ;;  %v8943_v38 = vld [vmem:[%s17376_s3 + $0x88] sm:$0xf]  ;;  %v9616_v63 = vor.u32 %v11426_v34, %v9615_v12 }
 0x4e4   :  { %v10505_v41 = vld [vmem:[%s17376_s3 + $0xce0] sm:$0xf0]  ;;  %6850 = vmatpush.bf16.msrb.mxu3 %v10860_v19  ;;  %v9263_v15 = vld [vmem:[%s17376_s3 + $0x308] sm:$0xf] }
 0x4e5   :  { %v11725_v37 = vld [vmem:[%s17376_s3 + $0xf44] sm:$0xf]  ;;  %v10508_v62 = vor.u32 %v11645_v0, %v10505_v41  ;;  %6829 = vmatpush.bf16.msrb.mxu1 %v10188_v27  ;;  %6863 = vmatpush.bf16.msra.mxu0 %v9072_v18  ;;  %v11258_v0 = vld [vmem:[%s17376_s3 + $0xa4] sm:$0xf0] }
 0x4e6   :  { %v10825_v39 = vld [vmem:[%s17376_s3 + $0xf60] sm:$0xf0]  ;;  %v11338_v41 = vld [vmem:[%s17376_s3 + $0x324] sm:$0xf0]  ;;  %v8944_v27 = vor.u32 %v11258_v0, %v8943_v38 }
 0x4e7   :  { %v11557_v33 = vld [vmem:[%s17376_s3 + $0xa04] sm:$0xf]  ;;  %v10828_v11 = vor.u32 %v11725_v37, %v10825_v39  ;;  %6840 = vmatpush.bf16.msrb.mxu2 %v10508_v62  ;;  %v9583_v37 = vld [vmem:[%s17376_s3 + $0x588] sm:$0xf] }
 0x4e8   :  { %v10153_v47 = vld [vmem:[%s17376_s3 + $0xa20] sm:$0xf0]  ;;  %v11418_v39 = vld [vmem:[%s17376_s3 + $0x5a4] sm:$0xf0] }
 0x4e9   :  { %v11637_v26 = vld [vmem:[%s17376_s3 + $0xc84] sm:$0xf]  ;;  %v10156_v35 = vor.u32 %v11557_v33, %v10153_v47  ;;  %6851 = vmatpush.bf16.msrb.mxu3 %v10828_v11  ;;  %6864 = vmatpush.bf16.msra.mxu0 %v9040_v7  ;;  %v9264_v33 = vor.u32 %v11338_v41, %v9263_v15  ;;  %v8911_v11 = vld [vmem:[%s17376_s3 + $0x48] sm:$0xf] }
 0x4ea   :  { %v10473_v1 = vld [vmem:[%s17376_s3 + $0xca0] sm:$0xf0]  ;;  %v11250_v47 = vld [vmem:[%s17376_s3 + $0x64] sm:$0xf0] }
 0x4eb   :  { %v11717_v30 = vld [vmem:[%s17376_s3 + $0xf04] sm:$0xf]  ;;  %v10476_v32 = vor.u32 %v11637_v26, %v10473_v1  ;;  %6830 = vmatpush.bf16.msrb.mxu1 %v10156_v35  ;;  %v9584_v26 = vor.u32 %v11418_v39, %v9583_v37  ;;  %v9231_v1 = vld [vmem:[%s17376_s3 + $0x2c8] sm:$0xf]  ;;  %v8912_v31 = vor.u32 %v11250_v47, %v8911_v11 }
 0x4ec   :  { %v10793_v4 = vld [vmem:[%s17376_s3 + $0xf20] sm:$0xf0]  ;;  %v11330_v18 = vld [vmem:[%s17376_s3 + $0x2e4] sm:$0xf0] }
 0x4ed   :  { %v10796_v58 = vor.u32 %v11717_v30, %v10793_v4  ;;  %v11629_v10 = vld [vmem:[%s17376_s3 + $0xc44] sm:$0xf]  ;;  %6841 = vmatpush.bf16.msrb.mxu2 %v10476_v32  ;;  %6865 = vmatpush.bf16.msra.mxu0 %v9008_v36  ;;  %v9551_v30 = vld [vmem:[%s17376_s3 + $0x548] sm:$0xf]  ;;  %v9232_v35 = vor.u32 %v11330_v18, %v9231_v1 }
 0x4ee   :  { %v10441_v60 = vld [vmem:[%s17376_s3 + $0xc60] sm:$0xf0]  ;;  %6831 = vmatmul.bf16.vlgmr.msrb.gmra.mxu1 %v14624_v22  ;;  %v11410_v4 = vld [vmem:[%s17376_s3 + $0x564] sm:$0xf0] }
 0x4ef   :  { %v11709_v54 = vld [vmem:[%s17376_s3 + $0xec4] sm:$0xf]  ;;  %6852 = vmatpush.bf16.msrb.mxu3 %v10796_v58  ;;  %v10444_v50 = vor.u32 %v11629_v10, %v10441_v60  ;;  %6875 = vmatpush.bf16.msra.mxu1 %v9360_v49  ;;  %v8879_v32 = vld [vmem:[%s17376_s3 + $0x8] sm:$0xf]  ;;  %v9552_v10 = vor.u32 %v11410_v4, %v9551_v30  ;;  %v9872_v60 = vor.u32 %v11490_v45, %v9871_v24 }
 0x4f0   :  { %v10761_v46 = vld [vmem:[%s17376_s3 + $0xee0] sm:$0xf0]  ;;  %6805 = vmatmul.bf16.vlgmr.msra.gmra.mxu3 %v14506_v51  ;;  %v11242_v58 = vld [vmem:[%s17376_s3 + $0x24] sm:$0xf0] }
 0x4f1   :  { %v10764_v28 = vor.u32 %v11709_v54, %v10761_v46  ;;  %v11621_v23 = vld [vmem:[%s17376_s3 + $0xc04] sm:$0xf]  ;;  %6842 = vmatpush.bf16.msrb.mxu2 %v10444_v50  ;;  %6866 = vmatpush.bf16.msra.mxu0 %v8976_v17  ;;  %v9199_v7 = vld [vmem:[%s17376_s3 + $0x288] sm:$0xf]  ;;  %v8880_v50 = vor.u32 %v11242_v58, %v8879_v32 }
 0x4f2   :  { %v10409_v3 = vld [vmem:[%s17376_s3 + $0xc20] sm:$0xf0]  ;;  %v11322_v49 = vld [vmem:[%s17376_s3 + $0x2a4] sm:$0xf0] }
 0x4f3   :  { %v11701_v21 = vld [vmem:[%s17376_s3 + $0xe84] sm:$0xf]  ;;  %6853 = vmatpush.bf16.msrb.mxu3 %v10764_v28  ;;  %v10412_v42 = vor.u32 %v11621_v23, %v10409_v3  ;;  %6876 = vmatpush.bf16.msra.mxu1 %v9328_v61  ;;  %v9519_v54 = vld [vmem:[%s17376_s3 + $0x508] sm:$0xf]  ;;  %v9200_v28 = vor.u32 %v11322_v49, %v9199_v7  ;;  %v9840_v3 = vor.u32 %v11482_v29, %v9839_v20 }
 0x4f4   :  { %v10729_v56 = vld [vmem:[%s17376_s3 + $0xea0] sm:$0xf0]  ;;  %v11402_v46 = vld [vmem:[%s17376_s3 + $0x524] sm:$0xf0] }
 0x4f5   :  { %v10732_v57 = vor.u32 %v11701_v21, %v10729_v56  ;;  %v11693_v55 = vld [vmem:[%s17376_s3 + $0xe44] sm:$0xf]  ;;  %6843 = vmatpush.bf16.msrb.mxu2 %v10412_v42  ;;  %6867 = vmatpush.bf16.msra.mxu0 %v8944_v27  ;;  %v10127_v5 = vld [vmem:[%s17376_s3 + $0x9c8] sm:$0xf]  ;;  %v9520_v23 = vor.u32 %v11402_v46, %v9519_v54 }
 0x4f6   :  { %v10697_v19 = vld [vmem:[%s17376_s3 + $0xe60] sm:$0xf0]  ;;  %v11554_v16 = vld [vmem:[%s17376_s3 + $0x9e4] sm:$0xf0] }
 0x4f7   :  { %6854 = vmatpush.bf16.msrb.mxu3 %v10732_v57  ;;  %v10700_v9 = vor.u32 %v11693_v55, %v10697_v19  ;;  %v11685_v13 = vld [vmem:[%s17376_s3 + $0xe04] sm:$0xf]  ;;  %6877 = vmatpush.bf16.msra.mxu1 %v9296_v59  ;;  %v9167_v36 = vld [vmem:[%s17376_s3 + $0x248] sm:$0xf]  ;;  %v10128_v56 = vor.u32 %v11554_v16, %v10127_v5 }
 0x4f8   :  { %v10665_v62 = vld [vmem:[%s17376_s3 + $0xe20] sm:$0xf0]  ;;  %6844 = vmatmul.bf16.vlgmr.msrb.gmra.mxu2 %v14677_v2  ;;  %v11314_v61 = vld [vmem:[%s17376_s3 + $0x264] sm:$0xf0] }
 0x4f9   :  { %6888 = vmatpush.bf16.msra.mxu2 %v9616_v63  ;;  %v10668_v8 = vor.u32 %v11685_v13, %v10665_v62  ;;  %6868 = vmatpush.bf16.msra.mxu0 %v8912_v31  ;;  %v9487_v21 = vld [vmem:[%s17376_s3 + $0x4c8] sm:$0xf]  ;;  %v9168_v34 = vor.u32 %v11314_v61, %v9167_v36 }
 0x4fa   :  { %v11394_v14 = vld [vmem:[%s17376_s3 + $0x4e4] sm:$0xf0] }
 0x4fb   :  { %6855 = vmatpush.bf16.msrb.mxu3 %v10700_v9  ;;  %6878 = vmatpush.bf16.msra.mxu1 %v9264_v33  ;;  %v9807_v25 = vld [vmem:[%s17376_s3 + $0x748] sm:$0xf]  ;;  %v9488_v57 = vor.u32 %v11394_v14, %v9487_v21 }
 0x4fc   :  { %v11474_v40 = vld [vmem:[%s17376_s3 + $0x764] sm:$0xf0] }
 0x4fd   :  { %6889 = vmatpush.bf16.msra.mxu2 %v9584_v26  ;;  %v10095_v48 = vld [vmem:[%s17376_s3 + $0x988] sm:$0xf]  ;;  %6869 = vmatpush.bf16.msra.mxu0 %v8880_v50  ;;  %v9808_v17 = vor.u32 %v11474_v40, %v9807_v25 }
 0x4fe   :  { %v11546_v12 = vld [vmem:[%s17376_s3 + $0x9a4] sm:$0xf0] }
 0x4ff   :  { %6856 = vmatpush.bf16.msrb.mxu3 %v10668_v8  ;;  %6879 = vmatpush.bf16.msra.mxu1 %v9232_v35  ;;  %v9135_v42 = vld [vmem:[%s17376_s3 + $0x208] sm:$0xf]  ;;  %v10096_v38 = vor.u32 %v11546_v12, %v10095_v48 }
 0x500   :  { %v11306_v59 = vld [vmem:[%s17376_s3 + $0x224] sm:$0xf0]  ;;  %6870 = vmatmul.bf16.vlgmr.msra.gmra.mxu0 %v14366_v6 }
 0x501   :  { %6890 = vmatpush.bf16.msra.mxu2 %v9552_v10  ;;  %v9455_v55 = vld [vmem:[%s17376_s3 + $0x488] sm:$0xf]  ;;  %6914 = vmatpush.bf16.msrb.mxu0 %v10128_v56  ;;  %v9136_v9 = vor.u32 %v11306_v59, %v9135_v42 }
 0x502   :  { %6857 = vmatmul.bf16.vlgmr.msrb.gmra.mxu3 %v14730_v53  ;;  %v11386_v19 = vld [vmem:[%s17376_s3 + $0x4a4] sm:$0xf0] }
 0x503   :  { %6901 = vmatpush.bf16.msra.mxu3 %v9872_v60  ;;  %6880 = vmatpush.bf16.msra.mxu1 %v9200_v28  ;;  %v9775_v63 = vld [vmem:[%s17376_s3 + $0x708] sm:$0xf]  ;;  %v9456_v13 = vor.u32 %v11386_v19, %v9455_v55 }
 0x504   :  { %v11466_v0 = vld [vmem:[%s17376_s3 + $0x724] sm:$0xf0] }
 0x505   :  { %6891 = vmatpush.bf16.msra.mxu2 %v9520_v23  ;;  %v10063_v15 = vld [vmem:[%s17376_s3 + $0x948] sm:$0xf]  ;;  %v9776_v27 = vor.u32 %v11466_v0, %v9775_v63  ;;  %6915 = vmatpush.bf16.msrb.mxu0 %v10096_v38 }
 0x506   :  { %v11538_v41 = vld [vmem:[%s17376_s3 + $0x964] sm:$0xf0] }
 0x507   :  { %6902 = vmatpush.bf16.msra.mxu3 %v9840_v3  ;;  %v10383_v37 = vld [vmem:[%s17376_s3 + $0xbc8] sm:$0xf]  ;;  %6881 = vmatpush.bf16.msra.mxu1 %v9168_v34  ;;  %v10064_v11 = vor.u32 %v11538_v41, %v10063_v15 }
 0x508   :  { %v11618_v39 = vld [vmem:[%s17376_s3 + $0xbe4] sm:$0xf0] }
 0x509   :  { %6892 = vmatpush.bf16.msra.mxu2 %v9488_v57  ;;  %v9423_v33 = vld [vmem:[%s17376_s3 + $0x448] sm:$0xf]  ;;  %v10384_v47 = vor.u32 %v11618_v39, %v10383_v37  ;;  %6916 = vmatpush.bf16.msrb.mxu0 %v10064_v11 }
 0x50a   :  { %v11378_v62 = vld [vmem:[%s17376_s3 + $0x464] sm:$0xf0] }
 0x50b   :  { %6903 = vmatpush.bf16.msra.mxu3 %v9808_v17  ;;  %v9743_v26 = vld [vmem:[%s17376_s3 + $0x6c8] sm:$0xf]  ;;  %6882 = vmatpush.bf16.msra.mxu1 %v9136_v9  ;;  %v9424_v45 = vor.u32 %v11378_v62, %v9423_v33 }
 0x50c   :  { %v11458_v1 = vld [vmem:[%s17376_s3 + $0x6e4] sm:$0xf0] }
 0x50d   :  { %v10031_v18 = vld [vmem:[%s17376_s3 + $0x908] sm:$0xf]  ;;  %6893 = vmatpush.bf16.msra.mxu2 %v9456_v13  ;;  %v9744_v8 = vor.u32 %v11458_v1, %v9743_v26 }
 0x50e   :  { %v11530_v30 = vld [vmem:[%s17376_s3 + $0x924] sm:$0xf0]  ;;  %6883 = vmatmul.bf16.vlgmr.msra.gmra.mxu1 %v14403_v52 }
 0x50f   :  { %v10351_v4 = vld [vmem:[%s17376_s3 + $0xb88] sm:$0xf]  ;;  %6904 = vmatpush.bf16.msra.mxu3 %v9776_v27  ;;  %6927 = vmatpush.bf16.msrb.mxu1 %v10384_v47  ;;  %v10032_v32 = vor.u32 %v11530_v30, %v10031_v18 }
 0x510   :  { %v11610_v24 = vld [vmem:[%s17376_s3 + $0xba4] sm:$0xf0] }
 0x511   :  { %v9391_v31 = vld [vmem:[%s17376_s3 + $0x408] sm:$0xf]  ;;  %v10352_v58 = vor.u32 %v11610_v24, %v10351_v4  ;;  %6894 = vmatpush.bf16.msra.mxu2 %v9424_v45  ;;  %6917 = vmatpush.bf16.msrb.mxu0 %v10032_v32  ;;  %v11294_v4 = vld [vmem:[%s17376_s3 + $0x1cc] sm:$0xf] }
 0x512   :  { %v11370_v35 = vld [vmem:[%s17376_s3 + $0x424] sm:$0xf0]  ;;  %v9105_v24 = vld [vmem:[%s17376_s3 + $0x1e8] sm:$0xf0] }
 0x513   :  { %v9711_v10 = vld [vmem:[%s17376_s3 + $0x688] sm:$0xf]  ;;  %6905 = vmatpush.bf16.msra.mxu3 %v9744_v8  ;;  %v9392_v5 = vor.u32 %v11370_v35, %v9391_v31  ;;  %6928 = vmatpush.bf16.msrb.mxu1 %v10352_v58 }
 0x514   :  { %v11450_v60 = vld [vmem:[%s17376_s3 + $0x6a4] sm:$0xf0] }
 0x515   :  { %v9999_v7 = vld [vmem:[%s17376_s3 + $0x8c8] sm:$0xf]  ;;  %v9712_v16 = vor.u32 %v11450_v60, %v9711_v10  ;;  %6895 = vmatpush.bf16.msra.mxu2 %v9392_v5  ;;  %v9108_v60 = vor.u32 %v11294_v4, %v9105_v24  ;;  %v15179_v5 = vld [vmem:[%s17377_s4] sm:$0xff]  ;;  %v11342_v4 = vld [vmem:[%s17376_s3 + $0x34c] sm:$0xf] }
 0x516   :  { %v11522_v49 = vld [vmem:[%s17376_s3 + $0x8e4] sm:$0xf0]  ;;  %v9297_v24 = vld [vmem:[%s17376_s3 + $0x368] sm:$0xf0] }
 0x517   :  { %v10319_v54 = vld [vmem:[%s17376_s3 + $0xb48] sm:$0xf]  ;;  %v10000_v50 = vor.u32 %v11522_v49, %v9999_v7  ;;  %6906 = vmatpush.bf16.msra.mxu3 %v9712_v16 }
 0x518   :  { %v11602_v46 = vld [vmem:[%s17376_s3 + $0xb64] sm:$0xf0]  ;;  %6896 = vmatmul.bf16.vlgmr.msra.gmra.mxu2 %v14444_v44 }
 0x519   :  { %v10639_v20 = vld [vmem:[%s17376_s3 + $0xdc8] sm:$0xf]  ;;  %v10320_v28 = vor.u32 %v11602_v46, %v10319_v54  ;;  %6918 = vmatpush.bf16.msrb.mxu0 %v10000_v50  ;;  %v11286_v46 = vld [vmem:[%s17376_s3 + $0x18c] sm:$0xf] }
 0x51a   :  { %v11682_v29 = vld [vmem:[%s17376_s3 + $0xde4] sm:$0xf0] }
 0x51b   :  { %v9679_v23 = vld [vmem:[%s17376_s3 + $0x648] sm:$0xf]  ;;  %v10640_v61 = vor.u32 %v11682_v29, %v10639_v20  ;;  %6929 = vmatpush.bf16.msrb.mxu1 %v10320_v28  ;;  %v9073_v20 = vld [vmem:[%s17376_s3 + $0x1a8] sm:$0xf0] }
 0x51c   :  { %v11442_v3 = vld [vmem:[%s17376_s3 + $0x664] sm:$0xf0] }
 0x51d   :  { %v9967_v36 = vld [vmem:[%s17376_s3 + $0x888] sm:$0xf]  ;;  %v9680_v48 = vor.u32 %v11442_v3, %v9679_v23  ;;  %6940 = vmatpush.bf16.msrb.mxu2 %v10640_v61  ;;  %v9076_v61 = vor.u32 %v11286_v46, %v9073_v20  ;;  %v11254_v46 = vld [vmem:[%s17376_s3 + $0x8c] sm:$0xf] }
 0x51e   :  { %v11514_v21 = vld [vmem:[%s17376_s3 + $0x8a4] sm:$0xf0] }
 0x51f   :  { %v10287_v56 = vld [vmem:[%s17376_s3 + $0xb08] sm:$0xf]  ;;  %v9968_v34 = vor.u32 %v11514_v21, %v9967_v36  ;;  %6907 = vmatpush.bf16.msra.mxu3 %v9680_v48  ;;  %v9361_v48 = vld [vmem:[%s17376_s3 + $0x3e8] sm:$0xf0] }
 0x520   :  { %v11594_v14 = vld [vmem:[%s17376_s3 + $0xb24] sm:$0xf0] }
 0x521   :  { %v10607_v25 = vld [vmem:[%s17376_s3 + $0xd88] sm:$0xf]  ;;  %v10288_v42 = vor.u32 %v11594_v14, %v10287_v56  ;;  %6919 = vmatpush.bf16.msrb.mxu0 %v9968_v34  ;;  %v11278_v14 = vld [vmem:[%s17376_s3 + $0x14c] sm:$0xf] }
 0x522   :  { %v11674_v40 = vld [vmem:[%s17376_s3 + $0xda4] sm:$0xf0] }
 0x523   :  { %v9647_v12 = vld [vmem:[%s17376_s3 + $0x608] sm:$0xf]  ;;  %v10608_v55 = vor.u32 %v11674_v40, %v10607_v25  ;;  %6930 = vmatpush.bf16.msrb.mxu1 %v10288_v42  ;;  %v9041_v25 = vld [vmem:[%s17376_s3 + $0x168] sm:$0xf0]  ;;  %v4078_v42 = vperm.slane %v15179_v5, 0 }
 0x524   :  { %v11434_v57 = vld [vmem:[%s17376_s3 + $0x624] sm:$0xf0]  ;;  %v11358_v40 = vld [vmem:[%s17376_s3 + $0x3cc] sm:$0xf] }
 0x525   :  { %v9935_v17 = vld [vmem:[%s17376_s3 + $0x848] sm:$0xf]  ;;  %v9648_v37 = vor.u32 %v11434_v57, %v9647_v12  ;;  %6941 = vmatpush.bf16.msrb.mxu2 %v10608_v55  ;;  %v6663_v12 = vpop.f32.mrf.mxu0 }
 0x526   :  { %v11506_v59 = vld [vmem:[%s17376_s3 + $0x864] sm:$0xf0] }
 0x527   :  { %v10255_v19 = vld [vmem:[%s17376_s3 + $0xac8] sm:$0xf]  ;;  %v9936_v39 = vor.u32 %v11506_v59, %v9935_v17  ;;  %6908 = vmatpush.bf16.msra.mxu3 %v9648_v37  ;;  %v11350_v37 = vld [vmem:[%s17376_s3 + $0x38c] sm:$0xf] }
 0x528   :  { %v11586_v38 = vld [vmem:[%s17376_s3 + $0xae4] sm:$0xf0] }
 0x529   :  { %v10575_v63 = vld [vmem:[%s17376_s3 + $0xd48] sm:$0xf]  ;;  %v10256_v9 = vor.u32 %v11586_v38, %v10255_v19  ;;  %6920 = vmatpush.bf16.msrb.mxu0 %v9936_v39  ;;  %v9044_v19 = vor.u32 %v11278_v14, %v9041_v25  ;;  %v9364_v38 = vor.u32 %v11358_v40, %v9361_v48  ;;  %v9329_v39 = vld [vmem:[%s17376_s3 + $0x3a8] sm:$0xf0] }
 0x52a   :  { %v11666_v0 = vld [vmem:[%s17376_s3 + $0xd64] sm:$0xf0]  ;;  %6909 = vmatmul.bf16.vlgmr.msra.gmra.mxu3 %v14506_v51  ;;  %v11246_v14 = vld [vmem:[%s17376_s3 + $0x4c] sm:$0xf] }
 0x52b   :  { %v10895_v15 = vld [vmem:[%s17376_s3 + $0xfc8] sm:$0xf]  ;;  %v10576_v33 = vor.u32 %v11666_v0, %v10575_v63  ;;  %6931 = vmatpush.bf16.msrb.mxu1 %v10256_v9  ;;  %v8913_v25 = vld [vmem:[%s17376_s3 + $0x68] sm:$0xf0] }
 0x52c   :  { %v11746_v41 = vld [vmem:[%s17376_s3 + $0xfe4] sm:$0xf0]  ;;  %v11326_v48 = vld [vmem:[%s17376_s3 + $0x2cc] sm:$0xf] }
 0x52d   :  { %v9903_v13 = vld [vmem:[%s17376_s3 + $0x808] sm:$0xf]  ;;  %v10896_v62 = vor.u32 %v11746_v41, %v10895_v15  ;;  %6942 = vmatpush.bf16.msrb.mxu2 %v10576_v33  ;;  %v11270_v15 = vld [vmem:[%s17376_s3 + $0x10c] sm:$0xf] }
 0x52e   :  { %v11498_v27 = vld [vmem:[%s17376_s3 + $0x824] sm:$0xf0]  ;;  %v9009_v41 = vld [vmem:[%s17376_s3 + $0x128] sm:$0xf0] }
 0x52f   :  { %v10223_v11 = vld [vmem:[%s17376_s3 + $0xa88] sm:$0xf]  ;;  %v9904_v45 = vor.u32 %v11498_v27, %v9903_v13  ;;  %6953 = vmatpush.bf16.msrb.mxu3 %v10896_v62  ;;  %v9012_v62 = vor.u32 %v11270_v15, %v9009_v41 }
 0x530   :  { %v11578_v47 = vld [vmem:[%s17376_s3 + $0xaa4] sm:$0xf0] }
 0x531   :  { %v10543_v26 = vld [vmem:[%s17376_s3 + $0xd08] sm:$0xf]  ;;  %v10224_v8 = vor.u32 %v11578_v47, %v10223_v11  ;;  %6921 = vmatpush.bf16.msrb.mxu0 %v9904_v45  ;;  %v9332_v11 = vor.u32 %v11350_v37, %v9329_v39  ;;  %v6665_v45 = vpop.f32.mrf.mxu0  ;;  %v11318_v37 = vld [vmem:[%s17376_s3 + $0x28c] sm:$0xf] }
 0x532   :  { %v11658_v1 = vld [vmem:[%s17376_s3 + $0xd24] sm:$0xf0]  ;;  %v9201_v39 = vld [vmem:[%s17376_s3 + $0x2a8] sm:$0xf0] }
 0x533   :  { %v10863_v18 = vld [vmem:[%s17376_s3 + $0xf88] sm:$0xf]  ;;  %v10544_v31 = vor.u32 %v11658_v1, %v10543_v26  ;;  %6932 = vmatpush.bf16.msrb.mxu1 %v10224_v8  ;;  %v11262_v1 = vld [vmem:[%s17376_s3 + $0xcc] sm:$0xf]  ;;  %v6676_v8 = vpop.f32.mrf.mxu1 }
 0x534   :  { %v11738_v30 = vld [vmem:[%s17376_s3 + $0xfa4] sm:$0xf0]  ;;  %6922 = vmatmul.bf16.vlgmr.msrb.gmra.mxu0 %v14565_v43  ;;  %v9169_v45 = vld [vmem:[%s17376_s3 + $0x268] sm:$0xf0] }
 0x535   :  { %v10864_v35 = vor.u32 %v11738_v30, %v10863_v18  ;;  %v10191_v32 = vld [vmem:[%s17376_s3 + $0xa48] sm:$0xf]  ;;  %6943 = vmatpush.bf16.msrb.mxu2 %v10544_v31  ;;  %6966 = vmatpush.bf16.msra.mxu0 %v9108_v60  ;;  %v6664_v18 = vadd.f32 %v6663_v12, %v4078_v42  ;;  %v8977_v30 = vld [vmem:[%s17376_s3 + $0xe8] sm:$0xf0] }
 0x536   :  { %v11570_v58 = vld [vmem:[%s17376_s3 + $0xa64] sm:$0xf0]  ;;  %v11422_v31 = vld [vmem:[%s17376_s3 + $0x5cc] sm:$0xf]  ;;  %v8980_v60 = vor.u32 %v11262_v1, %v8977_v30  ;;  %v9204_v1 = vor.u32 %v11318_v37, %v9201_v39 }
 0x537   :  { %v10511_v10 = vld [vmem:[%s17376_s3 + $0xcc8] sm:$0xf]  ;;  %v10192_v29 = vor.u32 %v11570_v58, %v10191_v32  ;;  %6954 = vmatpush.bf16.msrb.mxu3 %v10864_v35  ;;  %v9617_v35 = vld [vmem:[%s17376_s3 + $0x5e8] sm:$0xf0]  ;;  %v15268_v32 = vadd.f32 %v6676_v8, %v6664_v18 }
 0x538   :  { %v11650_v7 = vld [vmem:[%s17376_s3 + $0xce4] sm:$0xf0]  ;;  %v9620_v20 = vor.u32 %v11422_v31, %v9617_v35  ;;  %v9233_v12 = vld [vmem:[%s17376_s3 + $0x2e8] sm:$0xf0] }
 0x539   :  { %v10831_v49 = vld [vmem:[%s17376_s3 + $0xf48] sm:$0xf]  ;;  %v10512_v50 = vor.u32 %v11650_v7, %v10511_v10  ;;  %6933 = vmatpush.bf16.msrb.mxu1 %v10192_v29  ;;  %6967 = vmatpush.bf16.msra.mxu0 %v9076_v61  ;;  %v9300_v7 = vor.u32 %v11342_v4, %v9297_v24  ;;  %v8945_v29 = vld [vmem:[%s17376_s3 + $0xa8] sm:$0xf0] }
 0x53a   :  { %v11730_v54 = vld [vmem:[%s17376_s3 + $0xf64] sm:$0xf0]  ;;  %v8948_v61 = vor.u32 %v11254_v46, %v8945_v29  ;;  %v11310_v24 = vld [vmem:[%s17376_s3 + $0x24c] sm:$0xf] }
 0x53b   :  { %v10159_v16 = vld [vmem:[%s17376_s3 + $0xa08] sm:$0xf]  ;;  %v10832_v28 = vor.u32 %v11730_v54, %v10831_v49  ;;  %6944 = vmatpush.bf16.msrb.mxu2 %v10512_v50  ;;  %v9265_v50 = vld [vmem:[%s17376_s3 + $0x328] sm:$0xf0]  ;;  %v6678_v42 = vpop.f32.mrf.mxu1 }
 0x53c   :  { %v11562_v23 = vld [vmem:[%s17376_s3 + $0xa24] sm:$0xf0]  ;;  %v11390_v8 = vld [vmem:[%s17376_s3 + $0x4cc] sm:$0xf] }
 0x53d   :  { %v10479_v3 = vld [vmem:[%s17376_s3 + $0xc88] sm:$0xf]  ;;  %v10160_v34 = vor.u32 %v11562_v23, %v10159_v16  ;;  %6955 = vmatpush.bf16.msrb.mxu3 %v10832_v28  ;;  %6968 = vmatpush.bf16.msra.mxu0 %v9044_v19  ;;  %v11334_v16 = vld [vmem:[%s17376_s3 + $0x30c] sm:$0xf]  ;;  %v8916_v19 = vor.u32 %v11246_v14, %v8913_v25  ;;  %v6702_v14 = vpop.f32.mrf.mxu3 }
 0x53e   :  { %v11642_v36 = vld [vmem:[%s17376_s3 + $0xca4] sm:$0xf0]  ;;  %v11414_v28 = vld [vmem:[%s17376_s3 + $0x58c] sm:$0xf] }
 0x53f   :  { %v10799_v21 = vld [vmem:[%s17376_s3 + $0xf08] sm:$0xf]  ;;  %v10480_v57 = vor.u32 %v11642_v36, %v10479_v3  ;;  %6934 = vmatpush.bf16.msrb.mxu1 %v10160_v34  ;;  %v9585_v23 = vld [vmem:[%s17376_s3 + $0x5a8] sm:$0xf0] }
 0x540   :  { %v11722_v56 = vld [vmem:[%s17376_s3 + $0xf24] sm:$0xf0]  ;;  %v9588_v40 = vor.u32 %v11414_v28, %v9585_v23  ;;  %v11406_v34 = vld [vmem:[%s17376_s3 + $0x54c] sm:$0xf] }
 0x541   :  { %v10800_v17 = vor.u32 %v11722_v56, %v10799_v21  ;;  %v10447_v59 = vld [vmem:[%s17376_s3 + $0xc48] sm:$0xf]  ;;  %6945 = vmatpush.bf16.msrb.mxu2 %v10480_v57  ;;  %6969 = vmatpush.bf16.msra.mxu0 %v9012_v62  ;;  %v9268_v21 = vor.u32 %v11334_v16, %v9265_v50  ;;  %v9553_v57 = vld [vmem:[%s17376_s3 + $0x568] sm:$0xf0] }
 0x542   :  { %v11634_v55 = vld [vmem:[%s17376_s3 + $0xc64] sm:$0xf0]  ;;  %6935 = vmatmul.bf16.vlgmr.msrb.gmra.mxu1 %v14624_v22  ;;  %v9556_v15 = vor.u32 %v11406_v34, %v9553_v57  ;;  %v11550_v62 = vld [vmem:[%s17376_s3 + $0x9cc] sm:$0xf] }
 0x543   :  { %v10767_v63 = vld [vmem:[%s17376_s3 + $0xec8] sm:$0xf]  ;;  %6956 = vmatpush.bf16.msrb.mxu3 %v10800_v17  ;;  %v10448_v9 = vor.u32 %v11634_v55, %v10447_v59  ;;  %6979 = vmatpush.bf16.msra.mxu1 %v9364_v38  ;;  %v11486_v17 = vld [vmem:[%s17376_s3 + $0x7cc] sm:$0xf]  ;;  %v9236_v38 = vor.u32 %v11326_v48, %v9233_v12 }
 0x544   :  { %v11714_v0 = vld [vmem:[%s17376_s3 + $0xee4] sm:$0xf0]  ;;  %v9873_v59 = vld [vmem:[%s17376_s3 + $0x7e8] sm:$0xf0] }
 0x545   :  { %v10768_v13 = vor.u32 %v11714_v0, %v10767_v63  ;;  %v10415_v27 = vld [vmem:[%s17376_s3 + $0xc08] sm:$0xf]  ;;  %6946 = vmatpush.bf16.msrb.mxu2 %v10448_v9  ;;  %6970 = vmatpush.bf16.msra.mxu0 %v8980_v60  ;;  %v11238_v63 = vld [vmem:[%s17376_s3 + $0xc] sm:$0xf]  ;;  %v9876_v41 = vor.u32 %v11486_v17, %v9873_v59  ;;  %v6715_v59 = vpop.f32.mrf.mxu0 }
 0x546   :  { %v11626_v33 = vld [vmem:[%s17376_s3 + $0xc24] sm:$0xf0]  ;;  %v8881_v0 = vld [vmem:[%s17376_s3 + $0x28] sm:$0xf0] }
 0x547   :  { %v10735_v47 = vld [vmem:[%s17376_s3 + $0xe88] sm:$0xf]  ;;  %6957 = vmatpush.bf16.msrb.mxu3 %v10768_v13  ;;  %v10416_v58 = vor.u32 %v11626_v33, %v10415_v27  ;;  %6980 = vmatpush.bf16.msra.mxu1 %v9332_v11  ;;  %v11398_v9 = vld [vmem:[%s17376_s3 + $0x50c] sm:$0xf] }
 0x548   :  { %v11706_v26 = vld [vmem:[%s17376_s3 + $0xea4] sm:$0xf0]  ;;  %v9521_v13 = vld [vmem:[%s17376_s3 + $0x528] sm:$0xf0] }
 0x549   :  { %v10736_v10 = vor.u32 %v11706_v26, %v10735_v47  ;;  %v10703_v49 = vld [vmem:[%s17376_s3 + $0xe48] sm:$0xf]  ;;  %6947 = vmatpush.bf16.msrb.mxu2 %v10416_v58  ;;  %6971 = vmatpush.bf16.msra.mxu0 %v8948_v61  ;;  %v11478_v27 = vld [vmem:[%s17376_s3 + $0x78c] sm:$0xf]  ;;  %v6689_v47 = vpop.f32.mrf.mxu2  ;;  %v8884_v26 = vor.u32 %v11238_v63, %v8881_v0  ;;  %v9524_v30 = vor.u32 %v11398_v9, %v9521_v13 }
 0x54a   :  { %v11698_v54 = vld [vmem:[%s17376_s3 + $0xe64] sm:$0xf0]  ;;  %v9841_v33 = vld [vmem:[%s17376_s3 + $0x7a8] sm:$0xf0]  ;;  %v6690_v18 = vadd.f32 %v6689_v47, %v15268_v32 }
 0x54b   :  { %6958 = vmatpush.bf16.msrb.mxu3 %v10736_v10  ;;  %v10704_v3 = vor.u32 %v11698_v54, %v10703_v49  ;;  %v10671_v36 = vld [vmem:[%s17376_s3 + $0xe08] sm:$0xf]  ;;  %6981 = vmatpush.bf16.msra.mxu1 %v9300_v7  ;;  %v10129_v11 = vld [vmem:[%s17376_s3 + $0x9e8] sm:$0xf0]  ;;  %v9844_v4 = vor.u32 %v11478_v27, %v9841_v33  ;;  %v9172_v7 = vor.u32 %v11310_v24, %v9169_v45 }
 0x54c   :  { %v11690_v56 = vld [vmem:[%s17376_s3 + $0xe24] sm:$0xf0]  ;;  %6948 = vmatmul.bf16.vlgmr.msrb.gmra.mxu2 %v14677_v2  ;;  %v10132_v31 = vor.u32 %v11550_v62, %v10129_v11  ;;  %v9489_v35 = vld [vmem:[%s17376_s3 + $0x4e8] sm:$0xf0] }
 0x54d   :  { %6992 = vmatpush.bf16.msra.mxu2 %v9620_v20  ;;  %v10672_v55 = vor.u32 %v11690_v56, %v10671_v36  ;;  %6972 = vmatpush.bf16.msra.mxu0 %v8916_v19  ;;  %v11470_v32 = vld [vmem:[%s17376_s3 + $0x74c] sm:$0xf]  ;;  %v9492_v54 = vor.u32 %v11390_v8, %v9489_v35 }
 0x54e   :  { %v9809_v58 = vld [vmem:[%s17376_s3 + $0x768] sm:$0xf0] }
 0x54f   :  { %6959 = vmatpush.bf16.msrb.mxu3 %v10704_v3  ;;  %6982 = vmatpush.bf16.msra.mxu1 %v9268_v21  ;;  %v11542_v10 = vld [vmem:[%s17376_s3 + $0x98c] sm:$0xf]  ;;  %v9812_v46 = vor.u32 %v11470_v32, %v9809_v58  ;;  %v6717_v32 = vpop.f32.mrf.mxu0  ;;  %v6728_v58 = vpop.f32.mrf.mxu1 }
 0x550   :  { %v10097_v60 = vld [vmem:[%s17376_s3 + $0x9a8] sm:$0xf0] }
 0x551   :  { %6993 = vmatpush.bf16.msra.mxu2 %v9588_v40  ;;  %6973 = vmatpush.bf16.msra.mxu0 %v8884_v26  ;;  %v11302_v49 = vld [vmem:[%s17376_s3 + $0x20c] sm:$0xf]  ;;  %v10100_v50 = vor.u32 %v11542_v10, %v10097_v60  ;;  %v6691_v56 = vpop.f32.mrf.mxu2  ;;  %v6703_v40 = vadd.f32 %v6702_v14, %v6690_v18 }
 0x552   :  { %v9137_v20 = vld [vmem:[%s17376_s3 + $0x228] sm:$0xf0] }
 0x553   :  { %6960 = vmatpush.bf16.msrb.mxu3 %v10672_v55  ;;  %6983 = vmatpush.bf16.msra.mxu1 %v9236_v38  ;;  %v11382_v29 = vld [vmem:[%s17376_s3 + $0x48c] sm:$0xf]  ;;  %v9140_v25 = vor.u32 %v11302_v49, %v9137_v20  ;;  %v6716_v63 = vadd.f32 %v6715_v59, %v6703_v40 }
 0x554   :  { %v9457_v16 = vld [vmem:[%s17376_s3 + $0x4a8] sm:$0xf0]  ;;  %6974 = vmatmul.bf16.vlgmr.msra.gmra.mxu0 %v14366_v6 }
 0x555   :  { %6994 = vmatpush.bf16.msra.mxu2 %v9556_v15  ;;  %7018 = vmatpush.bf16.msrb.mxu0 %v10132_v31  ;;  %v11462_v28 = vld [vmem:[%s17376_s3 + $0x70c] sm:$0xf]  ;;  %v9460_v48 = vor.u32 %v11382_v29, %v9457_v16 }
 0x556   :  { %6961 = vmatmul.bf16.vlgmr.msrb.gmra.mxu3 %v14730_v53  ;;  %v9777_v23 = vld [vmem:[%s17376_s3 + $0x728] sm:$0xf0] }
 0x557   :  { %7005 = vmatpush.bf16.msra.mxu3 %v9876_v41  ;;  %6984 = vmatpush.bf16.msra.mxu1 %v9204_v1  ;;  %v11534_v3 = vld [vmem:[%s17376_s3 + $0x94c] sm:$0xf]  ;;  %v9780_v12 = vor.u32 %v11462_v28, %v9777_v23 }
 0x558   :  { %v10065_v36 = vld [vmem:[%s17376_s3 + $0x968] sm:$0xf0] }
 0x559   :  { %6995 = vmatpush.bf16.msra.mxu2 %v9524_v30  ;;  %v11614_v61 = vld [vmem:[%s17376_s3 + $0xbcc] sm:$0xf]  ;;  %7019 = vmatpush.bf16.msrb.mxu0 %v10100_v50  ;;  %v10068_v57 = vor.u32 %v11534_v3, %v10065_v36  ;;  %v6704_v30 = vpop.f32.mrf.mxu3 }
 0x55a   :  { %v10385_v21 = vld [vmem:[%s17376_s3 + $0xbe8] sm:$0xf0] }
 0x55b   :  { %7006 = vmatpush.bf16.msra.mxu3 %v9844_v4  ;;  %6985 = vmatpush.bf16.msra.mxu1 %v9172_v7  ;;  %v11374_v34 = vld [vmem:[%s17376_s3 + $0x44c] sm:$0xf]  ;;  %v10388_v17 = vor.u32 %v11614_v61, %v10385_v21 }
 0x55c   :  { %v9425_v42 = vld [vmem:[%s17376_s3 + $0x468] sm:$0xf0] }
 0x55d   :  { %6996 = vmatpush.bf16.msra.mxu2 %v9492_v54  ;;  %v11454_v55 = vld [vmem:[%s17376_s3 + $0x6cc] sm:$0xf]  ;;  %v9428_v37 = vor.u32 %v11374_v34, %v9425_v42  ;;  %7020 = vmatpush.bf16.msrb.mxu0 %v10068_v57  ;;  %v15476_v54 = vadd.f32 %v6728_v58, %v6716_v63 }
 0x55e   :  { %v9745_v19 = vld [vmem:[%s17376_s3 + $0x6e8] sm:$0xf0] }
 0x55f   :  { %7007 = vmatpush.bf16.msra.mxu3 %v9812_v46  ;;  %v11526_v38 = vld [vmem:[%s17376_s3 + $0x90c] sm:$0xf]  ;;  %6986 = vmatpush.bf16.msra.mxu1 %v9140_v25  ;;  %v9748_v39 = vor.u32 %v11454_v55, %v9745_v19  ;;  %v6730_v55 = vpop.f32.mrf.mxu1  ;;  %v6767_v19 = vpop.f32.mrf.mxu0 }
 0x560   :  { %v10033_v0 = vld [vmem:[%s17376_s3 + $0x928] sm:$0xf0] }
 0x561   :  { %v11606_v15 = vld [vmem:[%s17376_s3 + $0xb8c] sm:$0xf]  ;;  %6997 = vmatpush.bf16.msra.mxu2 %v9460_v48  ;;  %v10036_v27 = vor.u32 %v11526_v38, %v10033_v0 }
 0x562   :  { %v10353_v41 = vld [vmem:[%s17376_s3 + $0xba8] sm:$0xf0]  ;;  %6987 = vmatmul.bf16.vlgmr.msra.gmra.mxu1 %v14403_v52  ;;  %v6754_v55 = vpop.f32.mrf.mxu3 }
 0x563   :  { %7008 = vmatpush.bf16.msra.mxu3 %v9780_v12  ;;  %v11366_v9 = vld [vmem:[%s17376_s3 + $0x40c] sm:$0xf]  ;;  %7031 = vmatpush.bf16.msrb.mxu1 %v10388_v17  ;;  %v10356_v33 = vor.u32 %v11606_v15, %v10353_v41 }
 0x564   :  { %v9393_v13 = vld [vmem:[%s17376_s3 + $0x428] sm:$0xf0]  ;;  %7021 = vmatpush.bf16.msrb.mxu0 %v10036_v27 }
 0x565   :  { %v11446_v62 = vld [vmem:[%s17376_s3 + $0x68c] sm:$0xf]  ;;  %6998 = vmatpush.bf16.msra.mxu2 %v9428_v37  ;;  %v9396_v45 = vor.u32 %v11366_v9, %v9393_v13 }
 0x566   :  { %v9713_v11 = vld [vmem:[%s17376_s3 + $0x6a8] sm:$0xf0] }
 0x567   :  { %v11518_v47 = vld [vmem:[%s17376_s3 + $0x8cc] sm:$0xf]  ;;  %7009 = vmatpush.bf16.msra.mxu3 %v9748_v39  ;;  %v9716_v8 = vor.u32 %v11446_v62, %v9713_v11  ;;  %7032 = vmatpush.bf16.msrb.mxu1 %v10356_v33  ;;  %v4079_v33 = vperm.slane %v15179_v5, 1  ;;  %v9111_v62 = vld [vmem:[%s17376_s3 + $0x1d0] sm:$0xf] }
 0x568   :  { %v10001_v26 = vld [vmem:[%s17376_s3 + $0x8e8] sm:$0xf0]  ;;  %v11299_v11 = vld [vmem:[%s17376_s3 + $0x1ec] sm:$0xf0] }
 0x569   :  { %v11598_v1 = vld [vmem:[%s17376_s3 + $0xb4c] sm:$0xf]  ;;  %v10004_v31 = vor.u32 %v11518_v47, %v10001_v26  ;;  %6999 = vmatpush.bf16.msra.mxu2 %v9396_v45  ;;  %v6741_v45 = vpop.f32.mrf.mxu2  ;;  %v6768_v32 = vadd.f32 %v6767_v19, %v4079_v33 }
 0x56a   :  { %v10321_v18 = vld [vmem:[%s17376_s3 + $0xb68] sm:$0xf0]  ;;  %v6742_v58 = vadd.f32 %v6741_v45, %v15476_v54  ;;  %v11427_v45 = vld [vmem:[%s17376_s3 + $0x5ec] sm:$0xf0] }
 0x56b   :  { %v11678_v4 = vld [vmem:[%s17376_s3 + $0xdcc] sm:$0xf]  ;;  %v10324_v35 = vor.u32 %v11598_v1, %v10321_v18  ;;  %7010 = vmatpush.bf16.msra.mxu3 %v9716_v8  ;;  %7022 = vmatpush.bf16.msrb.mxu0 %v10004_v31 }
 0x56c   :  { %v10641_v24 = vld [vmem:[%s17376_s3 + $0xde8] sm:$0xf0]  ;;  %7000 = vmatmul.bf16.vlgmr.msra.gmra.mxu2 %v14444_v44 }
 0x56d   :  { %v11438_v10 = vld [vmem:[%s17376_s3 + $0x64c] sm:$0xf]  ;;  %v10644_v49 = vor.u32 %v11678_v4, %v10641_v24  ;;  %7033 = vmatpush.bf16.msrb.mxu1 %v10324_v35  ;;  %v9112_v24 = vor.u32 %v11299_v11, %v9111_v62 }
 0x56e   :  { %v9681_v60 = vld [vmem:[%s17376_s3 + $0x668] sm:$0xf0] }
 0x56f   :  { %v11510_v7 = vld [vmem:[%s17376_s3 + $0x88c] sm:$0xf]  ;;  %v9684_v28 = vor.u32 %v11438_v10, %v9681_v60  ;;  %7044 = vmatpush.bf16.msrb.mxu2 %v10644_v49  ;;  %v9079_v10 = vld [vmem:[%s17376_s3 + $0x190] sm:$0xf]  ;;  %v6769_v49 = vpop.f32.mrf.mxu0 }
 0x570   :  { %v9969_v46 = vld [vmem:[%s17376_s3 + $0x8a8] sm:$0xf0]  ;;  %v11291_v60 = vld [vmem:[%s17376_s3 + $0x1ac] sm:$0xf0] }
 0x571   :  { %v11590_v20 = vld [vmem:[%s17376_s3 + $0xb0c] sm:$0xf]  ;;  %v9972_v3 = vor.u32 %v11510_v7, %v9969_v46  ;;  %7011 = vmatpush.bf16.msra.mxu3 %v9684_v28  ;;  %v6780_v46 = vpop.f32.mrf.mxu1  ;;  %v8951_v49 = vld [vmem:[%s17376_s3 + $0x90] sm:$0xf] }
 0x572   :  { %v10289_v29 = vld [vmem:[%s17376_s3 + $0xb28] sm:$0xf0] }
 0x573   :  { %v11670_v16 = vld [vmem:[%s17376_s3 + $0xd8c] sm:$0xf]  ;;  %v10292_v36 = vor.u32 %v11590_v20, %v10289_v29  ;;  %7023 = vmatpush.bf16.msrb.mxu0 %v9972_v3  ;;  %v9080_v3 = vor.u32 %v11291_v60, %v9079_v10 }
 0x574   :  { %v10609_v50 = vld [vmem:[%s17376_s3 + $0xda8] sm:$0xf0] }
 0x575   :  { %v11430_v23 = vld [vmem:[%s17376_s3 + $0x60c] sm:$0xf]  ;;  %v10612_v14 = vor.u32 %v11670_v16, %v10609_v50  ;;  %7034 = vmatpush.bf16.msrb.mxu1 %v10292_v36  ;;  %v15584_v16 = vadd.f32 %v6780_v46, %v6768_v32 }
 0x576   :  { %v9649_v61 = vld [vmem:[%s17376_s3 + $0x628] sm:$0xf0] }
 0x577   :  { %v11502_v21 = vld [vmem:[%s17376_s3 + $0x84c] sm:$0xf]  ;;  %v9652_v57 = vor.u32 %v11430_v23, %v9649_v61  ;;  %7045 = vmatpush.bf16.msrb.mxu2 %v10612_v14  ;;  %v9367_v14 = vld [vmem:[%s17376_s3 + $0x3d0] sm:$0xf] }
 0x578   :  { %v9937_v56 = vld [vmem:[%s17376_s3 + $0x868] sm:$0xf0] }
 0x579   :  { %v11582_v25 = vld [vmem:[%s17376_s3 + $0xacc] sm:$0xf]  ;;  %v9940_v17 = vor.u32 %v11502_v21, %v9937_v56  ;;  %7012 = vmatpush.bf16.msra.mxu3 %v9652_v57  ;;  %v9047_v21 = vld [vmem:[%s17376_s3 + $0x150] sm:$0xf] }
 0x57a   :  { %v10257_v40 = vld [vmem:[%s17376_s3 + $0xae8] sm:$0xf0]  ;;  %v11283_v56 = vld [vmem:[%s17376_s3 + $0x16c] sm:$0xf0] }
 0x57b   :  { %v11662_v48 = vld [vmem:[%s17376_s3 + $0xd4c] sm:$0xf]  ;;  %v10260_v59 = vor.u32 %v11582_v25, %v10257_v40  ;;  %7024 = vmatpush.bf16.msrb.mxu0 %v9940_v17  ;;  %v11363_v25 = vld [vmem:[%s17376_s3 + $0x3ec] sm:$0xf0]  ;;  %v9048_v57 = vor.u32 %v11283_v56, %v9047_v21 }
 0x57c   :  { %v10577_v12 = vld [vmem:[%s17376_s3 + $0xd68] sm:$0xf0]  ;;  %7013 = vmatmul.bf16.vlgmr.msra.gmra.mxu3 %v14506_v51  ;;  %v9368_v17 = vor.u32 %v11363_v25, %v9367_v14  ;;  %v8919_v25 = vld [vmem:[%s17376_s3 + $0x50] sm:$0xf] }
 0x57d   :  { %v11742_v34 = vld [vmem:[%s17376_s3 + $0xfcc] sm:$0xf]  ;;  %v10580_v0 = vor.u32 %v11662_v48, %v10577_v12  ;;  %7035 = vmatpush.bf16.msrb.mxu1 %v10260_v59  ;;  %v6743_v59 = vpop.f32.mrf.mxu2 }
 0x57e   :  { %v10897_v42 = vld [vmem:[%s17376_s3 + $0xfe8] sm:$0xf0]  ;;  %v11491_v59 = vld [vmem:[%s17376_s3 + $0x7ec] sm:$0xf0] }
 0x57f   :  { %v11494_v38 = vld [vmem:[%s17376_s3 + $0x80c] sm:$0xf]  ;;  %v10900_v15 = vor.u32 %v11742_v34, %v10897_v42  ;;  %7046 = vmatpush.bf16.msrb.mxu2 %v10580_v0  ;;  %v15629_v0 = vadd.f32 %v6754_v55, %v6742_v58  ;;  %v6756_v58 = vpop.f32.mrf.mxu3 }
 0x580   :  { %v9905_v63 = vld [vmem:[%s17376_s3 + $0x828] sm:$0xf0] }
 0x581   :  { %v11574_v41 = vld [vmem:[%s17376_s3 + $0xa8c] sm:$0xf]  ;;  %v9908_v47 = vor.u32 %v11494_v38, %v9905_v63  ;;  %7057 = vmatpush.bf16.msrb.mxu3 %v10900_v15  ;;  %v9015_v63 = vld [vmem:[%s17376_s3 + $0x110] sm:$0xf] }
 0x582   :  { %v10225_v37 = vld [vmem:[%s17376_s3 + $0xaa8] sm:$0xf0]  ;;  %v11275_v15 = vld [vmem:[%s17376_s3 + $0x12c] sm:$0xf0] }
 0x583   :  { %v11654_v39 = vld [vmem:[%s17376_s3 + $0xd0c] sm:$0xf]  ;;  %v10228_v26 = vor.u32 %v11574_v41, %v10225_v37  ;;  %7025 = vmatpush.bf16.msrb.mxu0 %v9908_v47  ;;  %v9335_v41 = vld [vmem:[%s17376_s3 + $0x390] sm:$0xf]  ;;  %v9016_v11 = vor.u32 %v11275_v15, %v9015_v63 }
 0x584   :  { %v10545_v9 = vld [vmem:[%s17376_s3 + $0xd28] sm:$0xf0]  ;;  %v11355_v37 = vld [vmem:[%s17376_s3 + $0x3ac] sm:$0xf0] }
 0x585   :  { %v11734_v13 = vld [vmem:[%s17376_s3 + $0xf8c] sm:$0xf]  ;;  %v10548_v1 = vor.u32 %v11654_v39, %v10545_v9  ;;  %7036 = vmatpush.bf16.msrb.mxu1 %v10228_v26  ;;  %v6782_v39 = vpop.f32.mrf.mxu1  ;;  %v15640_v9 = vpop.f32.mrf.mxu0  ;;  %v9336_v47 = vor.u32 %v11355_v37, %v9335_v41  ;;  %v8887_v41 = vld [vmem:[%s17376_s3 + $0x10] sm:$0xf] }
 0x586   :  { %v10865_v27 = vld [vmem:[%s17376_s3 + $0xfa8] sm:$0xf0]  ;;  %7026 = vmatmul.bf16.vlgmr.msrb.gmra.mxu0 %v14565_v43  ;;  %v6793_v10 = vpop.f32.mrf.mxu2  ;;  %v11243_v37 = vld [vmem:[%s17376_s3 + $0x2c] sm:$0xf0] }
 0x587   :  { %v10868_v18 = vor.u32 %v11734_v13, %v10865_v27  ;;  %v11566_v5 = vld [vmem:[%s17376_s3 + $0xa4c] sm:$0xf]  ;;  %7047 = vmatpush.bf16.msrb.mxu2 %v10548_v1  ;;  %7070 = vmatpush.bf16.msra.mxu0 %v9112_v24  ;;  %v9623_v24 = vld [vmem:[%s17376_s3 + $0x5d0] sm:$0xf]  ;;  %v6806_v15 = vpop.f32.mrf.mxu3 }
 0x588   :  { %v10193_v30 = vld [vmem:[%s17376_s3 + $0xa68] sm:$0xf0]  ;;  %v9624_v46 = vor.u32 %v11427_v45, %v9623_v24  ;;  %v8888_v24 = vor.u32 %v11243_v37, %v8887_v41  ;;  %v10039_v41 = vld [vmem:[%s17376_s3 + $0x910] sm:$0xf] }
 0x589   :  { %v11646_v4 = vld [vmem:[%s17376_s3 + $0xccc] sm:$0xf]  ;;  %v10196_v7 = vor.u32 %v11566_v5, %v10193_v30  ;;  %7058 = vmatpush.bf16.msrb.mxu3 %v10868_v18  ;;  %v8983_v18 = vld [vmem:[%s17376_s3 + $0xd0] sm:$0xf] }
 0x58a   :  { %v10513_v8 = vld [vmem:[%s17376_s3 + $0xce8] sm:$0xf0]  ;;  %v11267_v5 = vld [vmem:[%s17376_s3 + $0xec] sm:$0xf0] }
 0x58b   :  { %v11726_v31 = vld [vmem:[%s17376_s3 + $0xf4c] sm:$0xf]  ;;  %v10516_v54 = vor.u32 %v11646_v4, %v10513_v8  ;;  %7037 = vmatpush.bf16.msrb.mxu1 %v10196_v7  ;;  %7071 = vmatpush.bf16.msra.mxu0 %v9080_v3  ;;  %v9303_v30 = vld [vmem:[%s17376_s3 + $0x350] sm:$0xf] }
 0x58c   :  { %v10833_v35 = vld [vmem:[%s17376_s3 + $0xf68] sm:$0xf0]  ;;  %v11347_v4 = vld [vmem:[%s17376_s3 + $0x36c] sm:$0xf0] }
 0x58d   :  { %v11558_v20 = vld [vmem:[%s17376_s3 + $0xa0c] sm:$0xf]  ;;  %v10836_v29 = vor.u32 %v11726_v31, %v10833_v35  ;;  %7048 = vmatpush.bf16.msrb.mxu2 %v10516_v54  ;;  %v8984_v35 = vor.u32 %v11267_v5, %v8983_v18  ;;  %v9304_v32 = vor.u32 %v11347_v4, %v9303_v30  ;;  %v11259_v54 = vld [vmem:[%s17376_s3 + $0xac] sm:$0xf0] }
 0x58e   :  { %v10161_v50 = vld [vmem:[%s17376_s3 + $0xa28] sm:$0xf0]  ;;  %v9591_v3 = vld [vmem:[%s17376_s3 + $0x590] sm:$0xf]  ;;  %v8952_v21 = vor.u32 %v11259_v54, %v8951_v49  ;;  %v6795_v63 = vpop.f32.mrf.mxu2 }
 0x58f   :  { %v11638_v28 = vld [vmem:[%s17376_s3 + $0xc8c] sm:$0xf]  ;;  %v10164_v40 = vor.u32 %v11558_v20, %v10161_v50  ;;  %7059 = vmatpush.bf16.msrb.mxu3 %v10836_v29  ;;  %7072 = vmatpush.bf16.msra.mxu0 %v9048_v57  ;;  %v6794_v20 = vadd.f32 %v6793_v10, %v15584_v16  ;;  %v9271_v29 = vld [vmem:[%s17376_s3 + $0x310] sm:$0xf] }
 0x590   :  { %v10481_v23 = vld [vmem:[%s17376_s3 + $0xca8] sm:$0xf0]  ;;  %v11339_v50 = vld [vmem:[%s17376_s3 + $0x32c] sm:$0xf0] }
 0x591   :  { %v11718_v36 = vld [vmem:[%s17376_s3 + $0xf0c] sm:$0xf]  ;;  %v10484_v48 = vor.u32 %v11638_v28, %v10481_v23  ;;  %7038 = vmatpush.bf16.msrb.mxu1 %v10164_v40  ;;  %v6821_v28 = vpop.f32.mrf.mxu0  ;;  %v6832_v23 = vpop.f32.mrf.mxu1  ;;  %v11419_v16 = vld [vmem:[%s17376_s3 + $0x5ac] sm:$0xf0]  ;;  %v9272_v56 = vor.u32 %v11339_v50, %v9271_v29 }
 0x592   :  { %v10801_v61 = vld [vmem:[%s17376_s3 + $0xf28] sm:$0xf0]  ;;  %v11251_v40 = vld [vmem:[%s17376_s3 + $0x6c] sm:$0xf0]  ;;  %v6808_v29 = vpop.f32.mrf.mxu3 }
 0x593   :  { %v10804_v12 = vor.u32 %v11718_v36, %v10801_v61  ;;  %v11630_v34 = vld [vmem:[%s17376_s3 + $0xc4c] sm:$0xf]  ;;  %7049 = vmatpush.bf16.msrb.mxu2 %v10484_v48  ;;  %7073 = vmatpush.bf16.msra.mxu0 %v9016_v11  ;;  %v9592_v48 = vor.u32 %v11419_v16, %v9591_v3  ;;  %v11411_v57 = vld [vmem:[%s17376_s3 + $0x56c] sm:$0xf0] }
 0x594   :  { %v10449_v42 = vld [vmem:[%s17376_s3 + $0xc68] sm:$0xf0]  ;;  %7039 = vmatmul.bf16.vlgmr.msrb.gmra.mxu1 %v14624_v22  ;;  %v9527_v11 = vld [vmem:[%s17376_s3 + $0x510] sm:$0xf] }
 0x595   :  { %v11710_v19 = vld [vmem:[%s17376_s3 + $0xecc] sm:$0xf]  ;;  %7060 = vmatpush.bf16.msrb.mxu3 %v10804_v12  ;;  %v10452_v13 = vor.u32 %v11630_v34, %v10449_v42  ;;  %7083 = vmatpush.bf16.msra.mxu1 %v9368_v17  ;;  %v9239_v12 = vld [vmem:[%s17376_s3 + $0x2d0] sm:$0xf] }
 0x596   :  { %v10769_v38 = vld [vmem:[%s17376_s3 + $0xee8] sm:$0xf0]  ;;  %v11331_v34 = vld [vmem:[%s17376_s3 + $0x2ec] sm:$0xf0]  ;;  %v6845_v3 = vpop.f32.mrf.mxu2 }
 0x597   :  { %v10772_v27 = vor.u32 %v11710_v19, %v10769_v38  ;;  %v11622_v33 = vld [vmem:[%s17376_s3 + $0xc0c] sm:$0xf]  ;;  %7050 = vmatpush.bf16.msrb.mxu2 %v10452_v13  ;;  %7074 = vmatpush.bf16.msra.mxu0 %v8984_v35  ;;  %v9559_v42 = vld [vmem:[%s17376_s3 + $0x550] sm:$0xf]  ;;  %v8920_v19 = vor.u32 %v11251_v40, %v8919_v25  ;;  %v9240_v38 = vor.u32 %v11331_v34, %v9239_v12 }
 0x598   :  { %v10417_v62 = vld [vmem:[%s17376_s3 + $0xc28] sm:$0xf0]  ;;  %v9879_v17 = vld [vmem:[%s17376_s3 + $0x7d0] sm:$0xf]  ;;  %v9560_v39 = vor.u32 %v11411_v57, %v9559_v42 }
 0x599   :  { %v11702_v26 = vld [vmem:[%s17376_s3 + $0xe8c] sm:$0xf]  ;;  %7061 = vmatpush.bf16.msrb.mxu3 %v10772_v27  ;;  %v10420_v8 = vor.u32 %v11622_v33, %v10417_v62  ;;  %7084 = vmatpush.bf16.msra.mxu1 %v9336_v47  ;;  %v9880_v13 = vor.u32 %v11491_v59, %v9879_v17  ;;  %v6807_v27 = vadd.f32 %v6806_v15, %v6794_v20  ;;  %v9207_v33 = vld [vmem:[%s17376_s3 + $0x290] sm:$0xf]  ;;  %v6834_v47 = vpop.f32.mrf.mxu1 }
 0x59a   :  { %v10737_v1 = vld [vmem:[%s17376_s3 + $0xea8] sm:$0xf0]  ;;  %v11323_v62 = vld [vmem:[%s17376_s3 + $0x2ac] sm:$0xf0]  ;;  %v6858_v47 = vpop.f32.mrf.mxu3 }
 0x59b   :  { %v10740_v31 = vor.u32 %v11702_v26, %v10737_v1  ;;  %v11694_v60 = vld [vmem:[%s17376_s3 + $0xe4c] sm:$0xf]  ;;  %7051 = vmatpush.bf16.msrb.mxu2 %v10420_v8  ;;  %7075 = vmatpush.bf16.msra.mxu0 %v8952_v21  ;;  %v11403_v26 = vld [vmem:[%s17376_s3 + $0x52c] sm:$0xf0]  ;;  %v6820_v5 = vadd.f32 %v15640_v9, %v6807_v27  ;;  %v9208_v45 = vor.u32 %v11323_v62, %v9207_v33  ;;  %v15840_v27 = vpop.f32.mrf.mxu0 }
 0x59c   :  { %v10705_v7 = vld [vmem:[%s17376_s3 + $0xe68] sm:$0xf0]  ;;  %v9847_v1 = vld [vmem:[%s17376_s3 + $0x790] sm:$0xf]  ;;  %v9528_v8 = vor.u32 %v11403_v26, %v9527_v11 }
 0x59d   :  { %7062 = vmatpush.bf16.msrb.mxu3 %v10740_v31  ;;  %v10708_v36 = vor.u32 %v11694_v60, %v10705_v7  ;;  %v11686_v61 = vld [vmem:[%s17376_s3 + $0xe0c] sm:$0xf]  ;;  %7085 = vmatpush.bf16.msra.mxu1 %v9304_v32  ;;  %v11483_v18 = vld [vmem:[%s17376_s3 + $0x7ac] sm:$0xf0]  ;;  %v6833_v58 = vadd.f32 %v6832_v23, %v6820_v5 }
 0x59e   :  { %v10673_v14 = vld [vmem:[%s17376_s3 + $0xe28] sm:$0xf0]  ;;  %7052 = vmatmul.bf16.vlgmr.msrb.gmra.mxu2 %v14677_v2  ;;  %v10135_v30 = vld [vmem:[%s17376_s3 + $0x9d0] sm:$0xf]  ;;  %v9848_v31 = vor.u32 %v11483_v18, %v9847_v1  ;;  %v6847_v11 = vpop.f32.mrf.mxu2 }
 0x59f   :  { %7096 = vmatpush.bf16.msra.mxu2 %v9624_v46  ;;  %v10676_v55 = vor.u32 %v11686_v61, %v10673_v14  ;;  %v11555_v4 = vld [vmem:[%s17376_s3 + $0x9ec] sm:$0xf0]  ;;  %7076 = vmatpush.bf16.msra.mxu0 %v8920_v19 }
 0x5a0   :  { %v9175_v9 = vld [vmem:[%s17376_s3 + $0x250] sm:$0xf]  ;;  %v10136_v10 = vor.u32 %v11555_v4, %v10135_v30 }
 0x5a1   :  { %7063 = vmatpush.bf16.msrb.mxu3 %v10708_v36  ;;  %7086 = vmatpush.bf16.msra.mxu1 %v9272_v56  ;;  %v11315_v35 = vld [vmem:[%s17376_s3 + $0x26c] sm:$0xf0]  ;;  %v6846_v56 = vadd.f32 %v6845_v3, %v6833_v58 }
 0x5a2   :  { %v9495_v32 = vld [vmem:[%s17376_s3 + $0x4d0] sm:$0xf]  ;;  %v9176_v54 = vor.u32 %v11315_v35, %v9175_v9  ;;  %v7486_v35 = vmax.f32 %v15629_v0, 0.0 }
 0x5a3   :  { %7097 = vmatpush.bf16.msra.mxu2 %v9592_v48  ;;  %v11395_v60 = vld [vmem:[%s17376_s3 + $0x4ec] sm:$0xf0]  ;;  %7077 = vmatpush.bf16.msra.mxu0 %v8888_v24  ;;  %v6859_v30 = vadd.f32 %v6858_v47, %v6846_v56 }
 0x5a4   :  { %v9815_v7 = vld [vmem:[%s17376_s3 + $0x750] sm:$0xf]  ;;  %v9496_v28 = vor.u32 %v11395_v60, %v9495_v32 }
 0x5a5   :  { %7064 = vmatpush.bf16.msrb.mxu3 %v10676_v55  ;;  %7087 = vmatpush.bf16.msra.mxu1 %v9240_v38  ;;  %v11475_v49 = vld [vmem:[%s17376_s3 + $0x76c] sm:$0xf0]  ;;  %v7487_v32 = vmax.f32 %v6859_v30, 0.0 }
 0x5a6   :  { %v10103_v46 = vld [vmem:[%s17376_s3 + $0x990] sm:$0xf]  ;;  %v9816_v23 = vor.u32 %v11475_v49, %v9815_v7  ;;  %7078 = vmatmul.bf16.vlgmr.msra.gmra.mxu0 %v14366_v6 }
 0x5a7   :  { %7098 = vmatpush.bf16.msra.mxu2 %v9560_v39  ;;  %v11547_v20 = vld [vmem:[%s17376_s3 + $0x9ac] sm:$0xf0]  ;;  %7122 = vmatpush.bf16.msrb.mxu0 %v10136_v10  ;;  %v15874_v49 = vmax.f32 %v7486_v35, %v7487_v32 }
 0x5a8   :  { %7065 = vmatmul.bf16.vlgmr.msrb.gmra.mxu3 %v14730_v53  ;;  %v9143_v50 = vld [vmem:[%s17376_s3 + $0x210] sm:$0xf]  ;;  %v10104_v21 = vor.u32 %v11547_v20, %v10103_v46 }
 0x5a9   :  { %7109 = vmatpush.bf16.msra.mxu3 %v9880_v13  ;;  %7088 = vmatpush.bf16.msra.mxu1 %v9208_v45  ;;  %v11307_v16 = vld [vmem:[%s17376_s3 + $0x22c] sm:$0xf0] }
 0x5aa   :  { %v9463_v36 = vld [vmem:[%s17376_s3 + $0x490] sm:$0xf]  ;;  %v9144_v42 = vor.u32 %v11307_v16, %v9143_v50  ;;  %v6873_v16 = vpop.f32.mrf.mxu0 }
 0x5ab   :  { %7099 = vmatpush.bf16.msra.mxu2 %v9528_v8  ;;  %v11387_v61 = vld [vmem:[%s17376_s3 + $0x4ac] sm:$0xf0]  ;;  %7123 = vmatpush.bf16.msrb.mxu0 %v10104_v21  ;;  %v6897_v16 = vpop.f32.mrf.mxu2 }
 0x5ac   :  { %v9783_v14 = vld [vmem:[%s17376_s3 + $0x710] sm:$0xf]  ;;  %v9464_v57 = vor.u32 %v11387_v61, %v9463_v36  ;;  %v15894_v36 = vpop.f32.mrf.mxu1 }
 0x5ad   :  { %7110 = vmatpush.bf16.msra.mxu3 %v9848_v31  ;;  %v11467_v25 = vld [vmem:[%s17376_s3 + $0x72c] sm:$0xf0]  ;;  %7089 = vmatpush.bf16.msra.mxu1 %v9176_v54 }
 0x5ae   :  { %v10071_v40 = vld [vmem:[%s17376_s3 + $0x950] sm:$0xf]  ;;  %v9784_v17 = vor.u32 %v11467_v25, %v9783_v14  ;;  %v6860_v14 = vpop.f32.mrf.mxu3 }
 0x5af   :  { %v11539_v48 = vld [vmem:[%s17376_s3 + $0x96c] sm:$0xf0]  ;;  %7100 = vmatpush.bf16.msra.mxu2 %v9496_v28 }
 0x5b0   :  { %v10391_v12 = vld [vmem:[%s17376_s3 + $0xbd0] sm:$0xf]  ;;  %v10072_v19 = vor.u32 %v11539_v48, %v10071_v40 }
 0x5b1   :  { %v11619_v34 = vld [vmem:[%s17376_s3 + $0xbec] sm:$0xf0]  ;;  %7111 = vmatpush.bf16.msra.mxu3 %v9816_v23  ;;  %7090 = vmatpush.bf16.msra.mxu1 %v9144_v42 }
 0x5b2   :  { %v9431_v59 = vld [vmem:[%s17376_s3 + $0x450] sm:$0xf]  ;;  %v10392_v38 = vor.u32 %v11619_v34, %v10391_v12  ;;  %7124 = vmatpush.bf16.msrb.mxu0 %v10072_v19 }
 0x5b3   :  { %v11379_v55 = vld [vmem:[%s17376_s3 + $0x46c] sm:$0xf0]  ;;  %7101 = vmatpush.bf16.msra.mxu2 %v9464_v57 }
 0x5b4   :  { %v9751_v63 = vld [vmem:[%s17376_s3 + $0x6d0] sm:$0xf]  ;;  %v9432_v33 = vor.u32 %v11379_v55, %v9431_v59  ;;  %7091 = vmatmul.bf16.vlgmr.msra.gmra.mxu1 %v14403_v52 }
 0x5b5   :  { %v11459_v15 = vld [vmem:[%s17376_s3 + $0x6ec] sm:$0xf0]  ;;  %7112 = vmatpush.bf16.msra.mxu3 %v9784_v17  ;;  %7135 = vmatpush.bf16.msrb.mxu1 %v10392_v38 }
 0x5b6   :  { %v11531_v37 = vld [vmem:[%s17376_s3 + $0x92c] sm:$0xf0]  ;;  %v9752_v62 = vor.u32 %v11459_v15, %v9751_v63 }
 0x5b7   :  { %v10359_v39 = vld [vmem:[%s17376_s3 + $0xb90] sm:$0xf]  ;;  %v10040_v18 = vor.u32 %v11531_v37, %v10039_v41  ;;  %7102 = vmatpush.bf16.msra.mxu2 %v9432_v33 }
 0x5b8   :  { %v11611_v13 = vld [vmem:[%s17376_s3 + $0xbac] sm:$0xf0] }
 0x5b9   :  { %v9399_v26 = vld [vmem:[%s17376_s3 + $0x410] sm:$0xf]  ;;  %v10360_v5 = vor.u32 %v11611_v13, %v10359_v39  ;;  %7113 = vmatpush.bf16.msra.mxu3 %v9752_v62  ;;  %7125 = vmatpush.bf16.msrb.mxu0 %v10040_v18 }
 0x5ba   :  { %v11371_v1 = vld [vmem:[%s17376_s3 + $0x42c] sm:$0xf0] }
 0x5bb   :  { %v9719_v4 = vld [vmem:[%s17376_s3 + $0x690] sm:$0xf]  ;;  %v9400_v60 = vor.u32 %v11371_v1, %v9399_v26  ;;  %7136 = vmatpush.bf16.msrb.mxu1 %v10360_v5  ;;  %v6886_v1 = vpop.f32.mrf.mxu1 }
 0x5bc   :  { %v11451_v24 = vld [vmem:[%s17376_s3 + $0x6ac] sm:$0xf0]  ;;  %v6899_v1 = vpop.f32.mrf.mxu2 }
 0x5bd   :  { %v10007_v45 = vld [vmem:[%s17376_s3 + $0x8d0] sm:$0xf]  ;;  %v9720_v7 = vor.u32 %v11451_v24, %v9719_v4  ;;  %7103 = vmatpush.bf16.msra.mxu2 %v9400_v60  ;;  %v11295_v4 = vld [vmem:[%s17376_s3 + $0x1d4] sm:$0xf] }
 0x5be   :  { %v11523_v8 = vld [vmem:[%s17376_s3 + $0x8ec] sm:$0xf0]  ;;  %v9113_v24 = vld [vmem:[%s17376_s3 + $0x1f0] sm:$0xf0] }
 0x5bf   :  { %v10327_v31 = vld [vmem:[%s17376_s3 + $0xb50] sm:$0xf]  ;;  %v10008_v46 = vor.u32 %v11523_v8, %v10007_v45  ;;  %7114 = vmatpush.bf16.msra.mxu3 %v9720_v7  ;;  %v11319_v1 = vld [vmem:[%s17376_s3 + $0x294] sm:$0xf] }
 0x5c0   :  { %v11603_v9 = vld [vmem:[%s17376_s3 + $0xb6c] sm:$0xf0]  ;;  %7104 = vmatmul.bf16.vlgmr.msra.gmra.mxu2 %v14444_v44 }
 0x5c1   :  { %v10647_v58 = vld [vmem:[%s17376_s3 + $0xdd0] sm:$0xf]  ;;  %v10328_v20 = vor.u32 %v11603_v9, %v10327_v31  ;;  %7126 = vmatpush.bf16.msrb.mxu0 %v10008_v46 }
 0x5c2   :  { %v11683_v10 = vld [vmem:[%s17376_s3 + $0xdec] sm:$0xf0] }
 0x5c3   :  { %v9687_v0 = vld [vmem:[%s17376_s3 + $0x650] sm:$0xf]  ;;  %v10648_v50 = vor.u32 %v11683_v10, %v10647_v58  ;;  %7137 = vmatpush.bf16.msrb.mxu1 %v10328_v20  ;;  %v9116_v10 = vor.u32 %v11295_v4, %v9113_v24  ;;  %v11287_v20 = vld [vmem:[%s17376_s3 + $0x194] sm:$0xf] }
 0x5c4   :  { %v11443_v54 = vld [vmem:[%s17376_s3 + $0x66c] sm:$0xf0] }
 0x5c5   :  { %v9975_v29 = vld [vmem:[%s17376_s3 + $0x890] sm:$0xf]  ;;  %v9688_v56 = vor.u32 %v11443_v54, %v9687_v0  ;;  %7148 = vmatpush.bf16.msrb.mxu2 %v10648_v50  ;;  %v9081_v0 = vld [vmem:[%s17376_s3 + $0x1b0] sm:$0xf0]  ;;  %v15991_v54 = vld [vmem:[%s17377_s4] sm:$0xff] }
 0x5c6   :  { %v11515_v28 = vld [vmem:[%s17376_s3 + $0x8ac] sm:$0xf0]  ;;  %v9084_v14 = vor.u32 %v11287_v20, %v9081_v0 }
 0x5c7   :  { %v10295_v23 = vld [vmem:[%s17376_s3 + $0xb10] sm:$0xf]  ;;  %v9976_v40 = vor.u32 %v11515_v28, %v9975_v29  ;;  %7115 = vmatpush.bf16.msra.mxu3 %v9688_v56  ;;  %v4080_v29 = vperm.slane %v15991_v54, 2 }
 0x5c8   :  { %v11595_v3 = vld [vmem:[%s17376_s3 + $0xb2c] sm:$0xf0] }
 0x5c9   :  { %v10615_v61 = vld [vmem:[%s17376_s3 + $0xd90] sm:$0xf]  ;;  %v10296_v48 = vor.u32 %v11595_v3, %v10295_v23  ;;  %7127 = vmatpush.bf16.msrb.mxu0 %v9976_v40 }
 0x5ca   :  { %v11675_v21 = vld [vmem:[%s17376_s3 + $0xdac] sm:$0xf0] }
 0x5cb   :  { %v9655_v25 = vld [vmem:[%s17376_s3 + $0x610] sm:$0xf]  ;;  %v10616_v57 = vor.u32 %v11675_v21, %v10615_v61  ;;  %7138 = vmatpush.bf16.msrb.mxu1 %v10296_v48  ;;  %v11279_v48 = vld [vmem:[%s17376_s3 + $0x154] sm:$0xf] }
 0x5cc   :  { %v11435_v12 = vld [vmem:[%s17376_s3 + $0x62c] sm:$0xf0] }
 0x5cd   :  { %v9943_v34 = vld [vmem:[%s17376_s3 + $0x850] sm:$0xf]  ;;  %v9656_v15 = vor.u32 %v11435_v12, %v9655_v25  ;;  %7149 = vmatpush.bf16.msrb.mxu2 %v10616_v57  ;;  %v9049_v12 = vld [vmem:[%s17376_s3 + $0x170] sm:$0xf0]  ;;  %v6872_v57 = vadd.f32 %v15840_v27, %v4080_v29 }
 0x5ce   :  { %v11507_v42 = vld [vmem:[%s17376_s3 + $0x86c] sm:$0xf0] }
 0x5cf   :  { %v10263_v17 = vld [vmem:[%s17376_s3 + $0xad0] sm:$0xf]  ;;  %v9944_v41 = vor.u32 %v11507_v42, %v9943_v34  ;;  %7116 = vmatpush.bf16.msra.mxu3 %v9656_v15  ;;  %v11359_v34 = vld [vmem:[%s17376_s3 + $0x3d4] sm:$0xf]  ;;  %v9052_v15 = vor.u32 %v11279_v48, %v9049_v12 }
 0x5d0   :  { %v11587_v59 = vld [vmem:[%s17376_s3 + $0xaec] sm:$0xf0]  ;;  %v9369_v42 = vld [vmem:[%s17376_s3 + $0x3f0] sm:$0xf0] }
 0x5d1   :  { %v10583_v55 = vld [vmem:[%s17376_s3 + $0xd50] sm:$0xf]  ;;  %v10264_v37 = vor.u32 %v11587_v59, %v10263_v17  ;;  %7128 = vmatpush.bf16.msrb.mxu0 %v9944_v41  ;;  %v9372_v41 = vor.u32 %v11359_v34, %v9369_v42 }
 0x5d2   :  { %v11667_v19 = vld [vmem:[%s17376_s3 + $0xd6c] sm:$0xf0]  ;;  %7117 = vmatmul.bf16.vlgmr.msra.gmra.mxu3 %v14506_v51 }
 0x5d3   :  { %v10903_v38 = vld [vmem:[%s17376_s3 + $0xfd0] sm:$0xf]  ;;  %v10584_v33 = vor.u32 %v11667_v19, %v10583_v55  ;;  %7139 = vmatpush.bf16.msrb.mxu1 %v10264_v37 }
 0x5d4   :  { %v11747_v63 = vld [vmem:[%s17376_s3 + $0xfec] sm:$0xf0] }
 0x5d5   :  { %v9911_v39 = vld [vmem:[%s17376_s3 + $0x810] sm:$0xf]  ;;  %v10904_v62 = vor.u32 %v11747_v63, %v10903_v38  ;;  %7150 = vmatpush.bf16.msrb.mxu2 %v10584_v33  ;;  %v6885_v63 = vadd.f32 %v15894_v36, %v6872_v57  ;;  %v11351_v36 = vld [vmem:[%s17376_s3 + $0x394] sm:$0xf] }
 0x5d6   :  { %v11499_v13 = vld [vmem:[%s17376_s3 + $0x82c] sm:$0xf0]  ;;  %v9337_v33 = vld [vmem:[%s17376_s3 + $0x3b0] sm:$0xf0] }
 0x5d7   :  { %v10231_v11 = vld [vmem:[%s17376_s3 + $0xa90] sm:$0xf]  ;;  %v9912_v45 = vor.u32 %v11499_v13, %v9911_v39  ;;  %7161 = vmatpush.bf16.msrb.mxu3 %v10904_v62  ;;  %v11271_v39 = vld [vmem:[%s17376_s3 + $0x114] sm:$0xf]  ;;  %v6898_v62 = vadd.f32 %v6897_v16, %v6885_v63 }
 0x5d8   :  { %v11579_v47 = vld [vmem:[%s17376_s3 + $0xaac] sm:$0xf0]  ;;  %v9017_v13 = vld [vmem:[%s17376_s3 + $0x130] sm:$0xf0] }
 0x5d9   :  { %v10551_v26 = vld [vmem:[%s17376_s3 + $0xd10] sm:$0xf]  ;;  %v10232_v8 = vor.u32 %v11579_v47, %v10231_v11  ;;  %7129 = vmatpush.bf16.msrb.mxu0 %v9912_v45  ;;  %v6923_v11 = vpop.f32.mrf.mxu0  ;;  %v9020_v24 = vor.u32 %v11271_v39, %v9017_v13  ;;  %v9340_v45 = vor.u32 %v11351_v36, %v9337_v33  ;;  %v8953_v16 = vld [vmem:[%s17376_s3 + $0xb0] sm:$0xf0] }
 0x5da   :  { %v11659_v18 = vld [vmem:[%s17376_s3 + $0xd2c] sm:$0xf0]  ;;  %v11327_v63 = vld [vmem:[%s17376_s3 + $0x2d4] sm:$0xf] }
 0x5db   :  { %v10871_v5 = vld [vmem:[%s17376_s3 + $0xf90] sm:$0xf]  ;;  %v10552_v31 = vor.u32 %v11659_v18, %v10551_v26  ;;  %7140 = vmatpush.bf16.msrb.mxu1 %v10232_v8  ;;  %v6910_v18 = vpop.f32.mrf.mxu3  ;;  %v9881_v39 = vld [vmem:[%s17376_s3 + $0x7f0] sm:$0xf0] }
 0x5dc   :  { %v11739_v30 = vld [vmem:[%s17376_s3 + $0xfac] sm:$0xf0]  ;;  %7130 = vmatmul.bf16.vlgmr.msrb.gmra.mxu0 %v14565_v43  ;;  %v6911_v4 = vadd.f32 %v6910_v18, %v6898_v62  ;;  %v11239_v62 = vld [vmem:[%s17376_s3 + $0x14] sm:$0xf] }
 0x5dd   :  { %v10872_v9 = vor.u32 %v11739_v30, %v10871_v5  ;;  %v10199_v35 = vld [vmem:[%s17376_s3 + $0xa50] sm:$0xf]  ;;  %7151 = vmatpush.bf16.msrb.mxu2 %v10552_v31  ;;  %7174 = vmatpush.bf16.msra.mxu0 %v9116_v10  ;;  %v11423_v10 = vld [vmem:[%s17376_s3 + $0x5d4] sm:$0xf] }
 0x5de   :  { %v11571_v32 = vld [vmem:[%s17376_s3 + $0xa6c] sm:$0xf0]  ;;  %v9209_v18 = vld [vmem:[%s17376_s3 + $0x2b0] sm:$0xf0] }
 0x5df   :  { %v10519_v58 = vld [vmem:[%s17376_s3 + $0xcd0] sm:$0xf]  ;;  %v10200_v50 = vor.u32 %v11571_v32, %v10199_v35  ;;  %7162 = vmatpush.bf16.msrb.mxu3 %v10872_v9  ;;  %v11263_v9 = vld [vmem:[%s17376_s3 + $0xd4] sm:$0xf] }
 0x5e0   :  { %v11651_v60 = vld [vmem:[%s17376_s3 + $0xcec] sm:$0xf0]  ;;  %v8985_v35 = vld [vmem:[%s17376_s3 + $0xf0] sm:$0xf0] }
 0x5e1   :  { %v10839_v7 = vld [vmem:[%s17376_s3 + $0xf50] sm:$0xf]  ;;  %v10520_v23 = vor.u32 %v11651_v60, %v10519_v58  ;;  %7141 = vmatpush.bf16.msrb.mxu1 %v10200_v50  ;;  %7175 = vmatpush.bf16.msra.mxu0 %v9084_v14  ;;  %v11343_v32 = vld [vmem:[%s17376_s3 + $0x354] sm:$0xf]  ;;  %v8988_v0 = vor.u32 %v11263_v9, %v8985_v35  ;;  %v6936_v14 = vpop.f32.mrf.mxu1  ;;  %v9212_v35 = vor.u32 %v11319_v1, %v9209_v18 }
 0x5e2   :  { %v11731_v46 = vld [vmem:[%s17376_s3 + $0xf6c] sm:$0xf0]  ;;  %v9305_v58 = vld [vmem:[%s17376_s3 + $0x370] sm:$0xf0] }
 0x5e3   :  { %v10167_v28 = vld [vmem:[%s17376_s3 + $0xa10] sm:$0xf]  ;;  %v10840_v3 = vor.u32 %v11731_v46, %v10839_v7  ;;  %7152 = vmatpush.bf16.msrb.mxu2 %v10520_v23  ;;  %v9625_v60 = vld [vmem:[%s17376_s3 + $0x5f0] sm:$0xf0]  ;;  %v6924_v7 = vadd.f32 %v6923_v11, %v6911_v4  ;;  %v9308_v29 = vor.u32 %v11343_v32, %v9305_v58  ;;  %v6912_v34 = vpop.f32.mrf.mxu3 }
 0x5e4   :  { %v11563_v61 = vld [vmem:[%s17376_s3 + $0xa2c] sm:$0xf0]  ;;  %v11255_v23 = vld [vmem:[%s17376_s3 + $0x94] sm:$0xf] }
 0x5e5   :  { %v10487_v21 = vld [vmem:[%s17376_s3 + $0xc90] sm:$0xf]  ;;  %v10168_v17 = vor.u32 %v11563_v61, %v10167_v28  ;;  %7163 = vmatpush.bf16.msrb.mxu3 %v10840_v3  ;;  %7176 = vmatpush.bf16.msra.mxu0 %v9052_v15  ;;  %v9628_v3 = vor.u32 %v11423_v10, %v9625_v60  ;;  %v11335_v61 = vld [vmem:[%s17376_s3 + $0x314] sm:$0xf]  ;;  %v16106_v48 = vadd.f32 %v6936_v14, %v6924_v7 }
 0x5e6   :  { %v11643_v56 = vld [vmem:[%s17376_s3 + $0xcac] sm:$0xf0]  ;;  %v8956_v57 = vor.u32 %v11255_v23, %v8953_v16  ;;  %v9241_v15 = vld [vmem:[%s17376_s3 + $0x2f0] sm:$0xf0] }
 0x5e7   :  { %v10807_v25 = vld [vmem:[%s17376_s3 + $0xf10] sm:$0xf]  ;;  %v10488_v59 = vor.u32 %v11643_v56, %v10487_v21  ;;  %7142 = vmatpush.bf16.msrb.mxu1 %v10168_v17  ;;  %v9273_v21 = vld [vmem:[%s17376_s3 + $0x330] sm:$0xf0]  ;;  %v6925_v56 = vpop.f32.mrf.mxu0  ;;  %v9244_v33 = vor.u32 %v11327_v63, %v9241_v15 }
 0x5e8   :  { %v11723_v40 = vld [vmem:[%s17376_s3 + $0xf2c] sm:$0xf0]  ;;  %v9276_v17 = vor.u32 %v11335_v61, %v9273_v21  ;;  %v8889_v11 = vld [vmem:[%s17376_s3 + $0x30] sm:$0xf0]  ;;  %v6949_v21 = vpop.f32.mrf.mxu2 }
 0x5e9   :  { %v10808_v55 = vor.u32 %v11723_v40, %v10807_v25  ;;  %v10455_v19 = vld [vmem:[%s17376_s3 + $0xc50] sm:$0xf]  ;;  %7153 = vmatpush.bf16.msrb.mxu2 %v10488_v59  ;;  %7177 = vmatpush.bf16.msra.mxu0 %v9020_v24  ;;  %v11415_v25 = vld [vmem:[%s17376_s3 + $0x594] sm:$0xf]  ;;  %v8892_v9 = vor.u32 %v11239_v62, %v8889_v11 }
 0x5ea   :  { %v11635_v38 = vld [vmem:[%s17376_s3 + $0xc6c] sm:$0xf0]  ;;  %7143 = vmatmul.bf16.vlgmr.msrb.gmra.mxu1 %v14624_v22  ;;  %v9593_v40 = vld [vmem:[%s17376_s3 + $0x5b0] sm:$0xf0] }
 0x5eb   :  { %v10775_v27 = vld [vmem:[%s17376_s3 + $0xed0] sm:$0xf]  ;;  %7164 = vmatpush.bf16.msrb.mxu3 %v10808_v55  ;;  %v10456_v47 = vor.u32 %v11635_v38, %v10455_v19  ;;  %7187 = vmatpush.bf16.msra.mxu1 %v9372_v41  ;;  %v11247_v55 = vld [vmem:[%s17376_s3 + $0x54] sm:$0xf]  ;;  %v9596_v38 = vor.u32 %v11415_v25, %v9593_v40  ;;  %v6950_v40 = vadd.f32 %v6949_v21, %v16106_v48 }
 0x5ec   :  { %v11715_v37 = vld [vmem:[%s17376_s3 + $0xeec] sm:$0xf0]  ;;  %v8921_v19 = vld [vmem:[%s17376_s3 + $0x70] sm:$0xf0] }
 0x5ed   :  { %v10776_v26 = vor.u32 %v11715_v37, %v10775_v27  ;;  %v10423_v5 = vld [vmem:[%s17376_s3 + $0xc10] sm:$0xf]  ;;  %7154 = vmatpush.bf16.msrb.mxu2 %v10456_v47  ;;  %7178 = vmatpush.bf16.msra.mxu0 %v8988_v0  ;;  %v11407_v41 = vld [vmem:[%s17376_s3 + $0x554] sm:$0xf]  ;;  %v8924_v36 = vor.u32 %v11247_v55, %v8921_v19 }
 0x5ee   :  { %v11627_v30 = vld [vmem:[%s17376_s3 + $0xc2c] sm:$0xf0]  ;;  %v9561_v27 = vld [vmem:[%s17376_s3 + $0x570] sm:$0xf0] }
 0x5ef   :  { %v10743_v8 = vld [vmem:[%s17376_s3 + $0xe90] sm:$0xf]  ;;  %7165 = vmatpush.bf16.msrb.mxu3 %v10776_v26  ;;  %v10424_v46 = vor.u32 %v11627_v30, %v10423_v5  ;;  %7188 = vmatpush.bf16.msra.mxu1 %v9340_v45  ;;  %v11487_v37 = vld [vmem:[%s17376_s3 + $0x7d4] sm:$0xf]  ;;  %v9564_v47 = vor.u32 %v11407_v41, %v9561_v27  ;;  %v6938_v30 = vpop.f32.mrf.mxu1  ;;  %v6975_v11 = vpop.f32.mrf.mxu0 }
 0x5f0   :  { %v11707_v31 = vld [vmem:[%s17376_s3 + $0xeac] sm:$0xf0]  ;;  %v9884_v26 = vor.u32 %v11487_v37, %v9881_v39  ;;  %v11399_v5 = vld [vmem:[%s17376_s3 + $0x514] sm:$0xf]  ;;  %v6951_v18 = vpop.f32.mrf.mxu2 }
 0x5f1   :  { %v10744_v20 = vor.u32 %v11707_v31, %v10743_v8  ;;  %v10711_v50 = vld [vmem:[%s17376_s3 + $0xe50] sm:$0xf]  ;;  %7155 = vmatpush.bf16.msrb.mxu2 %v10424_v46  ;;  %7179 = vmatpush.bf16.msra.mxu0 %v8956_v57  ;;  %v9529_v4 = vld [vmem:[%s17376_s3 + $0x530] sm:$0xf0] }
 0x5f2   :  { %v11699_v28 = vld [vmem:[%s17376_s3 + $0xe6c] sm:$0xf0]  ;;  %v11479_v24 = vld [vmem:[%s17376_s3 + $0x794] sm:$0xf]  ;;  %v9532_v32 = vor.u32 %v11399_v5, %v9529_v4  ;;  %v6962_v5 = vpop.f32.mrf.mxu3 }
 0x5f3   :  { %7166 = vmatpush.bf16.msrb.mxu3 %v10744_v20  ;;  %v10712_v12 = vor.u32 %v11699_v28, %v10711_v50  ;;  %v10679_v42 = vld [vmem:[%s17376_s3 + $0xe10] sm:$0xf]  ;;  %7189 = vmatpush.bf16.msra.mxu1 %v9308_v29  ;;  %v9849_v45 = vld [vmem:[%s17376_s3 + $0x7b0] sm:$0xf0] }
 0x5f4   :  { %v11691_v59 = vld [vmem:[%s17376_s3 + $0xe2c] sm:$0xf0]  ;;  %7156 = vmatmul.bf16.vlgmr.msrb.gmra.mxu2 %v14677_v2  ;;  %v11551_v8 = vld [vmem:[%s17376_s3 + $0x9d4] sm:$0xf]  ;;  %v9852_v58 = vor.u32 %v11479_v24, %v9849_v45  ;;  %v16257_v24 = vadd.f32 %v6962_v5, %v6950_v40 }
 0x5f5   :  { %7200 = vmatpush.bf16.msra.mxu2 %v9628_v3  ;;  %v10680_v13 = vor.u32 %v11691_v59, %v10679_v42  ;;  %v10137_v31 = vld [vmem:[%s17376_s3 + $0x9f0] sm:$0xf0]  ;;  %7180 = vmatpush.bf16.msra.mxu0 %v8924_v36 }
 0x5f6   :  { %v11311_v10 = vld [vmem:[%s17376_s3 + $0x254] sm:$0xf]  ;;  %v10140_v46 = vor.u32 %v11551_v8, %v10137_v31 }
 0x5f7   :  { %7167 = vmatpush.bf16.msrb.mxu3 %v10712_v12  ;;  %7190 = vmatpush.bf16.msra.mxu1 %v9276_v17  ;;  %v9177_v60 = vld [vmem:[%s17376_s3 + $0x270] sm:$0xf0] }
 0x5f8   :  { %v11391_v7 = vld [vmem:[%s17376_s3 + $0x4d4] sm:$0xf]  ;;  %v9180_v23 = vor.u32 %v11311_v10, %v9177_v60 }
 0x5f9   :  { %7201 = vmatpush.bf16.msra.mxu2 %v9596_v38  ;;  %v9497_v20 = vld [vmem:[%s17376_s3 + $0x4f0] sm:$0xf0]  ;;  %7181 = vmatpush.bf16.msra.mxu0 %v8892_v9 }
 0x5fa   :  { %v11471_v0 = vld [vmem:[%s17376_s3 + $0x754] sm:$0xf]  ;;  %v9500_v16 = vor.u32 %v11391_v7, %v9497_v20 }
 0x5fb   :  { %7168 = vmatpush.bf16.msrb.mxu3 %v10680_v13  ;;  %7191 = vmatpush.bf16.msra.mxu1 %v9244_v33  ;;  %v9817_v29 = vld [vmem:[%s17376_s3 + $0x770] sm:$0xf0] }
 0x5fc   :  { %v11543_v50 = vld [vmem:[%s17376_s3 + $0x994] sm:$0xf]  ;;  %v9820_v61 = vor.u32 %v11471_v0, %v9817_v29  ;;  %7182 = vmatmul.bf16.vlgmr.msra.gmra.mxu0 %v14366_v6 }
 0x5fd   :  { %7202 = vmatpush.bf16.msra.mxu2 %v9564_v47  ;;  %v10105_v28 = vld [vmem:[%s17376_s3 + $0x9b0] sm:$0xf0]  ;;  %7226 = vmatpush.bf16.msrb.mxu0 %v10140_v46  ;;  %v4081_v47 = vperm.slane %v15991_v54, 3 }
 0x5fe   :  { %7169 = vmatmul.bf16.vlgmr.msrb.gmra.mxu3 %v14730_v53  ;;  %v11303_v3 = vld [vmem:[%s17376_s3 + $0x214] sm:$0xf]  ;;  %v10108_v12 = vor.u32 %v11543_v50, %v10105_v28 }
 0x5ff   :  { %7213 = vmatpush.bf16.msra.mxu3 %v9884_v26  ;;  %7192 = vmatpush.bf16.msra.mxu1 %v9212_v35  ;;  %v9145_v56 = vld [vmem:[%s17376_s3 + $0x230] sm:$0xf0] }
 0x600   :  { %v11383_v14 = vld [vmem:[%s17376_s3 + $0x494] sm:$0xf]  ;;  %v9148_v55 = vor.u32 %v11303_v3, %v9145_v56  ;;  %v6976_v3 = vadd.f32 %v6975_v11, %v4081_v47 }
 0x601   :  { %7203 = vmatpush.bf16.msra.mxu2 %v9532_v32  ;;  %v9465_v25 = vld [vmem:[%s17376_s3 + $0x4b0] sm:$0xf0]  ;;  %7227 = vmatpush.bf16.msrb.mxu0 %v10108_v12 }
 0x602   :  { %v11463_v34 = vld [vmem:[%s17376_s3 + $0x714] sm:$0xf]  ;;  %v9468_v19 = vor.u32 %v11383_v14, %v9465_v25  ;;  %v6977_v14 = vpop.f32.mrf.mxu0  ;;  %v6988_v25 = vpop.f32.mrf.mxu1 }
 0x603   :  { %7214 = vmatpush.bf16.msra.mxu3 %v9852_v58  ;;  %v9785_v42 = vld [vmem:[%s17376_s3 + $0x730] sm:$0xf0]  ;;  %7193 = vmatpush.bf16.msra.mxu1 %v9180_v23  ;;  %v7001_v14 = vpop.f32.mrf.mxu2 }
 0x604   :  { %v11535_v57 = vld [vmem:[%s17376_s3 + $0x954] sm:$0xf]  ;;  %v9788_v38 = vor.u32 %v11463_v34, %v9785_v42  ;;  %v16308_v34 = vadd.f32 %v6988_v25, %v6976_v3  ;;  %v11292_v3 = vld [vmem:[%s17376_s3 + $0x1b4] sm:$0xf0] }
 0x605   :  { %v10073_v17 = vld [vmem:[%s17376_s3 + $0x970] sm:$0xf0]  ;;  %7204 = vmatpush.bf16.msra.mxu2 %v9500_v16 }
 0x606   :  { %v11615_v48 = vld [vmem:[%s17376_s3 + $0xbd4] sm:$0xf]  ;;  %v10076_v41 = vor.u32 %v11535_v57, %v10073_v17  ;;  %v6964_v57 = vpop.f32.mrf.mxu3 }
 0x607   :  { %v10393_v59 = vld [vmem:[%s17376_s3 + $0xbf0] sm:$0xf0]  ;;  %7215 = vmatpush.bf16.msra.mxu3 %v9820_v61  ;;  %7194 = vmatpush.bf16.msra.mxu1 %v9148_v55 }
 0x608   :  { %v11375_v63 = vld [vmem:[%s17376_s3 + $0x454] sm:$0xf]  ;;  %v10396_v27 = vor.u32 %v11615_v48, %v10393_v59  ;;  %7228 = vmatpush.bf16.msrb.mxu0 %v10076_v41 }
 0x609   :  { %v9433_v15 = vld [vmem:[%s17376_s3 + $0x470] sm:$0xf0]  ;;  %7205 = vmatpush.bf16.msra.mxu2 %v9468_v19 }
 0x60a   :  { %v11455_v37 = vld [vmem:[%s17376_s3 + $0x6d4] sm:$0xf]  ;;  %v9436_v26 = vor.u32 %v11375_v63, %v9433_v15  ;;  %7195 = vmatmul.bf16.vlgmr.msra.gmra.mxu1 %v14403_v52 }
 0x60b   :  { %v9753_v39 = vld [vmem:[%s17376_s3 + $0x6f0] sm:$0xf0]  ;;  %7216 = vmatpush.bf16.msra.mxu3 %v9788_v38  ;;  %7239 = vmatpush.bf16.msrb.mxu1 %v10396_v27 }
 0x60c   :  { %v11527_v13 = vld [vmem:[%s17376_s3 + $0x914] sm:$0xf]  ;;  %v9756_v1 = vor.u32 %v11455_v37, %v9753_v39 }
 0x60d   :  { %v10041_v36 = vld [vmem:[%s17376_s3 + $0x930] sm:$0xf0]  ;;  %7206 = vmatpush.bf16.msra.mxu2 %v9436_v26 }
 0x60e   :  { %v11607_v33 = vld [vmem:[%s17376_s3 + $0xb94] sm:$0xf]  ;;  %v10044_v45 = vor.u32 %v11527_v13, %v10041_v36 }
 0x60f   :  { %v10361_v62 = vld [vmem:[%s17376_s3 + $0xbb0] sm:$0xf0]  ;;  %7217 = vmatpush.bf16.msra.mxu3 %v9756_v1 }
 0x610   :  { %v11367_v30 = vld [vmem:[%s17376_s3 + $0x414] sm:$0xf]  ;;  %v10364_v8 = vor.u32 %v11607_v33, %v10361_v62  ;;  %7229 = vmatpush.bf16.msrb.mxu0 %v10044_v45 }
 0x611   :  { %v9401_v4 = vld [vmem:[%s17376_s3 + $0x430] sm:$0xf0] }
 0x612   :  { %v11447_v31 = vld [vmem:[%s17376_s3 + $0x694] sm:$0xf]  ;;  %v9404_v46 = vor.u32 %v11367_v30, %v9401_v4  ;;  %7240 = vmatpush.bf16.msrb.mxu1 %v10364_v8  ;;  %v6990_v4 = vpop.f32.mrf.mxu1 }
 0x613   :  { %v9721_v9 = vld [vmem:[%s17376_s3 + $0x6b0] sm:$0xf0] }
 0x614   :  { %v11519_v35 = vld [vmem:[%s17376_s3 + $0x8d4] sm:$0xf]  ;;  %v9724_v20 = vor.u32 %v11447_v31, %v9721_v9  ;;  %7207 = vmatpush.bf16.msra.mxu2 %v9404_v46  ;;  %v9119_v9 = vld [vmem:[%s17376_s3 + $0x1d8] sm:$0xf] }
 0x615   :  { %v10009_v32 = vld [vmem:[%s17376_s3 + $0x8f0] sm:$0xf0] }
 0x616   :  { %v11599_v58 = vld [vmem:[%s17376_s3 + $0xb54] sm:$0xf]  ;;  %v10012_v0 = vor.u32 %v11519_v35, %v10009_v32  ;;  %7218 = vmatpush.bf16.msra.mxu3 %v9724_v20  ;;  %v11300_v35 = vld [vmem:[%s17376_s3 + $0x1f4] sm:$0xf0] }
 0x617   :  { %v10329_v10 = vld [vmem:[%s17376_s3 + $0xb70] sm:$0xf0]  ;;  %7208 = vmatmul.bf16.vlgmr.msra.gmra.mxu2 %v14444_v44 }
 0x618   :  { %v11679_v60 = vld [vmem:[%s17376_s3 + $0xdd4] sm:$0xf]  ;;  %v10332_v29 = vor.u32 %v11599_v58, %v10329_v10  ;;  %7230 = vmatpush.bf16.msrb.mxu0 %v10012_v0  ;;  %v9120_v0 = vor.u32 %v11300_v35, %v9119_v9 }
 0x619   :  { %v10649_v7 = vld [vmem:[%s17376_s3 + $0xdf0] sm:$0xf0] }
 0x61a   :  { %v11439_v50 = vld [vmem:[%s17376_s3 + $0x654] sm:$0xf]  ;;  %v10652_v16 = vor.u32 %v11679_v60, %v10649_v7  ;;  %7241 = vmatpush.bf16.msrb.mxu1 %v10332_v29 }
 0x61b   :  { %v9689_v28 = vld [vmem:[%s17376_s3 + $0x670] sm:$0xf0] }
 0x61c   :  { %v11511_v23 = vld [vmem:[%s17376_s3 + $0x894] sm:$0xf]  ;;  %v9692_v42 = vor.u32 %v11439_v50, %v9689_v28  ;;  %7252 = vmatpush.bf16.msrb.mxu2 %v10652_v16 }
 0x61d   :  { %v9977_v61 = vld [vmem:[%s17376_s3 + $0x8b0] sm:$0xf0] }
 0x61e   :  { %v11591_v21 = vld [vmem:[%s17376_s3 + $0xb14] sm:$0xf]  ;;  %v9980_v48 = vor.u32 %v11511_v23, %v9977_v61  ;;  %7219 = vmatpush.bf16.msra.mxu3 %v9692_v42  ;;  %v9087_v23 = vld [vmem:[%s17376_s3 + $0x198] sm:$0xf]  ;;  %v7002_v42 = vadd.f32 %v7001_v14, %v16308_v34 }
 0x61f   :  { %v10297_v56 = vld [vmem:[%s17376_s3 + $0xb30] sm:$0xf0]  ;;  %v9088_v57 = vor.u32 %v11292_v3, %v9087_v23  ;;  %v9375_v34 = vld [vmem:[%s17376_s3 + $0x3d8] sm:$0xf] }
 0x620   :  { %v11671_v40 = vld [vmem:[%s17376_s3 + $0xd94] sm:$0xf]  ;;  %v10300_v59 = vor.u32 %v11591_v21, %v10297_v56  ;;  %7231 = vmatpush.bf16.msrb.mxu0 %v9980_v48  ;;  %v9279_v14 = vld [vmem:[%s17376_s3 + $0x318] sm:$0xf] }
 0x621   :  { %v10617_v12 = vld [vmem:[%s17376_s3 + $0xdb0] sm:$0xf0] }
 0x622   :  { %v11431_v17 = vld [vmem:[%s17376_s3 + $0x614] sm:$0xf]  ;;  %v10620_v63 = vor.u32 %v11671_v40, %v10617_v12  ;;  %7242 = vmatpush.bf16.msrb.mxu1 %v10300_v59  ;;  %v9055_v59 = vld [vmem:[%s17376_s3 + $0x158] sm:$0xf] }
 0x623   :  { %v9657_v55 = vld [vmem:[%s17376_s3 + $0x630] sm:$0xf0] }
 0x624   :  { %v11503_v19 = vld [vmem:[%s17376_s3 + $0x854] sm:$0xf]  ;;  %v9660_v36 = vor.u32 %v11431_v17, %v9657_v55  ;;  %7253 = vmatpush.bf16.msrb.mxu2 %v10620_v63  ;;  %v11284_v55 = vld [vmem:[%s17376_s3 + $0x174] sm:$0xf0] }
 0x625   :  { %v9945_v38 = vld [vmem:[%s17376_s3 + $0x870] sm:$0xf0] }
 0x626   :  { %v11583_v15 = vld [vmem:[%s17376_s3 + $0xad4] sm:$0xf]  ;;  %v9948_v33 = vor.u32 %v11503_v19, %v9945_v38  ;;  %7220 = vmatpush.bf16.msra.mxu3 %v9660_v36  ;;  %v11364_v19 = vld [vmem:[%s17376_s3 + $0x3f4] sm:$0xf0] }
 0x627   :  { %v10265_v41 = vld [vmem:[%s17376_s3 + $0xaf0] sm:$0xf0] }
 0x628   :  { %v11663_v27 = vld [vmem:[%s17376_s3 + $0xd54] sm:$0xf]  ;;  %v10268_v62 = vor.u32 %v11583_v15, %v10265_v41  ;;  %7232 = vmatpush.bf16.msrb.mxu0 %v9948_v33  ;;  %v9023_v33 = vld [vmem:[%s17376_s3 + $0x118] sm:$0xf] }
 0x629   :  { %v10585_v37 = vld [vmem:[%s17376_s3 + $0xd70] sm:$0xf0]  ;;  %7221 = vmatmul.bf16.vlgmr.msra.gmra.mxu3 %v14506_v51 }
 0x62a   :  { %v11743_v39 = vld [vmem:[%s17376_s3 + $0xfd4] sm:$0xf]  ;;  %v10588_v26 = vor.u32 %v11663_v27, %v10585_v37  ;;  %7243 = vmatpush.bf16.msrb.mxu1 %v10268_v62  ;;  %v9056_v37 = vor.u32 %v11284_v55, %v9055_v59  ;;  %v11276_v62 = vld [vmem:[%s17376_s3 + $0x134] sm:$0xf0] }
 0x62b   :  { %v10905_v13 = vld [vmem:[%s17376_s3 + $0xff0] sm:$0xf0] }
 0x62c   :  { %v11495_v11 = vld [vmem:[%s17376_s3 + $0x814] sm:$0xf]  ;;  %v10908_v1 = vor.u32 %v11743_v39, %v10905_v13  ;;  %7254 = vmatpush.bf16.msrb.mxu2 %v10588_v26  ;;  %v9376_v39 = vor.u32 %v11364_v19, %v9375_v34  ;;  %v7027_v26 = vpop.f32.mrf.mxu0 }
 0x62d   :  { %v9913_v47 = vld [vmem:[%s17376_s3 + $0x830] sm:$0xf0] }
 0x62e   :  { %v11575_v18 = vld [vmem:[%s17376_s3 + $0xa94] sm:$0xf]  ;;  %v9916_v32 = vor.u32 %v11495_v11, %v9913_v47  ;;  %7265 = vmatpush.bf16.msrb.mxu3 %v10908_v1  ;;  %v9343_v11 = vld [vmem:[%s17376_s3 + $0x398] sm:$0xf] }
 0x62f   :  { %v10233_v5 = vld [vmem:[%s17376_s3 + $0xab0] sm:$0xf0]  ;;  %v11356_v47 = vld [vmem:[%s17376_s3 + $0x3b4] sm:$0xf0] }
 0x630   :  { %v11655_v30 = vld [vmem:[%s17376_s3 + $0xd14] sm:$0xf]  ;;  %v10236_v58 = vor.u32 %v11575_v18, %v10233_v5  ;;  %7233 = vmatpush.bf16.msrb.mxu0 %v9916_v32  ;;  %v7003_v5 = vpop.f32.mrf.mxu2  ;;  %v9344_v9 = vor.u32 %v11356_v47, %v9343_v11 }
 0x631   :  { %v10553_v45 = vld [vmem:[%s17376_s3 + $0xd30] sm:$0xf0] }
 0x632   :  { %v11735_v8 = vld [vmem:[%s17376_s3 + $0xf94] sm:$0xf]  ;;  %v10556_v10 = vor.u32 %v11655_v30, %v10553_v45  ;;  %7244 = vmatpush.bf16.msrb.mxu1 %v10236_v58  ;;  %v7014_v30 = vpop.f32.mrf.mxu3  ;;  %v8991_v58 = vld [vmem:[%s17376_s3 + $0xd8] sm:$0xf] }
 0x633   :  { %v10873_v31 = vld [vmem:[%s17376_s3 + $0xfb0] sm:$0xf0]  ;;  %7234 = vmatmul.bf16.vlgmr.msrb.gmra.mxu0 %v14565_v43 }
 0x634   :  { %v10876_v60 = vor.u32 %v11735_v8, %v10873_v31  ;;  %v11567_v7 = vld [vmem:[%s17376_s3 + $0xa54] sm:$0xf]  ;;  %7255 = vmatpush.bf16.msrb.mxu2 %v10556_v10  ;;  %7278 = vmatpush.bf16.msra.mxu0 %v9120_v0  ;;  %v7015_v8 = vadd.f32 %v7014_v30, %v7002_v42  ;;  %v9024_v31 = vor.u32 %v11276_v62, %v9023_v33  ;;  %v11268_v10 = vld [vmem:[%s17376_s3 + $0xf4] sm:$0xf0] }
 0x635   :  { %v10201_v46 = vld [vmem:[%s17376_s3 + $0xa70] sm:$0xf0]  ;;  %v9599_v42 = vld [vmem:[%s17376_s3 + $0x598] sm:$0xf] }
 0x636   :  { %v11647_v20 = vld [vmem:[%s17376_s3 + $0xcd4] sm:$0xf]  ;;  %v10204_v16 = vor.u32 %v11567_v7, %v10201_v46  ;;  %7266 = vmatpush.bf16.msrb.mxu3 %v10876_v60  ;;  %v9311_v60 = vld [vmem:[%s17376_s3 + $0x358] sm:$0xf]  ;;  %v7028_v0 = vadd.f32 %v7027_v26, %v7015_v8 }
 0x637   :  { %v10521_v29 = vld [vmem:[%s17376_s3 + $0xcf0] sm:$0xf0]  ;;  %v11348_v7 = vld [vmem:[%s17376_s3 + $0x374] sm:$0xf0] }
 0x638   :  { %v11727_v50 = vld [vmem:[%s17376_s3 + $0xf54] sm:$0xf]  ;;  %v10524_v21 = vor.u32 %v11647_v20, %v10521_v29  ;;  %7245 = vmatpush.bf16.msrb.mxu1 %v10204_v16  ;;  %7279 = vmatpush.bf16.msra.mxu0 %v9088_v57  ;;  %v9631_v46 = vld [vmem:[%s17376_s3 + $0x5d8] sm:$0xf]  ;;  %v9312_v23 = vor.u32 %v11348_v7, %v9311_v60 }
 0x639   :  { %v10841_v28 = vld [vmem:[%s17376_s3 + $0xf70] sm:$0xf0]  ;;  %v11428_v20 = vld [vmem:[%s17376_s3 + $0x5f4] sm:$0xf0] }
 0x63a   :  { %v11559_v61 = vld [vmem:[%s17376_s3 + $0xa14] sm:$0xf]  ;;  %v10844_v56 = vor.u32 %v11727_v50, %v10841_v28  ;;  %7256 = vmatpush.bf16.msrb.mxu2 %v10524_v21  ;;  %v8992_v28 = vor.u32 %v11268_v10, %v8991_v58  ;;  %v9632_v21 = vor.u32 %v11428_v20, %v9631_v46  ;;  %v11420_v57 = vld [vmem:[%s17376_s3 + $0x5b4] sm:$0xf0]  ;;  %v7016_v59 = vpop.f32.mrf.mxu3 }
 0x63b   :  { %v10169_v25 = vld [vmem:[%s17376_s3 + $0xa30] sm:$0xf0]  ;;  %v11492_v33 = vld [vmem:[%s17376_s3 + $0x7f4] sm:$0xf0] }
 0x63c   :  { %v11639_v40 = vld [vmem:[%s17376_s3 + $0xc94] sm:$0xf]  ;;  %v10172_v38 = vor.u32 %v11559_v61, %v10169_v25  ;;  %7267 = vmatpush.bf16.msrb.mxu3 %v10844_v56  ;;  %7280 = vmatpush.bf16.msra.mxu0 %v9056_v37  ;;  %v8959_v61 = vld [vmem:[%s17376_s3 + $0x98] sm:$0xf] }
 0x63d   :  { %v10489_v12 = vld [vmem:[%s17376_s3 + $0xcb0] sm:$0xf0]  ;;  %v11260_v56 = vld [vmem:[%s17376_s3 + $0xb4] sm:$0xf0] }
 0x63e   :  { %v11719_v17 = vld [vmem:[%s17376_s3 + $0xf14] sm:$0xf]  ;;  %v10492_v63 = vor.u32 %v11639_v40, %v10489_v12  ;;  %7246 = vmatpush.bf16.msrb.mxu1 %v10172_v38  ;;  %v11340_v25 = vld [vmem:[%s17376_s3 + $0x334] sm:$0xf0]  ;;  %v7029_v40 = vpop.f32.mrf.mxu0  ;;  %v7040_v12 = vpop.f32.mrf.mxu1  ;;  %v8960_v34 = vor.u32 %v11260_v56, %v8959_v61 }
 0x63f   :  { %v10809_v48 = vld [vmem:[%s17376_s3 + $0xf30] sm:$0xf0]  ;;  %v9280_v19 = vor.u32 %v11340_v25, %v9279_v14  ;;  %v11332_v37 = vld [vmem:[%s17376_s3 + $0x2f4] sm:$0xf0]  ;;  %v7053_v40 = vpop.f32.mrf.mxu2 }
 0x640   :  { %v10812_v15 = vor.u32 %v11719_v17, %v10809_v48  ;;  %v11631_v41 = vld [vmem:[%s17376_s3 + $0xc54] sm:$0xf]  ;;  %7257 = vmatpush.bf16.msrb.mxu2 %v10492_v63  ;;  %7281 = vmatpush.bf16.msra.mxu0 %v9024_v31  ;;  %v16507_v17 = vadd.f32 %v7040_v12, %v7028_v0  ;;  %v8927_v63 = vld [vmem:[%s17376_s3 + $0x58] sm:$0xf] }
 0x641   :  { %v10457_v27 = vld [vmem:[%s17376_s3 + $0xc70] sm:$0xf0]  ;;  %7247 = vmatmul.bf16.vlgmr.msrb.gmra.mxu1 %v14624_v22  ;;  %v8895_v26 = vld [vmem:[%s17376_s3 + $0x18] sm:$0xf] }
 0x642   :  { %v11711_v13 = vld [vmem:[%s17376_s3 + $0xed4] sm:$0xf]  ;;  %7268 = vmatpush.bf16.msrb.mxu3 %v10812_v15  ;;  %v10460_v1 = vor.u32 %v11631_v41, %v10457_v27  ;;  %7291 = vmatpush.bf16.msra.mxu1 %v9376_v39  ;;  %v11252_v15 = vld [vmem:[%s17376_s3 + $0x74] sm:$0xf0]  ;;  %v9600_v41 = vor.u32 %v11420_v57, %v9599_v42 }
 0x643   :  { %v10777_v36 = vld [vmem:[%s17376_s3 + $0xef0] sm:$0xf0]  ;;  %v9247_v27 = vld [vmem:[%s17376_s3 + $0x2d8] sm:$0xf]  ;;  %v8928_v11 = vor.u32 %v11252_v15, %v8927_v63 }
 0x644   :  { %v10780_v18 = vor.u32 %v11711_v13, %v10777_v36  ;;  %v11623_v4 = vld [vmem:[%s17376_s3 + $0xc14] sm:$0xf]  ;;  %7258 = vmatpush.bf16.msrb.mxu2 %v10460_v1  ;;  %7282 = vmatpush.bf16.msra.mxu0 %v8992_v28  ;;  %v9567_v39 = vld [vmem:[%s17376_s3 + $0x558] sm:$0xf]  ;;  %v9248_v47 = vor.u32 %v11332_v37, %v9247_v27 }
 0x645   :  { %v10425_v45 = vld [vmem:[%s17376_s3 + $0xc30] sm:$0xf0]  ;;  %v11412_v13 = vld [vmem:[%s17376_s3 + $0x574] sm:$0xf0] }
 0x646   :  { %v11703_v35 = vld [vmem:[%s17376_s3 + $0xe94] sm:$0xf]  ;;  %7269 = vmatpush.bf16.msrb.mxu3 %v10780_v18  ;;  %v10428_v29 = vor.u32 %v11623_v4, %v10425_v45  ;;  %7292 = vmatpush.bf16.msra.mxu1 %v9344_v9  ;;  %v9887_v36 = vld [vmem:[%s17376_s3 + $0x7d8] sm:$0xf]  ;;  %v9568_v18 = vor.u32 %v11412_v13, %v9567_v39  ;;  %v7042_v8 = vpop.f32.mrf.mxu1 }
 0x647   :  { %v10745_v32 = vld [vmem:[%s17376_s3 + $0xeb0] sm:$0xf0]  ;;  %v11244_v1 = vld [vmem:[%s17376_s3 + $0x34] sm:$0xf0]  ;;  %v9888_v5 = vor.u32 %v11492_v33, %v9887_v36  ;;  %v7066_v8 = vpop.f32.mrf.mxu3 }
 0x648   :  { %v10748_v50 = vor.u32 %v11703_v35, %v10745_v32  ;;  %v11695_v3 = vld [vmem:[%s17376_s3 + $0xe54] sm:$0xf]  ;;  %7259 = vmatpush.bf16.msrb.mxu2 %v10428_v29  ;;  %7283 = vmatpush.bf16.msra.mxu0 %v8960_v34  ;;  %v9215_v30 = vld [vmem:[%s17376_s3 + $0x298] sm:$0xf]  ;;  %v8896_v10 = vor.u32 %v11244_v1, %v8895_v26 }
 0x649   :  { %v10713_v16 = vld [vmem:[%s17376_s3 + $0xe70] sm:$0xf0]  ;;  %v11324_v4 = vld [vmem:[%s17376_s3 + $0x2b4] sm:$0xf0] }
 0x64a   :  { %7270 = vmatpush.bf16.msrb.mxu3 %v10748_v50  ;;  %v10716_v48 = vor.u32 %v11695_v3, %v10713_v16  ;;  %v11687_v55 = vld [vmem:[%s17376_s3 + $0xe14] sm:$0xf]  ;;  %7293 = vmatpush.bf16.msra.mxu1 %v9312_v23  ;;  %v9535_v45 = vld [vmem:[%s17376_s3 + $0x518] sm:$0xf]  ;;  %v9216_v60 = vor.u32 %v11324_v4, %v9215_v30 }
 0x64b   :  { %v10681_v38 = vld [vmem:[%s17376_s3 + $0xe30] sm:$0xf0]  ;;  %7260 = vmatmul.bf16.vlgmr.msrb.gmra.mxu2 %v14677_v2  ;;  %v11404_v31 = vld [vmem:[%s17376_s3 + $0x534] sm:$0xf0] }
 0x64c   :  { %7304 = vmatpush.bf16.msra.mxu2 %v9632_v21  ;;  %v10684_v62 = vor.u32 %v11687_v55, %v10681_v38  ;;  %v9855_v9 = vld [vmem:[%s17376_s3 + $0x798] sm:$0xf]  ;;  %7284 = vmatpush.bf16.msra.mxu0 %v8928_v11  ;;  %v9536_v7 = vor.u32 %v11404_v31, %v9535_v45  ;;  %v7055_v45 = vpop.f32.mrf.mxu2 }
 0x64d   :  { %v11484_v35 = vld [vmem:[%s17376_s3 + $0x7b4] sm:$0xf0] }
 0x64e   :  { %7271 = vmatpush.bf16.msrb.mxu3 %v10716_v48  ;;  %7294 = vmatpush.bf16.msra.mxu1 %v9280_v19  ;;  %v10143_v32 = vld [vmem:[%s17376_s3 + $0x9d8] sm:$0xf]  ;;  %v9856_v46 = vor.u32 %v11484_v35, %v9855_v9  ;;  %v7054_v48 = vadd.f32 %v7053_v40, %v16507_v17 }
 0x64f   :  { %v11556_v58 = vld [vmem:[%s17376_s3 + $0x9f4] sm:$0xf0] }
 0x650   :  { %7305 = vmatpush.bf16.msra.mxu2 %v9600_v41  ;;  %v9183_v20 = vld [vmem:[%s17376_s3 + $0x258] sm:$0xf]  ;;  %v10144_v50 = vor.u32 %v11556_v58, %v10143_v32  ;;  %7285 = vmatpush.bf16.msra.mxu0 %v8896_v10  ;;  %v7067_v35 = vadd.f32 %v7066_v8, %v7054_v48 }
 0x651   :  { %v11316_v0 = vld [vmem:[%s17376_s3 + $0x274] sm:$0xf0] }
 0x652   :  { %7272 = vmatpush.bf16.msrb.mxu3 %v10684_v62  ;;  %7295 = vmatpush.bf16.msra.mxu1 %v9248_v47  ;;  %v9503_v29 = vld [vmem:[%s17376_s3 + $0x4d8] sm:$0xf]  ;;  %v9184_v21 = vor.u32 %v11316_v0, %v9183_v20  ;;  %v7488_v0 = vmax.f32 %v16257_v24, 0.0 }
 0x653   :  { %v11396_v28 = vld [vmem:[%s17376_s3 + $0x4f4] sm:$0xf0]  ;;  %7286 = vmatmul.bf16.vlgmr.msra.gmra.mxu0 %v14366_v6 }
 0x654   :  { %7306 = vmatpush.bf16.msra.mxu2 %v9568_v18  ;;  %v9823_v23 = vld [vmem:[%s17376_s3 + $0x758] sm:$0xf]  ;;  %v9504_v14 = vor.u32 %v11396_v28, %v9503_v29  ;;  %7330 = vmatpush.bf16.msrb.mxu0 %v10144_v50  ;;  %v7079_v18 = vpop.f32.mrf.mxu0  ;;  %v7489_v29 = vmax.f32 %v7067_v35, 0.0 }
 0x655   :  { %7273 = vmatmul.bf16.vlgmr.msrb.gmra.mxu3 %v14730_v53  ;;  %v11476_v3 = vld [vmem:[%s17376_s3 + $0x774] sm:$0xf0] }
 0x656   :  { %7317 = vmatpush.bf16.msra.mxu3 %v9888_v5  ;;  %v10111_v16 = vld [vmem:[%s17376_s3 + $0x998] sm:$0xf]  ;;  %7296 = vmatpush.bf16.msra.mxu1 %v9216_v60  ;;  %v9824_v25 = vor.u32 %v11476_v3, %v9823_v23  ;;  %v4082_v5 = vperm.slane %v15991_v54, 4 }
 0x657   :  { %v11548_v61 = vld [vmem:[%s17376_s3 + $0x9b4] sm:$0xf0] }
 0x658   :  { %v9151_v56 = vld [vmem:[%s17376_s3 + $0x218] sm:$0xf]  ;;  %7307 = vmatpush.bf16.msra.mxu2 %v9536_v7  ;;  %v10112_v59 = vor.u32 %v11548_v61, %v10111_v16  ;;  %v16684_v16 = vmax.f32 %v7488_v0, %v7489_v29 }
 0x659   :  { %v11308_v12 = vld [vmem:[%s17376_s3 + $0x234] sm:$0xf0] }
 0x65a   :  { %7318 = vmatpush.bf16.msra.mxu3 %v9856_v46  ;;  %v9471_v42 = vld [vmem:[%s17376_s3 + $0x498] sm:$0xf]  ;;  %7297 = vmatpush.bf16.msra.mxu1 %v9184_v21  ;;  %v9152_v15 = vor.u32 %v11308_v12, %v9151_v56  ;;  %v7498_v48 = vmax.f32 %v15874_v49, %v16684_v16  ;;  %v11750_v49 = vld [vmem:[%s17378_s6] ss:$0 sm:$0xff] }
 0x65b   :  { %v11388_v57 = vld [vmem:[%s17376_s3 + $0x4b4] sm:$0xf0]  ;;  %7331 = vmatpush.bf16.msrb.mxu0 %v10112_v59 }
 0x65c   :  { %v9791_v55 = vld [vmem:[%s17376_s3 + $0x718] sm:$0xf]  ;;  %7308 = vmatpush.bf16.msra.mxu2 %v9504_v14  ;;  %v9472_v41 = vor.u32 %v11388_v57, %v9471_v42  ;;  %v7081_v59 = vpop.f32.mrf.mxu0 }
 0x65d   :  { %v11468_v34 = vld [vmem:[%s17376_s3 + $0x734] sm:$0xf0]  ;;  %v7105_v59 = vpop.f32.mrf.mxu2 }
 0x65e   :  { %v10079_v19 = vld [vmem:[%s17376_s3 + $0x958] sm:$0xf]  ;;  %7319 = vmatpush.bf16.msra.mxu3 %v9824_v25  ;;  %v9792_v27 = vor.u32 %v11468_v34, %v9791_v55  ;;  %7298 = vmatpush.bf16.msra.mxu1 %v9152_v15  ;;  %v7080_v25 = vadd.f32 %v7079_v18, %v4082_v5  ;;  %v7092_v55 = vpop.f32.mrf.mxu1 }
 0x65f   :  { %v11540_v38 = vld [vmem:[%s17376_s3 + $0x974] sm:$0xf0] }
 0x660   :  { %v10399_v17 = vld [vmem:[%s17376_s3 + $0xbd8] sm:$0xf]  ;;  %v10080_v13 = vor.u32 %v11540_v38, %v10079_v19  ;;  %7309 = vmatpush.bf16.msra.mxu2 %v9472_v41  ;;  %v16712_v38 = vadd.f32 %v7092_v55, %v7080_v25  ;;  %v9089_v25 = vld [vmem:[%s17376_s3 + $0x1b8] sm:$0xf0] }
 0x661   :  { %v11620_v63 = vld [vmem:[%s17376_s3 + $0xbf4] sm:$0xf0]  ;;  %7299 = vmatmul.bf16.vlgmr.msra.gmra.mxu1 %v14403_v52 }
 0x662   :  { %v9439_v37 = vld [vmem:[%s17376_s3 + $0x458] sm:$0xf]  ;;  %v10400_v36 = vor.u32 %v11620_v63, %v10399_v17  ;;  %7320 = vmatpush.bf16.msra.mxu3 %v9792_v27  ;;  %7332 = vmatpush.bf16.msrb.mxu0 %v10080_v13  ;;  %v7068_v63 = vpop.f32.mrf.mxu3 }
 0x663   :  { %v11380_v39 = vld [vmem:[%s17376_s3 + $0x474] sm:$0xf0] }
 0x664   :  { %v9759_v33 = vld [vmem:[%s17376_s3 + $0x6d8] sm:$0xf]  ;;  %v9440_v30 = vor.u32 %v11380_v39, %v9439_v37  ;;  %7343 = vmatpush.bf16.msrb.mxu1 %v10400_v36 }
 0x665   :  { %v11460_v62 = vld [vmem:[%s17376_s3 + $0x6f4] sm:$0xf0] }
 0x666   :  { %v10047_v11 = vld [vmem:[%s17376_s3 + $0x918] sm:$0xf]  ;;  %v9760_v4 = vor.u32 %v11460_v62, %v9759_v33  ;;  %7310 = vmatpush.bf16.msra.mxu2 %v9440_v30 }
 0x667   :  { %v11532_v47 = vld [vmem:[%s17376_s3 + $0x934] sm:$0xf0] }
 0x668   :  { %v10367_v26 = vld [vmem:[%s17376_s3 + $0xb98] sm:$0xf]  ;;  %v10048_v32 = vor.u32 %v11532_v47, %v10047_v11  ;;  %7321 = vmatpush.bf16.msra.mxu3 %v9760_v4 }
 0x669   :  { %v11612_v1 = vld [vmem:[%s17376_s3 + $0xbb4] sm:$0xf0] }
 0x66a   :  { %v9407_v31 = vld [vmem:[%s17376_s3 + $0x418] sm:$0xf]  ;;  %v10368_v58 = vor.u32 %v11612_v1, %v10367_v26  ;;  %7333 = vmatpush.bf16.msrb.mxu0 %v10048_v32 }
 0x66b   :  { %v11372_v9 = vld [vmem:[%s17376_s3 + $0x434] sm:$0xf0] }
 0x66c   :  { %v9727_v54 = vld [vmem:[%s17376_s3 + $0x698] sm:$0xf]  ;;  %v9408_v23 = vor.u32 %v11372_v9, %v9407_v31  ;;  %7344 = vmatpush.bf16.msrb.mxu1 %v10368_v58  ;;  %v7094_v58 = vpop.f32.mrf.mxu1 }
 0x66d   :  { %v11452_v10 = vld [vmem:[%s17376_s3 + $0x6b4] sm:$0xf0] }
 0x66e   :  { %v10015_v60 = vld [vmem:[%s17376_s3 + $0x8d8] sm:$0xf]  ;;  %v9728_v3 = vor.u32 %v11452_v10, %v9727_v54  ;;  %7311 = vmatpush.bf16.msra.mxu2 %v9408_v23 }
 0x66f   :  { %v11524_v7 = vld [vmem:[%s17376_s3 + $0x8f4] sm:$0xf0] }
 0x670   :  { %v10335_v46 = vld [vmem:[%s17376_s3 + $0xb58] sm:$0xf]  ;;  %v10016_v61 = vor.u32 %v11524_v7, %v10015_v60  ;;  %7322 = vmatpush.bf16.msra.mxu3 %v9728_v3  ;;  %v11296_v7 = vld [vmem:[%s17376_s3 + $0x1dc] sm:$0xf] }
 0x671   :  { %v11604_v20 = vld [vmem:[%s17376_s3 + $0xb74] sm:$0xf0]  ;;  %7312 = vmatmul.bf16.vlgmr.msra.gmra.mxu2 %v14444_v44 }
 0x672   :  { %v10655_v50 = vld [vmem:[%s17376_s3 + $0xdd8] sm:$0xf]  ;;  %v10336_v21 = vor.u32 %v11604_v20, %v10335_v46  ;;  %7334 = vmatpush.bf16.msrb.mxu0 %v10016_v61  ;;  %v9121_v46 = vld [vmem:[%s17376_s3 + $0x1f8] sm:$0xf0] }
 0x673   :  { %v11684_v28 = vld [vmem:[%s17376_s3 + $0xdf4] sm:$0xf0]  ;;  %v9124_v61 = vor.u32 %v11296_v7, %v9121_v46 }
 0x674   :  { %v9695_v24 = vld [vmem:[%s17376_s3 + $0x658] sm:$0xf]  ;;  %v10656_v40 = vor.u32 %v11684_v28, %v10655_v50  ;;  %7345 = vmatpush.bf16.msrb.mxu1 %v10336_v21 }
 0x675   :  { %v11444_v56 = vld [vmem:[%s17376_s3 + $0x674] sm:$0xf0] }
 0x676   :  { %v9983_v14 = vld [vmem:[%s17376_s3 + $0x898] sm:$0xf]  ;;  %v9696_v17 = vor.u32 %v11444_v56, %v9695_v24  ;;  %7356 = vmatpush.bf16.msrb.mxu2 %v10656_v40 }
 0x677   :  { %v11516_v12 = vld [vmem:[%s17376_s3 + $0x8b4] sm:$0xf0] }
 0x678   :  { %v10303_v42 = vld [vmem:[%s17376_s3 + $0xb18] sm:$0xf]  ;;  %v9984_v41 = vor.u32 %v11516_v12, %v9983_v14  ;;  %7323 = vmatpush.bf16.msra.mxu3 %v9696_v17  ;;  %v11288_v14 = vld [vmem:[%s17376_s3 + $0x19c] sm:$0xf]  ;;  %v7106_v17 = vadd.f32 %v7105_v59, %v16712_v38 }
 0x679   :  { %v11596_v57 = vld [vmem:[%s17376_s3 + $0xb34] sm:$0xf0]  ;;  %v9092_v63 = vor.u32 %v11288_v14, %v9089_v25  ;;  %v11360_v38 = vld [vmem:[%s17376_s3 + $0x3dc] sm:$0xf] }
 0x67a   :  { %v10623_v34 = vld [vmem:[%s17376_s3 + $0xd98] sm:$0xf]  ;;  %v10304_v27 = vor.u32 %v11596_v57, %v10303_v42  ;;  %7335 = vmatpush.bf16.msrb.mxu0 %v9984_v41  ;;  %v11336_v59 = vld [vmem:[%s17376_s3 + $0x31c] sm:$0xf] }
 0x67b   :  { %v11676_v19 = vld [vmem:[%s17376_s3 + $0xdb4] sm:$0xf0] }
 0x67c   :  { %v9663_v15 = vld [vmem:[%s17376_s3 + $0x618] sm:$0xf]  ;;  %v10624_v36 = vor.u32 %v11676_v19, %v10623_v34  ;;  %7346 = vmatpush.bf16.msrb.mxu1 %v10304_v27  ;;  %v11280_v27 = vld [vmem:[%s17376_s3 + $0x15c] sm:$0xf] }
 0x67d   :  { %v11436_v37 = vld [vmem:[%s17376_s3 + $0x634] sm:$0xf0] }
 0x67e   :  { %v9951_v39 = vld [vmem:[%s17376_s3 + $0x858] sm:$0xf]  ;;  %v9664_v18 = vor.u32 %v11436_v37, %v9663_v15  ;;  %7357 = vmatpush.bf16.msrb.mxu2 %v10624_v36  ;;  %v9057_v37 = vld [vmem:[%s17376_s3 + $0x178] sm:$0xf0] }
 0x67f   :  { %v11508_v13 = vld [vmem:[%s17376_s3 + $0x874] sm:$0xf0] }
 0x680   :  { %v10271_v33 = vld [vmem:[%s17376_s3 + $0xad8] sm:$0xf]  ;;  %v9952_v5 = vor.u32 %v11508_v13, %v9951_v39  ;;  %7324 = vmatpush.bf16.msra.mxu3 %v9664_v18  ;;  %v9377_v39 = vld [vmem:[%s17376_s3 + $0x3f8] sm:$0xf0] }
 0x681   :  { %v11588_v62 = vld [vmem:[%s17376_s3 + $0xaf4] sm:$0xf0] }
 0x682   :  { %v10591_v11 = vld [vmem:[%s17376_s3 + $0xd58] sm:$0xf]  ;;  %v10272_v30 = vor.u32 %v11588_v62, %v10271_v33  ;;  %7336 = vmatpush.bf16.msrb.mxu0 %v9952_v5  ;;  %v11272_v5 = vld [vmem:[%s17376_s3 + $0x11c] sm:$0xf] }
 0x683   :  { %v11668_v47 = vld [vmem:[%s17376_s3 + $0xd74] sm:$0xf0]  ;;  %7325 = vmatmul.bf16.vlgmr.msra.gmra.mxu3 %v14506_v51 }
 0x684   :  { %v10911_v26 = vld [vmem:[%s17376_s3 + $0xfd8] sm:$0xf]  ;;  %v10592_v8 = vor.u32 %v11668_v47, %v10591_v11  ;;  %7347 = vmatpush.bf16.msrb.mxu1 %v10272_v30  ;;  %v9060_v47 = vor.u32 %v11280_v27, %v9057_v37  ;;  %v9025_v30 = vld [vmem:[%s17376_s3 + $0x138] sm:$0xf0] }
 0x685   :  { %v11748_v1 = vld [vmem:[%s17376_s3 + $0xff4] sm:$0xf0] }
 0x686   :  { %v9919_v4 = vld [vmem:[%s17376_s3 + $0x818] sm:$0xf]  ;;  %v10912_v31 = vor.u32 %v11748_v1, %v10911_v26  ;;  %7358 = vmatpush.bf16.msrb.mxu2 %v10592_v8  ;;  %v9380_v26 = vor.u32 %v11360_v38, %v9377_v39  ;;  %v7131_v8 = vpop.f32.mrf.mxu0 }
 0x687   :  { %v11500_v45 = vld [vmem:[%s17376_s3 + $0x834] sm:$0xf0] }
 0x688   :  { %v10239_v9 = vld [vmem:[%s17376_s3 + $0xa98] sm:$0xf]  ;;  %v9920_v20 = vor.u32 %v11500_v45, %v9919_v4  ;;  %7369 = vmatpush.bf16.msrb.mxu3 %v10912_v31  ;;  %v11352_v4 = vld [vmem:[%s17376_s3 + $0x39c] sm:$0xf] }
 0x689   :  { %v11580_v35 = vld [vmem:[%s17376_s3 + $0xab4] sm:$0xf0]  ;;  %v9345_v45 = vld [vmem:[%s17376_s3 + $0x3b8] sm:$0xf0] }
 0x68a   :  { %v10559_v32 = vld [vmem:[%s17376_s3 + $0xd18] sm:$0xf]  ;;  %v10240_v0 = vor.u32 %v11580_v35, %v10239_v9  ;;  %7337 = vmatpush.bf16.msrb.mxu0 %v9920_v20  ;;  %v7107_v35 = vpop.f32.mrf.mxu2  ;;  %v9348_v7 = vor.u32 %v11352_v4, %v9345_v45 }
 0x68b   :  { %v11660_v54 = vld [vmem:[%s17376_s3 + $0xd34] sm:$0xf0] }
 0x68c   :  { %v10879_v10 = vld [vmem:[%s17376_s3 + $0xf98] sm:$0xf]  ;;  %v10560_v29 = vor.u32 %v11660_v54, %v10559_v32  ;;  %7348 = vmatpush.bf16.msrb.mxu1 %v10240_v0  ;;  %v7118_v32 = vpop.f32.mrf.mxu3  ;;  %v11264_v0 = vld [vmem:[%s17376_s3 + $0xdc] sm:$0xf] }
 0x68d   :  { %v11740_v60 = vld [vmem:[%s17376_s3 + $0xfb4] sm:$0xf0]  ;;  %7338 = vmatmul.bf16.vlgmr.msrb.gmra.mxu0 %v14565_v43 }
 0x68e   :  { %v10880_v50 = vor.u32 %v11740_v60, %v10879_v10  ;;  %v10207_v28 = vld [vmem:[%s17376_s3 + $0xa58] sm:$0xf]  ;;  %7359 = vmatpush.bf16.msrb.mxu2 %v10560_v29  ;;  %7382 = vmatpush.bf16.msra.mxu0 %v9124_v61  ;;  %v7119_v10 = vadd.f32 %v7118_v32, %v7106_v17  ;;  %v9028_v60 = vor.u32 %v11272_v5, %v9025_v30  ;;  %v8993_v29 = vld [vmem:[%s17376_s3 + $0xf8] sm:$0xf0] }
 0x68f   :  { %v11572_v23 = vld [vmem:[%s17376_s3 + $0xa74] sm:$0xf0]  ;;  %v11416_v17 = vld [vmem:[%s17376_s3 + $0x59c] sm:$0xf] }
 0x690   :  { %v10527_v3 = vld [vmem:[%s17376_s3 + $0xcd8] sm:$0xf]  ;;  %v10208_v40 = vor.u32 %v11572_v23, %v10207_v28  ;;  %7370 = vmatpush.bf16.msrb.mxu3 %v10880_v50  ;;  %v11344_v50 = vld [vmem:[%s17376_s3 + $0x35c] sm:$0xf]  ;;  %v7132_v61 = vadd.f32 %v7131_v8, %v7119_v10 }
 0x691   :  { %v11652_v21 = vld [vmem:[%s17376_s3 + $0xcf4] sm:$0xf0]  ;;  %v9313_v28 = vld [vmem:[%s17376_s3 + $0x378] sm:$0xf0] }
 0x692   :  { %v10847_v24 = vld [vmem:[%s17376_s3 + $0xf58] sm:$0xf]  ;;  %v10528_v42 = vor.u32 %v11652_v21, %v10527_v3  ;;  %7349 = vmatpush.bf16.msrb.mxu1 %v10208_v40  ;;  %7383 = vmatpush.bf16.msra.mxu0 %v9092_v63  ;;  %v11424_v23 = vld [vmem:[%s17376_s3 + $0x5dc] sm:$0xf]  ;;  %v9316_v14 = vor.u32 %v11344_v50, %v9313_v28 }
 0x693   :  { %v11732_v56 = vld [vmem:[%s17376_s3 + $0xf74] sm:$0xf0]  ;;  %v9633_v3 = vld [vmem:[%s17376_s3 + $0x5f8] sm:$0xf0] }
 0x694   :  { %v10175_v12 = vld [vmem:[%s17376_s3 + $0xa18] sm:$0xf]  ;;  %v10848_v57 = vor.u32 %v11732_v56, %v10847_v24  ;;  %7360 = vmatpush.bf16.msrb.mxu2 %v10528_v42  ;;  %v8996_v56 = vor.u32 %v11264_v0, %v8993_v29  ;;  %v9636_v42 = vor.u32 %v11424_v23, %v9633_v3  ;;  %v9601_v63 = vld [vmem:[%s17376_s3 + $0x5b8] sm:$0xf0]  ;;  %v7120_v27 = vpop.f32.mrf.mxu3 }
 0x695   :  { %v11564_v55 = vld [vmem:[%s17376_s3 + $0xa34] sm:$0xf0]  ;;  %v9889_v5 = vld [vmem:[%s17376_s3 + $0x7f8] sm:$0xf0] }
 0x696   :  { %v10495_v34 = vld [vmem:[%s17376_s3 + $0xc98] sm:$0xf]  ;;  %v10176_v13 = vor.u32 %v11564_v55, %v10175_v12  ;;  %7371 = vmatpush.bf16.msrb.mxu3 %v10848_v57  ;;  %7384 = vmatpush.bf16.msra.mxu0 %v9060_v47  ;;  %v11256_v12 = vld [vmem:[%s17376_s3 + $0x9c] sm:$0xf] }
 0x697   :  { %v11644_v19 = vld [vmem:[%s17376_s3 + $0xcb4] sm:$0xf0]  ;;  %v8961_v57 = vld [vmem:[%s17376_s3 + $0xb8] sm:$0xf0] }
 0x698   :  { %v10815_v15 = vld [vmem:[%s17376_s3 + $0xf18] sm:$0xf]  ;;  %v10496_v36 = vor.u32 %v11644_v19, %v10495_v34  ;;  %7350 = vmatpush.bf16.msrb.mxu1 %v10176_v13  ;;  %v9281_v55 = vld [vmem:[%s17376_s3 + $0x338] sm:$0xf0]  ;;  %v7133_v34 = vpop.f32.mrf.mxu0  ;;  %v7144_v19 = vpop.f32.mrf.mxu1  ;;  %v8964_v38 = vor.u32 %v11256_v12, %v8961_v57 }
 0x699   :  { %v11724_v41 = vld [vmem:[%s17376_s3 + $0xf34] sm:$0xf0]  ;;  %v9284_v39 = vor.u32 %v11336_v59, %v9281_v55  ;;  %v9249_v47 = vld [vmem:[%s17376_s3 + $0x2f8] sm:$0xf0]  ;;  %v7157_v34 = vpop.f32.mrf.mxu2 }
 0x69a   :  { %v10816_v33 = vor.u32 %v11724_v41, %v10815_v15  ;;  %v10463_v62 = vld [vmem:[%s17376_s3 + $0xc58] sm:$0xf]  ;;  %7361 = vmatpush.bf16.msrb.mxu2 %v10496_v36  ;;  %7385 = vmatpush.bf16.msra.mxu0 %v9028_v60  ;;  %v16911_v15 = vadd.f32 %v7144_v19, %v7132_v61  ;;  %v11248_v36 = vld [vmem:[%s17376_s3 + $0x5c] sm:$0xf] }
 0x69b   :  { %v11636_v11 = vld [vmem:[%s17376_s3 + $0xc74] sm:$0xf0]  ;;  %7351 = vmatmul.bf16.vlgmr.msrb.gmra.mxu1 %v14624_v22  ;;  %v11240_v8 = vld [vmem:[%s17376_s3 + $0x1c] sm:$0xf] }
 0x69c   :  { %v10783_v1 = vld [vmem:[%s17376_s3 + $0xed8] sm:$0xf]  ;;  %7372 = vmatpush.bf16.msrb.mxu3 %v10816_v33  ;;  %v10464_v31 = vor.u32 %v11636_v11, %v10463_v62  ;;  %7395 = vmatpush.bf16.msra.mxu1 %v9380_v26  ;;  %v8929_v33 = vld [vmem:[%s17376_s3 + $0x78] sm:$0xf0]  ;;  %v9604_v62 = vor.u32 %v11416_v17, %v9601_v63 }
 0x69d   :  { %v11716_v18 = vld [vmem:[%s17376_s3 + $0xef4] sm:$0xf0]  ;;  %v11328_v11 = vld [vmem:[%s17376_s3 + $0x2dc] sm:$0xf]  ;;  %v8932_v4 = vor.u32 %v11248_v36, %v8929_v33 }
 0x69e   :  { %v10784_v9 = vor.u32 %v11716_v18, %v10783_v1  ;;  %v10431_v58 = vld [vmem:[%s17376_s3 + $0xc18] sm:$0xf]  ;;  %7362 = vmatpush.bf16.msrb.mxu2 %v10464_v31  ;;  %7386 = vmatpush.bf16.msra.mxu0 %v8996_v56  ;;  %v11408_v26 = vld [vmem:[%s17376_s3 + $0x55c] sm:$0xf]  ;;  %v9252_v45 = vor.u32 %v11328_v11, %v9249_v47 }
 0x69f   :  { %v11628_v54 = vld [vmem:[%s17376_s3 + $0xc34] sm:$0xf0]  ;;  %v9569_v1 = vld [vmem:[%s17376_s3 + $0x578] sm:$0xf0] }
 0x6a0   :  { %v10751_v46 = vld [vmem:[%s17376_s3 + $0xe98] sm:$0xf]  ;;  %7373 = vmatpush.bf16.msrb.mxu3 %v10784_v9  ;;  %v10432_v21 = vor.u32 %v11628_v54, %v10431_v58  ;;  %7396 = vmatpush.bf16.msra.mxu1 %v9348_v7  ;;  %v11488_v18 = vld [vmem:[%s17376_s3 + $0x7dc] sm:$0xf]  ;;  %v9572_v9 = vor.u32 %v11408_v26, %v9569_v1  ;;  %v7146_v10 = vpop.f32.mrf.mxu1 }
 0x6a1   :  { %v11708_v20 = vld [vmem:[%s17376_s3 + $0xeb4] sm:$0xf0]  ;;  %v8897_v31 = vld [vmem:[%s17376_s3 + $0x38] sm:$0xf0]  ;;  %v9892_v35 = vor.u32 %v11488_v18, %v9889_v5  ;;  %v7170_v10 = vpop.f32.mrf.mxu3 }
 0x6a2   :  { %v10752_v24 = vor.u32 %v11708_v20, %v10751_v46  ;;  %v10719_v25 = vld [vmem:[%s17376_s3 + $0xe58] sm:$0xf]  ;;  %7363 = vmatpush.bf16.msrb.mxu2 %v10432_v21  ;;  %7387 = vmatpush.bf16.msra.mxu0 %v8964_v38  ;;  %v11320_v32 = vld [vmem:[%s17376_s3 + $0x29c] sm:$0xf]  ;;  %v8900_v29 = vor.u32 %v11240_v8, %v8897_v31  ;;  %v7183_v31 = vpop.f32.mrf.mxu0 }
 0x6a3   :  { %v11700_v40 = vld [vmem:[%s17376_s3 + $0xe74] sm:$0xf0]  ;;  %v9217_v58 = vld [vmem:[%s17376_s3 + $0x2b8] sm:$0xf0] }
 0x6a4   :  { %7374 = vmatpush.bf16.msrb.mxu3 %v10752_v24  ;;  %v10720_v41 = vor.u32 %v11700_v40, %v10719_v25  ;;  %v10687_v37 = vld [vmem:[%s17376_s3 + $0xe18] sm:$0xf]  ;;  %7397 = vmatpush.bf16.msra.mxu1 %v9316_v14  ;;  %v11400_v54 = vld [vmem:[%s17376_s3 + $0x51c] sm:$0xf]  ;;  %v9220_v50 = vor.u32 %v11320_v32, %v9217_v58 }
 0x6a5   :  { %v11692_v13 = vld [vmem:[%s17376_s3 + $0xe34] sm:$0xf0]  ;;  %7364 = vmatmul.bf16.vlgmr.msrb.gmra.mxu2 %v14677_v2  ;;  %v9537_v60 = vld [vmem:[%s17376_s3 + $0x538] sm:$0xf0] }
 0x6a6   :  { %7408 = vmatpush.bf16.msra.mxu2 %v9636_v42  ;;  %v10688_v30 = vor.u32 %v11692_v13, %v10687_v37  ;;  %v11480_v7 = vld [vmem:[%s17376_s3 + $0x79c] sm:$0xf]  ;;  %7388 = vmatpush.bf16.msra.mxu0 %v8932_v4  ;;  %v9540_v28 = vor.u32 %v11400_v54, %v9537_v60  ;;  %v7159_v54 = vpop.f32.mrf.mxu2 }
 0x6a7   :  { %v9857_v46 = vld [vmem:[%s17376_s3 + $0x7b8] sm:$0xf0] }
 0x6a8   :  { %7375 = vmatpush.bf16.msrb.mxu3 %v10720_v41  ;;  %7398 = vmatpush.bf16.msra.mxu1 %v9284_v39  ;;  %v11552_v20 = vld [vmem:[%s17376_s3 + $0x9dc] sm:$0xf]  ;;  %v9860_v23 = vor.u32 %v11480_v7, %v9857_v46  ;;  %v7158_v41 = vadd.f32 %v7157_v34, %v16911_v15 }
 0x6a9   :  { %v10145_v0 = vld [vmem:[%s17376_s3 + $0x9f8] sm:$0xf0] }
 0x6aa   :  { %7409 = vmatpush.bf16.msra.mxu2 %v9604_v62  ;;  %v11312_v3 = vld [vmem:[%s17376_s3 + $0x25c] sm:$0xf]  ;;  %v10148_v24 = vor.u32 %v11552_v20, %v10145_v0  ;;  %7389 = vmatpush.bf16.msra.mxu0 %v8900_v29  ;;  %v17067_v46 = vadd.f32 %v7170_v10, %v7158_v41 }
 0x6ab   :  { %v9185_v61 = vld [vmem:[%s17376_s3 + $0x278] sm:$0xf0] }
 0x6ac   :  { %7376 = vmatpush.bf16.msrb.mxu3 %v10688_v30  ;;  %7399 = vmatpush.bf16.msra.mxu1 %v9252_v45  ;;  %v11392_v21 = vld [vmem:[%s17376_s3 + $0x4dc] sm:$0xf]  ;;  %v9188_v42 = vor.u32 %v11312_v3, %v9185_v61 }
 0x6ad   :  { %v9505_v56 = vld [vmem:[%s17376_s3 + $0x4f8] sm:$0xf0]  ;;  %7390 = vmatmul.bf16.vlgmr.msra.gmra.mxu0 %v14366_v6 }
 0x6ae   :  { %7410 = vmatpush.bf16.msra.mxu2 %v9572_v9  ;;  %v11472_v14 = vld [vmem:[%s17376_s3 + $0x75c] sm:$0xf]  ;;  %v9508_v59 = vor.u32 %v11392_v21, %v9505_v56  ;;  %7434 = vmatpush.bf16.msrb.mxu0 %v10148_v24  ;;  %v17058_v9 = vld [vmem:[%s17377_s4] sm:$0xff] }
 0x6af   :  { %7377 = vmatmul.bf16.vlgmr.msrb.gmra.mxu3 %v14730_v53  ;;  %v9825_v25 = vld [vmem:[%s17376_s3 + $0x778] sm:$0xf0] }
 0x6b0   :  { %7421 = vmatpush.bf16.msra.mxu3 %v9892_v35  ;;  %v11544_v40 = vld [vmem:[%s17376_s3 + $0x99c] sm:$0xf]  ;;  %7400 = vmatpush.bf16.msra.mxu1 %v9220_v50  ;;  %v9828_v55 = vor.u32 %v11472_v14, %v9825_v25  ;;  %v4083_v35 = vperm.slane %v17058_v9, 5 }
 0x6b1   :  { %v10113_v12 = vld [vmem:[%s17376_s3 + $0x9b8] sm:$0xf0] }
 0x6b2   :  { %v11304_v57 = vld [vmem:[%s17376_s3 + $0x21c] sm:$0xf]  ;;  %7411 = vmatpush.bf16.msra.mxu2 %v9540_v28  ;;  %v10116_v27 = vor.u32 %v11544_v40, %v10113_v12 }
 0x6b3   :  { %v9153_v19 = vld [vmem:[%s17376_s3 + $0x238] sm:$0xf0] }
 0x6b4   :  { %7422 = vmatpush.bf16.msra.mxu3 %v9860_v23  ;;  %v11384_v17 = vld [vmem:[%s17376_s3 + $0x49c] sm:$0xf]  ;;  %7401 = vmatpush.bf16.msra.mxu1 %v9188_v42  ;;  %v9156_v33 = vor.u32 %v11304_v57, %v9153_v19  ;;  %v7184_v57 = vadd.f32 %v7183_v31, %v4083_v35 }
 0x6b5   :  { %v9473_v63 = vld [vmem:[%s17376_s3 + $0x4b8] sm:$0xf0]  ;;  %7435 = vmatpush.bf16.msrb.mxu0 %v10116_v27 }
 0x6b6   :  { %v11464_v37 = vld [vmem:[%s17376_s3 + $0x71c] sm:$0xf]  ;;  %7412 = vmatpush.bf16.msra.mxu2 %v9508_v59  ;;  %v9476_v62 = vor.u32 %v11384_v17, %v9473_v63  ;;  %v7185_v17 = vpop.f32.mrf.mxu0  ;;  %v7196_v63 = vpop.f32.mrf.mxu1 }
 0x6b7   :  { %v9793_v38 = vld [vmem:[%s17376_s3 + $0x738] sm:$0xf0] }
 0x6b8   :  { %v11536_v39 = vld [vmem:[%s17376_s3 + $0x95c] sm:$0xf]  ;;  %7423 = vmatpush.bf16.msra.mxu3 %v9828_v55  ;;  %v9796_v11 = vor.u32 %v11464_v37, %v9793_v38  ;;  %7402 = vmatpush.bf16.msra.mxu1 %v9156_v33  ;;  %v17118_v37 = vadd.f32 %v7196_v63, %v7184_v57 }
 0x6b9   :  { %v10081_v13 = vld [vmem:[%s17376_s3 + $0x978] sm:$0xf0] }
 0x6ba   :  { %v11616_v15 = vld [vmem:[%s17376_s3 + $0xbdc] sm:$0xf]  ;;  %v10084_v26 = vor.u32 %v11536_v39, %v10081_v13  ;;  %7413 = vmatpush.bf16.msra.mxu2 %v9476_v62  ;;  %v7172_v39 = vpop.f32.mrf.mxu3 }
 0x6bb   :  { %v10401_v36 = vld [vmem:[%s17376_s3 + $0xbf8] sm:$0xf0]  ;;  %7403 = vmatmul.bf16.vlgmr.msra.gmra.mxu1 %v14403_v52 }
 0x6bc   :  { %v11376_v6 = vld [vmem:[%s17376_s3 + $0x45c] sm:$0xf]  ;;  %v10404_v1 = vor.u32 %v11616_v15, %v10401_v36  ;;  %7424 = vmatpush.bf16.msra.mxu3 %v9796_v11  ;;  %7436 = vmatpush.bf16.msrb.mxu0 %v10084_v26 }
 0x6bd   :  { %v9441_v47 = vld [vmem:[%s17376_s3 + $0x478] sm:$0xf0] }
 0x6be   :  { %v11456_v18 = vld [vmem:[%s17376_s3 + $0x6dc] sm:$0xf]  ;;  %v9444_v32 = vor.u32 %v11376_v6, %v9441_v47  ;;  %7447 = vmatpush.bf16.msrb.mxu1 %v10404_v1  ;;  %v7235_v39 = vpop.f32.mrf.mxu0 }
 0x6bf   :  { %v9761_v5 = vld [vmem:[%s17376_s3 + $0x6f8] sm:$0xf0] }
 0x6c0   :  { %v11528_v30 = vld [vmem:[%s17376_s3 + $0x91c] sm:$0xf]  ;;  %v9764_v58 = vor.u32 %v11456_v18, %v9761_v5  ;;  %7414 = vmatpush.bf16.msra.mxu2 %v9444_v32 }
 0x6c1   :  { %v10049_v4 = vld [vmem:[%s17376_s3 + $0x938] sm:$0xf0] }
 0x6c2   :  { %v11608_v45 = vld [vmem:[%s17376_s3 + $0xb9c] sm:$0xf]  ;;  %v10052_v20 = vor.u32 %v11528_v30, %v10049_v4  ;;  %7425 = vmatpush.bf16.msra.mxu3 %v9764_v58 }
 0x6c3   :  { %v10369_v8 = vld [vmem:[%s17376_s3 + $0xbb8] sm:$0xf0] }
 0x6c4   :  { %v11368_v60 = vld [vmem:[%s17376_s3 + $0x41c] sm:$0xf]  ;;  %v10372_v0 = vor.u32 %v11608_v45, %v10369_v8  ;;  %7437 = vmatpush.bf16.msrb.mxu0 %v10052_v20 }
 0x6c5   :  { %v9409_v7 = vld [vmem:[%s17376_s3 + $0x438] sm:$0xf0] }
 0x6c6   :  { %v11448_v29 = vld [vmem:[%s17376_s3 + $0x69c] sm:$0xf]  ;;  %v9412_v24 = vor.u32 %v11368_v60, %v9409_v7  ;;  %7448 = vmatpush.bf16.msrb.mxu1 %v10372_v0  ;;  %v7198_v60 = vpop.f32.mrf.mxu1 }
 0x6c7   :  { %v9729_v50 = vld [vmem:[%s17376_s3 + $0x6b8] sm:$0xf0] }
 0x6c8   :  { %v11520_v28 = vld [vmem:[%s17376_s3 + $0x8dc] sm:$0xf]  ;;  %v9732_v56 = vor.u32 %v11448_v29, %v9729_v50  ;;  %7415 = vmatpush.bf16.msra.mxu2 %v9412_v24 }
 0x6c9   :  { %v10017_v23 = vld [vmem:[%s17376_s3 + $0x8f8] sm:$0xf0] }
 0x6ca   :  { %v11600_v3 = vld [vmem:[%s17376_s3 + $0xb5c] sm:$0xf]  ;;  %v10020_v14 = vor.u32 %v11520_v28, %v10017_v23  ;;  %7426 = vmatpush.bf16.msra.mxu3 %v9732_v56 }
 0x6cb   :  { %v10337_v61 = vld [vmem:[%s17376_s3 + $0xb78] sm:$0xf0]  ;;  %7416 = vmatmul.bf16.vlgmr.msra.gmra.mxu2 %v14444_v44 }
 0x6cc   :  { %v11680_v21 = vld [vmem:[%s17376_s3 + $0xddc] sm:$0xf]  ;;  %v10340_v25 = vor.u32 %v11600_v3, %v10337_v61  ;;  %7438 = vmatpush.bf16.msrb.mxu0 %v10020_v14 }
 0x6cd   :  { %v10657_v52 = vld [vmem:[%s17376_s3 + $0xdf8] sm:$0xf0] }
 0x6ce   :  { %v11440_v40 = vld [vmem:[%s17376_s3 + $0x65c] sm:$0xf]  ;;  %v10660_v59 = vor.u32 %v11680_v21, %v10657_v52  ;;  %7449 = vmatpush.bf16.msrb.mxu1 %v10340_v25 }
 0x6cf   :  { %v9697_v12 = vld [vmem:[%s17376_s3 + $0x678] sm:$0xf0] }
 0x6d0   :  { %v11512_v42 = vld [vmem:[%s17376_s3 + $0x89c] sm:$0xf]  ;;  %v9700_v38 = vor.u32 %v11440_v40, %v9697_v12  ;;  %7460 = vmatpush.bf16.msrb.mxu2 %v10660_v59 }
 0x6d1   :  { %v9985_v55 = vld [vmem:[%s17376_s3 + $0x8b8] sm:$0xf0] }
 0x6d2   :  { %v11592_v34 = vld [vmem:[%s17376_s3 + $0xb1c] sm:$0xf]  ;;  %v9988_v15 = vor.u32 %v11512_v42, %v9985_v55  ;;  %7427 = vmatpush.bf16.msra.mxu3 %v9700_v38 }
 0x6d3   :  { %v10305_v19 = vld [vmem:[%s17376_s3 + $0xb38] sm:$0xf0] }
 0x6d4   :  { %v11672_v41 = vld [vmem:[%s17376_s3 + $0xd9c] sm:$0xf]  ;;  %v10308_v36 = vor.u32 %v11592_v34, %v10305_v19  ;;  %7439 = vmatpush.bf16.msrb.mxu0 %v9988_v15 }
 0x6d5   :  { %v10625_v27 = vld [vmem:[%s17376_s3 + $0xdb8] sm:$0xf0] }
 0x6d6   :  { %v11432_v13 = vld [vmem:[%s17376_s3 + $0x61c] sm:$0xf]  ;;  %v10628_v6 = vor.u32 %v11672_v41, %v10625_v27  ;;  %7450 = vmatpush.bf16.msrb.mxu1 %v10308_v36 }
 0x6d7   :  { %v9665_v33 = vld [vmem:[%s17376_s3 + $0x638] sm:$0xf0] }
 0x6d8   :  { %v11504_v62 = vld [vmem:[%s17376_s3 + $0x85c] sm:$0xf]  ;;  %v9668_v4 = vor.u32 %v11432_v13, %v9665_v33  ;;  %7461 = vmatpush.bf16.msrb.mxu2 %v10628_v6  ;;  %v7222_v33 = vpop.f32.mrf.mxu3 }
 0x6d9   :  { %v9953_v11 = vld [vmem:[%s17376_s3 + $0x878] sm:$0xf0] }
 0x6da   :  { %v11584_v47 = vld [vmem:[%s17376_s3 + $0xadc] sm:$0xf]  ;;  %v9956_v45 = vor.u32 %v11504_v62, %v9953_v11  ;;  %7428 = vmatpush.bf16.msra.mxu3 %v9668_v4 }
 0x6db   :  { %v10273_v26 = vld [vmem:[%s17376_s3 + $0xaf8] sm:$0xf0] }
 0x6dc   :  { %v11664_v1 = vld [vmem:[%s17376_s3 + $0xd5c] sm:$0xf]  ;;  %v10276_v8 = vor.u32 %v11584_v47, %v10273_v26  ;;  %7440 = vmatpush.bf16.msrb.mxu0 %v9956_v45  ;;  %v7237_v45 = vpop.f32.mrf.mxu0 }
 0x6dd   :  { %v10593_v18 = vld [vmem:[%s17376_s3 + $0xd78] sm:$0xf0]  ;;  %7429 = vmatmul.bf16.vlgmr.msra.gmra.mxu3 %v14506_v51  ;;  %v7209_v51 = vpop.f32.mrf.mxu2 }
 0x6de   :  { %v11744_v5 = vld [vmem:[%s17376_s3 + $0xfdc] sm:$0xf]  ;;  %v10596_v35 = vor.u32 %v11664_v1, %v10593_v18  ;;  %7451 = vmatpush.bf16.msrb.mxu1 %v10276_v8  ;;  %v7210_v59 = vadd.f32 %v7209_v51, %v17118_v37  ;;  %v7248_v8 = vpop.f32.mrf.mxu1 }
 0x6df   :  { %v10913_v30 = vld [vmem:[%s17376_s3 + $0xff8] sm:$0xf0] }
 0x6e0   :  { %v11496_v44 = vld [vmem:[%s17376_s3 + $0x81c] sm:$0xf]  ;;  %v10916_v32 = vor.u32 %v11744_v5, %v10913_v30  ;;  %7462 = vmatpush.bf16.msrb.mxu2 %v10596_v35  ;;  %v7223_v11 = vadd.f32 %v7222_v33, %v7210_v59 }
 0x6e1   :  { %v9921_v31 = vld [vmem:[%s17376_s3 + $0x838] sm:$0xf0] }
 0x6e2   :  { %v11576_v58 = vld [vmem:[%s17376_s3 + $0xa9c] sm:$0xf]  ;;  %v9924_v29 = vor.u32 %v11496_v44, %v9921_v31  ;;  %7473 = vmatpush.bf16.msrb.mxu3 %v10916_v32  ;;  %v7236_v1 = vadd.f32 %v7235_v39, %v7223_v11  ;;  %v7511_v11 = vld [vmem:[%s17379_s5 + $0x50] sm:$0xff] }
 0x6e3   :  { %v10241_v54 = vld [vmem:[%s17376_s3 + $0xab8] sm:$0xf0] }
 0x6e4   :  { %v11656_v10 = vld [vmem:[%s17376_s3 + $0xd1c] sm:$0xf]  ;;  %v10244_v50 = vor.u32 %v11576_v58, %v10241_v54  ;;  %7441 = vmatpush.bf16.msrb.mxu0 %v9924_v29  ;;  %v7249_v44 = vadd.f32 %v7248_v8, %v7236_v1 }
 0x6e5   :  { %v10561_v7 = vld [vmem:[%s17376_s3 + $0xd38] sm:$0xf0]  ;;  %v7211_v36 = vpop.f32.mrf.mxu2 }
 0x6e6   :  { %v11736_v20 = vld [vmem:[%s17376_s3 + $0xf9c] sm:$0xf]  ;;  %v10564_v28 = vor.u32 %v11656_v10, %v10561_v7  ;;  %7452 = vmatpush.bf16.msrb.mxu1 %v10244_v50  ;;  %v7250_v54 = vpop.f32.mrf.mxu1  ;;  %v7287_v7 = vpop.f32.mrf.mxu0  ;;  %v4084_v50 = vperm.slane %v17058_v9, 6  ;;  %v7513_v36 = vld [vmem:[%s17379_s5 + $0x60] sm:$0xff] }
 0x6e7   :  { %v10881_v0 = vld [vmem:[%s17376_s3 + $0xfb8] sm:$0xf0]  ;;  %7442 = vmatmul.bf16.vlgmr.msrb.gmra.mxu0 %v14565_v43 }
 0x6e8   :  { %v10884_v23 = vor.u32 %v11736_v20, %v10881_v0  ;;  %v11568_v3 = vld [vmem:[%s17376_s3 + $0xa5c] sm:$0xf]  ;;  %7463 = vmatpush.bf16.msrb.mxu2 %v10564_v28  ;;  %v7490_v28 = vmax.f32 %v17067_v46, 0.0 }
 0x6e9   :  { %v10209_v61 = vld [vmem:[%s17376_s3 + $0xa78] sm:$0xf0] }
 0x6ea   :  { %v11648_v21 = vld [vmem:[%s17376_s3 + $0xcdc] sm:$0xf]  ;;  %v10212_v14 = vor.u32 %v11568_v3, %v10209_v61  ;;  %7474 = vmatpush.bf16.msrb.mxu3 %v10884_v23 }
 0x6eb   :  { %v10529_v52 = vld [vmem:[%s17376_s3 + $0xcf8] sm:$0xf0] }
 0x6ec   :  { %v11728_v24 = vld [vmem:[%s17376_s3 + $0xf5c] sm:$0xf]  ;;  %v10532_v25 = vor.u32 %v11648_v21, %v10529_v52  ;;  %7453 = vmatpush.bf16.msrb.mxu1 %v10212_v14 }
 0x6ed   :  { %v10849_v56 = vld [vmem:[%s17376_s3 + $0xf78] sm:$0xf0]  ;;  %v7261_v10 = vpop.f32.mrf.mxu2 }
 0x6ee   :  { %v10852_v40 = vor.u32 %v11728_v24, %v10849_v56  ;;  %v11560_v12 = vld [vmem:[%s17376_s3 + $0xa1c] sm:$0xf]  ;;  %7464 = vmatpush.bf16.msrb.mxu2 %v10532_v25  ;;  %v7262_v60 = vadd.f32 %v7261_v10, %v7249_v44  ;;  %v7289_v61 = vpop.f32.mrf.mxu0  ;;  %v7300_v21 = vpop.f32.mrf.mxu1 }
 0x6ef   :  { %v10177_v42 = vld [vmem:[%s17376_s3 + $0xa38] sm:$0xf0]  ;;  %v7553_v61 = vld [vmem:[%s17380_s7 + $0x48] sm:$0xff] }
 0x6f0   :  { %v11640_v57 = vld [vmem:[%s17376_s3 + $0xc9c] sm:$0xf]  ;;  %v10180_v17 = vor.u32 %v11560_v12, %v10177_v42  ;;  %7475 = vmatpush.bf16.msrb.mxu3 %v10852_v40 }
 0x6f1   :  { %v10497_v55 = vld [vmem:[%s17376_s3 + $0xcb8] sm:$0xf0] }
 0x6f2   :  { %v11720_v34 = vld [vmem:[%s17376_s3 + $0xf1c] sm:$0xf]  ;;  %v10500_v63 = vor.u32 %v11640_v57, %v10497_v55  ;;  %7454 = vmatpush.bf16.msrb.mxu1 %v10180_v17 }
 0x6f3   :  { %v10817_v19 = vld [vmem:[%s17376_s3 + $0xf38] sm:$0xf0] }
 0x6f4   :  { %v10820_v41 = vor.u32 %v11720_v34, %v10817_v19  ;;  %v11632_v27 = vld [vmem:[%s17376_s3 + $0xc5c] sm:$0xf]  ;;  %7465 = vmatpush.bf16.msrb.mxu2 %v10500_v63 }
 0x6f5   :  { %v10465_v37 = vld [vmem:[%s17376_s3 + $0xc78] sm:$0xf0]  ;;  %7455 = vmatmul.bf16.vlgmr.msrb.gmra.mxu1 %v14624_v22  ;;  %v7224_v22 = vpop.f32.mrf.mxu3  ;;  %v7263_v20 = vpop.f32.mrf.mxu2 }
 0x6f6   :  { %v11712_v38 = vld [vmem:[%s17376_s3 + $0xedc] sm:$0xf]  ;;  %7476 = vmatpush.bf16.msrb.mxu3 %v10820_v41  ;;  %v10468_v13 = vor.u32 %v11632_v27, %v10465_v37  ;;  %v7302_v56 = vpop.f32.mrf.mxu1  ;;  %v7502_v22 = vld [vmem:[%s17379_s5 + $0x8] sm:$0xff] }
 0x6f7   :  { %v10785_v43 = vld [vmem:[%s17376_s3 + $0xef8] sm:$0xf0]  ;;  %v7557_v20 = vld [vmem:[%s17380_s7 + $0x68] sm:$0xff] }
 0x6f8   :  { %v10788_v15 = vor.u32 %v11712_v38, %v10785_v43  ;;  %v11624_v62 = vld [vmem:[%s17376_s3 + $0xc1c] sm:$0xf]  ;;  %7466 = vmatpush.bf16.msrb.mxu2 %v10468_v13  ;;  %v7515_v38 = vld [vmem:[%s17379_s5 + $0x70] sm:$0xff] }
 0x6f9   :  { %v10433_v6 = vld [vmem:[%s17376_s3 + $0xc38] sm:$0xf0] }
 0x6fa   :  { %v11704_v47 = vld [vmem:[%s17376_s3 + $0xe9c] sm:$0xf]  ;;  %7477 = vmatpush.bf16.msrb.mxu3 %v10788_v15  ;;  %v10436_v18 = vor.u32 %v11624_v62, %v10433_v6  ;;  %v7514_v15 = vld [vmem:[%s17379_s5 + $0x68] sm:$0xff] }
 0x6fb   :  { %v10753_v26 = vld [vmem:[%s17376_s3 + $0xeb8] sm:$0xf0]  ;;  %v7510_v6 = vld [vmem:[%s17379_s5 + $0x48] sm:$0xff] }
 0x6fc   :  { %v10756_v5 = vor.u32 %v11704_v47, %v10753_v26  ;;  %v11696_v30 = vld [vmem:[%s17376_s3 + $0xe5c] sm:$0xf]  ;;  %7467 = vmatpush.bf16.msrb.mxu2 %v10436_v18  ;;  %v7509_v47 = vld [vmem:[%s17379_s5 + $0x40] sm:$0xff]  ;;  %v7507_v18 = vld [vmem:[%s17379_s5 + $0x30] sm:$0xff] }
 0x6fd   :  { %v10721_v4 = vld [vmem:[%s17376_s3 + $0xe78] sm:$0xf0]  ;;  %v7274_v0 = vpop.f32.mrf.mxu3 }
 0x6fe   :  { %7478 = vmatpush.bf16.msrb.mxu3 %v10756_v5  ;;  %v10724_v31 = vor.u32 %v11696_v30, %v10721_v4  ;;  %v11688_v35 = vld [vmem:[%s17376_s3 + $0xe1c] sm:$0xf]  ;;  %v7275_v29 = vadd.f32 %v7274_v0, %v7262_v60  ;;  %v7506_v5 = vld [vmem:[%s17379_s5 + $0x28] sm:$0xff]  ;;  %v7505_v4 = vld [vmem:[%s17379_s5 + $0x20] sm:$0xff] }
 0x6ff   :  { %v10689_v32 = vld [vmem:[%s17376_s3 + $0xe38] sm:$0xf0]  ;;  %7468 = vmatmul.bf16.vlgmr.msrb.gmra.mxu2 %v14677_v2  ;;  %v7288_v2 = vadd.f32 %v7287_v7, %v4084_v50  ;;  %v7558_v60 = vld [vmem:[%s17380_s7 + $0x70] sm:$0xff]  ;;  %v4085_v7 = vperm.slane %v17058_v9, 7  ;;  %v7556_v0 = vld [vmem:[%s17380_s7 + $0x60] sm:$0xff] }
 0x700   :  { %v10692_v58 = vor.u32 %v11688_v35, %v10689_v32  ;;  %v7491_v23 = vmax.f32 %v7275_v29, 0.0  ;;  %v7516_v37 = vld [vmem:[%s17379_s5 + $0x78] sm:$0xff]  ;;  %v7554_v9 = vld [vmem:[%s17380_s7 + $0x50] sm:$0xff] }
 0x701   :  { %v7301_v52 = vadd.f32 %v7300_v21, %v7288_v2  ;;  %7521 = vmatpush.msra.mxu0 %v7516_v37  ;;  %v7512_v33 = vld [vmem:[%s17379_s5 + $0x58] sm:$0xff]  ;;  %v7546_v37 = vld [vmem:[%s17380_s7 + $0x10] sm:$0xff] }
 0x702   :  { %7479 = vmatpush.bf16.msrb.mxu3 %v10724_v31  ;;  %v17255_v3 = vmax.f32 %v7490_v28, %v7491_v23  ;;  %v7508_v26 = vld [vmem:[%s17379_s5 + $0x38] sm:$0xff]  ;;  %v7503_v31 = vld [vmem:[%s17379_s5 + $0x10] sm:$0xff] }
 0x703   :  { %7522 = vmatpush.msra.mxu0 %v7515_v38  ;;  %v7504_v44 = vld [vmem:[%s17379_s5 + $0x18] sm:$0xff]  ;;  %v7545_v38 = vld [vmem:[%s17380_s7 + $0x8] sm:$0xff] }
 0x704   :  { %v7559_v10 = vld [vmem:[%s17380_s7 + $0x78] sm:$0xff] }
 0x705   :  { %v7276_v24 = vpop.f32.mrf.mxu3  ;;  %7523 = vmatpush.msra.mxu0 %v7514_v15  ;;  %7564 = vmatpush.msra.mxu1 %v7559_v10  ;;  %v7555_v28 = vld [vmem:[%s17380_s7 + $0x58] sm:$0xff] }
 0x706   :  { %7480 = vmatpush.bf16.msrb.mxu3 %v10692_v58  ;;  %v7501_v58 = vld [vmem:[%s17379_s5] sm:$0xff]  ;;  %v7551_v56 = vld [vmem:[%s17380_s7 + $0x38] sm:$0xff] }
 0x707   :  { %7524 = vmatpush.msra.mxu0 %v7513_v36  ;;  %7565 = vmatpush.msra.mxu1 %v7558_v60 }
 0x709   :  { %7481 = vmatmul.bf16.vlgmr.msrb.gmra.mxu3 %v14730_v53  ;;  %v7313_v53 = vpop.f32.mrf.mxu2  ;;  %7525 = vmatpush.msra.mxu0 %v7512_v33 }
 0x70a   :  { %v7314_v14 = vadd.f32 %v7313_v53, %v7301_v52  ;;  %v7339_v25 = vpop.f32.mrf.mxu0  ;;  %7566 = vmatpush.msra.mxu1 %v7557_v20  ;;  %v7552_v52 = vld [vmem:[%s17380_s7 + $0x40] sm:$0xff] }
 0x70b   :  { %7526 = vmatpush.msra.mxu0 %v7511_v11 }
 0x70c   :  { %7567 = vmatpush.msra.mxu1 %v7556_v0 }
 0x70d   :  { %v7326_v51 = vpop.f32.mrf.mxu3  ;;  %7527 = vmatpush.msra.mxu0 %v7510_v6 }
 0x70e   :  { %v7327_v12 = vadd.f32 %v7326_v51, %v7314_v14  ;;  %7568 = vmatpush.msra.mxu1 %v7555_v28  ;;  %v7550_v14 = vld [vmem:[%s17380_s7 + $0x30] sm:$0xff] }
 0x70f   :  { %7528 = vmatpush.msra.mxu0 %v7509_v47 }
 0x710   :  { %v7340_v42 = vadd.f32 %v7339_v25, %v7327_v12  ;;  %7569 = vmatpush.msra.mxu1 %v7554_v9 }
 0x711   :  { %v7315_v40 = vpop.f32.mrf.mxu2  ;;  %7529 = vmatpush.msra.mxu0 %v7508_v26 }
 0x712   :  { %v7341_v57 = vpop.f32.mrf.mxu0  ;;  %7570 = vmatpush.msra.mxu1 %v7553_v61  ;;  %v7549_v40 = vld [vmem:[%s17380_s7 + $0x28] sm:$0xff] }
 0x713   :  { %7530 = vmatpush.msra.mxu0 %v7507_v18 }
 0x714   :  { %7571 = vmatpush.msra.mxu1 %v7552_v52 }
 0x715   :  { %v7328_v46 = vpop.f32.mrf.mxu3  ;;  %7531 = vmatpush.msra.mxu0 %v7506_v5 }
 0x716   :  { %7572 = vmatpush.msra.mxu1 %v7551_v56  ;;  %v7547_v46 = vld [vmem:[%s17380_s7 + $0x18] sm:$0xff] }
 0x717   :  { %7532 = vmatpush.msra.mxu0 %v7505_v4 }
 0x718   :  { %v7352_v59 = vpop.f32.mrf.mxu1  ;;  %7573 = vmatpush.msra.mxu1 %v7550_v14 }
 0x719   :  { %v7353_v55 = vadd.f32 %v7352_v59, %v7340_v42  ;;  %7533 = vmatpush.msra.mxu0 %v7504_v44  ;;  %v7548_v42 = vld [vmem:[%s17380_s7 + $0x20] sm:$0xff] }
 0x71a   :  { %7574 = vmatpush.msra.mxu1 %v7549_v40 }
 0x71b   :  { %7534 = vmatpush.msra.mxu0 %v7503_v31 }
 0x71c   :  { %7575 = vmatpush.msra.mxu1 %v7548_v42 }
 0x71d   :  { %7535 = vmatpush.msra.mxu0 %v7502_v22 }
 0x71e   :  { %7576 = vmatpush.msra.mxu1 %v7547_v46 }
 0x71f   :  { %7536 = vmatpush.msra.mxu0 %v7501_v58 }
 0x720   :  { %v7354_v34 = vpop.f32.mrf.mxu1  ;;  %7577 = vmatpush.msra.mxu1 %v7546_v37 }
 0x722   :  { %7578 = vmatpush.msra.mxu1 %v7545_v38 }
 0x728   :  { %v7365_v19 = vpop.f32.mrf.mxu2 }
 0x729   :  { %v17257_v17 = vadd.f32 %v7365_v19, %v7353_v55 }
 0x72a   :  { %v7391_v63 = vpop.f32.mrf.mxu0 }
 0x72b   :  { %v7392_v29 = vadd.f32 %v7391_v63, %v4085_v7 }
 0x730   :  { %v7367_v41 = vpop.f32.mrf.mxu2 }
 0x732   :  { %v17259_v27 = vpop.f32.mrf.mxu3  ;;  %v7393_v43 = vpop.f32.mrf.mxu0 }
 0x733   :  { %v7379_v51 = vadd.f32 %v17259_v27, %v17257_v17 }
 0x735   :  { %v7492_v34 = vmax.f32 %v7379_v51, 0.0 }
 0x738   :  { %v7404_v39 = vpop.f32.mrf.mxu1 }
 0x739   :  { %v7405_v23 = vadd.f32 %v7404_v39, %v7392_v29 }
 0x73a   :  { %v7380_v13 = vpop.f32.mrf.mxu3 }
 0x73b   :  { %v11751_v13 = vld [vmem:[%s17381_s8] ss:$0 sm:$0xff] }
 0x740   :  { %v7406_v62 = vpop.f32.mrf.mxu1 }
 0x74e   :  { %v7417_v1 = vpop.f32.mrf.mxu2 }
 0x74f   :  { %v7418_v2 = vadd.f32 %v7417_v1, %v7405_v23 }
 0x756   :  { %v7419_v45 = vpop.f32.mrf.mxu2 }
 0x760   :  { %v7430_v8 = vpop.f32.mrf.mxu3 }
 0x761   :  { %v7431_v21 = vadd.f32 %v7430_v8, %v7418_v2 }
 0x764   :  { %v7443_v30 = vpop.f32.mrf.mxu0 }
 0x765   :  { %v7444_v53 = vadd.f32 %v7443_v30, %v7431_v21 }
 0x768   :  { %v7432_v54 = vpop.f32.mrf.mxu3 }
 0x76c   :  { %v7445_v35 = vpop.f32.mrf.mxu0 }
 0x772   :  { %v7456_v32 = vpop.f32.mrf.mxu1 }
 0x773   :  { %v7457_v25 = vadd.f32 %v7456_v32, %v7444_v53 }
 0x77a   :  { %v7458_v50 = vpop.f32.mrf.mxu1 }
 0x782   :  { %v7469_v24 = vpop.f32.mrf.mxu2 }
 0x783   :  { %v7470_v12 = vadd.f32 %v7469_v24, %v7457_v25 }
 0x78a   :  { %v7471_v57 = vpop.f32.mrf.mxu2 }
 0x78c   :  { %v7482_v59 = vpop.f32.mrf.mxu3 }
 0x78d   :  { %v7483_v55 = vadd.f32 %v7482_v59, %v7470_v12 }
 0x78f   :  { %v7493_v19 = vmax.f32 %v7483_v55, 0.0 }
 0x791   :  { %v7497_v63 = vmax.f32 %v7492_v34, %v7493_v19 }
 0x793   :  { %v7499_v17 = vmax.f32 %v17255_v3, %v7497_v63  ;;  %v7544_v3 = vld [vmem:[%s17380_s7] sm:$0xff] }
 0x794   :  { %v7484_v41 = vpop.f32.mrf.mxu3  ;;  %7579 = vmatpush.msra.mxu1 %v7544_v3 }
 0x795   :  { %v7500_v27 = vmax.f32 %v7498_v48, %v7499_v17 }
 0x797   :  { %7537 = vmatmul.f32.vlgmr.msra.gmra.mxu0 %v7500_v27 }
 0x814   :  { %v7538_v16 = vpop.f32.mrf.mxu0 }
 0x815   :  { %v7539_v48 = vadd.f32 %v11750_v49, %v7538_v16 }
 0x817   :  { %vm7541_vm0 = vcmp.gt.f32.partialorder %v7539_v48, 0.0  ;;  %v7542_v43 = vmul.f32 0.01, %v7539_v48 }
 0x819   :  { %v7543_v39 = vsel %vm7541_vm0, %v7539_v48, %v7542_v43 }
 0x81a   :  { %7580 = vmatmul.f32.vlgmr.msra.gmra.mxu1 %v7543_v39 }
 0x897   :  { %v7581_v15 = vpop.f32.mrf.mxu1 }
 0x898   :  { %v7582_v36 = vadd.f32 %v11751_v13, %v7581_v15 }
 0x89a   :  { %7584 = vst [vmem:[%s17382_s9] sm:$0xff] %v7582_v36 }

</bundles_post_ra>
